<compile_context>
chip_gen: v6e
topology: v6e:2x2x1
jax: 0.10.0
libtpu: 0.0.40
codegen_flags: <defaults>
</compile_context>

<pallas_src>
import jax
import jax.numpy as jnp
from jax.experimental import pallas as pl
from jax.experimental.pallas import tpu as pltpu


def basic_block_kernel(xp_ref, w1_ref, b1_ref, w2_ref, b2_ref, ws_ref, bs_ref,
                       o_ref):
    Hp, Wp, Cin = xp_ref.shape
    H, W = Hp - 2, Wp - 2
    Hh, Wh = H // 2, W // 2
    Cout = w2_ref.shape[1]

    xp = xp_ref[...]                                      # (H+2, W+2, Cin) f32

    def im2col(padded, c):
        # Zero-padded (H+2, W+2, c) -> (H*W, 9*c) bf16 patch matrix, with
        # K ordered as (dy, dx, ci) to match w.reshape(9*c, Co).
        taps = [padded[dy:dy + H, dx:dx + W, :]
                for dy in range(3) for dx in range(3)]    # 9 x (H, W, c)
        patch = jnp.concatenate(taps, axis=-1)            # (H, W, 9*c)
        return patch.reshape(H * W, 9 * c).astype(jnp.bfloat16)

    def pool2x2(y):
        # AvgPool2d(kernel=2, stride=2): (H, W, c) -> (Hh, Wh, c), VPU adds only.
        c = y.shape[-1]
        yw = y.reshape(H, Wh, 2, c)
        yw = yw[:, :, 0, :] + yw[:, :, 1, :]              # pool along W
        yh = yw.reshape(Hh, 2, Wh, c)
        return (yh[:, 0] + yh[:, 1]) * 0.25               # pool along H

    # ---- conv branch: ReLU -> conv3x3 -> ReLU -> conv3x3 -> AvgPool2x2 ----
    r1p = jnp.maximum(xp, 0.0)                 # relu(pad(x)) == pad(relu(x))
    h1 = jnp.dot(im2col(r1p, Cin), w1_ref[...],
                 preferred_element_type=jnp.float32) + b1_ref[...]   # (H*W, Cin)
    r2 = jnp.maximum(h1, 0.0).reshape(H, W, Cin)

    # Zero-pad r2 by one pixel in-register (no VMEM scratch round trip).
    zc = jnp.zeros((H, 1, Cin), jnp.float32)
    zr = jnp.zeros((1, W + 2, Cin), jnp.float32)
    r2p = jnp.concatenate([zc, r2, zc], axis=1)           # (H, W+2, Cin)
    r2p = jnp.concatenate([zr, r2p, zr], axis=0)          # (H+2, W+2, Cin)

    h2 = jnp.dot(im2col(r2p, Cin), w2_ref[...],
                 preferred_element_type=jnp.float32) + b2_ref[...]   # (H*W, Cout)
    main = pool2x2(h2.reshape(H, W, Cout))                # (Hh, Wh, Cout)

    # ---- shortcut: AvgPool2x2 -> conv1x1 (+ bias) ----
    sx = pool2x2(xp[1:H + 1, 1:W + 1, :])                 # (Hh, Wh, Cin)
    sc = jnp.dot(sx.reshape(Hh * Wh, Cin).astype(jnp.bfloat16), ws_ref[...],
                 preferred_element_type=jnp.float32) + bs_ref[...]   # (Hh*Wh, Cout)

    out = main + sc.reshape(Hh, Wh, Cout)
    o_ref[...] = out.reshape(Hh, Wh * Cout).astype(o_ref.dtype)


def basic_block(x_nchw, params):
    w1, b1, w2, b2, ws, bs = params
    B, Cin, H, W = x_nchw.shape
    Cout = ws.shape[1]
    Hh, Wh = H // 2, W // 2

    # NCHW -> NHWC and zero-pad spatially by 1 once in the wrapper
    # (layout plumbing; replaces the in-kernel padded scratch).
    x = jnp.transpose(x_nchw, (0, 2, 3, 1)).astype(jnp.float32)
    xp = jnp.pad(x, ((0, 0), (1, 1), (1, 1), (0, 0)))

    # HWIO conv weights -> (9*Cin, Co) matching the kernel's (dy, dx, ci)
    # im2col ordering; MXU operands in bf16, biases stay f32.
    w1m = w1.reshape(9 * Cin, Cin).astype(jnp.bfloat16)
    w2m = w2.reshape(9 * Cin, Cout).astype(jnp.bfloat16)
    wsm = ws.astype(jnp.bfloat16)
    b1r = b1.reshape(1, Cin).astype(jnp.float32)
    b2r = b2.reshape(1, Cout).astype(jnp.float32)
    bsr = bs.reshape(1, Cout).astype(jnp.float32)

    grid_spec = pltpu.PrefetchScalarGridSpec(
        num_scalar_prefetch=0,
        grid=(B,),
        in_specs=[
            pl.BlockSpec((None, H + 2, W + 2, Cin), lambda b: (b, 0, 0, 0)),  # x pad
            pl.BlockSpec((9 * Cin, Cin), lambda b: (0, 0)),                   # w1
            pl.BlockSpec((1, Cin), lambda b: (0, 0)),                         # b1
            pl.BlockSpec((9 * Cin, Cout), lambda b: (0, 0)),                  # w2
            pl.BlockSpec((1, Cout), lambda b: (0, 0)),                        # b2
            pl.BlockSpec((Cin, Cout), lambda b: (0, 0)),                      # ws
            pl.BlockSpec((1, Cout), lambda b: (0, 0)),                        # bs
        ],
        out_specs=pl.BlockSpec((None, Hh, Wh * Cout), lambda b: (b, 0, 0)),
    )

    out = pl.pallas_call(
        basic_block_kernel,
        out_shape=jax.ShapeDtypeStruct((B, Hh, Wh * Cout), jnp.float32),
        grid_spec=grid_spec,
        compiler_params=pltpu.CompilerParams(
            dimension_semantics=("parallel",)),
    )(xp, w1m, b1r, w2m, b2r, wsm, bsr)

    out = out.reshape(B, Hh, Wh, Cout)
    return jnp.transpose(out, (0, 3, 1, 2))                # NHWC -> NCHW


def basic_block_reference(x_nchw, params):
    """Pure-JAX f32 reference (XLA convs) for the correctness check."""
    w1, b1, w2, b2, ws, bs = params
    Cin, Cout = ws.shape
    x = jnp.transpose(x_nchw, (0, 2, 3, 1)).astype(jnp.float32)

    def conv(inp, w, b, pad):
        y = jax.lax.conv_general_dilated(
            inp, w, window_strides=(1, 1), padding=pad,
            dimension_numbers=("NHWC", "HWIO", "NHWC"))
        return y + b.reshape(1, 1, 1, -1)

    def avgpool(y):
        s = jax.lax.reduce_window(y, 0.0, jax.lax.add,
                                  (1, 2, 2, 1), (1, 2, 2, 1), "VALID")
        return s * 0.25

    r1 = jax.nn.relu(x)
    h1 = conv(r1, w1, b1, ((1, 1), (1, 1)))
    r2 = jax.nn.relu(h1)
    h2 = conv(r2, w2, b2, ((1, 1), (1, 1)))
    main = avgpool(h2)
    sc = conv(avgpool(x), ws.reshape(1, 1, Cin, Cout), bs, ((0, 0), (0, 0)))
    return jnp.transpose(main + sc, (0, 3, 1, 2))


if __name__ == "__main__":
    B, Cin, Cout, H, W = 2, 4, 8, 16, 16

    key = jax.random.PRNGKey(0)
    kx, k1, k2, k3, k4, k5, k6 = jax.random.split(key, 7)
    x = jax.random.normal(kx, (B, Cin, H, W), jnp.float32)              # NCHW input
    w1 = jax.random.normal(k1, (3, 3, Cin, Cin), jnp.float32) * 0.1     # HWIO
    b1 = jax.random.normal(k2, (Cin,), jnp.float32) * 0.1
    w2 = jax.random.normal(k3, (3, 3, Cin, Cout), jnp.float32) * 0.1    # HWIO
    b2 = jax.random.normal(k4, (Cout,), jnp.float32) * 0.1
    ws = jax.random.normal(k5, (Cin, Cout), jnp.float32) * 0.1          # 1x1 conv
    bs = jax.random.normal(k6, (Cout,), jnp.float32) * 0.1
    params = (w1, b1, w2, b2, ws, bs)

    out = jax.block_until_ready(basic_block(x, params))
    ref = jax.block_until_ready(basic_block_reference(x, params))

    assert out.shape == (B, Cout, H // 2, W // 2), out.shape
    # bf16 MXU operands (f32 accumulation) vs. pure-f32 reference -> relaxed tol.
    err = float(jnp.max(jnp.abs(out - ref)))
    assert jnp.allclose(out, ref, atol=5e-2, rtol=5e-2), err
    print("KERNEL_OK")
</pallas_src>

<mosaic_0001>
module attributes {stable_mosaic.version = 11 : i64} {
  func.func @basic_block_kernel(%arg0: i32, %arg1: memref<1x18x18x4xf32, #tpu.memory_space<vmem>>, %arg2: memref<36x4xbf16, #tpu.memory_space<vmem>>, %arg3: memref<1x4xf32, #tpu.memory_space<vmem>>, %arg4: memref<36x8xbf16, #tpu.memory_space<vmem>>, %arg5: memref<1x8xf32, #tpu.memory_space<vmem>>, %arg6: memref<4x8xbf16, #tpu.memory_space<vmem>>, %arg7: memref<1x8xf32, #tpu.memory_space<vmem>>, %arg8: memref<1x8x64xf32, #tpu.memory_space<vmem>>) attributes {dimension_semantics = [#tpu.dimension_semantics<parallel>], iteration_bounds = array<i64: 2>, scalar_prefetch = 0 : i64, scratch_operands = 0 : i64, tpu.core_type = #tpu.core_type<tc>, window_params = [{transform_indices = @transform_0, window_bounds = array<i64: 1, 18, 18, 4>}, {pipeline_mode = #tpu.pipeline_mode<synchronous>, transform_indices = @transform_1, window_bounds = array<i64: 36, 4>}, {pipeline_mode = #tpu.pipeline_mode<synchronous>, transform_indices = @transform_2, window_bounds = array<i64: 1, 4>}, {pipeline_mode = #tpu.pipeline_mode<synchronous>, transform_indices = @transform_3, window_bounds = array<i64: 36, 8>}, {pipeline_mode = #tpu.pipeline_mode<synchronous>, transform_indices = @transform_4, window_bounds = array<i64: 1, 8>}, {pipeline_mode = #tpu.pipeline_mode<synchronous>, transform_indices = @transform_5, window_bounds = array<i64: 4, 8>}, {pipeline_mode = #tpu.pipeline_mode<synchronous>, transform_indices = @transform_6, window_bounds = array<i64: 1, 8>}, {transform_indices = @transform_7, window_bounds = array<i64: 1, 8, 64>}]} {
    %c0 = arith.constant 0 : index
    %c0_0 = arith.constant 0 : index
    %c0_1 = arith.constant 0 : index
    %c0_2 = arith.constant 0 : index
    %0 = vector.load %arg1[%c0, %c0_0, %c0_1, %c0_2] : memref<1x18x18x4xf32, #tpu.memory_space<vmem>>, vector<1x18x18x4xf32>
    %1 = vector.shape_cast %0 : vector<1x18x18x4xf32> to vector<18x18x4xf32>
    %cst = arith.constant 0.000000e+00 : f32
    %2 = vector.broadcast %cst : f32 to vector<18x18x4xf32>
    %3 = arith.maximumf %1, %2 : vector<18x18x4xf32>
    %4 = vector.extract_strided_slice %3 {offsets = [0, 0, 0], sizes = [16, 16, 4], strides = [1, 1, 1]} : vector<18x18x4xf32> to vector<16x16x4xf32>
    %5 = vector.extract_strided_slice %3 {offsets = [0, 1, 0], sizes = [16, 16, 4], strides = [1, 1, 1]} : vector<18x18x4xf32> to vector<16x16x4xf32>
    %6 = vector.extract_strided_slice %3 {offsets = [0, 2, 0], sizes = [16, 16, 4], strides = [1, 1, 1]} : vector<18x18x4xf32> to vector<16x16x4xf32>
    %7 = vector.extract_strided_slice %3 {offsets = [1, 0, 0], sizes = [16, 16, 4], strides = [1, 1, 1]} : vector<18x18x4xf32> to vector<16x16x4xf32>
    %8 = vector.extract_strided_slice %3 {offsets = [1, 1, 0], sizes = [16, 16, 4], strides = [1, 1, 1]} : vector<18x18x4xf32> to vector<16x16x4xf32>
    %9 = vector.extract_strided_slice %3 {offsets = [1, 2, 0], sizes = [16, 16, 4], strides = [1, 1, 1]} : vector<18x18x4xf32> to vector<16x16x4xf32>
    %10 = vector.extract_strided_slice %3 {offsets = [2, 0, 0], sizes = [16, 16, 4], strides = [1, 1, 1]} : vector<18x18x4xf32> to vector<16x16x4xf32>
    %11 = vector.extract_strided_slice %3 {offsets = [2, 1, 0], sizes = [16, 16, 4], strides = [1, 1, 1]} : vector<18x18x4xf32> to vector<16x16x4xf32>
    %12 = vector.extract_strided_slice %3 {offsets = [2, 2, 0], sizes = [16, 16, 4], strides = [1, 1, 1]} : vector<18x18x4xf32> to vector<16x16x4xf32>
    %13 = tpu.concatenate %4, %5, %6, %7, %8, %9, %10, %11, %12 in 2 : vector<16x16x4xf32>, vector<16x16x4xf32>, vector<16x16x4xf32>, vector<16x16x4xf32>, vector<16x16x4xf32>, vector<16x16x4xf32>, vector<16x16x4xf32>, vector<16x16x4xf32>, vector<16x16x4xf32> -> vector<16x16x36xf32>
    %14 = vector.shape_cast %13 : vector<16x16x36xf32> to vector<256x36xf32>
    %15 = arith.truncf %14 : vector<256x36xf32> to vector<256x36xbf16>
    %c0_3 = arith.constant 0 : index
    %c0_4 = arith.constant 0 : index
    %16 = vector.load %arg2[%c0_3, %c0_4] : memref<36x4xbf16, #tpu.memory_space<vmem>>, vector<36x4xbf16>
    %cst_5 = arith.constant dense<0.000000e+00> : vector<256x4xf32>
    %17 = tpu.matmul %15, %16, %cst_5 {dimension_numbers = #tpu.dot_dimension_numbers<[1], [0], [0], [1], [0, 0, 1, 1], [], []>} : vector<256x36xbf16>, vector<36x4xbf16>, vector<256x4xf32> -> vector<256x4xf32>
    %c0_6 = arith.constant 0 : index
    %c0_7 = arith.constant 0 : index
    %18 = vector.load %arg3[%c0_6, %c0_7] : memref<1x4xf32, #tpu.memory_space<vmem>>, vector<1x4xf32>
    %19 = vector.broadcast %18 : vector<1x4xf32> to vector<256x4xf32>
    %20 = arith.addf %17, %19 : vector<256x4xf32>
    %cst_8 = arith.constant 0.000000e+00 : f32
    %21 = vector.broadcast %cst_8 : f32 to vector<256x4xf32>
    %22 = arith.maximumf %20, %21 : vector<256x4xf32>
    %23 = vector.shape_cast %22 : vector<256x4xf32> to vector<16x16x4xf32>
    %cst_9 = arith.constant 0.000000e+00 : f32
    %24 = vector.broadcast %cst_9 : f32 to vector<16x1x4xf32>
    %cst_10 = arith.constant 0.000000e+00 : f32
    %25 = vector.broadcast %cst_10 : f32 to vector<1x18x4xf32>
    %26 = tpu.concatenate %24, %23, %24 in 1 : vector<16x1x4xf32>, vector<16x16x4xf32>, vector<16x1x4xf32> -> vector<16x18x4xf32>
    %27 = tpu.concatenate %25, %26, %25 in 0 : vector<1x18x4xf32>, vector<16x18x4xf32>, vector<1x18x4xf32> -> vector<18x18x4xf32>
    %28 = vector.extract_strided_slice %27 {offsets = [0, 0, 0], sizes = [16, 16, 4], strides = [1, 1, 1]} : vector<18x18x4xf32> to vector<16x16x4xf32>
    %29 = vector.extract_strided_slice %27 {offsets = [0, 1, 0], sizes = [16, 16, 4], strides = [1, 1, 1]} : vector<18x18x4xf32> to vector<16x16x4xf32>
    %30 = vector.extract_strided_slice %27 {offsets = [0, 2, 0], sizes = [16, 16, 4], strides = [1, 1, 1]} : vector<18x18x4xf32> to vector<16x16x4xf32>
    %31 = vector.extract_strided_slice %27 {offsets = [1, 0, 0], sizes = [16, 16, 4], strides = [1, 1, 1]} : vector<18x18x4xf32> to vector<16x16x4xf32>
    %32 = vector.extract_strided_slice %27 {offsets = [1, 1, 0], sizes = [16, 16, 4], strides = [1, 1, 1]} : vector<18x18x4xf32> to vector<16x16x4xf32>
    %33 = vector.extract_strided_slice %27 {offsets = [1, 2, 0], sizes = [16, 16, 4], strides = [1, 1, 1]} : vector<18x18x4xf32> to vector<16x16x4xf32>
    %34 = vector.extract_strided_slice %27 {offsets = [2, 0, 0], sizes = [16, 16, 4], strides = [1, 1, 1]} : vector<18x18x4xf32> to vector<16x16x4xf32>
    %35 = vector.extract_strided_slice %27 {offsets = [2, 1, 0], sizes = [16, 16, 4], strides = [1, 1, 1]} : vector<18x18x4xf32> to vector<16x16x4xf32>
    %36 = vector.extract_strided_slice %27 {offsets = [2, 2, 0], sizes = [16, 16, 4], strides = [1, 1, 1]} : vector<18x18x4xf32> to vector<16x16x4xf32>
    %37 = tpu.concatenate %28, %29, %30, %31, %32, %33, %34, %35, %36 in 2 : vector<16x16x4xf32>, vector<16x16x4xf32>, vector<16x16x4xf32>, vector<16x16x4xf32>, vector<16x16x4xf32>, vector<16x16x4xf32>, vector<16x16x4xf32>, vector<16x16x4xf32>, vector<16x16x4xf32> -> vector<16x16x36xf32>
    %38 = vector.shape_cast %37 : vector<16x16x36xf32> to vector<256x36xf32>
    %39 = arith.truncf %38 : vector<256x36xf32> to vector<256x36xbf16>
    %c0_11 = arith.constant 0 : index
    %c0_12 = arith.constant 0 : index
    %40 = vector.load %arg4[%c0_11, %c0_12] : memref<36x8xbf16, #tpu.memory_space<vmem>>, vector<36x8xbf16>
    %cst_13 = arith.constant dense<0.000000e+00> : vector<256x8xf32>
    %41 = tpu.matmul %39, %40, %cst_13 {dimension_numbers = #tpu.dot_dimension_numbers<[1], [0], [0], [1], [0, 0, 1, 1], [], []>} : vector<256x36xbf16>, vector<36x8xbf16>, vector<256x8xf32> -> vector<256x8xf32>
    %c0_14 = arith.constant 0 : index
    %c0_15 = arith.constant 0 : index
    %42 = vector.load %arg5[%c0_14, %c0_15] : memref<1x8xf32, #tpu.memory_space<vmem>>, vector<1x8xf32>
    %43 = vector.broadcast %42 : vector<1x8xf32> to vector<256x8xf32>
    %44 = arith.addf %41, %43 : vector<256x8xf32>
    %45 = vector.shape_cast %44 : vector<256x8xf32> to vector<16x16x8xf32>
    %46 = vector.shape_cast %45 : vector<16x16x8xf32> to vector<16x8x2x8xf32>
    %47 = vector.extract_strided_slice %46 {offsets = [0, 0, 0, 0], sizes = [16, 8, 1, 8], strides = [1, 1, 1, 1]} : vector<16x8x2x8xf32> to vector<16x8x1x8xf32>
    %48 = vector.shape_cast %47 : vector<16x8x1x8xf32> to vector<16x8x8xf32>
    %49 = vector.extract_strided_slice %46 {offsets = [0, 0, 1, 0], sizes = [16, 8, 1, 8], strides = [1, 1, 1, 1]} : vector<16x8x2x8xf32> to vector<16x8x1x8xf32>
    %50 = vector.shape_cast %49 : vector<16x8x1x8xf32> to vector<16x8x8xf32>
    %51 = arith.addf %48, %50 : vector<16x8x8xf32>
    %52 = vector.shape_cast %51 : vector<16x8x8xf32> to vector<8x2x8x8xf32>
    %53 = vector.extract_strided_slice %52 {offsets = [0, 0, 0, 0], sizes = [8, 1, 8, 8], strides = [1, 1, 1, 1]} : vector<8x2x8x8xf32> to vector<8x1x8x8xf32>
    %54 = vector.shape_cast %53 : vector<8x1x8x8xf32> to vector<8x8x8xf32>
    %55 = vector.extract_strided_slice %52 {offsets = [0, 1, 0, 0], sizes = [8, 1, 8, 8], strides = [1, 1, 1, 1]} : vector<8x2x8x8xf32> to vector<8x1x8x8xf32>
    %56 = vector.shape_cast %55 : vector<8x1x8x8xf32> to vector<8x8x8xf32>
    %57 = arith.addf %54, %56 : vector<8x8x8xf32>
    %cst_16 = arith.constant 2.500000e-01 : f32
    %58 = vector.broadcast %cst_16 : f32 to vector<8x8x8xf32>
    %59 = arith.mulf %57, %58 : vector<8x8x8xf32>
    %60 = vector.extract_strided_slice %1 {offsets = [1, 1, 0], sizes = [16, 16, 4], strides = [1, 1, 1]} : vector<18x18x4xf32> to vector<16x16x4xf32>
    %61 = vector.shape_cast %60 : vector<16x16x4xf32> to vector<16x8x2x4xf32>
    %62 = vector.extract_strided_slice %61 {offsets = [0, 0, 0, 0], sizes = [16, 8, 1, 4], strides = [1, 1, 1, 1]} : vector<16x8x2x4xf32> to vector<16x8x1x4xf32>
    %63 = vector.shape_cast %62 : vector<16x8x1x4xf32> to vector<16x8x4xf32>
    %64 = vector.extract_strided_slice %61 {offsets = [0, 0, 1, 0], sizes = [16, 8, 1, 4], strides = [1, 1, 1, 1]} : vector<16x8x2x4xf32> to vector<16x8x1x4xf32>
    %65 = vector.shape_cast %64 : vector<16x8x1x4xf32> to vector<16x8x4xf32>
    %66 = arith.addf %63, %65 : vector<16x8x4xf32>
    %67 = vector.shape_cast %66 : vector<16x8x4xf32> to vector<8x2x8x4xf32>
    %68 = vector.extract_strided_slice %67 {offsets = [0, 0, 0, 0], sizes = [8, 1, 8, 4], strides = [1, 1, 1, 1]} : vector<8x2x8x4xf32> to vector<8x1x8x4xf32>
    %69 = vector.shape_cast %68 : vector<8x1x8x4xf32> to vector<8x8x4xf32>
    %70 = vector.extract_strided_slice %67 {offsets = [0, 1, 0, 0], sizes = [8, 1, 8, 4], strides = [1, 1, 1, 1]} : vector<8x2x8x4xf32> to vector<8x1x8x4xf32>
    %71 = vector.shape_cast %70 : vector<8x1x8x4xf32> to vector<8x8x4xf32>
    %72 = arith.addf %69, %71 : vector<8x8x4xf32>
    %cst_17 = arith.constant 2.500000e-01 : f32
    %73 = vector.broadcast %cst_17 : f32 to vector<8x8x4xf32>
    %74 = arith.mulf %72, %73 : vector<8x8x4xf32>
    %75 = vector.shape_cast %74 : vector<8x8x4xf32> to vector<64x4xf32>
    %76 = arith.truncf %75 : vector<64x4xf32> to vector<64x4xbf16>
    %c0_18 = arith.constant 0 : index
    %c0_19 = arith.constant 0 : index
    %77 = vector.load %arg6[%c0_18, %c0_19] : memref<4x8xbf16, #tpu.memory_space<vmem>>, vector<4x8xbf16>
    %cst_20 = arith.constant dense<0.000000e+00> : vector<64x8xf32>
    %78 = tpu.matmul %76, %77, %cst_20 {dimension_numbers = #tpu.dot_dimension_numbers<[1], [0], [0], [1], [0, 0, 1, 1], [], []>} : vector<64x4xbf16>, vector<4x8xbf16>, vector<64x8xf32> -> vector<64x8xf32>
    %c0_21 = arith.constant 0 : index
    %c0_22 = arith.constant 0 : index
    %79 = vector.load %arg7[%c0_21, %c0_22] : memref<1x8xf32, #tpu.memory_space<vmem>>, vector<1x8xf32>
    %80 = vector.broadcast %79 : vector<1x8xf32> to vector<64x8xf32>
    %81 = arith.addf %78, %80 : vector<64x8xf32>
    %82 = vector.shape_cast %81 : vector<64x8xf32> to vector<8x8x8xf32>
    %83 = arith.addf %59, %82 : vector<8x8x8xf32>
    %84 = vector.shape_cast %83 : vector<8x8x8xf32> to vector<8x64xf32>
    %c0_23 = arith.constant 0 : index
    %c0_24 = arith.constant 0 : index
    %c0_25 = arith.constant 0 : index
    %85 = vector.load %arg8[%c0_23, %c0_24, %c0_25] : memref<1x8x64xf32, #tpu.memory_space<vmem>>, vector<1x8x64xf32>
    %86 = vector.shape_cast %85 : vector<1x8x64xf32> to vector<8x64xf32>
    %87 = vector.shape_cast %84 : vector<8x64xf32> to vector<1x8x64xf32>
    tpu.vector_store %arg8[%c0_23, %c0_24, %c0_25], %87 {strides = array<i32>} : memref<1x8x64xf32, #tpu.memory_space<vmem>>, vector<1x8x64xf32>,
    return
  }
  func.func @transform_0(%arg0: i32) -> (i32, i32, i32, i32) {
    %c0_i32 = arith.constant 0 : i32
    %c0_i32_0 = arith.constant 0 : i32
    %c0_i32_1 = arith.constant 0 : i32
    %c0_i32_2 = arith.constant 0 : i32
    return %arg0, %c0_i32, %c0_i32_0, %c0_i32_1 : i32, i32, i32, i32
  }
  func.func @transform_1(%arg0: i32) -> (i32, i32) {
    %c0_i32 = arith.constant 0 : i32
    %c0_i32_0 = arith.constant 0 : i32
    %c0_i32_1 = arith.constant 0 : i32
    return %c0_i32, %c0_i32_0 : i32, i32
  }
  func.func @transform_2(%arg0: i32) -> (i32, i32) {
    %c0_i32 = arith.constant 0 : i32
    %c0_i32_0 = arith.constant 0 : i32
    %c0_i32_1 = arith.constant 0 : i32
    return %c0_i32, %c0_i32_0 : i32, i32
  }
  func.func @transform_3(%arg0: i32) -> (i32, i32) {
    %c0_i32 = arith.constant 0 : i32
    %c0_i32_0 = arith.constant 0 : i32
    %c0_i32_1 = arith.constant 0 : i32
    return %c0_i32, %c0_i32_0 : i32, i32
  }
  func.func @transform_4(%arg0: i32) -> (i32, i32) {
    %c0_i32 = arith.constant 0 : i32
    %c0_i32_0 = arith.constant 0 : i32
    %c0_i32_1 = arith.constant 0 : i32
    return %c0_i32, %c0_i32_0 : i32, i32
  }
  func.func @transform_5(%arg0: i32) -> (i32, i32) {
    %c0_i32 = arith.constant 0 : i32
    %c0_i32_0 = arith.constant 0 : i32
    %c0_i32_1 = arith.constant 0 : i32
    return %c0_i32, %c0_i32_0 : i32, i32
  }
  func.func @transform_6(%arg0: i32) -> (i32, i32) {
    %c0_i32 = arith.constant 0 : i32
    %c0_i32_0 = arith.constant 0 : i32
    %c0_i32_1 = arith.constant 0 : i32
    return %c0_i32, %c0_i32_0 : i32, i32
  }
  func.func @transform_7(%arg0: i32) -> (i32, i32, i32) {
    %c0_i32 = arith.constant 0 : i32
    %c0_i32_0 = arith.constant 0 : i32
    %c0_i32_1 = arith.constant 0 : i32
    return %arg0, %c0_i32, %c0_i32_0 : i32, i32, i32
  }
}

</mosaic_0001>

<bundles_post_ra>
// kernel: tpu_custom_call.1
= control target key start
LH: loop header
LB: loop body
LE: loop exit
PB: predicated region body
PF: predicated region fallthrough
CT: control target
= control target key end

     0   :  { %12 = vsyncpa [#allocation3], 0  ;;  %s16316_s0 = inlined_call_operand.vmem [shape: f32[2,18,18,4], index: 0, kind: input, shape index: {}]   ;;  %s16317_s1 = inlined_call_operand.vmem [shape: bf16[36,4], index: 1, kind: input, shape index: {}]   ;;  %s16318_s2 = inlined_call_operand.vmem [shape: f32[1,4], index: 2, kind: input, shape index: {}]   ;;  %s16319_s3 = inlined_call_operand.vmem [shape: bf16[36,8], index: 3, kind: input, shape index: {}]   ;;  %s16320_s4 = inlined_call_operand.vmem [shape: f32[1,8], index: 4, kind: input, shape index: {}]   ;;  %s16321_s5 = inlined_call_operand.vmem [shape: bf16[4,8], index: 5, kind: input, shape index: {}]   ;;  %s16322_s6 = inlined_call_operand.vmem [shape: f32[1,8], index: 6, kind: input, shape index: {}]   ;;  %s16323_s7 = inlined_call_operand.hbm [shape: f32[2,8,64], index: 7, kind: output, shape index: {}]  }
   0x1   :  { %14 = vsyncpa [#allocation3 + $0x1], 0  ;;  %s10194_s24 = smov 0   ;;  %s10196_s25 = smov 0  }
   0x2   :  { %s10198_s26 = smov 0   ;;  %s10200_s27 = smov 0  }
   0x3 LB: > { %s10215_s28 = sadd.s32 4294967295, %s10137_s27   ;;  %s8227_s29 = sadd.s32 4294967294, %s10137_s27   ;;  %s10137_s27 = sphi %s10200_s27, %s17864_s27   ;;  %s10133_s26 = sphi %s10198_s26, %s17863_s26   ;;  %s10129_s25 = sphi %s10196_s25, %s17862_s25   ;;  %s10125_s24 = sphi %s10194_s24, %s17861_s24  }
   0x4   : > { %s10219_s30 = sadd.s32 1, %s10137_s27   ;;  %s179_s8 = sadd.s32 1, %s10133_s26 }
   0x5   : > { %s176_s9 = ssub.s32 %s10137_s27, %s10219_s30  ;;  %p189_p0 = scmp.ne.s32.totalorder %s10133_s26, %s10129_s25 }
   0x6   : > { %p177_p1 = scmp.eq.s32.totalorder %s176_s9, 0  ;;  %p190_p2 = scmp.eq.s32.totalorder %s10215_s28, 1 }
   0x7   : > { %p195_p3 = scmp.ne.s32.totalorder %s10129_s25, %s10125_s24  ;;  %p196_p4 = scmp.eq.s32.totalorder %s8227_s29, 1 }
   0x8   : > { %s10230_s10 = scalar_select %p177_p1, %s10133_s26, %s179_s8  }
   0x9   : > { %p10232_p5 = por %p190_p2, %p189_p0  ;;  %p10236_p6 = por %p196_p4, %p195_p3 }
   0xa   : > { %p8230_p7 = scmp.ge.s32.totalorder %s10137_s27, 1  ;;  %p240_p8 = scmp.lt.s32.totalorder %s10137_s27, 3 }
   0xc   : > { %p241_p9 = pnand %p8230_p7, %p240_p8 }
   0xe   : > { %244 = sbr.rel (%p241_p9) target bundleno = 1430 (0x596), region = 48 }
  0x13   : > { %p272_p10 = scmp.lt.s32.totalorder %s10215_s28, 1  ;;  %v3598_v0 = vlaneseq  ;;  %v10139_v1 = vmov 1983009808   ;;  %vm5610_vm0 = vcmask 1042434   ;;  %vm16736_vm1 = vcmask 1046528   ;;  %s10140_s18 = smov 4  }
  0x14   : > { %v3596_v2 = vunpack.c.l.s4 %v10139_v1  ;;  %vm1975_vm2 = vcmask 1040384   ;;  %vm5612_vm4 = vcmask 1044484   ;;  %vm16566_vm5 = vcmask 1046534   ;;  %s10141_s19 = smov 8   ;;  %s10142_s20 = smov 12  }
  0x15   : > { %s273_s13 = scalar_select %p272_p10, %s10215_s28, 1  ;;  %v10244_v3 = vshrl.u32 %v3598_v0, 7  ;;  %vm5611_vm3 = vmor %vm1975_vm2, %vm5610_vm0  ;;  %v16791_v39 = vmov 0  ;;  %vm16737_vm8 = vcmask 1045504   ;;  %vm1746_vm9 = vcmask 1041408  }
  0x16   : > { %v3597_v4 = vunpack.c.0.s8 %v3596_v2  ;;  %vm5613_vm6 = vmor %vm5611_vm3, %vm5612_vm4  ;;  %s10143_s21 = smov 16   ;;  %s10144_s22 = smov 20   ;;  %vm1390_vm10 = vcmask 31744   ;;  %vm1423_vm11 = vcmask 64512   ;;  %vm1456_vm12 = vcmask 97280  }
  0x17   : > { %s8697_s14 = smul.u32 432, %s273_s13  ;;  %16780 = vst [vmem:[#allocation5_spill] sm:$0xff] %v10244_v3  ;;  %vm10310_vm7 = vmor %vm5613_vm6, %vm16566_vm5  ;;  %s10145_s15 = smov 24   ;;  %vm16738_vm13 = vcmask 130048   ;;  %vm1522_vm14 = vcmask 162816   ;;  %vm1555_vm15 = vcmask 195584  }
  0x18   : > { %v10262_v11 = vsub.s32 %v3597_v4, %v10244_v3  ;;  %v16792_v39 = vsel %vm10310_vm7, 4294967295, %v16791_v39  ;;  %s10146_s16 = smov 28   ;;  %s10147_s23 = smov 32   ;;  %vm1588_vm3 = vcmask 228352   ;;  %vm1621_vm6 = vcmask 261120  }
  0x19   : > { %s10249_s17 = scalar_lea.vmem %s16316_s0, %s8697_s14  ;;  %16793 = vst [vmem:[#allocation16_spill] sm:$0xff] %v16792_v39  ;;  %vm16739_vm5 = vcmask 293888   ;;  %s269_s13 = sand.u32 1, %s10129_s25  }
  0x1a   : > { %v284_v5 = vld [vmem:[%s10249_s17 + $0x30] sm:$0xff]  ;;  %v285_v6 = vld [vmem:[%s10249_s17 + $0x38] sm:$0xff]  ;;  %v10254_v7 = vld [vmem:[%s10249_s17 + $0x40] sm:$0x3]  ;;  %16783 = vst [vmem:[#allocation8_spill] sm:$0xff] %v10262_v11  ;;  %s8559_s14 = sshll.u32 %s10215_s28, 7 }
  0x1b   : > { %v10256_v8 = vmax.f32 %v284_v5, 0.0  ;;  %v10258_v9 = vmax.f32 %v285_v6, 0.0  ;;  %v16328_v10 = vmax.f32 %v10254_v7, 0.0  ;;  %v5012_v12 = vcombine.high %v285_v6, %v285_v6  ;;  %v278_v20 = vld [vmem:[%s10249_s17] sm:$0xff]  ;;  %v279_v21 = vld [vmem:[%s10249_s17 + $0x8] sm:$0xff]  ;;  %v288_v25 = vld [vmem:[%s10249_s17 + $0x50] sm:$0xff] }
  0x1c   : > { %v5035_v17 = vrot.slane %v10254_v7, %v10262_v11  ;;  %v287_v22 = vld [vmem:[%s10249_s17 + $0x48] sm:$0xff]  ;;  %v10283_v24 = vld [vmem:[%s10249_s17 + $0x10] sm:$0x3]  ;;  %v10287_v26 = vld [vmem:[%s10249_s17 + $0x58] sm:$0x3]  ;;  %v10294_v30 = vmax.f32 %v278_v20, 0.0 }
  0x1d   : > { %16781 = vst [vmem:[#allocation6_spill] sm:$0xff] %v10256_v8  ;;  %16782 = vst [vmem:[#allocation7_spill] sm:$0xff] %v10258_v9  ;;  %v445_v13 = vrot.slane %v10256_v8, 1  ;;  %v446_v14 = vrot.slane %v10258_v9, 1  ;;  %v448_v15 = vrot.slane %v16328_v10, 1  ;;  %v10269_v16 = vrot.slane %v5012_v12, %v10262_v11  ;;  %v281_v49 = vld [vmem:[%s10249_s17 + $0x18] sm:$0xff] }
  0x1e   : > { %v5664_v29 = vrot.slane %v5035_v17, 7  ;;  %16787 = vst [vmem:[#allocation12_spill] sm:$0xff] %v10294_v30  ;;  %v10296_v31 = vmax.f32 %v279_v21, 0.0  ;;  %v16330_v32 = vmax.f32 %v10283_v24, 0.0  ;;  %v10301_v33 = vmax.f32 %v287_v22, 0.0  ;;  %v282_v51 = vld [vmem:[%s10249_s17 + $0x20] sm:$0xff] }
  0x1f   : > { %16784 = vst [vmem:[#allocation9_spill] sm:$0xff] %v10269_v16  ;;  %v447_v18 = vsel %vm16736_vm1, %v445_v13, %v446_v14  ;;  %v449_v19 = vsel %vm16736_vm1, %v446_v14, %v448_v15  ;;  %v5028_v23 = vcombine.high %v10269_v16, %v10269_v16  ;;  %v10303_v34 = vmax.f32 %v288_v25, 0.0  ;;  %v10331_v52 = vld [vmem:[%s10249_s17 + $0x28] sm:$0x3]  ;;  %v293_v62 = vld [vmem:[%s10249_s17 + $0x78] sm:$0xff]  ;;  %v294_v0 = vld [vmem:[%s10249_s17 + $0x80] sm:$0xff] }
  0x20   : > { %v10289_v27 = vpack.i.bf16 %v449_v19, %v447_v18  ;;  %16788 = vst [vmem:[#allocation13_spill] sm:$0xff] %v10296_v31  ;;  %16789 = vst [vmem:[#allocation14_spill] sm:$0xff] %v10301_v33  ;;  %v16329_v35 = vmax.f32 %v10287_v26, 0.0  ;;  %v435_v37 = vrot.slane %v10294_v30, 1  ;;  %v436_v38 = vrot.slane %v10296_v31, 1  ;;  %v297_v10 = vld [vmem:[%s10249_s17 + $0x98] sm:$0xff] }
  0x21   : > { %v10292_v28 = vrot.slane %v5028_v23, 7  ;;  %16790 = vst [vmem:[#allocation15_spill] sm:$0xff] %v10303_v34  ;;  %v438_v40 = vrot.slane %v16330_v32, 1  ;;  %v450_v41 = vrot.slane %v10301_v33, 1  ;;  %v451_v42 = vrot.slane %v10303_v34, 1  ;;  %v290_v23 = vld [vmem:[%s10249_s17 + $0x60] sm:$0xff] }
  0x22   : > { %16785 = vst [vmem:[#allocation10_spill] sm:$0xff] %v10289_v27  ;;  %8762 = vrot.lane.b32.xlu1 %v10289_v27, %s10140_s18  ;;  %v453_v43 = vrot.slane %v16329_v35, 1  ;;  %v437_v45 = vsel %vm16736_vm1, %v435_v37, %v436_v38  ;;  %v10336_v54 = vmax.f32 %v281_v49, 0.0  ;;  %v10338_v55 = vmax.f32 %v282_v51, 0.0  ;;  %v10354_v1 = vld [vmem:[%s10249_s17 + $0x88] sm:$0x3] }
  0x23   : > { %16786 = vst [vmem:[#allocation11_spill] sm:$0xff] %v10292_v28  ;;  %v5663_v36 = vrot.slane %v10292_v28, 2  ;;  %v439_v46 = vsel %vm16736_vm1, %v436_v38, %v438_v40  ;;  %v452_v47 = vsel %vm16736_vm1, %v450_v41, %v451_v42  ;;  %v16332_v56 = vmax.f32 %v10331_v52, 0.0  ;;  %v291_v38 = vld [vmem:[%s10249_s17 + $0x68] sm:$0xff]  ;;  %v10478_v35 = vld [vmem:[%s10249_s17 + $0xa0] sm:$0x3] }
  0x24   : > { %v454_v48 = vsel %vm16736_vm1, %v451_v42, %v453_v43  ;;  %v8751_v50 = vpack.i.bf16 %v439_v46, %v437_v45  ;;  %16796 = vst [vmem:[#allocation19_spill] sm:$0xff] %v10336_v54  ;;  %16797 = vst [vmem:[#allocation20_spill] sm:$0xff] %v10338_v55  ;;  %v440_v57 = vrot.slane %v10336_v54, 1  ;;  %v441_v58 = vrot.slane %v10338_v55, 1  ;;  %v10393_v43 = vld [vmem:[%s10249_s17 + $0x70] sm:$0x3] }
  0x25   : > { %v10322_v44 = vsel %vm10310_vm7, %v5663_v36, %v5664_v29  ;;  %v10334_v53 = vpack.i.bf16 %v454_v48, %v452_v47  ;;  %v443_v59 = vrot.slane %v16332_v56, 1  ;;  %v10358_v2 = vmax.f32 %v293_v62, 0.0  ;;  %v321_v27 = vld [vmem:[%s10249_s17 + $0x158] sm:$0xff]  ;;  %s8155_s29 = scalar_lea.sflag [#allocation3], %s269_s13  ;;  %s10153_s28 = smov [#allocation2]  }
  0x26   : > { %16794 = vst [vmem:[#allocation17_spill] sm:$0xff] %v10322_v44  ;;  %8752 = vrot.lane.b32.xlu0 %v8751_v50, %s10140_s18  ;;  %v442_v60 = vsel %vm16736_vm1, %v440_v57, %v441_v58  ;;  %v10360_v4 = vmax.f32 %v294_v0, 0.0  ;;  %v16327_v5 = vmax.f32 %v10354_v1, 0.0  ;;  %v5118_v6 = vcombine.high %v293_v62, %v293_v62  ;;  %s10081_s9 = sshll.u32 %s10153_s28, 4  ;;  %s10082_s9 = int_to_ptr.vmem [resolvable:$false] %s10081_s9 }
  0x27   : > { %16795 = vst [vmem:[#allocation18_spill] sm:$0xff] %v10334_v53  ;;  %8767 = vrot.lane.b32.xlu1 %v10334_v53, %s10140_s18  ;;  %v444_v61 = vsel %vm16736_vm1, %v441_v58, %v443_v59  ;;  %16799 = vst [vmem:[#allocation22_spill] sm:$0xff] %v10358_v2  ;;  %v460_v12 = vrot.slane %v10358_v2, 1  ;;  %v5135_v13 = vcombine.high %v294_v0, %v294_v0  ;;  %v10395_v45 = vmax.f32 %v290_v23, 0.0 }
  0x28   : > { %v10350_v63 = vpack.i.bf16 %v444_v61, %v442_v60  ;;  %16800 = vst [vmem:[#allocation23_spill] sm:$0xff] %v10360_v4  ;;  %v461_v14 = vrot.slane %v10360_v4, 1  ;;  %v463_v15 = vrot.slane %v16327_v5, 1  ;;  %v10368_v17 = vrot.slane %v5118_v6, %v10262_v11  ;;  %v10421_v61 = vld [vmem:[%s10249_s17 + $0xa8] sm:$0xff]  ;;  %v300_v6 = vld [vmem:[%s10249_s17 + $0xb0] sm:$0xff] }
  0x29   : > { %v10371_v18 = vrot.slane %v294_v0, %v10262_v11  ;;  %v10374_v19 = vrot.slane %v5135_v13, %v10262_v11  ;;  %v5158_v21 = vrot.slane %v10354_v1, %v10262_v11  ;;  %16806 = vst [vmem:[#allocation29_spill] sm:$0xff] %v10395_v45  ;;  %v10406_v49 = vmax.f32 %v291_v38, 0.0 }
  0x2a   : > { %16798 = vst [vmem:[#allocation21_spill] sm:$0xff] %v10350_v63  ;;  %8757 = vrot.lane.b32.xlu0 %v10350_v63, %s10140_s18  ;;  %16801 = vst [vmem:[#allocation24_spill] sm:$0xff] %v10368_v17  ;;  %v5134_v20 = vcombine.high %v10368_v17, %v10368_v17  ;;  %v462_v25 = vsel %vm16736_vm1, %v460_v12, %v461_v14  ;;  %v464_v29 = vsel %vm16736_vm1, %v461_v14, %v463_v15  ;;  %v10426_v12 = vld [vmem:[%s10249_s17 + $0xb8] sm:$0x3]  ;;  %v320_v63 = vld [vmem:[%s10249_s17 + $0x150] sm:$0xff] }
  0x2b   : > { %16802 = vst [vmem:[#allocation25_spill] sm:$0xff] %v10371_v18  ;;  %16803 = vst [vmem:[#allocation26_spill] sm:$0xff] %v10374_v19  ;;  %v5151_v22 = vcombine.high %v10374_v19, %v10374_v19  ;;  %v16324_v37 = vrot.slane %v10371_v18, 7  ;;  %v5739_v42 = vrot.slane %v5158_v21, 7  ;;  %v10397_v46 = vpack.i.bf16 %v464_v29, %v462_v25  ;;  %v10534_v19 = vld [vmem:[%s10249_s17 + $0xe8] sm:$0x3] }
  0x2c   : > { %v10385_v36 = vrot.slane %v5134_v20, 7  ;;  %16809 = vst [vmem:[#allocation32_spill] sm:$0xff] %v10406_v49  ;;  %v16326_v50 = vmax.f32 %v10393_v43, 0.0  ;;  %v455_v57 = vrot.slane %v10395_v45, 1  ;;  %v456_v58 = vrot.slane %v10406_v49, 1 }
  0x2d   : > { %v10390_v41 = vrot.slane %v5151_v22, 7  ;;  %16807 = vst [vmem:[#allocation30_spill] sm:$0xff] %v10397_v46  ;;  %8777 = vrot.lane.b32.xlu1 %v10397_v46, %s10140_s18  ;;  %v10431_v14 = vmax.f32 %v10421_v61, 0.0  ;;  %v10435_v15 = vmax.f32 %v300_v6, 0.0  ;;  %v16325_v20 = vmax.f32 %v10426_v12, 0.0 }
  0x2e   : > { %16804 = vst [vmem:[#allocation27_spill] sm:$0xff] %v10385_v36  ;;  %v5726_v40 = vrot.slane %v10385_v36, 2  ;;  %v458_v59 = vrot.slane %v16326_v50, 1  ;;  %v457_v60 = vsel %vm16736_vm1, %v455_v57, %v456_v58  ;;  %v5200_v21 = vcombine.high %v10421_v61, %v10421_v61  ;;  %v296_v50 = vld [vmem:[%s10249_s17 + $0x90] sm:$0xff]  ;;  %v311_v36 = vld [vmem:[%s10249_s17 + $0x108] sm:$0xff] }
  0x2f   : > { %16805 = vst [vmem:[#allocation28_spill] sm:$0xff] %v10390_v41  ;;  %v5738_v48 = vrot.slane %v10390_v41, 2  ;;  %v5217_v22 = vcombine.high %v300_v6, %v300_v6  ;;  %v470_v25 = vrot.slane %v10431_v14, 1  ;;  %v471_v29 = vrot.slane %v10435_v15, 1 }
  0x30   : > { %v10403_v47 = vsel %vm10310_vm7, %v5726_v40, %v16324_v37  ;;  %v459_v0 = vsel %vm16736_vm1, %v456_v58, %v458_v59  ;;  %v10441_v23 = vrot.slane %v5200_v21, %v10262_v11  ;;  %v10446_v38 = vrot.slane %v300_v6, %v10262_v11 }
  0x31   : > { %16808 = vst [vmem:[#allocation31_spill] sm:$0xff] %v10403_v47  ;;  %v10413_v51 = vsel %vm10310_vm7, %v5738_v48, %v5739_v42  ;;  %v10428_v13 = vpack.i.bf16 %v459_v0, %v457_v60  ;;  %v10449_v40 = vrot.slane %v5217_v22, %v10262_v11  ;;  %v473_v42 = vrot.slane %v16325_v20, 1 }
  0x32   : > { %16811 = vst [vmem:[#allocation34_spill] sm:$0xff] %v10441_v23  ;;  %16812 = vst [vmem:[#allocation35_spill] sm:$0xff] %v10446_v38  ;;  %v5216_v48 = vcombine.high %v10441_v23, %v10441_v23  ;;  %v5240_v57 = vrot.slane %v10426_v12, %v10262_v11  ;;  %v5125_v58 = vrot.slane %v293_v62, %v10262_v11  ;;  %v16331_v0 = vrot.slane %v10446_v38, 7  ;;  %v306_v38 = vld [vmem:[%s10249_s17 + $0xe0] sm:$0xff] }
  0x33   : > { %16810 = vst [vmem:[#allocation33_spill] sm:$0xff] %v10428_v13  ;;  %8772 = vrot.lane.b32.xlu0 %v10428_v13, %s10140_s18  ;;  %16813 = vst [vmem:[#allocation36_spill] sm:$0xff] %v10449_v40  ;;  %v5233_v59 = vcombine.high %v10449_v40, %v10449_v40  ;;  %v472_v6 = vsel %vm16736_vm1, %v470_v25, %v471_v29  ;;  %v474_v21 = vsel %vm16736_vm1, %v471_v29, %v473_v42 }
  0x34   : > { %v10460_v60 = vrot.slane %v5216_v48, 7  ;;  %v5789_v20 = vrot.slane %v5240_v57, 7  ;;  %v5133_v5 = vcombine.high %v5125_v58, %v5125_v58  ;;  %v8405_v25 = vrot.slane %v5125_v58, 9 }
  0x35   : > { %v10466_v37 = vrot.slane %v5233_v59, 7  ;;  %v10480_v29 = vpack.i.bf16 %v474_v21, %v472_v6  ;;  %v10482_v42 = vmax.f32 %v296_v50, 0.0  ;;  %v10488_v59 = vmax.f32 %v297_v10, 0.0 }
  0x36   : > { %16814 = vst [vmem:[#allocation37_spill] sm:$0xff] %v10460_v60  ;;  %v5776_v22 = vrot.slane %v10460_v60, 2  ;;  %v10490_v32 = vrot.slane %v5133_v5, 7  ;;  %v5166_v58 = vrot.slane %v296_v50, %v10262_v11  ;;  %v5176_v6 = vcombine.high %v297_v10, %v297_v10  ;;  %v305_v60 = vld [vmem:[%s10249_s17 + $0xd8] sm:$0xff] }
  0x37   : > { %16815 = vst [vmem:[#allocation38_spill] sm:$0xff] %v10466_v37  ;;  %v5788_v48 = vrot.slane %v10466_v37, 2  ;;  %16817 = vst [vmem:[#allocation40_spill] sm:$0xff] %v10480_v29  ;;  %8787 = vrot.lane.b32.xlu1 %v10480_v29, %s10140_s18 }
  0x38   : > { %v10474_v62 = vsel %vm10310_vm7, %v5776_v22, %v16331_v0  ;;  %16818 = vst [vmem:[#allocation41_spill] sm:$0xff] %v10482_v42  ;;  %16819 = vst [vmem:[#allocation42_spill] sm:$0xff] %v10488_v59  ;;  %v16337_v22 = vmax.f32 %v10478_v35, 0.0  ;;  %v5159_v0 = vcombine.high %v296_v50, %v296_v50  ;;  %v5719_v21 = vsel %vm10310_vm7, %v8405_v25, %v10490_v32 }
  0x39   : > { %16816 = vst [vmem:[#allocation39_spill] sm:$0xff] %v10474_v62  ;;  %v10486_v57 = vsel %vm10310_vm7, %v5788_v48, %v5789_v20  ;;  %16820 = vst [vmem:[#allocation43_spill] sm:$0xff] %v10490_v32  ;;  %v465_v20 = vrot.slane %v10482_v42, 1  ;;  %v466_v48 = vrot.slane %v10488_v59, 1  ;;  %v5174_v3 = vcombine.high %v5166_v58, %v5166_v58  ;;  %v10628_v32 = vld [vmem:[%s10249_s17 + $0x118] sm:$0x3] }
  0x3a   : > { %v468_v5 = vrot.slane %v16337_v22, 1  ;;  %v10504_v56 = vrot.slane %v5159_v0, %v10262_v11  ;;  %v10507_v50 = vrot.slane %v297_v10, %v10262_v11  ;;  %v10510_v37 = vrot.slane %v5176_v6, %v10262_v11 }
  0x3b   : > { %v5199_v25 = vrot.slane %v10478_v35, %v10262_v11  ;;  %v8406_v41 = vrot.slane %v5166_v58, 9  ;;  %v8449_v28 = vrot.slane %v5719_v21, 9  ;;  %v10518_v16 = vrot.slane %v5174_v3, 7 }
  0x3c   : > { %16821 = vst [vmem:[#allocation44_spill] sm:$0xff] %v10504_v56  ;;  %16822 = vst [vmem:[#allocation45_spill] sm:$0xff] %v10507_v50  ;;  %v5175_v22 = vcombine.high %v10504_v56, %v10504_v56  ;;  %v5192_v0 = vcombine.high %v10510_v37, %v10510_v37  ;;  %v467_v10 = vsel %vm16736_vm1, %v465_v20, %v466_v48  ;;  %v8456_v56 = vrot.slane %v10413_v51, 9 }
  0x3d   : > { %16823 = vst [vmem:[#allocation46_spill] sm:$0xff] %v10510_v37  ;;  %16824 = vst [vmem:[#allocation47_spill] sm:$0xff] %v10518_v16  ;;  %v469_v62 = vsel %vm16736_vm1, %v466_v48, %v468_v5  ;;  %v5744_v6 = vsel %vm10310_vm7, %v8406_v41, %v10518_v16  ;;  %v5764_v3 = vrot.slane %v5199_v25, 7  ;;  %v6560_v20 = vadd.f32 %v8449_v28, %v5719_v21 }
  0x3e   : > { %v10525_v40 = vrot.slane %v5175_v22, 7  ;;  %v10531_v47 = vrot.slane %v5192_v0, 7  ;;  %v8457_v37 = vrot.slane %v5744_v6, 9  ;;  %v10537_v5 = vpack.i.bf16 %v469_v62, %v467_v10 }
  0x3f   : > { %v5207_v41 = vrot.slane %v10421_v61, %v10262_v11  ;;  %v16828_v16 = vrot.slane %v10507_v50, 7  ;;  %v10550_v28 = vmax.f32 %v305_v60, 0.0  ;;  %v10552_v62 = vmax.f32 %v306_v38, 0.0 }
  0x40   : > { %16825 = vst [vmem:[#allocation48_spill] sm:$0xff] %v10525_v40  ;;  %16826 = vst [vmem:[#allocation49_spill] sm:$0xff] %v10531_v47  ;;  %v5751_v48 = vrot.slane %v10525_v40, 2  ;;  %v5763_v22 = vrot.slane %v10531_v47, 2  ;;  %v6568_v58 = vadd.f32 %v8457_v37, %v5744_v6  ;;  %8782 = vrot.lane.b32.xlu0 %v10537_v5, %s10140_s18  ;;  %v16355_v61 = vmax.f32 %v10534_v19, 0.0  ;;  %v303_v40 = vld [vmem:[%s10249_s17 + $0xc8] sm:$0xff] }
  0x41   : > { %16827 = vst [vmem:[#allocation50_spill] sm:$0xff] %v10537_v5  ;;  %16830 = vst [vmem:[#allocation52_spill] sm:$0xff] %v10550_v28  ;;  %v6567_v37 = vadd.f32 %v8456_v56, %v10413_v51  ;;  %v480_v10 = vrot.slane %v10550_v28, 1  ;;  %v481_v6 = vrot.slane %v10552_v62, 1  ;;  %v5215_v60 = vcombine.high %v5207_v41, %v5207_v41  ;;  %v302_v51 = vld [vmem:[%s10249_s17 + $0xc0] sm:$0xff] }
  0x42   : > { %v10546_v0 = vsel %vm10310_vm7, %v5751_v48, %v16828_v16  ;;  %16831 = vst [vmem:[#allocation53_spill] sm:$0xff] %v10552_v62  ;;  %v5765_v21 = vsel %vm10310_vm7, %v5763_v22, %v5764_v3  ;;  %v10558_v16 = vadd.f32 %v6568_v58, %v6560_v20  ;;  %v483_v38 = vrot.slane %v16355_v61, 1  ;;  %v10569_v3 = vld [vmem:[%s10249_s17 + $0xd0] sm:$0x3] }
  0x43   : > { %16829 = vst [vmem:[#allocation51_spill] sm:$0xff] %v10546_v0  ;;  %v8464_v25 = vrot.slane %v5765_v21, 9  ;;  %v482_v47 = vsel %vm16736_vm1, %v480_v10, %v481_v6  ;;  %v8407_v0 = vrot.slane %v5207_v41, 9  ;;  %v10575_v22 = vrot.slane %v5215_v60, 7 }
  0x44   : > { %16832 = vst [vmem:[#allocation54_spill] sm:$0xff] %v10558_v16  ;;  %v484_v56 = vsel %vm16736_vm1, %v481_v6, %v483_v38  ;;  %v10579_v61 = vmax.f32 %v302_v51, 0.0  ;;  %v16359_v41 = vmax.f32 %v10569_v3, 0.0  ;;  %v5241_v10 = vcombine.high %v302_v51, %v302_v51 }
  0x45   : > { %v6575_v48 = vadd.f32 %v8464_v25, %v5765_v21  ;;  %v10573_v20 = vpack.i.bf16 %v484_v56, %v482_v47  ;;  %16835 = vst [vmem:[#allocation57_spill] sm:$0xff] %v10575_v22  ;;  %v10581_v21 = vmax.f32 %v303_v40, 0.0  ;;  %v5769_v25 = vsel %vm10310_vm7, %v8407_v0, %v10575_v22 }
  0x46   : > { %16836 = vst [vmem:[#allocation58_spill] sm:$0xff] %v10579_v61  ;;  %v475_v47 = vrot.slane %v10579_v61, 1  ;;  %v478_v60 = vrot.slane %v16359_v41, 1  ;;  %v10593_v38 = vrot.slane %v5241_v10, %v10262_v11  ;;  %v5258_v56 = vcombine.high %v303_v40, %v303_v40 }
  0x47   : > { %v10571_v58 = vadd.f32 %v6575_v48, %v6567_v37  ;;  %16834 = vst [vmem:[#allocation56_spill] sm:$0xff] %v10573_v20  ;;  %8797 = vrot.lane.b32.xlu1 %v10573_v20, %s10140_s18  ;;  %16837 = vst [vmem:[#allocation59_spill] sm:$0xff] %v10581_v21  ;;  %v5248_v37 = vrot.slane %v302_v51, %v10262_v11  ;;  %v476_v6 = vrot.slane %v10581_v21, 1  ;;  %v8472_v18 = vrot.slane %v10486_v57, 9 }
  0x48   : > { %16838 = vst [vmem:[#allocation60_spill] sm:$0xff] %v10593_v38  ;;  %v10596_v16 = vrot.slane %v303_v40, %v10262_v11  ;;  %v5257_v22 = vcombine.high %v10593_v38, %v10593_v38  ;;  %v10603_v41 = vrot.slane %v5258_v56, %v10262_v11  ;;  %v5281_v10 = vrot.slane %v10569_v3, %v10262_v11 }
  0x49   : > { %16833 = vst [vmem:[#allocation55_spill] sm:$0xff] %v10571_v58  ;;  %v5256_v48 = vcombine.high %v5248_v37, %v5248_v37  ;;  %v8465_v58 = vrot.slane %v5769_v25, 9  ;;  %v477_v0 = vsel %vm16736_vm1, %v475_v47, %v476_v6  ;;  %v479_v51 = vsel %vm16736_vm1, %v476_v6, %v478_v60 }
  0x4a   : > { %16839 = vst [vmem:[#allocation61_spill] sm:$0xff] %v10596_v16  ;;  %v8408_v50 = vrot.slane %v5248_v37, 9  ;;  %16840 = vst [vmem:[#allocation62_spill] sm:$0xff] %v10603_v41  ;;  %v10609_v23 = vpack.i.bf16 %v479_v51, %v477_v0  ;;  %v5274_v47 = vcombine.high %v10603_v41, %v10603_v41  ;;  %v10616_v6 = vrot.slane %v5257_v22, 7  ;;  %v312_v41 = vld [vmem:[%s10249_s17 + $0x110] sm:$0xff] }
  0x4b   : > { %v10607_v40 = vrot.slane %v5256_v48, 7  ;;  %v16372_v60 = vrot.slane %v10596_v16, 7  ;;  %v6576_v56 = vadd.f32 %v8465_v58, %v5769_v25  ;;  %v5814_v0 = vrot.slane %v5281_v10, 7 }
  0x4c   : > { %16842 = vst [vmem:[#allocation64_spill] sm:$0xff] %v10609_v23  ;;  %16843 = vst [vmem:[#allocation65_spill] sm:$0xff] %v10616_v6  ;;  %8792 = vrot.lane.b32.xlu0 %v10609_v23, %s10140_s18  ;;  %v5801_v48 = vrot.slane %v10616_v6, 2  ;;  %v10622_v38 = vrot.slane %v5274_v47, 7  ;;  %v10637_v25 = vmax.f32 %v311_v36, 0.0  ;;  %v10639_v10 = vmax.f32 %v312_v41, 0.0 }
  0x4d   : > { %16841 = vst [vmem:[#allocation63_spill] sm:$0xff] %v10607_v40  ;;  %v5794_v37 = vsel %vm10310_vm7, %v8408_v50, %v10607_v40  ;;  %v16374_v40 = vmax.f32 %v10628_v32, 0.0  ;;  %v6583_v16 = vadd.f32 %v8472_v18, %v10486_v57  ;;  %v315_v23 = vld [vmem:[%s10249_s17 + $0x128] sm:$0xff] }
  0x4e   : > { %16844 = vst [vmem:[#allocation66_spill] sm:$0xff] %v10622_v38  ;;  %v8473_v51 = vrot.slane %v5794_v37, 9  ;;  %v10634_v50 = vsel %vm10310_vm7, %v5801_v48, %v16372_v60  ;;  %v5813_v58 = vrot.slane %v10622_v38, 2  ;;  %16846 = vst [vmem:[#allocation68_spill] sm:$0xff] %v10637_v25  ;;  %v490_v60 = vrot.slane %v10637_v25, 1 }
  0x4f   : > { %16845 = vst [vmem:[#allocation67_spill] sm:$0xff] %v10634_v50  ;;  %16847 = vst [vmem:[#allocation69_spill] sm:$0xff] %v10639_v10  ;;  %v491_v38 = vrot.slane %v10639_v10, 1  ;;  %v493_v36 = vrot.slane %v16374_v40, 1 }
  0x50   : > { %v6584_v22 = vadd.f32 %v8473_v51, %v5794_v37  ;;  %v5815_v47 = vsel %vm10310_vm7, %v5813_v58, %v5814_v0  ;;  %v308_v0 = vld [vmem:[%s10249_s17 + $0xf0] sm:$0xff]  ;;  %v309_v51 = vld [vmem:[%s10249_s17 + $0xf8] sm:$0xff]  ;;  %v10656_v58 = vld [vmem:[%s10249_s17 + $0x100] sm:$0x3] }
  0x51   : > { %v8480_v48 = vrot.slane %v5815_v47, 9  ;;  %v492_v37 = vsel %vm16736_vm1, %v490_v60, %v491_v38  ;;  %v16376_v60 = vmax.f32 %v10656_v58, 0.0 }
  0x52   : > { %v10643_v6 = vadd.f32 %v6584_v22, %v6576_v56  ;;  %v494_v56 = vsel %vm16736_vm1, %v491_v38, %v493_v36  ;;  %v10662_v22 = vmax.f32 %v308_v0, 0.0 }
  0x53   : > { %v6591_v41 = vadd.f32 %v8480_v48, %v5815_v47  ;;  %v10660_v57 = vpack.i.bf16 %v494_v56, %v492_v37  ;;  %v10666_v47 = vmax.f32 %v309_v51, 0.0  ;;  %v488_v36 = vrot.slane %v16376_v60, 1  ;;  %v10678_v56 = vld [vmem:[%s10249_s17 + $0x148] sm:$0x3] }
  0x54   : > { %16848 = vst [vmem:[#allocation70_spill] sm:$0xff] %v10643_v6  ;;  %16851 = vst [vmem:[#allocation73_spill] sm:$0xff] %v10662_v22  ;;  %v485_v48 = vrot.slane %v10662_v22, 1 }
  0x55   : > { %v10658_v18 = vadd.f32 %v6591_v41, %v6583_v16  ;;  %16850 = vst [vmem:[#allocation72_spill] sm:$0xff] %v10660_v57  ;;  %8807 = vrot.lane.b32.xlu1 %v10660_v57, %s10140_s18  ;;  %16852 = vst [vmem:[#allocation74_spill] sm:$0xff] %v10666_v47  ;;  %v486_v38 = vrot.slane %v10666_v47, 1  ;;  %v317_v16 = vld [vmem:[%s10249_s17 + $0x138] sm:$0xff]  ;;  %v318_v41 = vld [vmem:[%s10249_s17 + $0x140] sm:$0xff] }
  0x56   : > { %16853 = vst [vmem:[#allocation75_spill] sm:$0xff] %v10678_v56  ;;  %v10682_v51 = vmax.f32 %v317_v16, 0.0  ;;  %v10684_v6 = vmax.f32 %v318_v41, 0.0  ;;  %v5446_v50 = vcombine.high %v317_v16, %v317_v16  ;;  %v5463_v60 = vcombine.high %v318_v41, %v318_v41 }
  0x57   : > { %16849 = vst [vmem:[#allocation71_spill] sm:$0xff] %v10658_v18  ;;  %v487_v37 = vsel %vm16736_vm1, %v485_v48, %v486_v38  ;;  %v489_v0 = vsel %vm16736_vm1, %v486_v38, %v488_v36  ;;  %v16385_v18 = vmax.f32 %v10678_v56, 0.0  ;;  %v10693_v38 = vrot.slane %v318_v41, %v10262_v11 }
  0x58   : > { %v10680_v40 = vpack.i.bf16 %v489_v0, %v487_v37  ;;  %16855 = vst [vmem:[#allocation77_spill] sm:$0xff] %v10682_v51  ;;  %16856 = vst [vmem:[#allocation78_spill] sm:$0xff] %v10684_v6  ;;  %v10690_v48 = vrot.slane %v5446_v50, %v10262_v11  ;;  %v500_v36 = vrot.slane %v10682_v51, 1  ;;  %v501_v37 = vrot.slane %v10684_v6, 1 }
  0x59   : > { %16858 = vst [vmem:[#allocation80_spill] sm:$0xff] %v10693_v38  ;;  %v503_v0 = vrot.slane %v16385_v18, 1  ;;  %v10700_v44 = vrot.slane %v5463_v60, %v10262_v11  ;;  %v5486_v50 = vrot.slane %v10678_v56, %v10262_v11  ;;  %v16397_v20 = vrot.slane %v10693_v38, 7  ;;  %v314_v60 = vld [vmem:[%s10249_s17 + $0x120] sm:$0xff] }
  0x5a   : > { %16854 = vst [vmem:[#allocation76_spill] sm:$0xff] %v10680_v40  ;;  %8802 = vrot.lane.b32.xlu0 %v10680_v40, %s10140_s18  ;;  %16857 = vst [vmem:[#allocation79_spill] sm:$0xff] %v10690_v48  ;;  %v5462_v17 = vcombine.high %v10690_v48, %v10690_v48  ;;  %v502_v40 = vsel %vm16736_vm1, %v500_v36, %v501_v37 }
  0x5b   : > { %16859 = vst [vmem:[#allocation81_spill] sm:$0xff] %v10700_v44  ;;  %v5479_v41 = vcombine.high %v10700_v44, %v10700_v44  ;;  %v504_v18 = vsel %vm16736_vm1, %v501_v37, %v503_v0  ;;  %v5939_v46 = vrot.slane %v5486_v50, 7  ;;  %v10730_v0 = vmax.f32 %v314_v60, 0.0 }
  0x5c   : > { %v10708_v57 = vrot.slane %v5462_v17, 7  ;;  %v10720_v17 = vld [vmem:[%s10249_s17 + $0x130] sm:$0x3]  ;;  %v10728_v37 = vpack.i.bf16 %v504_v18, %v502_v40 }
  0x5d   : > { %v10713_v29 = vrot.slane %v5479_v41, 7  ;;  %16862 = vst [vmem:[#allocation84_spill] sm:$0xff] %v10720_v17  ;;  %16865 = vst [vmem:[#allocation87_spill] sm:$0xff] %v10730_v0  ;;  %v10732_v41 = vmax.f32 %v315_v23, 0.0  ;;  %v10750_v18 = vld [vmem:[%s10249_s17 + $0x170] sm:$0xff] }
  0x5e   : > { %16860 = vst [vmem:[#allocation82_spill] sm:$0xff] %v10708_v57  ;;  %v5926_v48 = vrot.slane %v10708_v57, 2  ;;  %16864 = vst [vmem:[#allocation86_spill] sm:$0xff] %v10728_v37  ;;  %8817 = vrot.lane.b32.xlu1 %v10728_v37, %s10140_s18  ;;  %v495_v57 = vrot.slane %v10730_v0, 1  ;;  %v10762_v38 = vmax.f32 %v10750_v18, 0.0  ;;  %v5453_v37 = vrot.slane %v317_v16, %v10262_v11 }
  0x5f   : > { %16861 = vst [vmem:[#allocation83_spill] sm:$0xff] %v10713_v29  ;;  %v5938_v44 = vrot.slane %v10713_v29, 2  ;;  %16866 = vst [vmem:[#allocation88_spill] sm:$0xff] %v10732_v41  ;;  %v16401_v29 = vmax.f32 %v10720_v17, 0.0 }
  0x60   : > { %v10726_v36 = vsel %vm10310_vm7, %v5926_v48, %v16397_v20  ;;  %v496_v48 = vrot.slane %v10732_v41, 1  ;;  %v10744_v20 = vld [vmem:[%s10249_s17 + $0x168] sm:$0xff]  ;;  %16870 = vst [vmem:[#allocation92_spill] sm:$0xff] %v10762_v38  ;;  %v5461_v13 = vcombine.high %v5453_v37, %v5453_v37  ;;  %v10792_v41 = vmax.f32 %v320_v63, 0.0 }
  0x61   : > { %16863 = vst [vmem:[#allocation85_spill] sm:$0xff] %v10726_v36  ;;  %v10736_v50 = vsel %vm10310_vm7, %v5938_v44, %v5939_v46  ;;  %v498_v40 = vrot.slane %v16401_v29, 1  ;;  %v10753_v44 = vld [vmem:[%s10249_s17 + $0x178] sm:$0x3]  ;;  %v10757_v60 = vmax.f32 %v10744_v20, 0.0 }
  0x62   : > { %v497_v23 = vsel %vm16736_vm1, %v495_v57, %v496_v48  ;;  %16867 = vst [vmem:[#allocation89_spill] sm:$0xff] %v10753_v44  ;;  %v16415_v29 = vmax.f32 %v10753_v44, 0.0  ;;  %v5568_v5 = vrot.slane %v10753_v44, %v10262_v11  ;;  %16875 = vst [vmem:[#allocation97_spill] sm:$0xff] %v10792_v41  ;;  %v10794_v44 = vmax.f32 %v321_v27, 0.0 }
  0x63   : > { %v499_v46 = vsel %vm16736_vm1, %v496_v48, %v498_v40  ;;  %16868 = vst [vmem:[#allocation90_spill] sm:$0xff] %v10757_v60  ;;  %v510_v57 = vrot.slane %v10757_v60, 1  ;;  %v511_v48 = vrot.slane %v10762_v38, 1  ;;  %v8413_v38 = vrot.slane %v5453_v37, 9 }
  0x64   : > { %v10759_v36 = vpack.i.bf16 %v499_v46, %v497_v23  ;;  %v513_v40 = vrot.slane %v16415_v29, 1  ;;  %v5545_v23 = vcombine.high %v10750_v18, %v10750_v18  ;;  %v10786_v29 = vld [vmem:[%s10249_s17 + $0x160] sm:$0x3]  ;;  %16876 = vst [vmem:[#allocation98_spill] sm:$0xff] %v10794_v44  ;;  %v5504_v37 = vcombine.high %v321_v27, %v321_v27 }
  0x65   : > { %v512_v53 = vsel %vm16736_vm1, %v510_v57, %v511_v48  ;;  %16872 = vst [vmem:[#allocation94_spill] sm:$0xff] %v10786_v29 }
  0x66   : > { %16869 = vst [vmem:[#allocation91_spill] sm:$0xff] %v10759_v36  ;;  %8812 = vrot.lane.b32.xlu0 %v10759_v36, %s10140_s18  ;;  %v10775_v46 = vrot.slane %v5545_v23, %v10262_v11  ;;  %v514_v16 = vsel %vm16736_vm1, %v511_v48, %v513_v40  ;;  %v5989_v23 = vrot.slane %v5568_v5, 7  ;;  %v5487_v48 = vcombine.high %v320_v63, %v320_v63 }
  0x67   : > { %v10790_v17 = vpack.i.bf16 %v514_v16, %v512_v53  ;;  %v10797_v40 = vrot.slane %v5461_v13, 7  ;;  %v10807_v5 = vrot.slane %v321_v27, %v10262_v11 }
  0x68   : > { %16871 = vst [vmem:[#allocation93_spill] sm:$0xff] %v10775_v46  ;;  %v5561_v36 = vcombine.high %v10775_v46, %v10775_v46  ;;  %v10804_v53 = vrot.slane %v5487_v48, %v10262_v11  ;;  %v506_v48 = vrot.slane %v10794_v44, 1 }
  0x69   : > { %16874 = vst [vmem:[#allocation96_spill] sm:$0xff] %v10790_v17  ;;  %16877 = vst [vmem:[#allocation99_spill] sm:$0xff] %v10797_v40  ;;  %8827 = vrot.lane.b32.xlu1 %v10790_v17, %s10140_s18  ;;  %v5919_v16 = vsel %vm10310_vm7, %v8413_v38, %v10797_v40  ;;  %v16882_v17 = vmax.f32 %v10786_v29, 0.0  ;;  %v16446_v44 = vrot.slane %v10807_v5, 7 }
  0x6a   : > { %v10788_v60 = vrot.slane %v5561_v36, 7  ;;  %v5494_v36 = vrot.slane %v320_v63, %v10262_v11  ;;  %16878 = vst [vmem:[#allocation100_spill] sm:$0xff] %v10804_v53  ;;  %16879 = vst [vmem:[#allocation101_spill] sm:$0xff] %v10807_v5  ;;  %v505_v63 = vrot.slane %v10792_v41, 1  ;;  %v5503_v0 = vcombine.high %v10804_v53, %v10804_v53 }
  0x6b   : > { %v508_v27 = vrot.slane %v16882_v17, 1  ;;  %v8520_v41 = vrot.slane %v10736_v50, 9 }
  0x6c   : > { %16873 = vst [vmem:[#allocation95_spill] sm:$0xff] %v10788_v60  ;;  %v5988_v46 = vrot.slane %v10788_v60, 2  ;;  %v5502_v57 = vcombine.high %v5494_v36, %v5494_v36  ;;  %v10817_v60 = vrot.slane %v5504_v37, %v10262_v11  ;;  %v8513_v37 = vrot.slane %v5919_v16, 9 }
  0x6d   : > { %v507_v53 = vsel %vm16736_vm1, %v505_v63, %v506_v48  ;;  %v6631_v63 = vadd.f32 %v8520_v41, %v10736_v50  ;;  %v618_v41 = vrot.slane %v10338_v55, 2  ;;  %v612_v50 = vrot.slane %v10294_v30, 2 }
  0x6e   : > { %v10814_v13 = vsel %vm10310_vm7, %v5988_v46, %v5989_v23  ;;  %16881 = vst [vmem:[#allocation103_spill] sm:$0xff] %v10817_v60  ;;  %v5520_v38 = vcombine.high %v10817_v60, %v10817_v60  ;;  %v5527_v46 = vrot.slane %v10786_v29, %v10262_v11  ;;  %v8414_v23 = vrot.slane %v5494_v36, 9 }
  0x6f   : > { %16880 = vst [vmem:[#allocation102_spill] sm:$0xff] %v10814_v13  ;;  %v10829_v40 = vrot.slane %v5502_v57, 7  ;;  %v10831_v13 = vrot.slane %v5503_v0, 7  ;;  %v509_v60 = vsel %vm16736_vm1, %v506_v48, %v508_v27  ;;  %v6624_v56 = vadd.f32 %v8513_v37, %v5919_v16 }
  0x70   : > { %v10841_v36 = vrot.slane %v5520_v38, 7  ;;  %v5964_v57 = vrot.slane %v5527_v46, 7  ;;  %v617_v38 = vrot.slane %v10336_v54, 2  ;;  %v613_v37 = vrot.slane %v10296_v31, 2 }
  0x71   : > { %16883 = vst [vmem:[#allocation104_spill] sm:$0xff] %v10829_v40  ;;  %16884 = vst [vmem:[#allocation105_spill] sm:$0xff] %v10831_v13  ;;  %v5944_v17 = vsel %vm10310_vm7, %v8414_v23, %v10829_v40  ;;  %v5951_v29 = vrot.slane %v10831_v13, 2  ;;  %v10850_v23 = vpack.i.bf16 %v509_v60, %v507_v53  ;;  %v16919_v40 = vld [vmem:[#allocation90_spill] sm:$0xff] }
  0x72   : > { %16885 = vst [vmem:[#allocation106_spill] sm:$0xff] %v10841_v36  ;;  %v5963_v6 = vrot.slane %v10841_v36, 2  ;;  %v8521_v51 = vrot.slane %v5944_v17, 9  ;;  %v619_v16 = vsel %vm16737_vm8, %v617_v38, %v618_v41  ;;  %v687_v5 = vrot.slane %v16919_v40, 2 }
  0x73   : > { %v10847_v0 = vsel %vm10310_vm7, %v5951_v29, %v16446_v44  ;;  %v10860_v29 = vrot.slane %v10744_v20, %v10262_v11  ;;  %8822 = vrot.lane.b32.xlu0 %v10850_v23, %s10140_s18  ;;  %v627_v44 = vrot.slane %v10301_v33, 2 }
  0x74   : > { %16886 = vst [vmem:[#allocation107_spill] sm:$0xff] %v10847_v0  ;;  %v5965_v48 = vsel %vm10310_vm7, %v5963_v6, %v5964_v57  ;;  %v6632_v27 = vadd.f32 %v8521_v51, %v5944_v17  ;;  %v16888_v6 = vmax.f32 %v10331_v52, 0.0  ;;  %v16889_v17 = vmax.f32 %v10283_v24, 0.0 }
  0x75   : > { %v8528_v46 = vrot.slane %v5965_v48, 9  ;;  %v16914_v0 = vcombine.high %v10744_v20, %v10744_v20  ;;  %v16920_v20 = vld [vmem:[#allocation92_spill] sm:$0xff] }
  0x76   : > { %v10864_v60 = vadd.f32 %v6632_v27, %v6624_v56  ;;  %v620_v51 = vrot.slane %v16888_v6, 2  ;;  %v615_v57 = vrot.slane %v16889_v17, 2  ;;  %v628_v27 = vrot.slane %v10303_v34, 2 }
  0x77   : > { %v6639_v53 = vadd.f32 %v8528_v46, %v5965_v48  ;;  %v614_v48 = vsel %vm16737_vm8, %v612_v50, %v613_v37  ;;  %v638_v50 = vrot.slane %v10360_v4, 2  ;;  %v10988_v13 = vrot.slane %v16914_v0, %v10262_v11 }
  0x78   : > { %16887 = vst [vmem:[#allocation108_spill] sm:$0xff] %v10864_v60  ;;  %v621_v56 = vsel %vm16737_vm8, %v618_v41, %v620_v51  ;;  %v16890_v60 = vmax.f32 %v10287_v26, 0.0  ;;  %v616_v24 = vsel %vm16737_vm8, %v613_v37, %v615_v57  ;;  %v629_v17 = vsel %vm16737_vm8, %v627_v44, %v628_v27 }
  0x79   : > { %v10879_v6 = vadd.f32 %v6639_v53, %v6631_v63  ;;  %v10881_v36 = vpack.i.bf16 %v621_v56, %v619_v16  ;;  %v8831_v46 = vpack.i.bf16 %v616_v24, %v614_v48  ;;  %v622_v41 = vrot.slane %v10256_v8, 2 }
  0x7a   : > { %v630_v52 = vrot.slane %v16890_v60, 2  ;;  %v10890_v51 = vrot.slane %v10750_v18, %v10262_v11  ;;  %v623_v63 = vrot.slane %v10258_v9, 2  ;;  %v16893_v16 = vmax.f32 %v10254_v7, 0.0 }
  0x7b   : > { %16891 = vst [vmem:[#allocation109_spill] sm:$0xff] %v10879_v6  ;;  %8837 = vrot.lane.b32.xlu1 %v10881_v36, %s10141_s19  ;;  %8832 = vrot.lane.b32.xlu0 %v8831_v46, %s10141_s19  ;;  %v637_v44 = vrot.slane %v10358_v2, 2  ;;  %v16894_v18 = vmax.f32 %v10354_v1, 0.0  ;;  %v632_v37 = vrot.slane %v10395_v45, 2  ;;  %v5543_v57 = vcombine.high %v10860_v29, %v10860_v29 }
  0x7c   : > { %v631_v38 = vsel %vm16737_vm8, %v628_v27, %v630_v52  ;;  %v625_v60 = vrot.slane %v16893_v16, 2  ;;  %v624_v56 = vsel %vm16737_vm8, %v622_v41, %v623_v63  ;;  %v633_v7 = vrot.slane %v10406_v49, 2 }
  0x7d   : > { %v10894_v26 = vpack.i.bf16 %v631_v38, %v629_v17  ;;  %v640_v53 = vrot.slane %v16894_v18, 2  ;;  %v639_v48 = vsel %vm16737_vm8, %v637_v44, %v638_v50  ;;  %v16895_v1 = vmax.f32 %v10393_v43, 0.0 }
  0x7e   : > { %v626_v27 = vsel %vm16737_vm8, %v623_v63, %v625_v60  ;;  %v634_v38 = vsel %vm16737_vm8, %v632_v37, %v633_v7  ;;  %v647_v41 = vrot.slane %v10431_v14, 2  ;;  %v648_v63 = vrot.slane %v10435_v15, 2 }
  0x7f   : > { %16892 = vst [vmem:[#allocation110_spill] sm:$0xff] %v10894_v26  ;;  %v10910_v52 = vpack.i.bf16 %v626_v27, %v624_v56  ;;  %v641_v24 = vsel %vm16737_vm8, %v638_v50, %v640_v53  ;;  %v635_v46 = vrot.slane %v16895_v1, 2  ;;  %8847 = vrot.lane.b32.xlu1 %v10894_v26, %s10141_s19  ;;  %v16897_v60 = vmax.f32 %v10426_v12, 0.0 }
  0x80   : > { %v10918_v17 = vpack.i.bf16 %v641_v24, %v639_v48  ;;  %v642_v44 = vrot.slane %v10482_v42, 2  ;;  %v643_v50 = vrot.slane %v10488_v59, 2  ;;  %v649_v53 = vsel %vm16737_vm8, %v647_v41, %v648_v63 }
  0x81   : > { %8842 = vrot.lane.b32.xlu0 %v10910_v52, %s10141_s19  ;;  %v636_v16 = vsel %vm16737_vm8, %v633_v7, %v635_v46  ;;  %v650_v43 = vrot.slane %v16897_v60, 2  ;;  %v16899_v37 = vmax.f32 %v10478_v35, 0.0  ;;  %v657_v27 = vrot.slane %v10550_v28, 2 }
  0x82   : > { %16896 = vst [vmem:[#allocation111_spill] sm:$0xff] %v10918_v17  ;;  %v10930_v18 = vpack.i.bf16 %v636_v16, %v634_v38  ;;  %v644_v7 = vsel %vm16737_vm8, %v642_v44, %v643_v50  ;;  %v658_v12 = vrot.slane %v10552_v62, 2  ;;  %v16900_v24 = vmax.f32 %v10534_v19, 0.0 }
  0x83   : > { %v645_v56 = vrot.slane %v16899_v37, 2  ;;  %v651_v48 = vsel %vm16737_vm8, %v648_v63, %v650_v43  ;;  %8857 = vrot.lane.b32.xlu1 %v10918_v17, %s10141_s19  ;;  %v652_v35 = vrot.slane %v10579_v61, 2  ;;  %v653_v41 = vrot.slane %v10581_v21, 2  ;;  %v16925_v17 = vld [vmem:[#allocation94_spill] sm:$0xff] }
  0x84   : > { %16898 = vst [vmem:[#allocation112_spill] sm:$0xff] %v10930_v18  ;;  %v660_v1 = vrot.slane %v16900_v24, 2  ;;  %v10943_v46 = vpack.i.bf16 %v651_v48, %v649_v53  ;;  %v659_v16 = vsel %vm16737_vm8, %v657_v27, %v658_v12  ;;  %v16903_v60 = vmax.f32 %v10569_v3, 0.0 }
  0x85   : > { %v646_v38 = vsel %vm16737_vm8, %v643_v50, %v645_v56  ;;  %8852 = vrot.lane.b32.xlu0 %v10930_v18, %s10141_s19  ;;  %v654_v50 = vsel %vm16737_vm8, %v652_v35, %v653_v41  ;;  %v667_v53 = vrot.slane %v10637_v25, 2  ;;  %v668_v37 = vrot.slane %v10639_v10, 2  ;;  %v16908_v35 = vld [vmem:[#allocation77_spill] sm:$0xff] }
  0x86   : > { %16901 = vst [vmem:[#allocation113_spill] sm:$0xff] %v10943_v46  ;;  %v10950_v63 = vpack.i.bf16 %v646_v38, %v644_v7  ;;  %v661_v19 = vsel %vm16737_vm8, %v658_v12, %v660_v1  ;;  %v655_v43 = vrot.slane %v16903_v60, 2  ;;  %v16905_v48 = vmax.f32 %v10628_v32, 0.0 }
  0x87   : > { %v10956_v44 = vpack.i.bf16 %v661_v19, %v659_v16  ;;  %v662_v27 = vrot.slane %v10662_v22, 2  ;;  %v663_v12 = vrot.slane %v10666_v47, 2  ;;  %8867 = vrot.lane.b32.xlu1 %v10943_v46, %s10141_s19  ;;  %v669_v24 = vsel %vm16737_vm8, %v667_v53, %v668_v37  ;;  %v16909_v19 = vld [vmem:[#allocation78_spill] sm:$0xff]  ;;  %v16912_v53 = vld [vmem:[#allocation87_spill] sm:$0xff] }
  0x88   : > { %16902 = vst [vmem:[#allocation114_spill] sm:$0xff] %v10950_v63  ;;  %v656_v56 = vsel %vm16737_vm8, %v653_v41, %v655_v43  ;;  %v670_v7 = vrot.slane %v16905_v48, 2  ;;  %v16907_v1 = vmax.f32 %v10656_v58, 0.0  ;;  %v677_v16 = vrot.slane %v16908_v35, 2  ;;  %v16910_v43 = vld [vmem:[#allocation75_spill] sm:$0xff]  ;;  %v16913_v58 = vld [vmem:[#allocation88_spill] sm:$0xff] }
  0x89   : > { %16904 = vst [vmem:[#allocation115_spill] sm:$0xff] %v10956_v44  ;;  %v10968_v3 = vpack.i.bf16 %v656_v56, %v654_v50  ;;  %8862 = vrot.lane.b32.xlu0 %v10950_v63, %s10141_s19  ;;  %v664_v41 = vsel %vm16737_vm8, %v662_v27, %v663_v12  ;;  %v678_v60 = vrot.slane %v16909_v19, 2  ;;  %v16911_v48 = vmax.f32 %v16910_v43, 0.0  ;;  %v16915_v27 = vld [vmem:[#allocation84_spill] sm:$0xff] }
  0x8a   : > { %v665_v38 = vrot.slane %v16907_v1, 2  ;;  %v671_v32 = vsel %vm16737_vm8, %v668_v37, %v670_v7  ;;  %v672_v6 = vrot.slane %v16912_v53, 2  ;;  %v673_v1 = vrot.slane %v16913_v58, 2 }
  0x8b   : > { %16906 = vst [vmem:[#allocation116_spill] sm:$0xff] %v10968_v3  ;;  %v680_v50 = vrot.slane %v16911_v48, 2  ;;  %v5560_v37 = vcombine.high %v10890_v51, %v10890_v51  ;;  %v10992_v7 = vrot.slane %v5543_v57, 7  ;;  %v16916_v43 = vmax.f32 %v16915_v27, 0.0  ;;  %8877 = vrot.lane.b32.xlu1 %v10956_v44, %s10141_s19 }
  0x8c   : > { %v666_v56 = vsel %vm16737_vm8, %v663_v12, %v665_v38  ;;  %v10998_v12 = vpack.i.bf16 %v671_v32, %v669_v24  ;;  %v688_v0 = vrot.slane %v16920_v20, 2  ;;  %v679_v57 = vsel %vm16737_vm8, %v677_v16, %v678_v60  ;;  %v16923_v32 = vld [vmem:[#allocation97_spill] sm:$0xff] }
  0x8d   : > { %v675_v48 = vrot.slane %v16916_v43, 2  ;;  %v11000_v38 = vpack.i.bf16 %v666_v56, %v664_v41  ;;  %8872 = vrot.lane.b32.xlu0 %v10968_v3, %s10141_s19  ;;  %v681_v30 = vsel %vm16737_vm8, %v678_v60, %v680_v50  ;;  %v674_v27 = vsel %vm16737_vm8, %v672_v6, %v673_v1  ;;  %v16921_v43 = vld [vmem:[#allocation89_spill] sm:$0xff]  ;;  %v16924_v56 = vld [vmem:[#allocation98_spill] sm:$0xff] }
  0x8e   : > { %16917 = vst [vmem:[#allocation75_spill] sm:$0xff] %v10998_v12  ;;  %v16922_v31 = vmax.f32 %v16921_v43, 0.0  ;;  %v682_v41 = vrot.slane %v16923_v32, 2  ;;  %v683_v46 = vrot.slane %v16924_v56, 2  ;;  %v16926_v63 = vmax.f32 %v16925_v17, 0.0 }
  0x8f   : > { %16918 = vst [vmem:[#allocation84_spill] sm:$0xff] %v11000_v38  ;;  %v676_v24 = vsel %vm16737_vm8, %v673_v1, %v675_v48  ;;  %v5544_v3 = vcombine.high %v10988_v13, %v10988_v13  ;;  %v16469_v16 = vrot.slane %v10988_v13, 7  ;;  %v5977_v60 = vrot.slane %v10890_v51, 7  ;;  %8887 = vrot.lane.b32.xlu1 %v10998_v12, %s10141_s19  ;;  %v16929_v48 = vld [vmem:[#allocation93_spill] sm:$0xff]  ;;  %v11045_v12 = vld [vmem:[%s10249_s17 + $0x188] sm:$0xff] }
  0x90   : > { %v690_v44 = vrot.slane %v16922_v31, 2  ;;  %v685_v26 = vrot.slane %v16926_v63, 2  ;;  %v11022_v31 = vpack.i.bf16 %v681_v30, %v679_v57  ;;  %v689_v6 = vsel %vm16737_vm8, %v687_v5, %v688_v0 }
  0x91   : > { %v8415_v17 = vrot.slane %v10860_v29, 9  ;;  %v11027_v63 = vrot.slane %v5560_v37, 7  ;;  %8882 = vrot.lane.b32.xlu0 %v11000_v38, %s10141_s19  ;;  %v11031_v1 = vpack.i.bf16 %v676_v24, %v674_v27  ;;  %v5970_v51 = vrot.slane %v10992_v7, 2 }
  0x92   : > { %16927 = vst [vmem:[#allocation89_spill] sm:$0xff] %v11022_v31  ;;  %v691_v50 = vsel %vm16737_vm8, %v688_v0, %v690_v44  ;;  %v684_v30 = vsel %vm16737_vm8, %v682_v41, %v683_v46  ;;  %v686_v57 = vsel %vm16737_vm8, %v683_v46, %v685_v26  ;;  %v5973_v5 = vrot.slane %v16469_v16, 2  ;;  %v11042_v0 = vld [vmem:[%s10249_s17 + $0x180] sm:$0xff] }
  0x93   : > { %16928 = vst [vmem:[#allocation94_spill] sm:$0xff] %v11031_v1  ;;  %v5974_v44 = vrot.slane %v5544_v3, 7  ;;  %v5979_v29 = vrot.slane %v5977_v60, 2  ;;  %v11039_v37 = vpack.i.bf16 %v691_v50, %v689_v6  ;;  %8897 = vrot.lane.b32.xlu1 %v11022_v31, %s10141_s19  ;;  %v5569_v27 = vcombine.high %v11042_v0, %v11042_v0 }
  0x94   : > { %v5576_v26 = vrot.slane %v11042_v0, %v10262_v11  ;;  %v5586_v46 = vcombine.high %v11045_v12, %v11045_v12  ;;  %v5593_v3 = vrot.slane %v11045_v12, %v10262_v11  ;;  %v5982_v24 = vrot.slane %v11027_v63, 2 }
  0x95   : > { %16930 = vst [vmem:[#allocation117_spill] sm:$0xff] %v11039_v37  ;;  %8892 = vrot.lane.b32.xlu0 %v11031_v1, %s10141_s19  ;;  %v11060_v41 = vpack.i.bf16 %v686_v57, %v684_v30  ;;  %v11064_v6 = vpack.i.bf16 %v10258_v9, %v10256_v8  ;;  %v8911_v50 = vpack.i.bf16 %v10338_v55, %v10336_v54  ;;  %v5976_v1 = vrot.slane %v5974_v44, 2 }
  0x96   : > { %v5583_v43 = vrot.slane %v5569_v27, %v10262_v11  ;;  %v5584_v16 = vcombine.high %v5576_v26, %v5576_v26  ;;  %v11070_v31 = vrot.slane %v5586_v46, %v10262_v11  ;;  %v5601_v38 = vcombine.high %v5593_v3, %v5593_v3 }
  0x97   : > { %v11074_v18 = vpack.i.bf16 %v10406_v49, %v10395_v45  ;;  %v8416_v30 = vrot.slane %v5576_v26, 9  ;;  %v6002_v57 = vrot.slane %v5593_v3, 7  ;;  %8907 = vrot.lane.b32.xlu1 %v11039_v37, %s10141_s19  ;;  %v11080_v54 = vpack.i.bf16 %v10303_v34, %v10301_v33 }
  0x98   : > { %16931 = vst [vmem:[#allocation118_spill] sm:$0xff] %v11070_v31  ;;  %v5585_v27 = vcombine.high %v5583_v43, %v5583_v43  ;;  %v5993_v55 = vrot.slane %v5584_v16, 7  ;;  %v5996_v8 = vrot.slane %v5583_v43, 7  ;;  %v6005_v9 = vrot.slane %v5601_v38, 7 }
  0x99   : > { %8902 = vrot.lane.b32.xlu0 %v11060_v41, %s10141_s19  ;;  %v6004_v46 = vrot.slane %v6002_v57, 2  ;;  %v16488_v45 = vrot.slane %v11070_v31, 7  ;;  %v5978_v26 = vsel %vm10310_vm7, %v5976_v1, %v5977_v60  ;;  %v11091_v16 = vpack.i.bf16 %v10488_v59, %v10482_v42 }
  0x9a   : > { %v5994_v3 = vsel %vm10310_vm7, %v8416_v30, %v5993_v55  ;;  %v5995_v49 = vrot.slane %v5993_v55, 2  ;;  %v5998_v37 = vrot.slane %v5996_v8, 2  ;;  %v5999_v33 = vrot.slane %v5585_v27, 7 }
  0x9b   : > { %v6006_v43 = vsel %vm10310_vm7, %v6004_v46, %v6005_v9  ;;  %v6007_v34 = vrot.slane %v6005_v9, 2  ;;  %v5969_v38 = vsel %vm10310_vm7, %v8415_v17, %v10992_v7  ;;  %8917 = vrot.lane.b32.xlu1 %v11064_v6, %s10142_s20  ;;  %v8537_v30 = vrot.slane %v5994_v3, 9 }
  0x9c   : > { %v5997_v55 = vsel %vm10310_vm7, %v5995_v49, %v5996_v8  ;;  %v6000_v60 = vsel %vm10310_vm7, %v5998_v37, %v5999_v33  ;;  %v6001_v1 = vrot.slane %v5999_v33, 2  ;;  %v16932_v27 = vrot.slane %v10988_v13, 7 }
  0x9d   : > { %8912 = vrot.lane.b32.xlu0 %v8911_v50, %s10142_s20  ;;  %v6009_v9 = vsel %vm10310_vm7, %v6007_v34, %v16488_v45  ;;  %v8538_v7 = vrot.slane %v5997_v55, 9  ;;  %v8539_v17 = vrot.slane %v6000_v60, 9  ;;  %v8541_v49 = vrot.slane %v6006_v43, 9 }
  0x9e   : > { %v5972_v46 = vsel %vm10310_vm7, %v5970_v51, %v16932_v27  ;;  %v6003_v8 = vsel %vm10310_vm7, %v6001_v1, %v6002_v57  ;;  %v8542_v33 = vrot.slane %v6009_v9, 9  ;;  %v5975_v37 = vsel %vm10310_vm7, %v5973_v5, %v5974_v44 }
  0x9f   : > { %v11119_v50 = vpack.i.bf16 %v10360_v4, %v10358_v2  ;;  %v8540_v34 = vrot.slane %v6003_v8, 9  ;;  %v6648_v45 = vadd.f32 %v8537_v30, %v5994_v3  ;;  %v5981_v13 = vsel %vm10310_vm7, %v5979_v29, %v11027_v63  ;;  %8927 = vrot.lane.b32.xlu1 %v11074_v18, %s10142_s20 }
  0xa0   : > { %v6649_v51 = vadd.f32 %v8538_v7, %v5997_v55  ;;  %v6650_v57 = vadd.f32 %v8539_v17, %v6000_v60  ;;  %v6652_v1 = vadd.f32 %v8541_v49, %v6006_v43  ;;  %v16933_v27 = vrot.slane %v16929_v48, 7  ;;  %v16957_v48 = vld [vmem:[#allocation96_spill] sm:$0xff] }
  0xa1   : > { %8922 = vrot.lane.b32.xlu0 %v11080_v54, %s10142_s20  ;;  %v6653_v44 = vadd.f32 %v8542_v33, %v6009_v9  ;;  %v8529_v3 = vrot.slane %v5969_v38, 9  ;;  %v8530_v30 = vrot.slane %v5972_v46, 9  ;;  %v8531_v42 = vrot.slane %v5975_v37, 9 }
  0xa2   : > { %v5984_v5 = vsel %vm10310_vm7, %v5982_v24, %v16933_v27  ;;  %v6651_v59 = vadd.f32 %v8540_v34, %v6003_v8  ;;  %v8532_v63 = vrot.slane %v5978_v26, 9  ;;  %v8533_v29 = vrot.slane %v5981_v13, 9 }
  0xa3   : > { %v8534_v2 = vrot.slane %v5984_v5, 9  ;;  %v6640_v4 = vadd.f32 %v8529_v3, %v5969_v38  ;;  %v6641_v55 = vadd.f32 %v8530_v30, %v5972_v46  ;;  %v6642_v60 = vadd.f32 %v8531_v42, %v5975_v37  ;;  %8937 = vrot.lane.b32.xlu1 %v11091_v16, %s10142_s20 }
  0xa4   : > { %v11136_v24 = vpack.i.bf16 %v10581_v21, %v10579_v61  ;;  %v6643_v43 = vadd.f32 %v8532_v63, %v5978_v26  ;;  %v6644_v7 = vadd.f32 %v8533_v29, %v5981_v13  ;;  %v11142_v17 = vpack.i.bf16 %v10435_v15, %v10431_v14  ;;  %v16941_v63 = vld [vmem:[#allocation102_spill] sm:$0xff] }
  0xa5   : > { %v6645_v9 = vadd.f32 %v8534_v2, %v5984_v5  ;;  %8932 = vrot.lane.b32.xlu0 %v11119_v50, %s10142_s20  ;;  %v11144_v38 = vadd.f32 %v6648_v45, %v6640_v4  ;;  %v11146_v42 = vadd.f32 %v6649_v51, %v6641_v55  ;;  %v11148_v46 = vadd.f32 %v6650_v57, %v6642_v60  ;;  %v16972_v21 = vld [vmem:[#allocation94_spill] sm:$0xff] }
  0xa6   : > { %v11150_v8 = vadd.f32 %v6651_v59, %v6643_v43  ;;  %v11152_v49 = vadd.f32 %v6652_v1, %v6644_v7  ;;  %v11160_v2 = vpack.i.bf16 %v10666_v47, %v10662_v22  ;;  %v11166_v4 = vpack.i.bf16 %v10552_v62, %v10550_v28  ;;  %v328_v1 = vld [vmem:[%s10249_s17 + $0x190] sm:$0x3]  ;;  %v16968_v47 = vld [vmem:[#allocation84_spill] sm:$0xff] }
  0xa7   : > { %16934 = vst [vmem:[#allocation119_spill] sm:$0xff] %v11144_v38  ;;  %16935 = vst [vmem:[#allocation120_spill] sm:$0xff] %v11146_v42  ;;  %v11154_v26 = vadd.f32 %v6653_v44, %v6645_v9  ;;  %8947 = vrot.lane.b32.xlu1 %v11136_v24, %s10142_s20  ;;  %v11172_v45 = vpack.i.bf16 %v16913_v58, %v16912_v53  ;;  %v11178_v59 = vpack.i.bf16 %v10639_v10, %v10637_v25  ;;  %v16962_v53 = vld [vmem:[#allocation114_spill] sm:$0xff]  ;;  %v16963_v58 = vld [vmem:[#allocation111_spill] sm:$0xff] }
  0xa8   : > { %16936 = vst [vmem:[#allocation121_spill] sm:$0xff] %v11148_v46  ;;  %16937 = vst [vmem:[#allocation122_spill] sm:$0xff] %v11150_v8  ;;  %v5602_v33 = vcombine.high %v11070_v31, %v11070_v31  ;;  %v11186_v37 = vpack.i.bf16 %v16924_v56, %v16923_v32  ;;  %v380_v34 = vmax.f32 %v11042_v0, 0.0  ;;  %v381_v13 = vmax.f32 %v11045_v12, 0.0  ;;  %v16952_v8 = vld [vmem:[#allocation76_spill] sm:$0xff]  ;;  %v16959_v56 = vld [vmem:[#allocation110_spill] sm:$0xff] }
  0xa9   : > { %16938 = vst [vmem:[#allocation123_spill] sm:$0xff] %v11152_v49  ;;  %16939 = vst [vmem:[#allocation124_spill] sm:$0xff] %v11154_v26  ;;  %8942 = vrot.lane.b32.xlu0 %v11142_v17, %s10142_s20  ;;  %v11194_v51 = vpack.i.bf16 %v16909_v19, %v16908_v35  ;;  %v382_v5 = vmax.f32 %v328_v1, 0.0  ;;  %v11207_v12 = vpack.i.bf16 %v16920_v20, %v16919_v40  ;;  %v8536_v29 = vrot.slane %v16941_v63, 9  ;;  %v16953_v46 = vld [vmem:[#allocation56_spill] sm:$0xff]  ;;  %v16966_v19 = vld [vmem:[#allocation113_spill] sm:$0xff] }
  0xaa   : > { %v11196_v57 = vrot.slane %v5602_v33, 7  ;;  %v11201_v27 = vpack.i.bf16 %v381_v13, %v380_v34  ;;  %v887_v44 = vrot.slane %v380_v34, 1  ;;  %v888_v0 = vrot.slane %v381_v13, 1  ;;  %v16958_v32 = vld [vmem:[#allocation112_spill] sm:$0xff]  ;;  %v16969_v25 = vld [vmem:[#allocation115_spill] sm:$0xff]  ;;  %v16979_v62 = vld [vmem:[#allocation117_spill] sm:$0xff] }
  0xab   : > { %8957 = vrot.lane.b32.xlu1 %v11160_v2, %s10142_s20  ;;  %v5609_v3 = vrot.slane %v328_v1, %v10262_v11  ;;  %v890_v55 = vrot.slane %v382_v5, 1  ;;  %v6647_v1 = vadd.f32 %v8536_v29, %v16941_v63  ;;  %v16947_v63 = vld [vmem:[#allocation18_spill] sm:$0xff]  ;;  %v988_v29 = vrot.slane %v380_v34, 2  ;;  %v16950_v34 = vld [vmem:[#allocation64_spill] sm:$0xff] }
  0xac   : > { %16940 = vst [vmem:[#allocation125_spill] sm:$0xff] %v11196_v57  ;;  %v6013_v30 = vrot.slane %v11196_v57, 2  ;;  %v889_v43 = vsel %vm16736_vm1, %v887_v44, %v888_v0  ;;  %v16944_v44 = vld [vmem:[#allocation21_spill] sm:$0xff]  ;;  %v11231_v57 = vpop.permute.xlu0 %8752 }
  0xad   : > { %8952 = vrot.lane.b32.xlu0 %v11166_v4, %s10142_s20  ;;  %v6014_v60 = vrot.slane %v5609_v3, 7  ;;  %v891_v7 = vsel %vm16736_vm1, %v888_v0, %v890_v55  ;;  %v16943_v3 = vld [vmem:[#allocation10_spill] sm:$0xff]  ;;  %v11227_v0 = vpop.permute.xlu1 %8762 }
  0xae   : > { %v11220_v33 = vpack.i.bf16 %v891_v7, %v889_v43  ;;  %v991_v43 = vrot.slane %v382_v5, 2 }
  0xaf   : > { %8967 = vrot.lane.b32.xlu1 %v11172_v45, %s10142_s20  ;;  %v6015_v9 = vsel %vm10310_vm7, %v6013_v30, %v6014_v60  ;;  %v16946_v30 = vld [vmem:[#allocation33_spill] sm:$0xff]  ;;  %v989_v60 = vrot.slane %v381_v13, 2  ;;  %v16951_v13 = vld [vmem:[#allocation40_spill] sm:$0xff] }
  0xb0   : > { %16942 = vst [vmem:[#allocation102_spill] sm:$0xff] %v11220_v33  ;;  %v8544_v26 = vrot.slane %v6015_v9, 9 }
  0xb1   : > { %8962 = vrot.lane.b32.xlu0 %v11178_v59, %s10142_s20  ;;  %v11239_v7 = vpop.permute.xlu1 %8767 }
  0xb2   : > { %v6655_v38 = vadd.f32 %v8544_v26, %v6015_v9  ;;  %v16948_v26 = vld [vmem:[#allocation50_spill] sm:$0xff] }
  0xb3   : > { %8977 = vrot.lane.b32.xlu1 %v11186_v37, %s10142_s20  ;;  %v16949_v9 = vld [vmem:[#allocation30_spill] sm:$0xff] }
  0xb4   : > { %v11229_v55 = vadd.f32 %v6655_v38, %v6647_v1  ;;  %v11243_v38 = vpop.permute.xlu0 %8757  ;;  %v990_v1 = vsel %vm16737_vm8, %v988_v29, %v989_v60  ;;  %v16954_v29 = vld [vmem:[#allocation91_spill] sm:$0xff] }
  0xb5   : > { %8972 = vrot.lane.b32.xlu0 %v11194_v51, %s10142_s20  ;;  %v11253_v5 = vpop.permute.xlu1 %8777 }
  0xb6   : > { %16945 = vst [vmem:[#allocation10_spill] sm:$0xff] %v11229_v55 }
  0xb7   : > { %8987 = vrot.lane.b32.xlu1 %v11201_v27, %s10142_s20 }
  0xb8   : > { %v11255_v49 = vpop.permute.xlu0 %8772 }
  0xb9   : > { %8982 = vrot.lane.b32.xlu0 %v11207_v12, %s10142_s20 }
  0xbb   : > { %8997 = vrot.lane.b32.xlu1 %v16943_v3, %s10143_s21 }
  0xbd   : > { %8992 = vrot.lane.b32.xlu0 %v16944_v44, %s10143_s21  ;;  %v992_v44 = vsel %vm16737_vm8, %v989_v60, %v991_v43  ;;  %v11263_v60 = vpop.permute.xlu1 %8787  ;;  %v16955_v43 = vld [vmem:[#allocation72_spill] sm:$0xff] }
  0xbe   : > { %v11247_v55 = vpack.i.bf16 %v992_v44, %v990_v1  ;;  %v11267_v1 = vpop.permute.xlu0 %8782  ;;  %v16956_v44 = vld [vmem:[#allocation86_spill] sm:$0xff] }
  0xbf   : > { %9007 = vrot.lane.b32.xlu1 %v16946_v30, %s10143_s21 }
  0xc1   : > { %9002 = vrot.lane.b32.xlu0 %v16947_v63, %s10143_s21  ;;  %v11273_v42 = vpop.permute.xlu1 %8797 }
  0xc2   : > { %v11275_v31 = vpop.permute.xlu0 %8792 }
  0xc3   : > { %9017 = vrot.lane.b32.xlu1 %v16948_v26, %s10143_s21 }
  0xc5   : > { %9012 = vrot.lane.b32.xlu0 %v16949_v9, %s10143_s21 }
  0xc7   : > { %9027 = vrot.lane.b32.xlu1 %v16950_v34, %s10143_s21  ;;  %v11283_v39 = vpop.permute.xlu1 %8807 }
  0xc9   : > { %9022 = vrot.lane.b32.xlu0 %v16951_v13, %s10143_s21 }
  0xcb   : > { %9037 = vrot.lane.b32.xlu1 %v16952_v8, %s10143_s21 }
  0xcc   : > { %v11287_v11 = vpop.permute.xlu0 %8802 }
  0xcd   : > { %9032 = vrot.lane.b32.xlu0 %v16953_v46, %s10143_s21 }
  0xcf   : > { %9047 = vrot.lane.b32.xlu1 %v16954_v29, %s10143_s21 }
  0xd0   : > { %v11293_v40 = vpop.permute.xlu1 %8817 }
  0xd1   : > { %9042 = vrot.lane.b32.xlu0 %v16955_v43, %s10143_s21  ;;  %16960 = vst [vmem:[#allocation21_spill] sm:$0xff] %v11293_v40 }
  0xd3   : > { %9057 = vrot.lane.b32.xlu1 %v10850_v23, %s10143_s21 }
  0xd5   : > { %9052 = vrot.lane.b32.xlu0 %v16956_v44, %s10143_s21 }
  0xd7   : > { %9067 = vrot.lane.b32.xlu1 %v11220_v33, %s10143_s21 }
  0xd8   : > { %v11295_v20 = vpop.permute.xlu0 %8812 }
  0xd9   : > { %9062 = vrot.lane.b32.xlu0 %v16957_v48, %s10143_s21  ;;  %16961 = vst [vmem:[#allocation33_spill] sm:$0xff] %v11295_v20 }
  0xdb   : > { %9077 = vrot.lane.b32.xlu1 %v10910_v52, %s10144_s22  ;;  %v11303_v35 = vpop.permute.xlu1 %8827 }
  0xdc   : > { %16965 = vst [vmem:[#allocation18_spill] sm:$0xff] %v11303_v35  ;;  %v16973_v35 = vld [vmem:[#allocation75_spill] sm:$0xff] }
  0xdd   : > { %9072 = vrot.lane.b32.xlu0 %v10881_v36, %s10144_s22  ;;  %v16964_v36 = vld [vmem:[#allocation116_spill] sm:$0xff] }
  0xdf   : > { %9087 = vrot.lane.b32.xlu1 %v16958_v32, %s10144_s22 }
  0xe1   : > { %9082 = vrot.lane.b32.xlu0 %v16959_v56, %s10144_s22 }
  0xe3   : > { %9097 = vrot.lane.b32.xlu1 %v16962_v53, %s10144_s22 }
  0xe5   : > { %9092 = vrot.lane.b32.xlu0 %v16963_v58, %s10144_s22  ;;  %v11307_v22 = vpop.permute.xlu0 %8822 }
  0xe6   : > { %16967 = vst [vmem:[#allocation50_spill] sm:$0xff] %v11307_v22  ;;  %v10038_v22 = vld [vmem:[%s16317_s1 + $0x10] ss:$0 sps:$4 sm:$0x33]  }
  0xe7   : > { %9107 = vrot.lane.b32.xlu1 %v16964_v36, %s10144_s22  ;;  %8693 = vmatprep.subr.msk.bf16.mxu0 %vm1746_vm9, %v10038_v22 }
  0xe9   : > { %9102 = vrot.lane.b32.xlu0 %v16966_v19, %s10144_s22 }
  0xeb   : > { %9117 = vrot.lane.b32.xlu1 %v16968_v47, %s10144_s22 }
  0xed   : > { %9112 = vrot.lane.b32.xlu0 %v16969_v25, %s10144_s22  ;;  %v11313_v10 = vpop.permute.xlu1 %8837  ;;  %v11315_v61 = vpop.permute.xlu0 %8832 }
  0xee   : > { %16970 = vst [vmem:[#allocation30_spill] sm:$0xff] %v11313_v10  ;;  %16971 = vst [vmem:[#allocation64_spill] sm:$0xff] %v11315_v61  ;;  %v16976_v61 = vld [vmem:[#allocation89_spill] sm:$0xff]  ;;  %v1748_v10 = vsel %vm1746_vm9, %v10038_v22, 0 }
  0xef   : > { %9127 = vrot.lane.b32.xlu1 %v16972_v21, %s10144_s22  ;;  %8606 = vmatpush3.bf16.msra.mxu0 %v1748_v10  ;;  %v10040_v10 = vld [vmem:[%s16317_s1] sm:$0xff]  }
  0xf1   : > { %9122 = vrot.lane.b32.xlu0 %v16973_v35, %s10144_s22  ;;  %v11321_v28 = vpop.permute.xlu1 %8847 }
  0xf2   : > { %16974 = vst [vmem:[#allocation40_spill] sm:$0xff] %v11321_v28 }
  0xf3   : > { %v11323_v33 = vpop.permute.xlu0 %8842  ;;  %9137 = vrot.lane.b32.xlu1 %v11060_v41, %s10144_s22 }
  0xf4   : > { %16975 = vst [vmem:[#allocation76_spill] sm:$0xff] %v11323_v33  ;;  %v10039_v33 = vld [vmem:[%s16317_s1 + $0x8] sm:$0xff]  }
  0xf5   : > { %9132 = vrot.lane.b32.xlu0 %v16976_v61, %s10144_s22  ;;  %v11334_v20 = vpop.permute.xlu1 %8857  ;;  %8607 = vmatprep.subr.bf16.mxu0 %v10039_v33 }
  0xf6   : > { %16977 = vst [vmem:[#allocation56_spill] sm:$0xff] %v11334_v20  ;;  %8608 = vmatpush3.bf16.msra.mxu0 %v10039_v33 }
  0xf7   : > { %v11336_v28 = vpop.permute.xlu0 %8852  ;;  %9147 = vrot.lane.b32.xlu1 %v11247_v55, %s10144_s22  ;;  %8609 = vmatprep.subr.bf16.mxu0 %v10040_v10 }
  0xf8   : > { %16978 = vst [vmem:[#allocation91_spill] sm:$0xff] %v11336_v28 }
  0xf9   : > { %9142 = vrot.lane.b32.xlu0 %v16979_v62, %s10144_s22  ;;  %v11345_v40 = vpop.permute.xlu1 %8867 }
  0xfa   : > { %8610 = vmatpush3.bf16.msra.mxu0 %v10040_v10  ;;  %v330_v10 = vld [vmem:[%s10249_s17 + $0x1a0] sm:$0xff] }
  0xfb   : > { %v11347_v22 = vpop.permute.xlu0 %8862  ;;  %9157 = vrot.lane.b32.xlu1 %v11080_v54, %s10145_s15 }
  0xfc   : > { %16980 = vst [vmem:[#allocation72_spill] sm:$0xff] %v11347_v22 }
  0xfd   : > { %9152 = vrot.lane.b32.xlu0 %v11064_v6, %s10145_s15  ;;  %v11356_v28 = vpop.permute.xlu1 %8877 }
  0xff   : > { %v11358_v20 = vpop.permute.xlu0 %8872  ;;  %9167 = vrot.lane.b32.xlu1 %v16943_v3, %s10146_s16 }
 0x101   : > { %9162 = vrot.lane.b32.xlu0 %v11074_v18, %s10145_s15  ;;  %v11364_v33 = vpop.permute.xlu1 %8887 }
 0x103   : > { %v11366_v22 = vpop.permute.xlu0 %8882  ;;  %9177 = vrot.lane.b32.xlu1 %v10910_v52, %s10147_s23 }
 0x105   : > { %9172 = vrot.lane.b32.xlu0 %v16947_v63, %s10146_s16  ;;  %v11372_v54 = vpop.permute.xlu1 %8897 }
 0x107   : > { %v11374_v6 = vpop.permute.xlu0 %8892  ;;  %9187 = vrot.lane.b32.xlu1 %v11119_v50, %s10145_s15 }
 0x109   : > { %9182 = vrot.lane.b32.xlu0 %v16959_v56, %s10147_s23  ;;  %v11380_v18 = vpop.permute.xlu1 %8907 }
 0x10b   : > { %v11382_v3 = vpop.permute.xlu0 %8902  ;;  %9197 = vrot.lane.b32.xlu1 %v16949_v9, %s10146_s16 }
 0x10c   : > { %16981 = vst [vmem:[#allocation86_spill] sm:$0xff] %v11382_v3 }
 0x10d   : > { %9192 = vrot.lane.b32.xlu0 %v16946_v30, %s10146_s16  ;;  %v11388_v52 = vpop.permute.xlu1 %8917 }
 0x10f   : > { %v11390_v63 = vpop.permute.xlu0 %8912  ;;  %9207 = vrot.lane.b32.xlu1 %v16963_v58, %s10147_s23 }
 0x111   : > { %9202 = vrot.lane.b32.xlu0 %v16958_v32, %s10147_s23  ;;  %v11396_v56 = vpop.permute.xlu1 %8927 }
 0x113   : > { %v11398_v50 = vpop.permute.xlu0 %8922  ;;  %9217 = vrot.lane.b32.xlu1 %v11142_v17, %s10145_s15 }
 0x114   : > { %16982 = vst [vmem:[#allocation96_spill] sm:$0xff] %v11398_v50  ;;  %v17058_v50 = vld [vmem:[#allocation97_spill] sm:$0xff] }
 0x115   : > { %9212 = vrot.lane.b32.xlu0 %v11091_v16, %s10145_s15  ;;  %v11404_v30 = vpop.permute.xlu1 %8937 }
 0x116   : > { %16983 = vst [vmem:[#allocation112_spill] sm:$0xff] %v11404_v30  ;;  %v17057_v30 = vld [vmem:[#allocation98_spill] sm:$0xff] }
 0x117   : > { %v11406_v9 = vpop.permute.xlu0 %8932  ;;  %9227 = vrot.lane.b32.xlu1 %v16951_v13, %s10146_s16 }
 0x118   : > { %16984 = vst [vmem:[#allocation110_spill] sm:$0xff] %v11406_v9 }
 0x119   : > { %9222 = vrot.lane.b32.xlu0 %v16948_v26, %s10146_s16  ;;  %v11412_v58 = vpop.permute.xlu1 %8947 }
 0x11a   : > { %16985 = vst [vmem:[#allocation114_spill] sm:$0xff] %v11412_v58 }
 0x11b   : > { %v11414_v32 = vpop.permute.xlu0 %8942  ;;  %9237 = vrot.lane.b32.xlu1 %v16966_v19, %s10147_s23 }
 0x11c   : > { %16986 = vst [vmem:[#allocation111_spill] sm:$0xff] %v11414_v32 }
 0x11d   : > { %9232 = vrot.lane.b32.xlu0 %v16962_v53, %s10147_s23  ;;  %v11420_v16 = vpop.permute.xlu1 %8957 }
 0x11e   : > { %16987 = vst [vmem:[#allocation116_spill] sm:$0xff] %v11420_v16  ;;  %v17018_v16 = vld [vmem:[#allocation19_spill] sm:$0xff] }
 0x11f   : > { %v11422_v17 = vpop.permute.xlu0 %8952  ;;  %9247 = vrot.lane.b32.xlu1 %v11166_v4, %s10145_s15 }
 0x120   : > { %16988 = vst [vmem:[#allocation113_spill] sm:$0xff] %v11422_v17  ;;  %v17015_v17 = vld [vmem:[#allocation15_spill] sm:$0xff] }
 0x121   : > { %9242 = vrot.lane.b32.xlu0 %v11136_v24, %s10145_s15  ;;  %v11428_v26 = vpop.permute.xlu1 %8967 }
 0x122   : > { %16989 = vst [vmem:[#allocation84_spill] sm:$0xff] %v11428_v26 }
 0x123   : > { %v11430_v13 = vpop.permute.xlu0 %8962  ;;  %9257 = vrot.lane.b32.xlu1 %v16953_v46, %s10146_s16 }
 0x124   : > { %16990 = vst [vmem:[#allocation115_spill] sm:$0xff] %v11430_v13  ;;  %v17010_v13 = vld [vmem:[#allocation6_spill] sm:$0xff] }
 0x125   : > { %9252 = vrot.lane.b32.xlu0 %v16950_v34, %s10146_s16  ;;  %v11436_v19 = vpop.permute.xlu1 %8977 }
 0x126   : > { %16991 = vst [vmem:[#allocation94_spill] sm:$0xff] %v11436_v19 }
 0x127   : > { %v11438_v53 = vpop.permute.xlu0 %8972  ;;  %9267 = vrot.lane.b32.xlu1 %v16969_v25, %s10147_s23 }
 0x128   : > { %16992 = vst [vmem:[#allocation75_spill] sm:$0xff] %v11438_v53  ;;  %v8755_v53 = vunpack.i.h.bf16 %v11231_v57 }
 0x129   : > { %9262 = vrot.lane.b32.xlu0 %v16964_v36, %s10147_s23  ;;  %v11444_v24 = vpop.permute.xlu1 %8987 }
 0x12a   : > { %16993 = vst [vmem:[#allocation89_spill] sm:$0xff] %v11444_v24 }
 0x12b   : > { %v11446_v4 = vpop.permute.xlu0 %8982  ;;  %9277 = vrot.lane.b32.xlu1 %v11178_v59, %s10145_s15 }
 0x12c   : > { %16994 = vst [vmem:[#allocation117_spill] sm:$0xff] %v11446_v4  ;;  %v331_v4 = vld [vmem:[%s10249_s17 + $0x1a8] sm:$0x3] }
 0x12d   : > { %9272 = vrot.lane.b32.xlu0 %v11160_v2, %s10145_s15  ;;  %v11452_v46 = vpop.permute.xlu1 %8997 }
 0x12e   : > { %16995 = vst [vmem:[#allocation126_spill] sm:$0xff] %v11452_v46 }
 0x12f   : > { %v11454_v34 = vpop.permute.xlu0 %8992  ;;  %9287 = vrot.lane.b32.xlu1 %v16955_v43, %s10146_s16 }
 0x130   : > { %16996 = vst [vmem:[#allocation127_spill] sm:$0xff] %v11454_v34 }
 0x131   : > { %9282 = vrot.lane.b32.xlu0 %v16952_v8, %s10146_s16  ;;  %v11460_v25 = vpop.permute.xlu1 %9007 }
 0x132   : > { %16997 = vst [vmem:[#allocation128_spill] sm:$0xff] %v11460_v25  ;;  %v17051_v25 = vld [vmem:[#allocation40_spill] sm:$0xff] }
 0x133   : > { %v11462_v36 = vpop.permute.xlu0 %9002  ;;  %9297 = vrot.lane.b32.xlu1 %v16973_v35, %s10147_s23 }
 0x134   : > { %16998 = vst [vmem:[#allocation129_spill] sm:$0xff] %v11462_v36 }
 0x135   : > { %9292 = vrot.lane.b32.xlu0 %v16968_v47, %s10147_s23  ;;  %v11468_v2 = vpop.permute.xlu1 %9017 }
 0x136   : > { %16999 = vst [vmem:[#allocation130_spill] sm:$0xff] %v11468_v2  ;;  %v17031_v2 = vld [vmem:[#allocation33_spill] sm:$0xff] }
 0x137   : > { %v11470_v59 = vpop.permute.xlu0 %9012  ;;  %9307 = vrot.lane.b32.xlu1 %v11194_v51, %s10145_s15  ;;  %v329_v51 = vld [vmem:[%s10249_s17 + $0x198] sm:$0xff] }
 0x138   : > { %17000 = vst [vmem:[#allocation131_spill] sm:$0xff] %v11470_v59 }
 0x139   : > { %9302 = vrot.lane.b32.xlu0 %v11172_v45, %s10145_s15  ;;  %v11476_v8 = vpop.permute.xlu1 %9027 }
 0x13a   : > { %17001 = vst [vmem:[#allocation132_spill] sm:$0xff] %v11476_v8 }
 0x13b   : > { %v11478_v43 = vpop.permute.xlu0 %9022  ;;  %9317 = vrot.lane.b32.xlu1 %v16956_v44, %s10146_s16  ;;  %v8765_v44 = vunpack.i.h.bf16 %v11227_v0 }
 0x13c   : > { %17002 = vst [vmem:[#allocation133_spill] sm:$0xff] %v11478_v43  ;;  %v8790_v43 = vunpack.i.h.bf16 %v11263_v60 }
 0x13d   : > { %9312 = vrot.lane.b32.xlu0 %v16954_v29, %s10146_s16  ;;  %v11484_v47 = vpop.permute.xlu1 %9037  ;;  %v8764_v29 = vunpack.i.l.bf16 %v11227_v0 }
 0x13e   : > { %17003 = vst [vmem:[#allocation134_spill] sm:$0xff] %v11484_v47  ;;  %v17009_v47 = vld [vmem:[#allocation7_spill] sm:$0xff] }
 0x13f   : > { %v11486_v35 = vpop.permute.xlu0 %9032  ;;  %9327 = vrot.lane.b32.xlu1 %v16976_v61, %s10147_s23  ;;  %v383_v61 = vmax.f32 %v329_v51, 0.0  ;;  %v11513_v0 = vsel %vm1390_vm10, %v17009_v47, %v8765_v44  ;;  %v8770_v47 = vunpack.i.h.bf16 %v11239_v7  ;;  %v8769_v44 = vunpack.i.l.bf16 %v11239_v7 }
 0x140   : > { %17004 = vst [vmem:[#allocation135_spill] sm:$0xff] %v11486_v35  ;;  %v8774_v7 = vunpack.i.l.bf16 %v11255_v49 }
 0x141   : > { %9322 = vrot.lane.b32.xlu0 %v16972_v21, %s10147_s23  ;;  %v11492_v45 = vpop.permute.xlu1 %9047  ;;  %v384_v21 = vmax.f32 %v330_v10, 0.0 }
 0x142   : > { %17005 = vst [vmem:[#allocation136_spill] sm:$0xff] %v11492_v45  ;;  %v385_v45 = vmax.f32 %v331_v4, 0.0 }
 0x143   : > { %v11497_v24 = vpop.permute.xlu0 %9042  ;;  %9337 = vrot.lane.b32.xlu1 %v11207_v12, %s10145_s15  ;;  %v11517_v12 = vsel %vm1390_vm10, %v17010_v13, %v8764_v29  ;;  %v1189_v51 = vrot.slane %v384_v21, 1  ;;  %v8760_v13 = vunpack.i.h.bf16 %v11243_v38  ;;  %v8759_v29 = vunpack.i.l.bf16 %v11243_v38 }
 0x144   : > { %17006 = vst [vmem:[#allocation137_spill] sm:$0xff] %v11497_v24  ;;  %v8754_v24 = vunpack.i.l.bf16 %v11231_v57  ;;  %v1188_v57 = vrot.slane %v383_v61, 1  ;;  %v1191_v10 = vrot.slane %v385_v45, 1  ;;  %v9366_v38 = vpack.i.bf16 %v384_v21, %v383_v61 }
 0x145   : > { %9332 = vrot.lane.b32.xlu0 %v11186_v37, %s10145_s15  ;;  %v11506_v19 = vpop.permute.xlu1 %9057  ;;  %v17011_v37 = vld [vmem:[#allocation13_spill] sm:$0xff]  ;;  %v1292_v8 = vrot.slane %v385_v45, 2 }
 0x146   : > { %17007 = vst [vmem:[#allocation138_spill] sm:$0xff] %v11506_v19  ;;  %v11523_v4 = vsel %vm1390_vm10, %v17011_v37, %v8755_v53  ;;  %v8780_v37 = vunpack.i.h.bf16 %v11253_v5  ;;  %v8775_v19 = vunpack.i.h.bf16 %v11255_v49  ;;  %v17016_v49 = vld [vmem:[#allocation14_spill] sm:$0xff] }
 0x147   : > { %v11509_v35 = vpop.permute.xlu0 %9052  ;;  %9347 = vrot.lane.b32.xlu1 %v16957_v48, %s10146_s16  ;;  %v17013_v48 = vld [vmem:[#allocation12_spill] sm:$0xff]  ;;  %v11556_v59 = vsel %vm1390_vm10, %v17016_v49, %v8769_v44  ;;  %v8789_v44 = vunpack.i.l.bf16 %v11263_v60  ;;  %v8785_v49 = vunpack.i.h.bf16 %v11267_v1 }
 0x148   : > { %17008 = vst [vmem:[#allocation139_spill] sm:$0xff] %v11509_v35  ;;  %v11535_v53 = vsel %vm1390_vm10, %v17013_v48, %v8754_v24  ;;  %v1190_v24 = vsel %vm16736_vm1, %v1188_v57, %v1189_v51  ;;  %v1290_v48 = vrot.slane %v384_v21, 2  ;;  %v17020_v21 = vld [vmem:[#allocation23_spill] sm:$0xff] }
 0x149   : > { %9342 = vrot.lane.b32.xlu0 %v10850_v23, %s10146_s16  ;;  %v11531_v35 = vpop.permute.xlu1 %9067  ;;  %v8779_v23 = vunpack.i.l.bf16 %v11253_v5  ;;  %v1192_v5 = vsel %vm16736_vm1, %v1189_v51, %v1191_v10  ;;  %v11570_v45 = vsel %vm1390_vm10, %v17020_v21, %v8780_v37  ;;  %v17022_v10 = vld [vmem:[#allocation32_spill] sm:$0xff]  ;;  %v8784_v37 = vunpack.i.l.bf16 %v11267_v1 }
 0x14a   : > { %17012 = vst [vmem:[#allocation7_spill] sm:$0xff] %v11531_v35  ;;  %v1289_v35 = vrot.slane %v383_v61, 2  ;;  %v8799_v21 = vunpack.i.l.bf16 %v11273_v42  ;;  %v8795_v1 = vunpack.i.h.bf16 %v11275_v31 }
 0x14b   : > { %v11540_v26 = vpop.permute.xlu0 %9062  ;;  %9357 = vrot.lane.b32.xlu1 %v16979_v62, %s10147_s23  ;;  %v17017_v62 = vld [vmem:[#allocation20_spill] sm:$0xff] }
 0x14c   : > { %17014 = vst [vmem:[#allocation6_spill] sm:$0xff] %v11540_v26  ;;  %v11552_v26 = vsel %vm1390_vm10, %v17015_v17, %v8770_v47  ;;  %v11560_v61 = vsel %vm1390_vm10, %v17017_v62, %v8760_v13  ;;  %v17021_v17 = vld [vmem:[#allocation22_spill] sm:$0xff]  ;;  %v11578_v47 = vsel %vm1390_vm10, %v17022_v10, %v8775_v19  ;;  %v11592_v62 = vsel %vm1390_vm10, %v10435_v15, %v8790_v43 }
 0x14d   : > { %9352 = vrot.lane.b32.xlu0 %v11060_v41, %s10147_s23  ;;  %v11564_v41 = vsel %vm1390_vm10, %v17018_v16, %v8759_v29  ;;  %v11566_v57 = vpop.permute.xlu1 %9077  ;;  %v11574_v51 = vsel %vm1390_vm10, %v17021_v17, %v8779_v23  ;;  %v17024_v16 = vld [vmem:[#allocation29_spill] sm:$0xff]  ;;  %v9376_v23 = vpack.i.bf16 %v1192_v5, %v1190_v24  ;;  %v8800_v19 = vunpack.i.h.bf16 %v11273_v42  ;;  %v17027_v42 = vld [vmem:[#allocation42_spill] sm:$0xff] }
 0x14e   : > { %17019 = vst [vmem:[#allocation13_spill] sm:$0xff] %v11566_v57  ;;  %v11585_v29 = vsel %vm1390_vm10, %v17024_v16, %v8774_v7  ;;  %v1291_v60 = vsel %vm16737_vm8, %v1289_v35, %v1290_v48  ;;  %v1293_v7 = vsel %vm16737_vm8, %v1290_v48, %v1292_v8  ;;  %v8810_v24 = vunpack.i.h.bf16 %v11283_v39  ;;  %v17030_v16 = vld [vmem:[#allocation53_spill] sm:$0xff] }
 0x14f   : > { %v11581_v13 = vpop.permute.xlu0 %9072  ;;  %9367 = vrot.lane.b32.xlu1 %v9366_v38, %s10145_s15  ;;  %v8794_v38 = vunpack.i.l.bf16 %v11275_v31  ;;  %v11607_v15 = vsel %vm1390_vm10, %v10431_v14, %v8789_v44  ;;  %v8805_v43 = vunpack.i.h.bf16 %v11287_v11  ;;  %v8804_v8 = vunpack.i.l.bf16 %v11287_v11  ;;  %v17028_v31 = vld [vmem:[#allocation21_spill] sm:$0xff] }
 0x150   : > { %17023 = vst [vmem:[#allocation12_spill] sm:$0xff] %v11581_v13  ;;  %v11616_v48 = vsel %vm1390_vm10, %v17027_v42, %v8785_v49  ;;  %v8820_v17 = vunpack.i.h.bf16 %v17028_v31  ;;  %v8819_v10 = vunpack.i.l.bf16 %v17028_v31  ;;  %v9386_v14 = vpack.i.bf16 %v1293_v7, %v1291_v60  ;;  %v17029_v44 = vld [vmem:[#allocation41_spill] sm:$0xff]  ;;  %v17032_v42 = vld [vmem:[#allocation102_spill] sm:$0xff]  ;;  %v17052_v13 = vld [vmem:[#allocation76_spill] sm:$0xff] }
 0x151   : > { %9362 = vrot.lane.b32.xlu0 %v11201_v27, %s10145_s15  ;;  %v11603_v5 = vpop.permute.xlu1 %9087  ;;  %v8809_v27 = vunpack.i.l.bf16 %v11283_v39  ;;  %v11623_v39 = vsel %vm1390_vm10, %v17029_v44, %v8784_v37  ;;  %v11627_v11 = vsel %vm1390_vm10, %v17030_v16, %v8800_v19  ;;  %v8814_v49 = vunpack.i.l.bf16 %v17031_v2  ;;  %v17035_v37 = vld [vmem:[#allocation58_spill] sm:$0xff]  ;;  %v17036_v19 = vld [vmem:[#allocation69_spill] sm:$0xff]  ;;  %v17038_v16 = vld [vmem:[#allocation68_spill] sm:$0xff] }
 0x152   : > { %17025 = vst [vmem:[#allocation15_spill] sm:$0xff] %v11603_v5  ;;  %v17033_v5 = vld [vmem:[#allocation52_spill] sm:$0xff]  ;;  %v11643_v7 = vsel %vm1390_vm10, %v17035_v37, %v8794_v38  ;;  %v11647_v44 = vsel %vm1390_vm10, %v17036_v19, %v8810_v24  ;;  %v17042_v37 = vld [vmem:[#allocation78_spill] sm:$0xff]  ;;  %v17043_v19 = vld [vmem:[#allocation77_spill] sm:$0xff]  ;;  %v8845_v32 = vunpack.i.h.bf16 %v17052_v13 }
 0x153   : > { %v11612_v35 = vpop.permute.xlu0 %9082  ;;  %9377 = vrot.lane.b32.xlu1 %v9376_v23, %s10146_s16  ;;  %v11635_v31 = vsel %vm1390_vm10, %v17033_v5, %v8799_v21  ;;  %v17034_v23 = vld [vmem:[#allocation59_spill] sm:$0xff]  ;;  %v17039_v21 = vld [vmem:[#allocation74_spill] sm:$0xff]  ;;  %v11667_v24 = vsel %vm1390_vm10, %v17042_v37, %v8820_v17 }
 0x154   : > { %17026 = vst [vmem:[#allocation14_spill] sm:$0xff] %v11612_v35  ;;  %v8815_v35 = vunpack.i.h.bf16 %v17031_v2  ;;  %v11639_v60 = vsel %vm1390_vm10, %v17034_v23, %v8795_v1  ;;  %v11657_v5 = vsel %vm1390_vm10, %v17039_v21, %v8805_v43  ;;  %v17040_v1 = vld [vmem:[#allocation73_spill] sm:$0xff]  ;;  %v17045_v21 = vld [vmem:[#allocation88_spill] sm:$0xff]  ;;  %v17047_v17 = vld [vmem:[#allocation50_spill] sm:$0xff] }
 0x155   : > { %9372 = vrot.lane.b32.xlu0 %v17032_v42, %s10146_s16  ;;  %v11649_v2 = vpop.permute.xlu1 %9097  ;;  %v11653_v42 = vsel %vm1390_vm10, %v17038_v16, %v8809_v27  ;;  %v11661_v23 = vsel %vm1390_vm10, %v17040_v1, %v8804_v8  ;;  %v17044_v27 = vld [vmem:[#allocation18_spill] sm:$0xff]  ;;  %v17046_v1 = vld [vmem:[#allocation87_spill] sm:$0xff]  ;;  %v8825_v37 = vunpack.i.h.bf16 %v17047_v17  ;;  %v8824_v36 = vunpack.i.l.bf16 %v17047_v17 }
 0x156   : > { %17037 = vst [vmem:[#allocation20_spill] sm:$0xff] %v11649_v2  ;;  %v11671_v2 = vsel %vm1390_vm10, %v17043_v19, %v8819_v10  ;;  %v8830_v16 = vunpack.i.h.bf16 %v17044_v27  ;;  %v8829_v43 = vunpack.i.l.bf16 %v17044_v27  ;;  %v11678_v8 = vsel %vm1390_vm10, %v17045_v21, %v8815_v35  ;;  %v17048_v10 = vld [vmem:[#allocation30_spill] sm:$0xff] }
 0x157   : > { %v11663_v38 = vpop.permute.xlu0 %9092  ;;  %9387 = vrot.lane.b32.xlu1 %v9386_v14, %s10147_s23  ;;  %v8840_v19 = vunpack.i.h.bf16 %v17048_v10  ;;  %v8839_v27 = vunpack.i.l.bf16 %v17048_v10  ;;  %v17049_v14 = vld [vmem:[#allocation64_spill] sm:$0xff]  ;;  %v8844_v17 = vunpack.i.l.bf16 %v17052_v13  ;;  %v17055_v10 = vld [vmem:[#allocation90_spill] sm:$0xff]  ;;  %v11716_v13 = vsel %vm1390_vm10, %v17058_v50, %v8824_v36 }
 0x158   : > { %17041 = vst [vmem:[#allocation19_spill] sm:$0xff] %v11663_v38  ;;  %v11682_v38 = vsel %vm1390_vm10, %v17046_v1, %v8814_v49  ;;  %v8835_v57 = vunpack.i.h.bf16 %v17049_v14  ;;  %v8834_v35 = vunpack.i.l.bf16 %v17049_v14  ;;  %v8850_v49 = vunpack.i.h.bf16 %v17051_v25  ;;  %v17056_v14 = vld [vmem:[#allocation56_spill] sm:$0xff] }
 0x159   : > { %9382 = vrot.lane.b32.xlu0 %v11247_v55, %s10147_s23  ;;  %v11692_v21 = vpop.permute.xlu1 %9107  ;;  %v8849_v1 = vunpack.i.l.bf16 %v17051_v25  ;;  %v17054_v55 = vld [vmem:[#allocation92_spill] sm:$0xff]  ;;  %v11706_v58 = vsel %vm1390_vm10, %v17055_v10, %v8829_v43  ;;  %v8859_v9 = vunpack.i.l.bf16 %v17056_v14  ;;  %v11712_v25 = vsel %vm1390_vm10, %v17057_v30, %v8825_v37 }
 0x15a   : > { %17050 = vst [vmem:[#allocation23_spill] sm:$0xff] %v11692_v21  ;;  %v11702_v46 = vsel %vm1390_vm10, %v17054_v55, %v8830_v16  ;;  %v8860_v21 = vunpack.i.h.bf16 %v17056_v14  ;;  %v11722_v43 = vsel %vm1423_vm11, %v11564_v41, %v8839_v27  ;;  %v11726_v55 = vsel %vm1423_vm11, %v11560_v61, %v8840_v19 }
 0x15b   : > { %v11698_v34 = vpop.permute.xlu0 %9102  ;;  %v11730_v30 = vsel %vm1423_vm11, %v11535_v53, %v8834_v35  ;;  %v11734_v50 = vsel %vm1423_vm11, %v11523_v4, %v8835_v57  ;;  %v11744_v41 = vsel %vm1423_vm11, %v11556_v59, %v8849_v1  ;;  %v11748_v61 = vsel %vm1423_vm11, %v11513_v0, %v8845_v32 }
 0x15c   : > { %17053 = vst [vmem:[#allocation22_spill] sm:$0xff] %v11698_v34  ;;  %v17059_v34 = vld [vmem:[#allocation91_spill] sm:$0xff]  ;;  %v11752_v53 = vsel %vm1423_vm11, %v11517_v12, %v8844_v17  ;;  %v11758_v57 = vsel %vm1423_vm11, %v11570_v45, %v8860_v21  ;;  %v8870_v59 = vunpack.i.h.bf16 %v11345_v40  ;;  %v8869_v37 = vunpack.i.l.bf16 %v11345_v40  ;;  %v17060_v12 = vld [vmem:[#allocation72_spill] sm:$0xff] }
 0x15d   : > { %v8855_v3 = vunpack.i.h.bf16 %v17059_v34  ;;  %v8854_v16 = vunpack.i.l.bf16 %v17059_v34  ;;  %v11736_v36 = vpop.permute.xlu1 %9117  ;;  %v11740_v34 = vsel %vm1423_vm11, %v11552_v26, %v8850_v49  ;;  %v11762_v26 = vsel %vm1423_vm11, %v11574_v51, %v8859_v9 }
 0x15e   : > { %v8865_v19 = vunpack.i.h.bf16 %v17060_v12  ;;  %v8864_v45 = vunpack.i.l.bf16 %v17060_v12  ;;  %v8880_v27 = vunpack.i.h.bf16 %v11356_v28  ;;  %v8879_v9 = vunpack.i.l.bf16 %v11356_v28 }
 0x15f   : > { %v11754_v4 = vpop.permute.xlu0 %9112  ;;  %v11768_v32 = vsel %vm1423_vm11, %v11585_v29, %v8854_v16  ;;  %v11772_v0 = vsel %vm1423_vm11, %v11578_v47, %v8855_v3  ;;  %v8875_v51 = vunpack.i.h.bf16 %v11358_v20  ;;  %v8874_v40 = vunpack.i.l.bf16 %v11358_v20 }
 0x160   : > { %v8890_v29 = vunpack.i.h.bf16 %v11364_v33  ;;  %v8889_v3 = vunpack.i.l.bf16 %v11364_v33  ;;  %v8885_v47 = vunpack.i.h.bf16 %v11366_v22  ;;  %v8884_v21 = vunpack.i.l.bf16 %v11366_v22 }
 0x161   : > { %v11780_v35 = vpop.permute.xlu1 %9127  ;;  %v11790_v28 = vsel %vm1423_vm11, %v11592_v62, %v8870_v59  ;;  %v11794_v20 = vsel %vm1423_vm11, %v11607_v15, %v8869_v37  ;;  %v8900_v1 = vunpack.i.h.bf16 %v11372_v54  ;;  %v8899_v17 = vunpack.i.l.bf16 %v11372_v54 }
 0x162   : > { %v11800_v33 = vsel %vm1423_vm11, %v11623_v39, %v8864_v45  ;;  %v11804_v22 = vsel %vm1423_vm11, %v11616_v48, %v8865_v19  ;;  %v8895_v10 = vunpack.i.h.bf16 %v11374_v6  ;;  %v8894_v62 = vunpack.i.l.bf16 %v11374_v6 }
 0x163   : > { %v11786_v49 = vpop.permute.xlu0 %9122  ;;  %v11810_v15 = vsel %vm1423_vm11, %v11627_v11, %v8880_v27  ;;  %v11814_v14 = vsel %vm1423_vm11, %v11635_v31, %v8879_v9  ;;  %v11818_v54 = vsel %vm1423_vm11, %v11643_v7, %v8874_v40  ;;  %v11822_v48 = vsel %vm1423_vm11, %v11639_v60, %v8875_v51  ;;  %v17063_v9 = vld [vmem:[#allocation96_spill] sm:$0xff] }
 0x164   : > { %v11828_v6 = vsel %vm1423_vm11, %v11647_v44, %v8890_v29  ;;  %v11832_v11 = vsel %vm1423_vm11, %v11653_v42, %v8889_v3  ;;  %v11836_v31 = vsel %vm1423_vm11, %v11661_v23, %v8884_v21  ;;  %v11840_v7 = vsel %vm1423_vm11, %v11657_v5, %v8885_v47  ;;  %v17066_v29 = vld [vmem:[#allocation112_spill] sm:$0xff] }
 0x165   : > { %v11824_v39 = vpop.permute.xlu1 %9137  ;;  %v11846_v16 = vsel %vm1423_vm11, %v11667_v24, %v8900_v1  ;;  %v11850_v44 = vsel %vm1423_vm11, %v11671_v2, %v8899_v17  ;;  %v8910_v42 = vunpack.i.h.bf16 %v11380_v18  ;;  %v8909_v59 = vunpack.i.l.bf16 %v11380_v18  ;;  %v17067_v17 = vld [vmem:[#allocation110_spill] sm:$0xff] }
 0x166   : > { %v11856_v23 = vsel %vm1423_vm11, %v11682_v38, %v8894_v62  ;;  %v11860_v5 = vsel %vm1423_vm11, %v11678_v8, %v8895_v10  ;;  %v8920_v37 = vunpack.i.h.bf16 %v11388_v52  ;;  %v8919_v24 = vunpack.i.l.bf16 %v11388_v52  ;;  %v17062_v38 = vld [vmem:[#allocation86_spill] sm:$0xff] }
 0x167   : > { %v11842_v60 = vpop.permute.xlu0 %9132  ;;  %v8915_v2 = vunpack.i.h.bf16 %v11390_v63  ;;  %v8914_v12 = vunpack.i.l.bf16 %v11390_v63  ;;  %v8930_v19 = vunpack.i.h.bf16 %v11396_v56  ;;  %v8929_v18 = vunpack.i.l.bf16 %v11396_v56 }
 0x168   : > { %v8925_v51 = vunpack.i.h.bf16 %v17063_v9  ;;  %v8924_v40 = vunpack.i.l.bf16 %v17063_v9  ;;  %v11878_v63 = vsel %vm1423_vm11, %v11702_v46, %v8910_v42  ;;  %v11882_v56 = vsel %vm1423_vm11, %v11706_v58, %v8909_v59  ;;  %v17070_v9 = vld [vmem:[#allocation127_spill] sm:$0xff] }
 0x169   : > { %v11868_v45 = vpop.permute.xlu1 %9147  ;;  %17065 = vst [vmem:[#allocation42_spill] sm:$0xff] %v11878_v63  ;;  %v8940_v3 = vunpack.i.h.bf16 %v17066_v29  ;;  %v8939_v47 = vunpack.i.l.bf16 %v17066_v29  ;;  %v1459_v21 = vsel %vm1456_vm12, %v11722_v43, %v8919_v24  ;;  %v1460_v1 = vsel %vm1456_vm12, %v11726_v55, %v8920_v37  ;;  %v17068_v37 = vld [vmem:[#allocation114_spill] sm:$0xff] }
 0x16a   : > { %17061 = vst [vmem:[#allocation32_spill] sm:$0xff] %v11868_v45  ;;  %v8935_v10 = vunpack.i.h.bf16 %v17067_v17  ;;  %v8934_v46 = vunpack.i.l.bf16 %v17067_v17  ;;  %v1457_v58 = vsel %vm1456_vm12, %v11730_v30, %v8914_v12  ;;  %v1458_v62 = vsel %vm1456_vm12, %v11734_v50, %v8915_v2  ;;  %v17069_v12 = vld [vmem:[#allocation126_spill] sm:$0xff] }
 0x16b   : > { %v11874_v52 = vpop.permute.xlu0 %9142  ;;  %v1463_v42 = vsel %vm1456_vm12, %v11744_v41, %v8929_v18  ;;  %v11900_v43 = vsel %vm1456_vm12, %v11740_v34, %v8930_v19  ;;  %v11906_v55 = vsel %vm1456_vm12, %v11752_v53, %v8924_v40  ;;  %v11910_v30 = vsel %vm1456_vm12, %v11748_v61, %v8925_v51  ;;  %v17071_v40 = vld [vmem:[#allocation111_spill] sm:$0xff] }
 0x16c   : > { %17064 = vst [vmem:[#allocation29_spill] sm:$0xff] %v11874_v52  ;;  %v8950_v50 = vunpack.i.h.bf16 %v17068_v37  ;;  %v8949_v24 = vunpack.i.l.bf16 %v17068_v37  ;;  %v11916_v34 = vsel %vm1456_vm12, %v11762_v26, %v8939_v47  ;;  %v11920_v2 = vsel %vm1456_vm12, %v11758_v57, %v8940_v3  ;;  %v17072_v3 = vld [vmem:[#allocation12_spill] sm:$0xff] }
 0x16d   : > { %v11902_v59 = vpop.permute.xlu1 %9157  ;;  %v9000_v53 = vunpack.i.h.bf16 %v17069_v12  ;;  %v8999_v19 = vunpack.i.l.bf16 %v17069_v12  ;;  %v11926_v61 = vsel %vm1456_vm12, %v11768_v32, %v8934_v46  ;;  %v11930_v18 = vsel %vm1456_vm12, %v11772_v0, %v8935_v10 }
 0x16e   : > { %v8995_v51 = vunpack.i.h.bf16 %v17070_v9  ;;  %v8994_v26 = vunpack.i.l.bf16 %v17070_v9  ;;  %v9075_v47 = vunpack.i.h.bf16 %v17072_v3  ;;  %v9074_v17 = vunpack.i.l.bf16 %v17072_v3 }
 0x16f   : > { %v9153_v41 = vpop.permute.xlu0 %9152  ;;  %v11940_v32 = vsel %vm1456_vm12, %v11794_v20, %v8949_v24  ;;  %v11944_v0 = vsel %vm1456_vm12, %v11790_v28, %v8950_v50  ;;  %v1492_v9 = vsel %vm16738_vm13, %v1459_v21, %v8999_v19  ;;  %v1493_v27 = vsel %vm16738_vm13, %v1460_v1, %v9000_v53  ;;  %v17073_v20 = vld [vmem:[#allocation128_spill] sm:$0xff]  ;;  %v17074_v28 = vld [vmem:[#allocation13_spill] sm:$0xff] }
 0x170   : > { %v9155_v10 = vunpack.i.h.bf16 %v9153_v41  ;;  %v9154_v46 = vunpack.i.l.bf16 %v9153_v41  ;;  %v1490_v3 = vsel %vm16738_vm13, %v1457_v58, %v8994_v26  ;;  %v1491_v29 = vsel %vm16738_vm13, %v1458_v62, %v8995_v51 }
 0x171   : > { %v9168_v37 = vpop.permute.xlu1 %9167  ;;  %v9010_v24 = vunpack.i.h.bf16 %v17073_v20  ;;  %v9009_v52 = vunpack.i.l.bf16 %v17073_v20  ;;  %v9080_v50 = vunpack.i.h.bf16 %v17074_v28  ;;  %v9079_v41 = vunpack.i.l.bf16 %v17074_v28 }
 0x172   : > { %v9170_v8 = vunpack.i.h.bf16 %v9168_v37  ;;  %v9169_v57 = vunpack.i.l.bf16 %v9168_v37  ;;  %v1523_v45 = vsel %vm1522_vm14, %v1490_v3, %v9074_v17  ;;  %v1524_v21 = vsel %vm1522_vm14, %v1491_v29, %v9075_v47 }
 0x173   : > { %v11946_v12 = vpop.permute.xlu0 %9162  ;;  %v1556_v58 = vsel %vm1555_vm15, %v1523_v45, %v9154_v46  ;;  %v1557_v62 = vsel %vm1555_vm15, %v1524_v21, %v9155_v10  ;;  %v9160_v51 = vunpack.i.h.bf16 %v11902_v59  ;;  %v9159_v26 = vunpack.i.l.bf16 %v11902_v59 }
 0x174   : > { %v1589_v20 = vsel %vm1588_vm3, %v1556_v58, %v9169_v57  ;;  %v1590_v28 = vsel %vm1588_vm3, %v1557_v62, %v9170_v8  ;;  %v1496_v3 = vsel %vm16738_vm13, %v1463_v42, %v9009_v52  ;;  %v1525_v59 = vsel %vm1522_vm14, %v1492_v9, %v9079_v41  ;;  %v17076_v58 = vld [vmem:[#allocation15_spill] sm:$0xff] }
 0x175   : > { %v9178_v19 = vpop.permute.xlu1 %9177  ;;  %v1526_v57 = vsel %vm1522_vm14, %v1493_v27, %v9080_v50  ;;  %v9090_v8 = vunpack.i.h.bf16 %v17076_v58  ;;  %v9165_v50 = vunpack.i.h.bf16 %v11946_v12  ;;  %v9164_v41 = vunpack.i.l.bf16 %v11946_v12 }
 0x176   : > { %v9180_v1 = vunpack.i.h.bf16 %v9178_v19  ;;  %v9179_v53 = vunpack.i.l.bf16 %v9178_v19  ;;  %v17075_v19 = vld [vmem:[#allocation129_spill] sm:$0xff] }
 0x177   : > { %v9173_v37 = vpop.permute.xlu0 %9172  ;;  %v9005_v45 = vunpack.i.h.bf16 %v17075_v19  ;;  %v9004_v10 = vunpack.i.l.bf16 %v17075_v19  ;;  %v1497_v19 = vsel %vm16738_vm13, %v11900_v43, %v9010_v24 }
 0x178   : > { %v9175_v63 = vunpack.i.h.bf16 %v9173_v37  ;;  %v9174_v17 = vunpack.i.l.bf16 %v9173_v37  ;;  %v1622_v29 = vsel %vm1621_vm6, %v1589_v20, %v9179_v53  ;;  %v1623_v47 = vsel %vm1621_vm6, %v1590_v28, %v9180_v1  ;;  %v17077_v20 = vld [vmem:[#allocation14_spill] sm:$0xff] }
 0x179   : > { %v9188_v46 = vpop.permute.xlu1 %9187  ;;  %v1654_v21 = vpack.c.bf16 %v1623_v47, %v1622_v29  ;;  %v9089_v37 = vunpack.i.l.bf16 %v17076_v58  ;;  %v1558_v53 = vsel %vm1555_vm15, %v1525_v59, %v9159_v26  ;;  %v1559_v1 = vsel %vm1555_vm15, %v1526_v57, %v9160_v51 }
 0x17a   : > { %v9085_v28 = vunpack.i.h.bf16 %v17077_v20  ;;  %v9084_v29 = vunpack.i.l.bf16 %v17077_v20  ;;  %v1591_v9 = vsel %vm1588_vm3, %v1558_v53, %v9174_v17  ;;  %v1592_v27 = vsel %vm1588_vm3, %v1559_v1, %v9175_v63 }
 0x17b   : > { %v9183_v62 = vpop.permute.xlu0 %9182  ;;  %8611 = vmatprep.mubr.msk.bf16.mxu0 %vm16739_vm5, %v1654_v21  ;;  %v9190_v21 = vunpack.i.h.bf16 %v9188_v46  ;;  %v9189_v59 = vunpack.i.l.bf16 %v9188_v46  ;;  %v1494_v17 = vsel %vm16738_vm13, %v11906_v55, %v9004_v10  ;;  %v1495_v63 = vsel %vm16738_vm13, %v11910_v30, %v9005_v45 }
 0x17c   : > { %v9185_v52 = vunpack.i.h.bf16 %v9183_v62  ;;  %v9184_v42 = vunpack.i.l.bf16 %v9183_v62  ;;  %v1527_v53 = vsel %vm1522_vm14, %v1494_v17, %v9084_v29  ;;  %v1528_v1 = vsel %vm1522_vm14, %v1495_v63, %v9085_v28  ;;  %v17080_v63 = vld [vmem:[#allocation130_spill] sm:$0xff] }
 0x17d   : > { %v9198_v47 = vpop.permute.xlu1 %9197  ;;  %v1529_v43 = vsel %vm1522_vm14, %v1496_v3, %v9089_v37  ;;  %v1530_v24 = vsel %vm1522_vm14, %v1497_v19, %v9090_v8  ;;  %v1560_v46 = vsel %vm1555_vm15, %v1527_v53, %v9164_v41  ;;  %v1561_v55 = vsel %vm1555_vm15, %v1528_v1, %v9165_v50 }
 0x17e   : > { %v1624_v26 = vsel %vm1621_vm6, %v1591_v9, %v9184_v42  ;;  %v1625_v51 = vsel %vm1621_vm6, %v1592_v27, %v9185_v52  ;;  %v9200_v62 = vunpack.i.h.bf16 %v9198_v47  ;;  %v9199_v12 = vunpack.i.l.bf16 %v9198_v47 }
 0x17f   : > { %v9193_v57 = vpop.permute.xlu0 %9192  ;;  %v1655_v58 = vpack.c.bf16 %v1625_v51, %v1624_v26  ;;  %v1562_v30 = vsel %vm1555_vm15, %v1529_v43, %v9189_v59  ;;  %v1563_v45 = vsel %vm1555_vm15, %v1530_v24, %v9190_v21  ;;  %v17078_v51 = vunpack.i.l.bf16 %v17071_v40  ;;  %v17082_v43 = vld [vmem:[#allocation131_spill] sm:$0xff] }
 0x180   : > { %v9195_v52 = vunpack.i.h.bf16 %v9193_v57  ;;  %v9194_v42 = vunpack.i.l.bf16 %v9193_v57  ;;  %v1595_v9 = vsel %vm1588_vm3, %v1562_v30, %v9199_v12  ;;  %v1596_v27 = vsel %vm1588_vm3, %v1563_v45, %v9200_v62 }
 0x181   : > { %8612 = vmatmul.mubr.msk.bf16.vlgmr.msra.gmra.mxu0 %vm16739_vm5, %v1655_v58  ;;  %v9208_v10 = vpop.permute.xlu1 %9207  ;;  %v12009_v47 = vsel %vm1456_vm12, %v11800_v33, %v17078_v51  ;;  %v17079_v58 = vunpack.i.h.bf16 %v17071_v40  ;;  %v9020_v62 = vunpack.i.h.bf16 %v17080_v63  ;;  %v9019_v12 = vunpack.i.l.bf16 %v17080_v63  ;;  %v17081_v33 = vld [vmem:[#allocation116_spill] sm:$0xff] }
 0x182   : > { %v9210_v20 = vunpack.i.h.bf16 %v9208_v10  ;;  %v9209_v29 = vunpack.i.l.bf16 %v9208_v10  ;;  %v1593_v8 = vsel %vm1588_vm3, %v1560_v46, %v9194_v42  ;;  %v1594_v37 = vsel %vm1588_vm3, %v1561_v55, %v9195_v52  ;;  %v17083_v55 = vld [vmem:[#allocation113_spill] sm:$0xff] }
 0x183   : > { %v9203_v28 = vpop.permute.xlu0 %9202  ;;  %v12017_v17 = vsel %vm1456_vm12, %v11804_v22, %v17079_v58  ;;  %v8960_v52 = vunpack.i.h.bf16 %v17081_v33  ;;  %v8959_v42 = vunpack.i.l.bf16 %v17081_v33  ;;  %v9015_v24 = vunpack.i.h.bf16 %v17082_v43  ;;  %v17084_v22 = vld [vmem:[#allocation20_spill] sm:$0xff] }
 0x184   : > { %v9205_v26 = vunpack.i.h.bf16 %v9203_v28  ;;  %v9204_v3 = vunpack.i.l.bf16 %v9203_v28  ;;  %v1628_v50 = vsel %vm1621_vm6, %v1595_v9, %v9209_v29  ;;  %v1629_v41 = vsel %vm1621_vm6, %v1596_v27, %v9210_v20  ;;  %v17085_v20 = vld [vmem:[#allocation19_spill] sm:$0xff] }
 0x185   : > { %v9218_v59 = vpop.permute.xlu1 %9217  ;;  %v1657_v57 = vpack.c.bf16 %v1629_v41, %v1628_v50  ;;  %v9014_v46 = vunpack.i.l.bf16 %v17082_v43  ;;  %v8955_v40 = vunpack.i.h.bf16 %v17083_v55  ;;  %v8954_v10 = vunpack.i.l.bf16 %v17083_v55 }
 0x186   : > { %v1626_v19 = vsel %vm1621_vm6, %v1593_v8, %v9204_v3  ;;  %v1627_v21 = vsel %vm1621_vm6, %v1594_v37, %v9205_v26  ;;  %v9100_v30 = vunpack.i.h.bf16 %v17084_v22  ;;  %v9099_v45 = vunpack.i.l.bf16 %v17084_v22 }
 0x187   : > { %v9213_v53 = vpop.permute.xlu0 %9212  ;;  %v1656_v1 = vpack.c.bf16 %v1627_v21, %v1626_v19  ;;  %v9095_v29 = vunpack.i.h.bf16 %v17085_v20  ;;  %v9094_v28 = vunpack.i.l.bf16 %v17085_v20  ;;  %v9220_v9 = vunpack.i.h.bf16 %v9218_v59 }
 0x188   : > { %v9219_v27 = vunpack.i.l.bf16 %v9218_v59  ;;  %v1500_v3 = vsel %vm16738_vm13, %v11916_v34, %v9019_v12  ;;  %v1501_v8 = vsel %vm16738_vm13, %v11920_v2, %v9020_v62  ;;  %v9215_v37 = vunpack.i.h.bf16 %v9213_v53 }
 0x189   : > { %8615 = vmatprep.mubr.msk.bf16.mxu0 %vm16739_vm5, %v1656_v1  ;;  %v9228_v26 = vpop.permute.xlu1 %9227  ;;  %v9214_v50 = vunpack.i.l.bf16 %v9213_v53  ;;  %v1498_v51 = vsel %vm16738_vm13, %v11926_v61, %v9014_v46  ;;  %v1499_v19 = vsel %vm16738_vm13, %v11930_v18, %v9015_v24  ;;  %v1534_v58 = vsel %vm1522_vm14, %v1501_v8, %v9100_v30 }
 0x18a   : > { %8616 = vmatmul.mubr.msk.bf16.gmra.mxu0 %vm16739_vm5, %v1657_v57  ;;  %v9230_v21 = vunpack.i.h.bf16 %v9228_v26  ;;  %v9229_v59 = vunpack.i.l.bf16 %v9228_v26  ;;  %v1533_v57 = vsel %vm1522_vm14, %v1500_v3, %v9099_v45  ;;  %v1531_v12 = vsel %vm1522_vm14, %v1498_v51, %v9094_v28 }
 0x18b   : > { %v9223_v41 = vpop.permute.xlu0 %9222  ;;  %v1532_v2 = vsel %vm1522_vm14, %v1499_v19, %v9095_v29  ;;  %v1566_v62 = vsel %vm1555_vm15, %v1533_v57, %v9219_v27  ;;  %v1567_v53 = vsel %vm1555_vm15, %v1534_v58, %v9220_v9  ;;  %v1564_v1 = vsel %vm1555_vm15, %v1531_v12, %v9214_v50  ;;  %v17086_v50 = vld [vmem:[#allocation132_spill] sm:$0xff] }
 0x18c   : > { %v9225_v63 = vunpack.i.h.bf16 %v9223_v41  ;;  %v9224_v34 = vunpack.i.l.bf16 %v9223_v41  ;;  %v1565_v18 = vsel %vm1555_vm15, %v1532_v2, %v9215_v37  ;;  %v1599_v46 = vsel %vm1588_vm3, %v1566_v62, %v9229_v59  ;;  %v17087_v59 = vld [vmem:[#allocation133_spill] sm:$0xff] }
 0x18d   : > { %v9238_v61 = vpop.permute.xlu1 %9237  ;;  %v1600_v55 = vsel %vm1588_vm3, %v1567_v53, %v9230_v21  ;;  %v12057_v9 = vsel %vm1456_vm12, %v11814_v14, %v8959_v42  ;;  %v12063_v37 = vsel %vm1456_vm12, %v11810_v15, %v8960_v52  ;;  %v9030_v41 = vunpack.i.h.bf16 %v17086_v50  ;;  %v17088_v15 = vld [vmem:[#allocation84_spill] sm:$0xff] }
 0x18e   : > { %v9240_v33 = vunpack.i.h.bf16 %v9238_v61  ;;  %v9239_v43 = vunpack.i.l.bf16 %v9238_v61  ;;  %v1597_v45 = vsel %vm1588_vm3, %v1564_v1, %v9224_v34  ;;  %v1598_v20 = vsel %vm1588_vm3, %v1565_v18, %v9225_v63  ;;  %v17089_v34 = vld [vmem:[#allocation23_spill] sm:$0xff] }
 0x18f   : > { %v9233_v24 = vpop.permute.xlu0 %9232  ;;  %v9029_v51 = vunpack.i.l.bf16 %v17086_v50  ;;  %v12069_v14 = vsel %vm1456_vm12, %v11818_v54, %v8954_v10  ;;  %v12073_v42 = vsel %vm1456_vm12, %v11822_v48, %v8955_v40  ;;  %v9025_v57 = vunpack.i.h.bf16 %v17087_v59  ;;  %v17090_v54 = vld [vmem:[#allocation22_spill] sm:$0xff] }
 0x190   : > { %v9235_v22 = vunpack.i.h.bf16 %v9233_v24  ;;  %v9234_v30 = vunpack.i.l.bf16 %v9233_v24  ;;  %v1632_v29 = vsel %vm1621_vm6, %v1599_v46, %v9239_v43  ;;  %v1633_v28 = vsel %vm1621_vm6, %v1600_v55, %v9240_v33 }
 0x191   : > { %v9248_v3 = vpop.permute.xlu1 %9247  ;;  %v1659_v8 = vpack.c.bf16 %v1633_v28, %v1632_v29  ;;  %v9024_v58 = vunpack.i.l.bf16 %v17087_v59  ;;  %v8970_v52 = vunpack.i.h.bf16 %v17088_v15  ;;  %v8969_v63 = vunpack.i.l.bf16 %v17088_v15 }
 0x192   : > { %v1630_v27 = vsel %vm1621_vm6, %v1597_v45, %v9234_v30  ;;  %v1631_v26 = vsel %vm1621_vm6, %v1598_v20, %v9235_v22  ;;  %v9110_v12 = vunpack.i.h.bf16 %v17089_v34  ;;  %v9109_v2 = vunpack.i.l.bf16 %v17089_v34  ;;  %v17091_v34 = vld [vmem:[#allocation115_spill] sm:$0xff] }
 0x193   : > { %v9243_v19 = vpop.permute.xlu0 %9242  ;;  %v1658_v21 = vpack.c.bf16 %v1631_v26, %v1630_v27  ;;  %v9105_v10 = vunpack.i.h.bf16 %v17090_v54  ;;  %v9104_v62 = vunpack.i.l.bf16 %v17090_v54  ;;  %v9250_v48 = vunpack.i.h.bf16 %v9248_v3 }
 0x194   : > { %v9249_v40 = vunpack.i.l.bf16 %v9248_v3  ;;  %v1504_v61 = vsel %vm16738_vm13, %v11940_v32, %v9029_v51  ;;  %v1505_v1 = vsel %vm16738_vm13, %v11944_v0, %v9030_v41  ;;  %v9245_v18 = vunpack.i.h.bf16 %v9243_v19 }
 0x195   : > { %8619 = vmatprep.mubr.msk.bf16.mxu0 %vm16739_vm5, %v1658_v21  ;;  %v9258_v53 = vpop.permute.xlu1 %9257  ;;  %v9244_v33 = vunpack.i.l.bf16 %v9243_v19  ;;  %v1502_v24 = vsel %vm16738_vm13, %v12009_v47, %v9024_v58  ;;  %v1503_v46 = vsel %vm16738_vm13, %v12017_v17, %v9025_v57  ;;  %v1537_v30 = vsel %vm1522_vm14, %v1504_v61, %v9109_v2 }
 0x196   : > { %8620 = vmatmul.mubr.msk.bf16.gmra.mxu0 %vm16739_vm5, %v1659_v8  ;;  %v9260_v55 = vunpack.i.h.bf16 %v9258_v53  ;;  %v9259_v22 = vunpack.i.l.bf16 %v9258_v53  ;;  %v1538_v45 = vsel %vm1522_vm14, %v1505_v1, %v9110_v12  ;;  %v1535_v29 = vsel %vm1522_vm14, %v1502_v24, %v9104_v62  ;;  %v17093_v24 = vld [vmem:[#allocation135_spill] sm:$0xff] }
 0x197   : > { %v9253_v43 = vpop.permute.xlu0 %9252  ;;  %v1536_v0 = vsel %vm1522_vm14, %v1503_v46, %v9105_v10  ;;  %v1570_v28 = vsel %vm1555_vm15, %v1537_v30, %v9249_v40  ;;  %v1571_v27 = vsel %vm1555_vm15, %v1538_v45, %v9250_v48  ;;  %v1568_v26 = vsel %vm1555_vm15, %v1535_v29, %v9244_v33  ;;  %v17092_v40 = vld [vmem:[#allocation134_spill] sm:$0xff] }
 0x198   : > { %v9255_v20 = vunpack.i.h.bf16 %v9253_v43  ;;  %v9254_v32 = vunpack.i.l.bf16 %v9253_v43  ;;  %v1569_v17 = vsel %vm1555_vm15, %v1536_v0, %v9245_v18  ;;  %v1603_v41 = vsel %vm1588_vm3, %v1570_v28, %v9259_v22  ;;  %v17094_v22 = vld [vmem:[#allocation94_spill] sm:$0xff] }
 0x199   : > { %v9268_v47 = vpop.permute.xlu1 %9267  ;;  %v1604_v51 = vsel %vm1588_vm3, %v1571_v27, %v9260_v55  ;;  %v8965_v12 = vunpack.i.h.bf16 %v17091_v34  ;;  %v8964_v48 = vunpack.i.l.bf16 %v17091_v34  ;;  %v9040_v53 = vunpack.i.h.bf16 %v17092_v40 }
 0x19a   : > { %v9270_v3 = vunpack.i.h.bf16 %v9268_v47  ;;  %v9269_v8 = vunpack.i.l.bf16 %v9268_v47  ;;  %v1601_v59 = vsel %vm1588_vm3, %v1568_v26, %v9254_v32  ;;  %v1602_v57 = vsel %vm1588_vm3, %v1569_v17, %v9255_v20 }
 0x19b   : > { %v9263_v50 = vpop.permute.xlu0 %9262  ;;  %v9039_v61 = vunpack.i.l.bf16 %v17092_v40  ;;  %v12115_v33 = vsel %vm1456_vm12, %v11832_v11, %v8969_v63  ;;  %v12119_v43 = vsel %vm1456_vm12, %v11828_v6, %v8970_v52  ;;  %v9035_v46 = vunpack.i.h.bf16 %v17093_v24 }
 0x19c   : > { %v9265_v19 = vunpack.i.h.bf16 %v9263_v50  ;;  %v9264_v21 = vunpack.i.l.bf16 %v9263_v50  ;;  %v1636_v58 = vsel %vm1621_vm6, %v1603_v41, %v9269_v8  ;;  %v1637_v15 = vsel %vm1621_vm6, %v1604_v51, %v9270_v3 }
 0x19d   : > { %v9278_v10 = vpop.permute.xlu1 %9277  ;;  %v1661_v62 = vpack.c.bf16 %v1637_v15, %v1636_v58  ;;  %v9034_v55 = vunpack.i.l.bf16 %v17093_v24  ;;  %v8980_v30 = vunpack.i.h.bf16 %v17094_v22  ;;  %v8979_v45 = vunpack.i.l.bf16 %v17094_v22 }
 0x19e   : > { %v1634_v2 = vsel %vm1621_vm6, %v1601_v59, %v9264_v21  ;;  %v1635_v54 = vsel %vm1621_vm6, %v1602_v57, %v9265_v19  ;;  %v9120_v20 = vunpack.i.h.bf16 %v11736_v36  ;;  %v9119_v32 = vunpack.i.l.bf16 %v11736_v36 }
 0x19f   : > { %v9273_v1 = vpop.permute.xlu0 %9272  ;;  %v1660_v18 = vpack.c.bf16 %v1635_v54, %v1634_v2  ;;  %v9115_v11 = vunpack.i.h.bf16 %v11754_v4  ;;  %v9114_v63 = vunpack.i.l.bf16 %v11754_v4  ;;  %v9280_v6 = vunpack.i.h.bf16 %v9278_v10 }
 0x1a0   : > { %v9279_v52 = vunpack.i.l.bf16 %v9278_v10  ;;  %v1508_v0 = vsel %vm16738_vm13, %v12057_v9, %v9039_v61  ;;  %v1509_v28 = vsel %vm16738_vm13, %v12063_v37, %v9040_v53  ;;  %v9275_v27 = vunpack.i.h.bf16 %v9273_v1 }
 0x1a1   : > { %8623 = vmatprep.mubr.msk.bf16.mxu0 %vm16739_vm5, %v1660_v18  ;;  %v9288_v29 = vpop.permute.xlu1 %9287  ;;  %v9274_v47 = vunpack.i.l.bf16 %v9273_v1  ;;  %v1506_v26 = vsel %vm16738_vm13, %v12069_v14, %v9034_v55  ;;  %v1507_v4 = vsel %vm16738_vm13, %v12073_v42, %v9035_v46  ;;  %v1541_v8 = vsel %vm1522_vm14, %v1508_v0, %v9119_v32 }
 0x1a2   : > { %8624 = vmatmul.mubr.msk.bf16.gmra.mxu0 %vm16739_vm5, %v1661_v62  ;;  %v9290_v17 = vunpack.i.h.bf16 %v9288_v29  ;;  %v9289_v3 = vunpack.i.l.bf16 %v9288_v29  ;;  %v1542_v50 = vsel %vm1522_vm14, %v1509_v28, %v9120_v20  ;;  %v1539_v51 = vsel %vm1522_vm14, %v1506_v26, %v9114_v63  ;;  %v17095_v20 = vld [vmem:[#allocation136_spill] sm:$0xff] }
 0x1a3   : > { %v9283_v36 = vpop.permute.xlu0 %9282  ;;  %v1540_v37 = vsel %vm1522_vm14, %v1507_v4, %v9115_v11  ;;  %v1574_v19 = vsel %vm1555_vm15, %v1541_v8, %v9279_v52  ;;  %v1575_v21 = vsel %vm1555_vm15, %v1542_v50, %v9280_v6  ;;  %v1572_v59 = vsel %vm1555_vm15, %v1539_v51, %v9274_v47  ;;  %v17096_v52 = vld [vmem:[#allocation75_spill] sm:$0xff] }
 0x1a4   : > { %v9285_v41 = vunpack.i.h.bf16 %v9283_v36  ;;  %v9284_v9 = vunpack.i.l.bf16 %v9283_v36  ;;  %v1573_v42 = vsel %vm1555_vm15, %v1540_v37, %v9275_v27  ;;  %v1607_v34 = vsel %vm1588_vm3, %v1574_v19, %v9289_v3 }
 0x1a5   : > { %v9298_v14 = vpop.permute.xlu1 %9297  ;;  %v1608_v2 = vsel %vm1588_vm3, %v1575_v21, %v9290_v17  ;;  %v1477_v1 = vsel %vm1456_vm12, %v11836_v31, %v8964_v48  ;;  %v1478_v22 = vsel %vm1456_vm12, %v11840_v7, %v8965_v12  ;;  %v9050_v32 = vunpack.i.h.bf16 %v17095_v20  ;;  %v17097_v31 = vld [vmem:[#allocation137_spill] sm:$0xff] }
 0x1a6   : > { %v9300_v57 = vunpack.i.h.bf16 %v9298_v14  ;;  %v9299_v58 = vunpack.i.l.bf16 %v9298_v14  ;;  %v1605_v62 = vsel %vm1588_vm3, %v1572_v59, %v9284_v9  ;;  %v1606_v40 = vsel %vm1588_vm3, %v1573_v42, %v9285_v41 }
 0x1a7   : > { %v9293_v15 = vpop.permute.xlu0 %9292  ;;  %v9049_v11 = vunpack.i.l.bf16 %v17095_v20  ;;  %v8975_v29 = vunpack.i.h.bf16 %v17096_v52  ;;  %v8974_v0 = vunpack.i.l.bf16 %v17096_v52  ;;  %v9045_v48 = vunpack.i.h.bf16 %v17097_v31 }
 0x1a8   : > { %v9295_v54 = vunpack.i.h.bf16 %v9293_v15  ;;  %v9294_v10 = vunpack.i.l.bf16 %v9293_v15  ;;  %v1640_v53 = vsel %vm1621_vm6, %v1607_v34, %v9299_v58  ;;  %v1641_v61 = vsel %vm1621_vm6, %v1608_v2, %v9300_v57 }
 0x1a9   : > { %v9308_v46 = vpop.permute.xlu1 %9307  ;;  %v1663_v55 = vpack.c.bf16 %v1641_v61, %v1640_v53  ;;  %v9044_v28 = vunpack.i.l.bf16 %v17097_v31  ;;  %v12167_v27 = vsel %vm1456_vm12, %v11850_v44, %v8979_v45  ;;  %v12171_v7 = vsel %vm1456_vm12, %v11846_v16, %v8980_v30  ;;  %v17099_v31 = vld [vmem:[#allocation89_spill] sm:$0xff] }
 0x1aa   : > { %v1638_v18 = vsel %vm1621_vm6, %v1605_v62, %v9294_v10  ;;  %v1639_v24 = vsel %vm1621_vm6, %v1606_v40, %v9295_v54  ;;  %v9130_v12 = vunpack.i.h.bf16 %v11780_v35  ;;  %v9129_v47 = vunpack.i.l.bf16 %v11780_v35 }
 0x1ab   : > { %v9303_v63 = vpop.permute.xlu0 %9302  ;;  %v1662_v6 = vpack.c.bf16 %v1639_v24, %v1638_v18  ;;  %v9125_v36 = vunpack.i.h.bf16 %v11786_v49  ;;  %v9124_v26 = vunpack.i.l.bf16 %v11786_v49  ;;  %v9310_v4 = vunpack.i.h.bf16 %v9308_v46 }
 0x1ac   : > { %v9309_v17 = vunpack.i.l.bf16 %v9308_v46  ;;  %v1512_v45 = vsel %vm16738_vm13, %v12115_v33, %v9049_v11  ;;  %v1513_v16 = vsel %vm16738_vm13, %v12119_v43, %v9050_v32  ;;  %v9305_v30 = vunpack.i.h.bf16 %v9303_v63  ;;  %v17098_v32 = vld [vmem:[#allocation138_spill] sm:$0xff] }
 0x1ad   : > { %8627 = vmatprep.mubr.msk.bf16.mxu0 %vm16739_vm5, %v1662_v6  ;;  %v9318_v44 = vpop.permute.xlu1 %9317  ;;  %v9304_v3 = vunpack.i.l.bf16 %v9303_v63  ;;  %v1510_v8 = vsel %vm16738_vm13, %v1477_v1, %v9044_v28  ;;  %v1511_v50 = vsel %vm16738_vm13, %v1478_v22, %v9045_v48  ;;  %v1545_v9 = vsel %vm1522_vm14, %v1512_v45, %v9129_v47  ;;  %v17101_v47 = vld [vmem:[#allocation117_spill] sm:$0xff] }
 0x1ae   : > { %8628 = vmatmul.mubr.msk.bf16.gmra.mxu0 %vm16739_vm5, %v1663_v55  ;;  %v9320_v41 = vunpack.i.h.bf16 %v9318_v44  ;;  %v9319_v49 = vunpack.i.l.bf16 %v9318_v44  ;;  %v1546_v51 = vsel %vm1522_vm14, %v1513_v16, %v9130_v12  ;;  %v1543_v33 = vsel %vm1522_vm14, %v1510_v8, %v9124_v26 }
 0x1af   : > { %v9313_v35 = vpop.permute.xlu0 %9312  ;;  %v1544_v21 = vsel %vm1522_vm14, %v1511_v50, %v9125_v36  ;;  %v1578_v43 = vsel %vm1555_vm15, %v1545_v9, %v9309_v17  ;;  %v1579_v14 = vsel %vm1555_vm15, %v1546_v51, %v9310_v4  ;;  %v1576_v42 = vsel %vm1555_vm15, %v1543_v33, %v9304_v3 }
 0x1b0   : > { %v9315_v37 = vunpack.i.h.bf16 %v9313_v35  ;;  %v9314_v19 = vunpack.i.l.bf16 %v9313_v35  ;;  %v1577_v57 = vsel %vm1555_vm15, %v1544_v21, %v9305_v30  ;;  %v1611_v2 = vsel %vm1588_vm3, %v1578_v43, %v9319_v49 }
 0x1b1   : > { %v9328_v59 = vpop.permute.xlu1 %9327  ;;  %v1612_v54 = vsel %vm1588_vm3, %v1579_v14, %v9320_v41  ;;  %v1481_v18 = vsel %vm1456_vm12, %v11856_v23, %v8974_v0  ;;  %v1482_v20 = vsel %vm1456_vm12, %v11860_v5, %v8975_v29  ;;  %v9060_v11 = vunpack.i.h.bf16 %v17098_v32  ;;  %v17100_v23 = vld [vmem:[#allocation139_spill] sm:$0xff] }
 0x1b2   : > { %v9330_v58 = vunpack.i.h.bf16 %v9328_v59  ;;  %v9329_v15 = vunpack.i.l.bf16 %v9328_v59  ;;  %v1609_v40 = vsel %vm1588_vm3, %v1576_v42, %v9314_v19  ;;  %v1610_v53 = vsel %vm1588_vm3, %v1577_v57, %v9315_v37 }
 0x1b3   : > { %v9323_v34 = vpop.permute.xlu0 %9322  ;;  %v9059_v63 = vunpack.i.l.bf16 %v17098_v32  ;;  %v8990_v48 = vunpack.i.h.bf16 %v17099_v31  ;;  %v8989_v28 = vunpack.i.l.bf16 %v17099_v31  ;;  %v9055_v0 = vunpack.i.h.bf16 %v17100_v23  ;;  %v17104_v32 = vld [vmem:[#allocation7_spill] sm:$0xff]  ;;  %v17105_v31 = vld [vmem:[#allocation42_spill] sm:$0xff] }
 0x1b4   : > { %v9325_v10 = vunpack.i.h.bf16 %v9323_v34  ;;  %v9324_v62 = vunpack.i.l.bf16 %v9323_v34  ;;  %v1644_v61 = vsel %vm1621_vm6, %v1611_v2, %v9329_v15  ;;  %v1645_v1 = vsel %vm1621_vm6, %v1612_v54, %v9330_v58 }
 0x1b5   : > { %v9338_v55 = vpop.permute.xlu1 %9337  ;;  %v1665_v22 = vpack.c.bf16 %v1645_v1, %v1644_v61  ;;  %v9054_v12 = vunpack.i.l.bf16 %v17100_v23  ;;  %v8985_v36 = vunpack.i.h.bf16 %v17101_v47  ;;  %v8984_v26 = vunpack.i.l.bf16 %v17101_v47 }
 0x1b6   : > { %v1642_v24 = vsel %vm1621_vm6, %v1609_v40, %v9324_v62  ;;  %v1643_v46 = vsel %vm1621_vm6, %v1610_v53, %v9325_v10  ;;  %v9140_v5 = vunpack.i.h.bf16 %v11824_v39  ;;  %v9139_v29 = vunpack.i.l.bf16 %v11824_v39 }
 0x1b7   : > { %v9333_v6 = vpop.permute.xlu0 %9332  ;;  %v1664_v52 = vpack.c.bf16 %v1643_v46, %v1642_v24  ;;  %v9135_v4 = vunpack.i.h.bf16 %v11842_v60  ;;  %v9134_v17 = vunpack.i.l.bf16 %v11842_v60  ;;  %v9340_v44 = vunpack.i.h.bf16 %v9338_v55 }
 0x1b8   : > { %v9339_v45 = vunpack.i.l.bf16 %v9338_v55  ;;  %v1516_v30 = vsel %vm16738_vm13, %v12167_v27, %v9059_v63  ;;  %v1517_v3 = vsel %vm16738_vm13, %v12171_v7, %v9060_v11  ;;  %v9335_v35 = vunpack.i.h.bf16 %v9333_v6 }
 0x1b9   : > { %8631 = vmatprep.mubr.msk.bf16.mxu0 %vm16739_vm5, %v1664_v52  ;;  %v9348_v16 = vpop.permute.xlu1 %9347  ;;  %v9334_v8 = vunpack.i.l.bf16 %v9333_v6  ;;  %v1514_v50 = vsel %vm16738_vm13, %v1481_v18, %v9054_v12  ;;  %v1515_v41 = vsel %vm16738_vm13, %v1482_v20, %v9055_v0  ;;  %v1549_v9 = vsel %vm1522_vm14, %v1516_v30, %v9139_v29  ;;  %v17106_v0 = vld [vmem:[#allocation6_spill] sm:$0xff] }
 0x1ba   : > { %8632 = vmatmul.mubr.msk.bf16.gmra.mxu0 %vm16739_vm5, %v1665_v22  ;;  %v9350_v49 = vunpack.i.h.bf16 %v9348_v16  ;;  %v9349_v60 = vunpack.i.l.bf16 %v9348_v16  ;;  %v1550_v51 = vsel %vm1522_vm14, %v1517_v3, %v9140_v5  ;;  %v1547_v27 = vsel %vm1522_vm14, %v1514_v50, %v9134_v17  ;;  %v17107_v5 = vld [vmem:[#allocation32_spill] sm:$0xff]  ;;  %v17108_v17 = vld [vmem:[#allocation29_spill] sm:$0xff] }
 0x1bb   : > { %v9343_v39 = vpop.permute.xlu0 %9342  ;;  %v1548_v33 = vsel %vm1522_vm14, %v1515_v41, %v9135_v4  ;;  %v1582_v7 = vsel %vm1555_vm15, %v1549_v9, %v9339_v45  ;;  %v1583_v21 = vsel %vm1555_vm15, %v1550_v51, %v9340_v44  ;;  %v1580_v14 = vsel %vm1555_vm15, %v1547_v27, %v9334_v8 }
 0x1bc   : > { %v9345_v37 = vunpack.i.h.bf16 %v9343_v39  ;;  %v9344_v19 = vunpack.i.l.bf16 %v9343_v39  ;;  %v1581_v59 = vsel %vm1555_vm15, %v1548_v33, %v9335_v35  ;;  %v1615_v15 = vsel %vm1588_vm3, %v1582_v7, %v9349_v60 }
 0x1bd   : > { %v9358_v43 = vpop.permute.xlu1 %9357  ;;  %v1616_v34 = vsel %vm1588_vm3, %v1583_v21, %v9350_v49  ;;  %v17102_v61 = vunpack.i.l.bf16 %v17062_v38  ;;  %v17103_v22 = vunpack.i.h.bf16 %v17062_v38  ;;  %v9070_v11 = vunpack.i.h.bf16 %v17104_v32 }
 0x1be   : > { %v9360_v42 = vunpack.i.h.bf16 %v9358_v43  ;;  %v9359_v57 = vunpack.i.l.bf16 %v9358_v43  ;;  %v1613_v10 = vsel %vm1588_vm3, %v1580_v14, %v9344_v19  ;;  %v1614_v62 = vsel %vm1588_vm3, %v1581_v59, %v9345_v37 }
 0x1bf   : > { %v9353_v58 = vpop.permute.xlu0 %9352  ;;  %v1452_v1 = vsel %vm1423_vm11, %v11716_v13, %v17102_v61  ;;  %v1453_v20 = vsel %vm1423_vm11, %v11712_v25, %v17103_v22  ;;  %v9069_v63 = vunpack.i.l.bf16 %v17104_v32  ;;  %v1487_v13 = vsel %vm1456_vm12, %v11882_v56, %v8989_v28 }
 0x1c0   : > { %v9355_v2 = vunpack.i.h.bf16 %v9353_v58  ;;  %v9354_v54 = vunpack.i.l.bf16 %v9353_v58  ;;  %v1648_v40 = vsel %vm1621_vm6, %v1615_v15, %v9359_v57  ;;  %v1649_v53 = vsel %vm1621_vm6, %v1616_v34, %v9360_v42 }
 0x1c1   : > { %v9368_v46 = vpop.permute.xlu1 %9367  ;;  %v1667_v55 = vpack.c.bf16 %v1649_v53, %v1648_v40  ;;  %v1488_v23 = vsel %vm1456_vm12, %v17105_v31, %v8990_v48  ;;  %v9065_v12 = vunpack.i.h.bf16 %v17106_v0  ;;  %v9064_v47 = vunpack.i.l.bf16 %v17106_v0 }
 0x1c2   : > { %v1646_v18 = vsel %vm1621_vm6, %v1613_v10, %v9354_v54  ;;  %v1647_v24 = vsel %vm1621_vm6, %v1614_v62, %v9355_v2  ;;  %v1485_v38 = vsel %vm1456_vm12, %v1452_v1, %v8984_v26  ;;  %v1486_v25 = vsel %vm1456_vm12, %v1453_v20, %v8985_v36  ;;  %v10044_v1 = vld [vmem:[%s10249_s17 + $0x30] sm:$0xff]  ;;  %v10046_v20 = vld [vmem:[%s10249_s17 + $0x48] sm:$0xff] }
 0x1c3   : > { %v9363_v6 = vpop.permute.xlu0 %9362  ;;  %v1666_v52 = vpack.c.bf16 %v1647_v24, %v1646_v18  ;;  %v9150_v29 = vunpack.i.h.bf16 %v17107_v5  ;;  %v9149_v4 = vunpack.i.l.bf16 %v17107_v5  ;;  %v9145_v44 = vunpack.i.h.bf16 %v17108_v17  ;;  %v17109_v24 = vld [vmem:[#allocation8_spill] sm:$0xff] }
 0x1c4   : > { %v9144_v56 = vunpack.i.l.bf16 %v17108_v17  ;;  %v9370_v28 = vunpack.i.h.bf16 %v9368_v46  ;;  %v9369_v48 = vunpack.i.l.bf16 %v9368_v46  ;;  %v1520_v16 = vsel %vm16738_vm13, %v1487_v13, %v9069_v63 }
 0x1c5   : > { %8635 = vmatprep.mubr.msk.bf16.mxu0 %vm16739_vm5, %v1666_v52  ;;  %v9378_v45 = vpop.permute.xlu1 %9377  ;;  %v1521_v26 = vsel %vm16738_vm13, %v1488_v23, %v9070_v11  ;;  %v9365_v36 = vunpack.i.h.bf16 %v9363_v6  ;;  %v9364_v30 = vunpack.i.l.bf16 %v9363_v6  ;;  %v1518_v35 = vsel %vm16738_vm13, %v1485_v38, %v9064_v47  ;;  %v10047_v52 = vld [vmem:[%s10249_s17 + $0x18] sm:$0xff] }
 0x1c6   : > { %8636 = vmatmul.mubr.msk.bf16.gmra.mxu0 %vm16739_vm5, %v1667_v55  ;;  %v1519_v8 = vsel %vm16738_vm13, %v1486_v25, %v9065_v12  ;;  %v9380_v39 = vunpack.i.h.bf16 %v9378_v45  ;;  %v9379_v50 = vunpack.i.l.bf16 %v9378_v45  ;;  %v1553_v41 = vsel %vm1522_vm14, %v1520_v16, %v9149_v4  ;;  %v12292_v55 = vld.sshfl [vmem:[%s10249_s17 + $0x38] sm:$0xff pattern:$0x76325410] }
 0x1c7   : > { %v9373_v3 = vpop.permute.xlu0 %9372  ;;  %v1554_v49 = vsel %vm1522_vm14, %v1521_v26, %v9150_v29  ;;  %v1551_v51 = vsel %vm1522_vm14, %v1518_v35, %v9144_v56  ;;  %v1552_v37 = vsel %vm1522_vm14, %v1519_v8, %v9145_v44  ;;  %v1586_v19 = vsel %vm1555_vm15, %v1553_v41, %v9369_v48  ;;  %17111 = vst [vmem:[#allocation41_spill] sm:$0xff] %v12292_v55  ;;  %v10048_v44 = vld [vmem:[%s10249_s17 + $0x20] sm:$0xff]  ;;  %v17118_v48 = vld [vmem:[#allocation24_spill] sm:$0xff] }
 0x1c8   : > { %v9375_v60 = vunpack.i.h.bf16 %v9373_v3  ;;  %v9374_v9 = vunpack.i.l.bf16 %v9373_v3  ;;  %v1587_v27 = vsel %vm1555_vm15, %v1554_v49, %v9370_v28  ;;  %v1584_v7 = vsel %vm1555_vm15, %v1551_v51, %v9364_v30 }
 0x1c9   : > { %v9388_v33 = vpop.permute.xlu1 %9387  ;;  %v1585_v21 = vsel %vm1555_vm15, %v1552_v37, %v9365_v36  ;;  %v1619_v42 = vsel %vm1588_vm3, %v1586_v19, %v9379_v50  ;;  %v1620_v57 = vsel %vm1588_vm3, %v1587_v27, %v9380_v39  ;;  %v4995_v18 = vcombine.high %v10044_v1, %v10044_v1  ;;  %v12335_v36 = vld [vmem:[%s10249_s17 + $0x50] sm:$0xff]  ;;  %v12345_v50 = vld.sshfl [vmem:[%s10249_s17 + $0x58] sm:$0x3 pattern:$0x76325410]  ;;  %v17124_v27 = vld [vmem:[#allocation43_spill] sm:$0xff] }
 0x1ca   : > { %v9390_v43 = vunpack.i.h.bf16 %v9388_v33  ;;  %v9389_v14 = vunpack.i.l.bf16 %v9388_v33  ;;  %v1617_v34 = vsel %vm1588_vm3, %v1584_v7, %v9374_v9  ;;  %v1618_v2 = vsel %vm1588_vm3, %v1585_v21, %v9375_v60  ;;  %17122 = vst [vmem:[#allocation74_spill] sm:$0xff] %v12345_v50  ;;  %v17147_v21 = vld [vmem:[#allocation35_spill] sm:$0xff]  ;;  %v17156_v60 = vld [vmem:[#allocation45_spill] sm:$0xff] }
 0x1cb   : > { %v9383_v59 = vpop.permute.xlu0 %9382  ;;  %v12289_v46 = vrot.slane %v10044_v1, %v17109_v24  ;;  %v12295_v22 = vrot.slane %v4995_v18, %v17109_v24  ;;  %v5036_v32 = vcombine.high %v10046_v20, %v10046_v20  ;;  %v12301_v63 = vrot.slane %v10046_v20, %v17109_v24  ;;  %v17130_v18 = vld [vmem:[#allocation27_spill] sm:$0xff] }
 0x1cc   : > { %v9385_v58 = vunpack.i.h.bf16 %v9383_v59  ;;  %v9384_v15 = vunpack.i.l.bf16 %v9383_v59  ;;  %v1652_v54 = vsel %vm1621_vm6, %v1619_v42, %v9389_v14  ;;  %v1653_v10 = vsel %vm1621_vm6, %v1620_v57, %v9390_v43 }
 0x1cd   : > { %v1669_v53 = vpack.c.bf16 %v1653_v10, %v1652_v54  ;;  %17110 = vst [vmem:[#allocation21_spill] sm:$0xff] %v12289_v46  ;;  %17112 = vst [vmem:[#allocation53_spill] sm:$0xff] %v12295_v22  ;;  %v5010_v11 = vcombine.high %v12289_v46, %v12289_v46  ;;  %v5027_v6 = vcombine.high %v12292_v55, %v12292_v55  ;;  %v16570_v31 = vrot.slane %v12295_v22, 7 }
 0x1ce   : > { %v1650_v62 = vsel %vm1621_vm6, %v1617_v34, %v9384_v15  ;;  %v1651_v40 = vsel %vm1621_vm6, %v1618_v2, %v9385_v58  ;;  %17113 = vst [vmem:[#allocation33_spill] sm:$0xff] %v12301_v63  ;;  %v4961_v13 = vrot.slane %v10047_v52, %v17109_v24  ;;  %v5011_v23 = vcombine.high %v12295_v22, %v12295_v22  ;;  %v12365_v58 = vld.sshfl [vmem:[%s10249_s17 + $0x28] sm:$0x3 pattern:$0x76325410] }
 0x1cf   : > { %v1668_v61 = vpack.c.bf16 %v1651_v40, %v1650_v62  ;;  %v12311_v0 = vrot.slane %v5036_v32, %v17109_v24  ;;  %v4954_v12 = vcombine.high %v10047_v52, %v10047_v52  ;;  %v12313_v47 = vrot.slane %v5010_v11, 7  ;;  %17126 = vst [vmem:[#allocation77_spill] sm:$0xff] %v12365_v58  ;;  %v17128_v62 = vld [vmem:[#allocation25_spill] sm:$0xff]  ;;  %v10052_v11 = vld [vmem:[%s10249_s17 + $0x60] sm:$0xff] }
 0x1d0   : > { %v5051_v38 = vcombine.high %v12301_v63, %v12301_v63  ;;  %v12319_v29 = vrot.slane %v5027_v6, 7  ;;  %v4969_v4 = vcombine.high %v4961_v13, %v4961_v13  ;;  %v12323_v17 = vrot.slane %v16570_v31, 2 }
 0x1d1   : > { %8639 = vmatprep.mubr.msk.bf16.mxu0 %vm16739_vm5, %v1668_v61  ;;  %17114 = vst [vmem:[#allocation102_spill] sm:$0xff] %v12311_v0  ;;  %17115 = vst [vmem:[#allocation52_spill] sm:$0xff] %v12313_v47  ;;  %v4971_v56 = vcombine.high %v10048_v44, %v10048_v44  ;;  %v12327_v28 = vrot.slane %v10048_v44, %v17109_v24  ;;  %v5721_v45 = vrot.slane %v17118_v48, 7  ;;  %v12330_v16 = vrot.slane %v5011_v23, 7  ;;  %v17134_v44 = vld [vmem:[#allocation26_spill] sm:$0xff]  ;;  %v17159_v61 = vld [vmem:[#allocation39_spill] sm:$0xff] }
 0x1d2   : > { %8640 = vmatmul.mubr.msk.bf16.gmra.mxu0 %vm16739_vm5, %v1669_v53  ;;  %17116 = vst [vmem:[#allocation59_spill] sm:$0xff] %v12319_v29  ;;  %17117 = vst [vmem:[#allocation58_spill] sm:$0xff] %v12323_v17  ;;  %v5052_v26 = vcombine.high %v12311_v0, %v12311_v0  ;;  %v12339_v30 = vrot.slane %v12335_v36, %v17109_v24  ;;  %v4968_v3 = vrot.slane %v4954_v12, %v17109_v24 }
 0x1d3   : > { %17119 = vst [vmem:[#allocation69_spill] sm:$0xff] %v12330_v16  ;;  %v12347_v41 = vrot.slane %v5051_v38, 7  ;;  %v8401_v9 = vrot.slane %v4961_v13, 9  ;;  %v5618_v51 = vrot.slane %v4969_v4, 7  ;;  %v12353_v37 = vrot.slane %v4971_v56, %v17109_v24  ;;  %v17132_v13 = vld [vmem:[#allocation34_spill] sm:$0xff] }
 0x1d4   : > { %17120 = vst [vmem:[#allocation68_spill] sm:$0xff] %v12339_v30  ;;  %v4986_v19 = vcombine.high %v12327_v28, %v12327_v28  ;;  %v5720_v33 = vrot.slane %v17124_v27, 2  ;;  %v5723_v7 = vrot.slane %v5721_v45, 2  ;;  %v12359_v43 = vrot.slane %v5052_v26, 7 }
 0x1d5   : > { %17123 = vst [vmem:[#allocation73_spill] sm:$0xff] %v12347_v41  ;;  %v4970_v59 = vcombine.high %v4968_v3, %v4968_v3  ;;  %v5621_v15 = vrot.slane %v4968_v3, 7  ;;  %v5619_v2 = vsel %vm10310_vm7, %v8401_v9, %v5618_v51  ;;  %v5620_v54 = vrot.slane %v5618_v51, 2 }
 0x1d6   : > { %17125 = vst [vmem:[#allocation78_spill] sm:$0xff] %v12359_v43  ;;  %v16571_v10 = vrot.slane %v12327_v28, 7  ;;  %v5150_v40 = vcombine.high %v17128_v62, %v17128_v62  ;;  %v12372_v53 = vrot.slane %v4986_v19, 7  ;;  %v5722_v1 = vsel %vm10310_vm7, %v5720_v33, %v5721_v45  ;;  %v17138_v19 = vld [vmem:[#allocation31_spill] sm:$0xff]  ;;  %v17139_v33 = vld [vmem:[#allocation57_spill] sm:$0xff] }
 0x1d7   : > { %v5725_v20 = vsel %vm10310_vm7, %v5723_v7, %v17130_v18  ;;  %v12380_v32 = vrot.slane %v4970_v59, 7  ;;  %v5077_v6 = vcombine.high %v10052_v11, %v10052_v11  ;;  %v12384_v52 = vrot.slane %v10052_v11, %v17109_v24 }
 0x1d8   : > { %17129 = vst [vmem:[#allocation18_spill] sm:$0xff] %v12372_v53  ;;  %v5771_v23 = vrot.slane %v17132_v13, 7  ;;  %v12387_v12 = vrot.slane %v5621_v15, 2  ;;  %v8417_v4 = vrot.slane %v5619_v2, 9  ;;  %v16569_v56 = vrot.slane %v17134_v44, 7 }
 0x1d9   : > { %17131 = vst [vmem:[#allocation88_spill] sm:$0xff] %v12384_v52  ;;  %v12393_v48 = vsel %vm10310_vm7, %v5620_v54, %v5621_v15  ;;  %v12395_v45 = vrot.slane %v5150_v40, 7  ;;  %v8450_v26 = vrot.slane %v5722_v1, 9  ;;  %v8451_v3 = vrot.slane %v5725_v20, 9 }
 0x1da   : > { %17133 = vst [vmem:[#allocation87_spill] sm:$0xff] %v12387_v12  ;;  %17135 = vst [vmem:[#allocation50_spill] sm:$0xff] %v12393_v48  ;;  %v12399_v9 = vrot.slane %v16571_v10, 2  ;;  %v8452_v27 = vrot.slane %v17138_v19, 9  ;;  %v5770_v7 = vrot.slane %v17139_v33, 2  ;;  %v12406_v15 = vrot.slane %v5077_v6, %v17109_v24  ;;  %v17151_v6 = vld [vmem:[#allocation44_spill] sm:$0xff] }
 0x1db   : > { %17136 = vst [vmem:[#allocation30_spill] sm:$0xff] %v12395_v45  ;;  %v5092_v54 = vcombine.high %v12384_v52, %v12384_v52  ;;  %v5773_v40 = vrot.slane %v5771_v23, 2  ;;  %v12411_v11 = vadd.f32 %v8417_v4, %v5619_v2  ;;  %v17142_v13 = vrot.slane %v17128_v62, 7  ;;  %v12432_v4 = vld [vmem:[%s10249_s17 + $0x68] sm:$0xff] }
 0x1dc   : > { %17137 = vst [vmem:[#allocation64_spill] sm:$0xff] %v12399_v9  ;;  %17140 = vst [vmem:[#allocation40_spill] sm:$0xff] %v12406_v15  ;;  %v12419_v33 = vrot.slane %v16569_v56, 2  ;;  %v12422_v57 = vadd.f32 %v8450_v26, %v5722_v1  ;;  %v12424_v42 = vadd.f32 %v8451_v3, %v5725_v20  ;;  %v5232_v14 = vcombine.high %v17147_v21, %v17147_v21  ;;  %v12444_v20 = vld [vmem:[%s16318_s2] ss:$0 sm:$0xff]  ;;  %v17171_v10 = vld [vmem:[#allocation60_spill] sm:$0xff] }
 0x1dd   : > { %17141 = vst [vmem:[#allocation76_spill] sm:$0xff] %v12411_v11  ;;  %v12415_v39 = vrot.slane %v17142_v13, 2  ;;  %v12429_v2 = vadd.f32 %v8452_v27, %v17138_v19  ;;  %17149 = vst [vmem:[#allocation91_spill] sm:$0xff] %v12432_v4  ;;  %v12436_v62 = vrot.slane %v12432_v4, %v17109_v24  ;;  %v5772_v13 = vsel %vm10310_vm7, %v5770_v7, %v5771_v23  ;;  %v17154_v27 = vld [vmem:[#allocation37_spill] sm:$0xff] }
 0x1de   : > { %17144 = vst [vmem:[#allocation90_spill] sm:$0xff] %v12419_v33  ;;  %17145 = vst [vmem:[#allocation56_spill] sm:$0xff] %v12422_v57  ;;  %v5746_v1 = vrot.slane %v17151_v6, 7  ;;  %v5093_v26 = vcombine.high %v12406_v15, %v12406_v15  ;;  %v12451_v19 = vrot.slane %v5092_v54, 7  ;;  %v5775_v56 = vsel %vm10310_vm7, %v5773_v40, %v17154_v27  ;;  %v17155_v6 = vld [vmem:[#allocation36_spill] sm:$0xff]  ;;  %v17158_v54 = vld [vmem:[#allocation47_spill] sm:$0xff] }
 0x1df   : > { %17143 = vst [vmem:[#allocation92_spill] sm:$0xff] %v12415_v39  ;;  %17146 = vst [vmem:[#allocation98_spill] sm:$0xff] %v12424_v42  ;;  %v12449_v3 = vld.sshfl [vmem:[%s10249_s17 + $0x70] sm:$0x3 pattern:$0x76325410]  ;;  %v5191_v35 = vcombine.high %v17156_v60, %v17156_v60 }
 0x1e0   : > { %17148 = vst [vmem:[#allocation97_spill] sm:$0xff] %v12429_v2  ;;  %17150 = vst [vmem:[#allocation72_spill] sm:$0xff] %v12436_v62  ;;  %v12462_v25 = vrot.slane %v5232_v14, 7  ;;  %v8466_v38 = vrot.slane %v5772_v13, 9  ;;  %v5745_v5 = vrot.slane %v17158_v54, 2  ;;  %v8467_v27 = vrot.slane %v5775_v56, 9 }
 0x1e1   : > { %17152 = vst [vmem:[#allocation86_spill] sm:$0xff] %v12449_v3  ;;  %17153 = vst [vmem:[#allocation96_spill] sm:$0xff] %v12451_v19  ;;  %v8468_v23 = vrot.slane %v17159_v61, 9  ;;  %v5748_v59 = vrot.slane %v5746_v1, 2  ;;  %v12470_v18 = vrot.slane %v5093_v26, 7  ;;  %v17161_v2 = vrot.slane %v17147_v21, 7 }
 0x1e2   : > { %17157 = vst [vmem:[#allocation112_spill] sm:$0xff] %v12462_v25  ;;  %v12481_v42 = vrot.slane %v5191_v35, 7  ;;  %v12484_v44 = vadd.f32 %v8466_v38, %v5772_v13  ;;  %v5747_v26 = vsel %vm10310_vm7, %v5745_v5, %v5746_v1  ;;  %v12489_v21 = vadd.f32 %v8467_v27, %v5775_v56 }
 0x1e3   : > { %17160 = vst [vmem:[#allocation110_spill] sm:$0xff] %v12470_v18  ;;  %v12475_v54 = vrot.slane %v17161_v2, 2  ;;  %v12492_v2 = vadd.f32 %v8468_v23, %v17159_v61  ;;  %v5796_v38 = vrot.slane %v17171_v10, 7  ;;  %v17172_v56 = vrot.slane %v17156_v60, 7  ;;  %v17179_v60 = vld [vmem:[#allocation61_spill] sm:$0xff]  ;;  %v17180_v61 = vld [vmem:[#allocation63_spill] sm:$0xff] }
 0x1e4   : > { %17165 = vst [vmem:[#allocation127_spill] sm:$0xff] %v12481_v42  ;;  %17166 = vst [vmem:[#allocation111_spill] sm:$0xff] %v12484_v44  ;;  %v8458_v1 = vrot.slane %v5747_v26, 9 }
 0x1e5   : > { %17162 = vst [vmem:[#allocation114_spill] sm:$0xff] %v12475_v54  ;;  %17167 = vst [vmem:[#allocation12_spill] sm:$0xff] %v12489_v21 }
 0x1e6   : > { %17168 = vst [vmem:[#allocation128_spill] sm:$0xff] %v12492_v2 }
 0x241   : > { %v8613_v31 = vpop.f32.mrf.mxu0 }
 0x242   : > { %v1793_v51 = vadd.f32 %v8613_v31, %v12444_v20  ;;  %v17163_v31 = vrot.slane %v17155_v6, 7  ;;  %v5795_v6 = vrot.slane %v17180_v61, 2 }
 0x243   : > { %v1784_v7 = vpop.f32.mrf.mxu0 }
 0x244   : > { %v12479_v40 = vrot.slane %v17163_v31, 2  ;;  %v1913_v57 = vmax.f32 %v1793_v51, 0.0  ;;  %v17169_v31 = vld [vmem:[#allocation48_spill] sm:$0xff]  ;;  %v17170_v51 = vld [vmem:[#allocation46_spill] sm:$0xff]  ;;  %v1785_v13 = vadd.f32 %v12444_v20, %v1784_v7 }
 0x245   : > { %v8614_v33 = vpop.f32.mrf.mxu0  ;;  %v5750_v35 = vsel %vm10310_vm7, %v5748_v59, %v17169_v31  ;;  %v17174_v59 = vld [vmem:[#allocation51_spill] sm:$0xff]  ;;  %v17175_v10 = vrot.slane %v17170_v51, 7  ;;  %v12521_v51 = vadd.f32 %v8458_v1, %v5747_v26 }
 0x246   : > { %17164 = vst [vmem:[#allocation126_spill] sm:$0xff] %v12479_v40  ;;  %v1796_v14 = vadd.f32 %v8614_v33, %v12444_v20  ;;  %v12503_v33 = vrot.slane %v17172_v56, 2  ;;  %v1979_v23 = vrot.slane %v1913_v57, 7  ;;  %v8459_v27 = vrot.slane %v5750_v35, 9 }
 0x247   : > { %v1787_v40 = vpop.f32.mrf.mxu0  ;;  %v8460_v31 = vrot.slane %v17174_v59, 9  ;;  %v12509_v7 = vrot.slane %v17175_v10, 2  ;;  %v5273_v56 = vcombine.high %v17179_v60, %v17179_v60  ;;  %v5798_v57 = vrot.slane %v5796_v38, 2  ;;  %17182 = vst [vmem:[#allocation130_spill] sm:$0xff] %v12521_v51 }
 0x248   : > { %v1914_v44 = vmax.f32 %v1796_v14, 0.0  ;;  %v1788_v5 = vadd.f32 %v12444_v20, %v1787_v40  ;;  %17173 = vst [vmem:[#allocation13_spill] sm:$0xff] %v12503_v33  ;;  %v17177_v40 = vld [vmem:[#allocation55_spill] sm:$0xff]  ;;  %v1911_v54 = vmax.f32 %v1785_v13, 0.0  ;;  %v12524_v10 = vsel %vm1975_vm2, 0.0, %v1979_v23  ;;  %v12533_v13 = vld [vmem:[%s10249_s17 + $0xd8] sm:$0xff] }
 0x249   : > { %17176 = vst [vmem:[#allocation129_spill] sm:$0xff] %v12509_v7  ;;  %v12512_v14 = vmul.f32 0.25, %v17177_v40  ;;  %17183 = vst [vmem:[#allocation116_spill] sm:$0xff] %v12524_v10  ;;  %v12527_v33 = vadd.f32 %v8459_v27, %v5750_v35  ;;  %v12530_v61 = vadd.f32 %v8460_v31, %v17174_v59  ;;  %v12541_v1 = vrot.slane %v12533_v13, %v17109_v24  ;;  %v17191_v31 = vld [vmem:[#allocation65_spill] sm:$0xff] }
 0x24a   : > { %v1980_v49 = vrot.slane %v1914_v44, 7  ;;  %v1912_v2 = vmax.f32 %v1788_v5, 0.0  ;;  %v8617_v21 = vpop.f32.mrf.mxu0  ;;  %17186 = vst [vmem:[#allocation20_spill] sm:$0xff] %v12533_v13  ;;  %v17188_v35 = vrot.slane %v17179_v60, 7  ;;  %v12547_v27 = vrot.slane %v5273_v56, 7 }
 0x24b   : > { %17178 = vst [vmem:[#allocation15_spill] sm:$0xff] %v12512_v14  ;;  %17184 = vst [vmem:[#allocation131_spill] sm:$0xff] %v12527_v33  ;;  %v5797_v59 = vsel %vm10310_vm7, %v5795_v6, %v5796_v38  ;;  %v2141_v42 = vrot.slane %v12524_v10, 1  ;;  %v1976_v26 = vrot.slane %v1911_v54, 7 }
 0x24c   : > { %v12518_v25 = vsel %vm1975_vm2, %v1979_v23, %v1980_v49  ;;  %v2088_v44 = vsel %vm1975_vm2, %v1980_v49, 0.0  ;;  %v1800_v5 = vpop.f32.mrf.mxu0  ;;  %17185 = vst [vmem:[#allocation113_spill] sm:$0xff] %v12530_v61  ;;  %v1977_v49 = vrot.slane %v1912_v2, 7  ;;  %17187 = vst [vmem:[#allocation19_spill] sm:$0xff] %v12541_v1  ;;  %v12545_v23 = vrot.slane %v17188_v35, 2 }
 0x24d   : > { %17181 = vst [vmem:[#allocation14_spill] sm:$0xff] %v12518_v25  ;;  %v2142_v40 = vrot.slane %v12518_v25, 1  ;;  %v2144_v7 = vrot.slane %v2088_v44, 1  ;;  %17190 = vst [vmem:[#allocation133_spill] sm:$0xff] %v12547_v27  ;;  %v5800_v2 = vsel %vm10310_vm7, %v5798_v57, %v17191_v31  ;;  %v2312_v1 = vrot.slane %v12518_v25, 2  ;;  %v17193_v57 = vld [vmem:[#allocation62_spill] sm:$0xff] }
 0x24e   : > { %v8618_v39 = vpop.f32.mrf.mxu0  ;;  %17189 = vst [vmem:[#allocation132_spill] sm:$0xff] %v12545_v23  ;;  %v9396_v60 = vpack.i.bf16 %v12518_v25, %v12524_v10  ;;  %v2314_v35 = vrot.slane %v2088_v44, 2  ;;  %v12562_v13 = vsel %vm1975_vm2, %v1976_v26, %v1977_v49  ;;  %v8474_v31 = vrot.slane %v5797_v59, 9  ;;  %v17197_v25 = vld [vmem:[#allocation67_spill] sm:$0xff] }
 0x24f   : > { %v12556_v14 = vsel %vm16736_vm1, %v2142_v40, %v2144_v7  ;;  %17192 = vst [vmem:[#allocation84_spill] sm:$0xff] %v12562_v13  ;;  %v1812_v6 = vadd.f32 %v8618_v39, %v12444_v20  ;;  %v12566_v38 = vsel %vm16736_vm1, %v2141_v42, %v2142_v40  ;;  %v2311_v7 = vrot.slane %v12524_v10, 2 }
 0x250   : > { %v1803_v56 = vpop.f32.mrf.mxu0  ;;  %v1809_v61 = vadd.f32 %v8617_v21, %v12444_v20  ;;  %9397 = vrot.lane.b32.xlu1 %v9396_v60, %s10145_s15  ;;  %9392 = vrot.lane.b32.xlu0 %v9396_v60, %s10142_s20  ;;  %v12574_v44 = vsel %vm1975_vm2, 0.0, %v1976_v26  ;;  %v1801_v33 = vadd.f32 %v12444_v20, %v1800_v5  ;;  %v9406_v42 = vpack.i.bf16 %v12556_v14, %v12566_v38 }
 0x251   : > { %17194 = vst [vmem:[#allocation23_spill] sm:$0xff] %v12574_v44  ;;  %v1804_v39 = vadd.f32 %v12444_v20, %v1803_v56  ;;  %v8475_v54 = vrot.slane %v5800_v2, 9  ;;  %v9401_v21 = vpack.i.bf16 %v12562_v13, %v12574_v44  ;;  %v12584_v51 = vsel %vm16737_vm8, %v2312_v1, %v2314_v35 }
 0x252   : > { %v2137_v60 = vrot.slane %v12562_v13, 1  ;;  %v1918_v26 = vmax.f32 %v1812_v6, 0.0  ;;  %v12588_v5 = vsel %vm16737_vm8, %v2311_v7, %v2312_v1  ;;  %v17195_v56 = vrot.slane %v17193_v57, 7 }
 0x253   : > { %v8476_v40 = vrot.slane %v17197_v25, 9  ;;  %v2087_v27 = vsel %vm1975_vm2, %v1977_v49, 0.0  ;;  %v1917_v10 = vmax.f32 %v1809_v61, 0.0  ;;  %v12598_v35 = vadd.f32 %v8474_v31, %v5797_v59 }
 0x254   : > { %v12592_v45 = vrot.slane %v17195_v56, 2  ;;  %9407 = vrot.lane.b32.xlu0 %v9406_v42, %s10143_s21  ;;  %9402 = vrot.lane.b32.xlu1 %v9401_v21, %s10142_s20  ;;  %v2136_v6 = vrot.slane %v12574_v44, 1  ;;  %v1915_v11 = vmax.f32 %v1801_v33, 0.0  ;;  %v1916_v1 = vmax.f32 %v1804_v39, 0.0 }
 0x255   : > { %17198 = vst [vmem:[#allocation115_spill] sm:$0xff] %v12598_v35  ;;  %v12601_v8 = vadd.f32 %v8475_v54, %v5800_v2  ;;  %v9411_v56 = vpack.i.bf16 %v12584_v51, %v12588_v5  ;;  %v2139_v61 = vrot.slane %v2087_v27, 1  ;;  %v2307_v57 = vrot.slane %v12562_v13, 2  ;;  %v17202_v2 = vld [vmem:[#allocation71_spill] sm:$0xff] }
 0x256   : > { %v8621_v23 = vpop.f32.mrf.mxu0  ;;  %17196 = vst [vmem:[#allocation22_spill] sm:$0xff] %v12592_v45  ;;  %v16594_v45 = vmov 0.0   ;;  %v1986_v21 = vrot.slane %v1918_v26, 7  ;;  %v12610_v31 = vsel %vm16736_vm1, %v2136_v6, %v2137_v60  ;;  %v12613_v33 = vadd.f32 %v8476_v40, %v17197_v25 }
 0x257   : > { %17199 = vst [vmem:[#allocation134_spill] sm:$0xff] %v12601_v8  ;;  %v12606_v49 = vrot.slane %v16594_v45, 1  ;;  %v12616_v54 = vmul.f32 0.25, %v17202_v2  ;;  %v1985_v39 = vrot.slane %v1917_v10, 7  ;;  %v12621_v8 = vrot.slane %v16594_v45, 2 }
 0x258   : > { %v1816_v7 = vpop.f32.mrf.mxu0  ;;  %17201 = vst [vmem:[#allocation94_spill] sm:$0xff] %v12613_v33  ;;  %9412 = vrot.lane.b32.xlu0 %v9411_v56, %s10144_s22  ;;  %9417 = vrot.lane.b32.xlu1 %v9406_v42, %s10146_s16  ;;  %v2306_v26 = vrot.slane %v12574_v44, 2  ;;  %v1982_v35 = vrot.slane %v1915_v11, 7  ;;  %v1983_v13 = vrot.slane %v1916_v1, 7  ;;  %v1825_v6 = vadd.f32 %v8621_v23, %v12444_v20 }
 0x259   : > { %17200 = vst [vmem:[#allocation135_spill] sm:$0xff] %v12606_v49  ;;  %17203 = vst [vmem:[#allocation136_spill] sm:$0xff] %v12616_v54  ;;  %v2309_v25 = vrot.slane %v2087_v27, 2  ;;  %v9426_v10 = vpack.i.bf16 %v12610_v31, %v12606_v49  ;;  %v12629_v2 = vsel %vm1975_vm2, %v1985_v39, %v1986_v21  ;;  %v1817_v42 = vadd.f32 %v12444_v20, %v1816_v7 }
 0x25a   : > { %v8622_v59 = vpop.f32.mrf.mxu0  ;;  %17204 = vst [vmem:[#allocation75_spill] sm:$0xff] %v12621_v8  ;;  %17205 = vst [vmem:[#allocation137_spill] sm:$0xff] %v12629_v2  ;;  %v12633_v45 = vsel %vm16736_vm1, %v2137_v60, %v2139_v61  ;;  %v12636_v11 = vsel %vm16737_vm8, %v2306_v26, %v2307_v57  ;;  %v12641_v27 = vsel %vm1975_vm2, 0.0, %v1985_v39  ;;  %v2090_v1 = vsel %vm1975_vm2, %v1986_v21, 0.0 }
 0x25b   : > { %v1828_v40 = vadd.f32 %v8622_v59, %v12444_v20  ;;  %17206 = vst [vmem:[#allocation138_spill] sm:$0xff] %v12641_v27  ;;  %v12648_v60 = vsel %vm1975_vm2, 0.0, %v1982_v35  ;;  %v12651_v61 = vsel %vm1975_vm2, %v1982_v35, %v1983_v13  ;;  %v2089_v59 = vsel %vm1975_vm2, %v1983_v13, 0.0 }
 0x25c   : > { %v1819_v48 = vpop.f32.mrf.mxu0  ;;  %9422 = vrot.lane.b32.xlu1 %v9411_v56, %s10147_s23  ;;  %9427 = vrot.lane.b32.xlu0 %v9426_v10, %s10140_s18  ;;  %17207 = vst [vmem:[#allocation89_spill] sm:$0xff] %v12648_v60  ;;  %17208 = vst [vmem:[#allocation139_spill] sm:$0xff] %v12651_v61  ;;  %v1921_v26 = vmax.f32 %v1825_v6, 0.0  ;;  %v2152_v39 = vrot.slane %v12629_v2, 1  ;;  %v9431_v21 = vpack.i.bf16 %v12566_v38, %v12633_v45  ;;  %v2154_v10 = vrot.slane %v2090_v1, 1 }
 0x25d   : > { %v1820_v7 = vadd.f32 %v12444_v20, %v1819_v48  ;;  %v1922_v23 = vmax.f32 %v1828_v40, 0.0  ;;  %v9436_v56 = vpack.i.bf16 %v12636_v11, %v12621_v8  ;;  %v2322_v48 = vrot.slane %v12629_v2, 2 }
 0x25e   : > { %v1919_v49 = vmax.f32 %v1817_v42, 0.0  ;;  %v12661_v35 = vsel %vm16737_vm8, %v2307_v57, %v2309_v25  ;;  %v2324_v33 = vrot.slane %v2090_v1, 2  ;;  %v16602_v13 = vrot.slane %v12651_v61, 1 }
 0x25f   : > { %v2149_v6 = vrot.slane %v2089_v59, 1  ;;  %v1920_v44 = vmax.f32 %v1820_v7, 0.0  ;;  %v2151_v38 = vrot.slane %v12641_v27, 1  ;;  %v2319_v8 = vrot.slane %v2089_v59, 2 }
 0x260   : > { %9432 = vrot.lane.b32.xlu1 %v9431_v21, %s10140_s18  ;;  %9437 = vrot.lane.b32.xlu0 %v9436_v56, %s10141_s19  ;;  %v1991_v3 = vrot.slane %v1921_v26, 7  ;;  %v1992_v52 = vrot.slane %v1922_v23, 7  ;;  %v9441_v25 = vpack.i.bf16 %v12588_v5, %v12661_v35  ;;  %v12673_v1 = vpack.i.bf16 %v12629_v2, %v12641_v27 }
 0x261   : > { %v2321_v7 = vrot.slane %v12641_v27, 2  ;;  %v2146_v21 = vrot.slane %v12648_v60, 1  ;;  %v1988_v40 = vrot.slane %v1919_v49, 7  ;;  %v12679_v26 = vsel %vm16736_vm1, %v2152_v39, %v2154_v10 }
 0x262   : > { %v8625_v54 = vpop.f32.mrf.mxu0  ;;  %v12687_v5 = vsel %vm16736_vm1, %v16602_v13, %v2149_v6  ;;  %v1989_v23 = vrot.slane %v1920_v44, 7  ;;  %v17209_v49 = vrot.slane %v12651_v61, 2  ;;  %v12698_v10 = vsel %vm1975_vm2, 0.0, %v1991_v3 }
 0x263   : > { %v1841_v57 = vadd.f32 %v8625_v54, %v12444_v20  ;;  %v12682_v54 = vsel %vm16737_vm8, %v2322_v48, %v2324_v33  ;;  %17210 = vst [vmem:[#allocation117_spill] sm:$0xff] %v12698_v10  ;;  %v9446_v6 = vpack.i.bf16 %v12633_v45, %v12610_v31  ;;  %v12704_v44 = vsel %vm1975_vm2, %v1991_v3, %v1992_v52 }
 0x264   : > { %v1832_v42 = vpop.f32.mrf.mxu0  ;;  %9442 = vrot.lane.b32.xlu1 %v9441_v25, %s10141_s19  ;;  %9457 = vrot.lane.b32.xlu0 %v12673_v1, %s10142_s20  ;;  %v12695_v56 = vsel %vm16737_vm8, %v17209_v49, %v2319_v8  ;;  %17211 = vst [vmem:[#allocation7_spill] sm:$0xff] %v12704_v44  ;;  %v2092_v25 = vsel %vm1975_vm2, %v1992_v52, 0.0  ;;  %v12709_v27 = vpack.i.bf16 %v12651_v61, %v12648_v60  ;;  %v12712_v8 = vsel %vm1975_vm2, 0.0, %v1988_v40 }
 0x265   : > { %v1925_v2 = vmax.f32 %v1841_v57, 0.0  ;;  %17212 = vst [vmem:[#allocation42_spill] sm:$0xff] %v12712_v8  ;;  %v12718_v45 = vsel %vm16736_vm1, %v2151_v38, %v2152_v39  ;;  %v12722_v52 = vsel %vm1975_vm2, %v1988_v40, %v1989_v23  ;;  %v2091_v31 = vsel %vm1975_vm2, %v1989_v23, 0.0 }
 0x266   : > { %v8626_v59 = vpop.f32.mrf.mxu0  ;;  %17213 = vst [vmem:[#allocation6_spill] sm:$0xff] %v12722_v52  ;;  %v1833_v57 = vadd.f32 %v12444_v20, %v1832_v42  ;;  %v2164_v39 = vrot.slane %v2092_v25, 1  ;;  %v2334_v3 = vrot.slane %v2092_v25, 2  ;;  %v12734_v23 = vpack.i.bf16 %v12679_v26, %v12718_v45 }
 0x267   : > { %v1844_v33 = vadd.f32 %v8626_v59, %v12444_v20  ;;  %v9451_v59 = vpack.i.bf16 %v12661_v35, %v12636_v11  ;;  %v1997_v40 = vrot.slane %v1925_v2, 7  ;;  %v16614_v42 = vrot.slane %v12722_v52, 1 }
 0x268   : > { %v1835_v13 = vpop.f32.mrf.mxu0  ;;  %9447 = vrot.lane.b32.xlu1 %v9446_v6, %s10143_s21  ;;  %9467 = vrot.lane.b32.xlu0 %v12709_v27, %s10145_s15  ;;  %v2159_v6 = vrot.slane %v2091_v31, 1  ;;  %v12738_v15 = vsel %vm16737_vm8, %v2321_v7, %v2322_v48  ;;  %v2329_v11 = vrot.slane %v2091_v31, 2  ;;  %v1923_v38 = vmax.f32 %v1833_v57, 0.0 }
 0x269   : > { %v1836_v49 = vadd.f32 %v12444_v20, %v1835_v13  ;;  %v1926_v35 = vmax.f32 %v1844_v33, 0.0  ;;  %v17214_v25 = vrot.slane %v12704_v44, 1  ;;  %v12752_v13 = vsel %vm1975_vm2, 0.0, %v1997_v40 }
 0x26a   : > { %17215 = vst [vmem:[#allocation32_spill] sm:$0xff] %v12752_v13  ;;  %v17216_v57 = vrot.slane %v12651_v61, 1  ;;  %v1994_v63 = vrot.slane %v1923_v38, 7  ;;  %v17245_v53 = vrot.slane %v12712_v8, 2 }
 0x26b   : > { %v1924_v19 = vmax.f32 %v1836_v49, 0.0  ;;  %v12749_v49 = vsel %vm16736_vm1, %v17214_v25, %v2164_v39  ;;  %v1998_v48 = vrot.slane %v1926_v35, 7  ;;  %v12765_v39 = vld [vmem:[%s16319_s3 + $0x10] ss:$0 sps:$4 sm:$0x33]   ;;  %v17217_v35 = vrot.slane %v12704_v44, 2 }
 0x26c   : > { %9452 = vrot.lane.b32.xlu1 %v9451_v59, %s10144_s22  ;;  %9477 = vrot.lane.b32.xlu0 %v12734_v23, %s10143_s21  ;;  %v12757_v59 = vpack.i.bf16 %v12682_v54, %v12738_v15  ;;  %v2148_v2 = vsel %vm16736_vm1, %v2146_v21, %v17216_v57  ;;  %v17218_v21 = vrot.slane %v12722_v52, 2 }
 0x26d   : > { %v12770_v25 = vsel %vm16737_vm8, %v17217_v35, %v2334_v3  ;;  %v1995_v33 = vrot.slane %v1924_v19, 7  ;;  %v12790_v19 = vsel %vm1975_vm2, %v1997_v40, %v1998_v48  ;;  %8694 = vmatprep.subr.msk.bf16.mxu1 %vm1746_vm9, %v12765_v39 }
 0x26e   : > { %v8629_v50 = vpop.f32.mrf.mxu0  ;;  %v12781_v57 = vsel %vm16737_vm8, %v17218_v21, %v2329_v11  ;;  %17219 = vst [vmem:[#allocation29_spill] sm:$0xff] %v12790_v19  ;;  %v2094_v11 = vsel %vm1975_vm2, %v1998_v48, 0.0  ;;  %v17220_v21 = vrot.slane %v12651_v61, 2  ;;  %v12808_v48 = vsel %vm1975_vm2, 0.0, %v1994_v63 }
 0x26f   : > { %v1857_v31 = vadd.f32 %v8629_v50, %v12444_v20  ;;  %v12775_v50 = vsel %vm16736_vm1, %v16614_v42, %v2159_v6  ;;  %v12803_v40 = vsel %vm1975_vm2, %v1994_v63, %v1995_v33  ;;  %17223 = vst [vmem:[#allocation43_spill] sm:$0xff] %v12808_v48 }
 0x270   : > { %v1848_v7 = vpop.f32.mrf.mxu0  ;;  %9462 = vrot.lane.b32.xlu1 %v12673_v1, %s10145_s15  ;;  %9482 = vrot.lane.b32.xlu0 %v12757_v59, %s10144_s22  ;;  %17222 = vst [vmem:[#allocation24_spill] sm:$0xff] %v12803_v40  ;;  %v16621_v63 = vrot.slane %v12803_v40, 2 }
 0x271   : > { %v1849_v18 = vadd.f32 %v12444_v20, %v1848_v7  ;;  %v9496_v7 = vpack.i.bf16 %v2148_v2, %v12556_v14  ;;  %v1929_v38 = vmax.f32 %v1857_v31, 0.0  ;;  %v2093_v14 = vsel %vm1975_vm2, %v1995_v33, 0.0 }
 0x272   : > { %v8630_v0 = vpop.f32.mrf.mxu0 }
 0x273   : > { %v1860_v3 = vadd.f32 %v8630_v0, %v12444_v20  ;;  %v17221_v0 = vrot.slane %v12648_v60, 2  ;;  %v1927_v42 = vmax.f32 %v1849_v18, 0.0  ;;  %v16622_v18 = vrot.slane %v12803_v40, 1 }
 0x274   : > { %v1851_v35 = vpop.f32.mrf.mxu0  ;;  %9472 = vrot.lane.b32.xlu1 %v12709_v27, %s10142_s20  ;;  %9497 = vrot.lane.b32.xlu0 %v9496_v7, %s10140_s18  ;;  %v2003_v29 = vrot.slane %v1929_v38, 7  ;;  %v2339_v60 = vrot.slane %v2093_v14, 2  ;;  %v17224_v38 = vrot.slane %v12790_v19, 1  ;;  %v17231_v27 = vrot.slane %v12704_v44, 1 }
 0x275   : > { %v1852_v1 = vadd.f32 %v12444_v20, %v1851_v35  ;;  %v2318_v6 = vsel %vm16737_vm8, %v17221_v0, %v17220_v21  ;;  %v1930_v41 = vmax.f32 %v1860_v3, 0.0  ;;  %v2174_v35 = vrot.slane %v2094_v11, 1 }
 0x276   : > { %v16623_v21 = vrot.slane %v12790_v19, 2  ;;  %v2344_v0 = vrot.slane %v2094_v11, 2  ;;  %v9506_v33 = vpack.i.bf16 %v2318_v6, %v12584_v51  ;;  %v2169_v3 = vrot.slane %v2093_v14, 1 }
 0x277   : > { %v1928_v61 = vmax.f32 %v1852_v1, 0.0  ;;  %v2000_v31 = vrot.slane %v1927_v42, 7  ;;  %v2004_v17 = vrot.slane %v1930_v41, 7  ;;  %v12825_v11 = vpack.i.bf16 %v12687_v5, %v2148_v2 }
 0x278   : > { %9487 = vrot.lane.b32.xlu1 %v12734_v23, %s10146_s16  ;;  %9507 = vrot.lane.b32.xlu0 %v9506_v33, %s10141_s19  ;;  %v12830_v42 = vsel %vm16736_vm1, %v17224_v38, %v2174_v35  ;;  %v12835_v41 = vsel %vm16737_vm8, %v16623_v21, %v2344_v0  ;;  %v9501_v23 = vpack.i.bf16 %v12718_v45, %v12687_v5  ;;  %v12848_v2 = vsel %vm1975_vm2, 0.0, %v2003_v29 }
 0x279   : > { %17225 = vst [vmem:[#allocation25_spill] sm:$0xff] %v12830_v42  ;;  %17226 = vst [vmem:[#allocation27_spill] sm:$0xff] %v12835_v41  ;;  %v12840_v14 = vpack.i.bf16 %v12695_v56, %v2318_v6  ;;  %v2001_v35 = vrot.slane %v1928_v61, 7  ;;  %v9511_v0 = vpack.i.bf16 %v12738_v15, %v12695_v56  ;;  %v12855_v33 = vsel %vm16737_vm8, %v16621_v63, %v2339_v60 }
 0x27a   : > { %v8633_v43 = vpop.f32.mrf.mxu0  ;;  %17227 = vst [vmem:[#allocation34_spill] sm:$0xff] %v12848_v2  ;;  %v12858_v5 = vsel %vm1975_vm2, 0.0, %v2000_v31  ;;  %v12861_v45 = vsel %vm1975_vm2, %v2003_v29, %v2004_v17  ;;  %v2096_v61 = vsel %vm1975_vm2, %v2004_v17, 0.0  ;;  %v12878_v63 = vpack.i.bf16 %v12722_v52, %v12712_v8 }
 0x27b   : > { %v1873_v51 = vadd.f32 %v8633_v43, %v12444_v20  ;;  %v12845_v43 = vsel %vm16736_vm1, %v16622_v18, %v2169_v3  ;;  %17228 = vst [vmem:[#allocation31_spill] sm:$0xff] %v12858_v5  ;;  %17229 = vst [vmem:[#allocation57_spill] sm:$0xff] %v12861_v45  ;;  %v12865_v3 = vpack.i.bf16 %v12704_v44, %v12698_v10  ;;  %v2184_v29 = vrot.slane %v2096_v61, 1 }
 0x27c   : > { %v1864_v1 = vpop.f32.mrf.mxu0  ;;  %9492 = vrot.lane.b32.xlu1 %v12757_v59, %s10147_s23  ;;  %9517 = vrot.lane.b32.xlu0 %v12825_v11, %s10146_s16  ;;  %v12881_v17 = vsel %vm1975_vm2, %v2000_v31, %v2001_v35  ;;  %v2095_v59 = vsel %vm1975_vm2, %v2001_v35, 0.0  ;;  %v17232_v18 = vrot.slane %v12698_v10, 1  ;;  %v17234_v56 = vrot.slane %v12698_v10, 2 }
 0x27d   : > { %v1933_v38 = vmax.f32 %v1873_v51, 0.0  ;;  %v1865_v15 = vadd.f32 %v12444_v20, %v1864_v1  ;;  %17230 = vst [vmem:[#allocation35_spill] sm:$0xff] %v12881_v17  ;;  %v12888_v1 = vld [vmem:[%s16321_s5] sm:$0x3]  ;;  %v16636_v46 = vrot.slane %v12881_v17, 1  ;;  %v17235_v58 = vrot.slane %v12861_v45, 1 }
 0x27e   : > { %v8634_v6 = vpop.f32.mrf.mxu0  ;;  %v12897_v31 = vsel %vm16736_vm1, %v17232_v18, %v17231_v27  ;;  %8695 = vmatprep.subr.msk.bf16.mxu0 %vm1746_vm9, %v12888_v1  ;;  %v16635_v18 = vrot.slane %v12861_v45, 2  ;;  %v2354_v27 = vrot.slane %v2096_v61, 2 }
 0x27f   : > { %v1876_v60 = vadd.f32 %v8634_v6, %v12444_v20  ;;  %v1931_v35 = vmax.f32 %v1865_v15, 0.0  ;;  %v17233_v6 = vrot.slane %v12704_v44, 2  ;;  %v12918_v44 = vsel %vm16736_vm1, %v17235_v58, %v2184_v29 }
 0x280   : > { %v1867_v7 = vpop.f32.mrf.mxu0  ;;  %9502 = vrot.lane.b32.xlu1 %v9501_v23, %s10140_s18  ;;  %9522 = vrot.lane.b32.xlu0 %v12840_v14, %s10147_s23  ;;  %17236 = vst [vmem:[#allocation44_spill] sm:$0xff] %v12918_v44  ;;  %v17238_v58 = vrot.slane %v12722_v52, 1  ;;  %v17239_v29 = vrot.slane %v12712_v8, 1  ;;  %v12944_v23 = vsel %vm16737_vm8, %v16635_v18, %v2354_v27 }
 0x281   : > { %v1868_v51 = vadd.f32 %v12444_v20, %v1867_v7  ;;  %v2009_v7 = vrot.slane %v1933_v38, 7  ;;  %v1934_v21 = vmax.f32 %v1876_v60, 0.0  ;;  %v12909_v22 = vsel %vm16737_vm8, %v17234_v56, %v17233_v6  ;;  %17240 = vst [vmem:[#allocation45_spill] sm:$0xff] %v12944_v23 }
 0x282   : > { %v2179_v38 = vrot.slane %v2095_v59, 1  ;;  %v2349_v60 = vrot.slane %v2095_v59, 2  ;;  %v12922_v56 = vpack.i.bf16 %v12749_v49, %v12897_v31  ;;  %v12926_v61 = vpack.i.bf16 %v12770_v25, %v12909_v22 }
 0x283   : > { %v1932_v47 = vmax.f32 %v1868_v51, 0.0  ;;  %v12929_v6 = vsel %vm1975_vm2, 0.0, %v2009_v7  ;;  %v2006_v15 = vrot.slane %v1931_v35, 7  ;;  %v2010_v59 = vrot.slane %v1934_v21, 7 }
 0x284   : > { %17237 = vst [vmem:[#allocation37_spill] sm:$0xff] %v12929_v6  ;;  %9512 = vrot.lane.b32.xlu1 %v9511_v0, %s10141_s19  ;;  %9537 = vrot.lane.b32.xlu0 %v12865_v3, %s10142_s20  ;;  %v12939_v51 = vsel %vm16736_vm1, %v17239_v29, %v17238_v58  ;;  %v12949_v21 = vsel %vm16736_vm1, %v16636_v46, %v2179_v38  ;;  %v17242_v35 = vrot.slane %v12881_v17, 2  ;;  %v17244_v29 = vrot.slane %v12722_v52, 2 }
 0x285   : > { %17241 = vst [vmem:[#allocation47_spill] sm:$0xff] %v12949_v21  ;;  %v2007_v9 = vrot.slane %v1932_v47, 7  ;;  %v9576_v46 = vpack.i.bf16 %v12939_v51, %v12679_v26  ;;  %v12972_v47 = vsel %vm1975_vm2, 0.0, %v2006_v15 }
 0x286   : > { %v8637_v10 = vpop.f32.mrf.mxu0  ;;  %v12954_v55 = vsel %vm16737_vm8, %v17242_v35, %v2349_v60  ;;  %v12962_v27 = vsel %vm16737_vm8, %v17245_v53, %v17244_v29  ;;  %v12969_v60 = vpack.i.bf16 %v12775_v50, %v12939_v51  ;;  %17246 = vst [vmem:[#allocation48_spill] sm:$0xff] %v12972_v47  ;;  %v2098_v35 = vsel %vm1975_vm2, %v2010_v59, 0.0 }
 0x287   : > { %17243 = vst [vmem:[#allocation39_spill] sm:$0xff] %v12954_v55  ;;  %v1889_v58 = vadd.f32 %v8637_v10, %v12444_v20  ;;  %v12975_v10 = vsel %vm1975_vm2, %v2009_v7, %v2010_v59  ;;  %v12990_v59 = vpack.i.bf16 %v12781_v57, %v12962_v27  ;;  %v2097_v18 = vsel %vm1975_vm2, %v2007_v9, 0.0 }
 0x288   : > { %v1880_v0 = vpop.f32.mrf.mxu0  ;;  %17247 = vst [vmem:[#allocation60_spill] sm:$0xff] %v12975_v10  ;;  %9527 = vrot.lane.b32.xlu1 %v12825_v11, %s10143_s21  ;;  %9547 = vrot.lane.b32.xlu0 %v12878_v63, %s10145_s15  ;;  %v12993_v11 = vsel %vm1975_vm2, %v2006_v15, %v2007_v9  ;;  %v16643_v52 = vrot.slane %v12975_v10, 1  ;;  %v2194_v29 = vrot.slane %v2098_v35, 1  ;;  %v16644_v16 = vrot.slane %v12975_v10, 2 }
 0x289   : > { %17248 = vst [vmem:[#allocation51_spill] sm:$0xff] %v12993_v11  ;;  %v1937_v8 = vmax.f32 %v1889_v58, 0.0  ;;  %v1881_v23 = vadd.f32 %v12444_v20, %v1880_v0  ;;  %v2364_v12 = vrot.slane %v2098_v35, 2  ;;  %v2189_v15 = vrot.slane %v2097_v18, 1 }
 0x28a   : > { %v8638_v38 = vpop.f32.mrf.mxu0  ;;  %v2359_v7 = vrot.slane %v2097_v18, 2  ;;  %v13012_v35 = vpack.i.bf16 %v12790_v19, %v12752_v13  ;;  %v17254_v0 = vrot.slane %v12993_v11, 1 }
 0x28b   : > { %v1892_v53 = vadd.f32 %v8638_v38, %v12444_v20  ;;  %v2015_v26 = vrot.slane %v1937_v8, 7  ;;  %v13026_v18 = vsel %vm16737_vm8, %v16644_v16, %v2364_v12 }
 0x28c   : > { %v1883_v51 = vpop.f32.mrf.mxu0  ;;  %9532 = vrot.lane.b32.xlu1 %v12840_v14, %s10144_s22  ;;  %9557 = vrot.lane.b32.xlu0 %v12922_v56, %s10143_s21  ;;  %v13017_v14 = vsel %vm16736_vm1, %v16643_v52, %v2194_v29  ;;  %17251 = vst [vmem:[#allocation63_spill] sm:$0xff] %v13026_v18  ;;  %v17253_v52 = vrot.slane %v12752_v13, 1  ;;  %v13043_v12 = vsel %vm16736_vm1, %v17254_v0, %v2189_v15 }
 0x28d   : > { %v1884_v38 = vadd.f32 %v12444_v20, %v1883_v51  ;;  %v1938_v62 = vmax.f32 %v1892_v53, 0.0  ;;  %17249 = vst [vmem:[#allocation55_spill] sm:$0xff] %v13017_v14  ;;  %v1935_v53 = vmax.f32 %v1881_v23, 0.0  ;;  %v17252_v23 = vrot.slane %v12790_v19, 1  ;;  %17255 = vst [vmem:[#allocation65_spill] sm:$0xff] %v13043_v12 }
 0x28f   : > { %v1936_v58 = vmax.f32 %v1884_v38, 0.0  ;;  %v13021_v38 = vpack.i.bf16 %v12803_v40, %v12808_v48  ;;  %v2016_v8 = vrot.slane %v1938_v62, 7  ;;  %v13038_v51 = vsel %vm16736_vm1, %v17253_v52, %v17252_v23 }
 0x290   : > { %9542 = vrot.lane.b32.xlu1 %v12865_v3, %s10145_s15  ;;  %9562 = vrot.lane.b32.xlu0 %v12926_v61, %s10144_s22  ;;  %v17256_v3 = vrot.slane %v12993_v11, 2  ;;  %v17259_v52 = vrot.slane %v12790_v19, 2  ;;  %v17260_v23 = vrot.slane %v12752_v13, 2  ;;  %v2012_v15 = vrot.slane %v1935_v53, 7 }
 0x291   : > { %17250 = vst [vmem:[#allocation61_spill] sm:$0xff] %v13021_v38  ;;  %v2013_v62 = vrot.slane %v1936_v58, 7  ;;  %v13063_v0 = vpack.i.bf16 %v12830_v42, %v13038_v51  ;;  %v2100_v19 = vsel %vm1975_vm2, %v2016_v8, 0.0  ;;  %v17269_v38 = vrot.slane %v12808_v48, 2 }
 0x292   : > { %v8641_v9 = vpop.f32.mrf.mxu0  ;;  %v13048_v18 = vsel %vm16737_vm8, %v17256_v3, %v2359_v7  ;;  %v13059_v4 = vsel %vm16737_vm8, %v17260_v23, %v17259_v52  ;;  %v17262_v7 = vrot.slane %v12803_v40, 1  ;;  %v17263_v3 = vrot.slane %v12808_v48, 1 }
 0x293   : > { %v1905_v29 = vadd.f32 %v8641_v9, %v12444_v20  ;;  %17257 = vst [vmem:[#allocation67_spill] sm:$0xff] %v13048_v18  ;;  %v13051_v9 = vsel %vm1975_vm2, 0.0, %v2015_v26  ;;  %17261 = vst [vmem:[#allocation140_spill] sm:$0xff] %v13063_v0  ;;  %v2204_v13 = vrot.slane %v2100_v19, 1  ;;  %v17268_v0 = vrot.slane %v12803_v40, 2 }
 0x294   : > { %v1896_v16 = vpop.f32.mrf.mxu0  ;;  %17258 = vst [vmem:[#allocation71_spill] sm:$0xff] %v13051_v9  ;;  %v13070_v18 = vsel %vm16736_vm1, %v17263_v3, %v17262_v7  ;;  %9552 = vrot.lane.b32.xlu1 %v12878_v63, %s10142_s20  ;;  %9577 = vrot.lane.b32.xlu0 %v9576_v46, %s10140_s18  ;;  %v13083_v7 = vsel %vm1975_vm2, %v2012_v15, %v2013_v62  ;;  %v17282_v40 = vrot.slane %v12881_v17, 2 }
 0x295   : > { %v1897_v30 = vadd.f32 %v12444_v20, %v1896_v16  ;;  %v13073_v16 = vsel %vm1975_vm2, %v2015_v26, %v2016_v8  ;;  %v1941_v52 = vmax.f32 %v1905_v29, 0.0  ;;  %17265 = vst [vmem:[#allocation142_spill] sm:$0xff] %v13083_v7  ;;  %v13087_v26 = vpack.i.bf16 %v12835_v41, %v13059_v4  ;;  %v17356_v41 = vld [vmem:[#allocation40_spill] sm:$0xff] }
 0x296   : > { %v8642_v58 = vpop.f32.mrf.mxu0  ;;  %17264 = vst [vmem:[#allocation141_spill] sm:$0xff] %v13073_v16  ;;  %v2099_v8 = vsel %vm1975_vm2, %v2013_v62, 0.0  ;;  %v16657_v23 = vrot.slane %v13073_v16, 1  ;;  %v13100_v34 = vsel %vm16737_vm8, %v17269_v38, %v17268_v0  ;;  %v2374_v62 = vrot.slane %v2100_v19, 2 }
 0x297   : > { %v1908_v53 = vadd.f32 %v8642_v58, %v12444_v20  ;;  %17266 = vst [vmem:[#allocation143_spill] sm:$0xff] %v13087_v26  ;;  %v1939_v29 = vmax.f32 %v1897_v30, 0.0  ;;  %v13092_v58 = vsel %vm1975_vm2, 0.0, %v2012_v15  ;;  %v2021_v30 = vrot.slane %v1941_v52, 7 }
 0x298   : > { %v1899_v3 = vpop.f32.mrf.mxu0  ;;  %17267 = vst [vmem:[#allocation144_spill] sm:$0xff] %v13092_v58  ;;  %9567 = vrot.lane.b32.xlu1 %v12922_v56, %s10146_s16  ;;  %v2197_v15 = vrot.slane %v13083_v7, 1  ;;  %v2196_v19 = vrot.slane %v13092_v58, 1  ;;  %v16661_v26 = vrot.slane %v13083_v7, 2  ;;  %v13127_v0 = vsel %vm16736_vm1, %v16657_v23, %v2204_v13  ;;  %v17324_v58 = vld [vmem:[#allocation18_spill] sm:$0xff] }
 0x299   : > { %v1942_v63 = vmax.f32 %v1908_v53, 0.0  ;;  %v1900_v46 = vadd.f32 %v12444_v20, %v1899_v3  ;;  %v17270_v20 = vpack.i.bf16 %v12962_v27, %v12682_v54  ;;  %v2199_v3 = vrot.slane %v2099_v8, 1  ;;  %17272 = vst [vmem:[#allocation146_spill] sm:$0xff] %v13127_v0  ;;  %v17355_v0 = vld [vmem:[#allocation110_spill] sm:$0xff] }
 0x29a   : > { %v2018_v52 = vrot.slane %v1939_v29, 7  ;;  %v2369_v54 = vrot.slane %v2099_v8, 2  ;;  %v17273_v29 = vrot.slane %v13073_v16, 2  ;;  %v13140_v8 = vpack.i.bf16 %v12845_v43, %v13070_v18 }
 0x29b   : > { %v2022_v53 = vrot.slane %v1942_v63, 7  ;;  %9587 = vrot.lane.b32.xlu0 %v17270_v20, %s10141_s19  ;;  %v1940_v56 = vmax.f32 %v1900_v46, 0.0  ;;  %v13143_v38 = vsel %vm16736_vm1, %v2197_v15, %v2199_v3  ;;  %v13146_v13 = vsel %vm1975_vm2, 0.0, %v2021_v30 }
 0x29c   : > { %v13132_v46 = vsel %vm16737_vm8, %v17273_v29, %v2374_v62  ;;  %9572 = vrot.lane.b32.xlu1 %v12926_v61, %s10147_s23  ;;  %17275 = vst [vmem:[#allocation148_spill] sm:$0xff] %v13143_v38  ;;  %17276 = vst [vmem:[#allocation149_spill] sm:$0xff] %v13146_v13  ;;  %v13150_v62 = vpack.i.bf16 %v12855_v33, %v13100_v34  ;;  %v13153_v29 = vsel %vm1975_vm2, 0.0, %v2018_v52  ;;  %v17278_v20 = vrot.slane %v12881_v17, 1 }
 0x29d   : > { %v13116_v63 = vsel %vm1975_vm2, %v2021_v30, %v2022_v53  ;;  %17274 = vst [vmem:[#allocation147_spill] sm:$0xff] %v13132_v46  ;;  %17277 = vst [vmem:[#allocation150_spill] sm:$0xff] %v13153_v29  ;;  %v2019_v61 = vrot.slane %v1940_v56, 7  ;;  %v17279_v27 = vrot.slane %v12858_v5, 1  ;;  %v13165_v30 = vsel %vm16737_vm8, %v16661_v26, %v2369_v54 }
 0x29e   : > { %17271 = vst [vmem:[#allocation145_spill] sm:$0xff] %v13116_v63  ;;  %17281 = vst [vmem:[#allocation152_spill] sm:$0xff] %v13165_v30  ;;  %v13169_v3 = vpack.i.bf16 %v12881_v17, %v12858_v5  ;;  %v17283_v56 = vrot.slane %v12858_v5, 2  ;;  %v17286_v54 = vpack.i.bf16 %v12897_v31, %v12775_v50  ;;  %v17287_v26 = vrot.slane %v12861_v45, 1  ;;  %v10042_v31 = vld [vmem:[%s16319_s3 + $0x8] sm:$0xff]  }
 0x29f   : > { %9597 = vrot.lane.b32.xlu0 %v12969_v60, %s10146_s16  ;;  %v13160_v23 = vsel %vm16736_vm1, %v17279_v27, %v17278_v20  ;;  %v13181_v20 = vsel %vm1975_vm2, %v2022_v53, 0.0  ;;  %v2206_v27 = vrot.slane %v13153_v29, 1  ;;  %v17292_v53 = vrot.slane %v12972_v47, 1  ;;  %v17358_v47 = vld [vmem:[#allocation74_spill] sm:$0xff] }
 0x2a0   : > { %17280 = vst [vmem:[#allocation151_spill] sm:$0xff] %v13160_v23  ;;  %v13176_v48 = vsel %vm16737_vm8, %v17283_v56, %v17282_v40  ;;  %17285 = vst [vmem:[#allocation154_spill] sm:$0xff] %v13181_v20  ;;  %9582 = vrot.lane.b32.xlu1 %v17286_v54, %s10140_s18  ;;  %v17288_v40 = vrot.slane %v12848_v2, 1  ;;  %v13206_v54 = vsel %vm1975_vm2, %v2018_v52, %v2019_v61  ;;  %v3399_v50 = vsel %vm1746_vm9, %v12765_v39, 0  ;;  %v17325_v20 = vld [vmem:[#allocation64_spill] sm:$0xff] }
 0x2a1   : > { %17284 = vst [vmem:[#allocation153_spill] sm:$0xff] %v13176_v48  ;;  %17290 = vst [vmem:[#allocation156_spill] sm:$0xff] %v13206_v54  ;;  %v13223_v52 = vpack.i.bf16 %v12949_v21, %v13160_v23  ;;  %8644 = vmatpush3.bf16.msra.mxu1 %v3399_v50  ;;  %v17295_v29 = vpack.i.bf16 %v12909_v22, %v12781_v57  ;;  %v17296_v39 = vrot.slane %v12975_v10, 1  ;;  %v13244_v50 = vsel %vm1746_vm9, %v12888_v1, 0  ;;  %v17380_v23 = vld [vmem:[#allocation50_spill] sm:$0xff] }
 0x2a2   : > { %v13194_v56 = vsel %vm16736_vm1, %v17288_v40, %v17287_v26  ;;  %v17291_v40 = vrot.slane %v12993_v11, 1  ;;  %v13240_v5 = vsel %vm16736_vm1, %v2196_v19, %v2197_v15  ;;  %17300 = vst [vmem:[#allocation161_spill] sm:$0xff] %v13244_v50  ;;  %v17302_v26 = vrot.slane %v12848_v2, 2  ;;  %8645 = vmatprep.subr.bf16.mxu1 %v10042_v31  ;;  %v10043_v19 = vld [vmem:[%s16319_s3] sm:$0xff]   ;;  %8682 = vmatpush3.bf16.msra.mxu0 %v13244_v50 }
 0x2a3   : > { %9602 = vrot.lane.b32.xlu0 %v12990_v59, %s10147_s23  ;;  %17289 = vst [vmem:[#allocation155_spill] sm:$0xff] %v13194_v56  ;;  %17294 = vst [vmem:[#allocation158_spill] sm:$0xff] %v13223_v52  ;;  %v17305_v46 = vrot.slane %v13073_v16, 1  ;;  %v17306_v57 = vrot.slane %v13051_v9, 1  ;;  %v17310_v9 = vrot.slane %v12380_v32, 2  ;;  %v17326_v50 = vrot.slane %v12353_v37, 7 }
 0x2a4   : > { %v13215_v17 = vsel %vm16736_vm1, %v17292_v53, %v17291_v40  ;;  %9592 = vrot.lane.b32.xlu1 %v17295_v29, %s10141_s19  ;;  %v17297_v53 = vrot.slane %v12929_v6, 1  ;;  %17299 = vst [vmem:[#allocation160_spill] sm:$0xff] %v13240_v5  ;;  %v17301_v29 = vrot.slane %v12861_v45, 2  ;;  %v17330_v5 = vld [vmem:[#allocation41_spill] sm:$0xff] }
 0x2a5   : > { %17293 = vst [vmem:[#allocation157_spill] sm:$0xff] %v13215_v17  ;;  %v13270_v22 = vsel %vm16736_vm1, %v17306_v57, %v17305_v46  ;;  %8646 = vmatpush3.bf16.msra.mxu1 %v10042_v31  ;;  %v17309_v57 = vrot.slane %v12327_v28, 7  ;;  %v13304_v31 = vpack.i.bf16 %v12861_v45, %v12848_v2  ;;  %v17315_v28 = vld [vmem:[#allocation91_spill] sm:$0xff]  ;;  %v17331_v38 = vrot.slane %v17330_v5, 7  ;;  %v17346_v6 = vld [vmem:[#allocation33_spill] sm:$0xff] }
 0x2a6   : > { %v13237_v40 = vsel %vm16736_vm1, %v17297_v53, %v17296_v39  ;;  %v13255_v39 = vsel %vm16737_vm8, %v17302_v26, %v17301_v29  ;;  %v13263_v53 = vpack.i.bf16 %v12954_v55, %v13176_v48  ;;  %17307 = vst [vmem:[#allocation164_spill] sm:$0xff] %v13270_v22  ;;  %v4987_v26 = vcombine.high %v12353_v37, %v12353_v37  ;;  %v17334_v22 = vld [vmem:[#allocation77_spill] sm:$0xff]  ;;  %v17336_v55 = vld [vmem:[#allocation52_spill] sm:$0xff] }
 0x2a7   : > { %9617 = vrot.lane.b32.xlu0 %v13012_v35, %s10142_s20  ;;  %17298 = vst [vmem:[#allocation159_spill] sm:$0xff] %v13237_v40  ;;  %17303 = vst [vmem:[#allocation162_spill] sm:$0xff] %v13255_v39  ;;  %v17308_v29 = vcombine.high %v12335_v36, %v12335_v36  ;;  %v13293_v30 = vsel %vm10310_vm7, %v17310_v9, %v17309_v57  ;;  %v13296_v36 = vsel %vm1975_vm2, %v2019_v61, 0.0  ;;  %v17317_v9 = vrot.slane %v13206_v54, 1  ;;  %v17320_v57 = vld [vmem:[#allocation68_spill] sm:$0xff] }
 0x2a8   : > { %17304 = vst [vmem:[#allocation163_spill] sm:$0xff] %v13263_v53  ;;  %17312 = vst [vmem:[#allocation165_spill] sm:$0xff] %v13296_v36  ;;  %9607 = vrot.lane.b32.xlu1 %v12969_v60, %s10143_s21  ;;  %v17316_v46 = vcombine.high %v17315_v28, %v17315_v28  ;;  %v13319_v60 = vpack.i.bf16 %v12918_v44, %v13194_v56  ;;  %8647 = vmatprep.subr.bf16.mxu1 %v10043_v19  ;;  %v5636_v45 = vrot.slane %v4987_v26, 7  ;;  %v17321_v28 = vld [vmem:[#allocation72_spill] sm:$0xff]  ;;  %v17337_v44 = vld [vmem:[#allocation21_spill] sm:$0xff]  ;;  %vm6985_vm2 = vcmask 1041409  }
 0x2a9   : > { %v13279_v15 = vrot.slane %v17308_v29, %v17109_v24  ;;  %v17313_v29 = vld [vmem:[#allocation61_spill] sm:$0xff]  ;;  %v13315_v61 = vsel %vm16736_vm1, %v2206_v27, %v17317_v9  ;;  %v5068_v63 = vcombine.high %v17320_v57, %v17320_v57  ;;  %8648 = vmatpush3.bf16.msra.mxu1 %v10043_v19  ;;  %v13338_v26 = vsel %vm10310_vm7, %v17325_v20, %v17324_v58  ;;  %v17329_v19 = vld [vmem:[#allocation140_spill] sm:$0xff] }
 0x2aa   : > { %17314 = vst [vmem:[#allocation61_spill] sm:$0xff] %v13304_v31  ;;  %v13310_v13 = vrot.slane %v17316_v46, %v17109_v24  ;;  %17318 = vst [vmem:[#allocation91_spill] sm:$0xff] %v13315_v61  ;;  %v5109_v46 = vcombine.high %v17321_v28, %v17321_v28  ;;  %v17322_v24 = vld [vmem:[#allocation87_spill] sm:$0xff]  ;;  %v17323_v9 = vld [vmem:[#allocation69_spill] sm:$0xff]  ;;  %v5638_v14 = vrot.slane %v5636_v45, 2  ;;  %v17335_v53 = vrot.slane %v17334_v22, 7  ;;  %8696 = vmatprep.subr.msk.bf16.mxu1 %vm1746_vm9, %v12888_v1 }
 0x2ab   : > { %9627 = vrot.lane.b32.xlu0 %v17313_v29, %s10145_s15  ;;  %17319 = vst [vmem:[#allocation166_spill] sm:$0xff] %v13319_v60  ;;  %v5069_v2 = vcombine.high %v13279_v15, %v13279_v15  ;;  %v13331_v27 = vsel %vm10310_vm7, %v17322_v24, %v12380_v32  ;;  %v5651_v7 = vrot.slane %v17323_v9, 2  ;;  %v17327_v60 = vrot.slane %v17324_v58, 2  ;;  %v17342_v22 = vld [vmem:[#allocation78_spill] sm:$0xff] }
 0x2ac   : > { %v17328_v24 = vmov %v17326_v50  ;;  %9612 = vrot.lane.b32.xlu1 %v12990_v59, %s10144_s22  ;;  %v5110_v20 = vcombine.high %v13310_v13, %v13310_v13  ;;  %v13369_v59 = vsel %vm10310_vm7, %v5638_v14, %v17335_v53  ;;  %v17338_v40 = vrot.slane %v17337_v44, 9  ;;  %v17343_v14 = vld [vmem:[#allocation58_spill] sm:$0xff] }
 0x2ad   : > { %v13346_v31 = vsel %vm10310_vm7, %v17327_v60, %v17326_v50  ;;  %v5635_v32 = vrot.slane %v17328_v24, 2  ;;  %v13360_v58 = vsel %vm10310_vm7, %v5651_v7, %v17331_v38  ;;  %v17332_v50 = vmov %v17331_v38  ;;  %v17333_v60 = vld [vmem:[#allocation9_spill] sm:$0xff] }
 0x2ae   : > { %v5654_v37 = vrot.slane %v17332_v50, 2  ;;  %v5658_v24 = vrot.slane %v17333_v60, 7  ;;  %v13376_v52 = vsel %vm10310_vm7, %v17338_v40, %v17336_v55  ;;  %v17339_v7 = vld [vmem:[#allocation53_spill] sm:$0xff]  ;;  %v17341_v5 = vrot.slane %v17336_v55, 2  ;;  %v17344_v40 = vld [vmem:[#allocation59_spill] sm:$0xff] }
 0x2af   : > { %9637 = vrot.lane.b32.xlu0 %v17329_v19, %s10143_s21  ;;  %v17340_v38 = vrot.slane %v17339_v7, 7  ;;  %v5676_v60 = vrot.slane %v17342_v22, 2  ;;  %v13393_v44 = vsel %vm10310_vm7, %v17343_v14, %v17323_v9  ;;  %v5657_v53 = vrot.slane %v17344_v40, 2 }
 0x2b0   : > { %v5680_v7 = vrot.slane %v5068_v63, 7  ;;  %v5683_v55 = vrot.slane %v13279_v15, 7  ;;  %v17347_v10 = vrot.slane %v17346_v6, 9  ;;  %v17348_v12 = vrot.slane %v17320_v57, 7  ;;  %9622 = vrot.lane.b32.xlu1 %v13012_v35, %s10145_s15  ;;  %v17350_v15 = vld [vmem:[#allocation102_spill] sm:$0xff] }
 0x2b1   : > { %v13384_v50 = vsel %vm10310_vm7, %v17341_v5, %v17340_v38  ;;  %v13399_v38 = vsel %vm10310_vm7, %v5635_v32, %v5636_v45  ;;  %v17345_v5 = vld [vmem:[#allocation73_spill] sm:$0xff]  ;;  %v5686_v63 = vrot.slane %v5069_v2, 7  ;;  %v17349_v45 = vld [vmem:[#allocation143_spill] sm:$0xff]  ;;  %v13421_v6 = vsel %vm10310_vm7, %v5654_v37, %v17344_v40 }
 0x2b2   : > { %v13406_v1 = vsel %vm10310_vm7, %v17347_v10, %v17345_v5  ;;  %v13412_v9 = vsel %vm10310_vm7, %v5676_v60, %v17348_v12  ;;  %v5660_v10 = vrot.slane %v5658_v24, 2  ;;  %v17351_v32 = vrot.slane %v17350_v15, 7 }
 0x2b3   : > { %9642 = vrot.lane.b32.xlu0 %v17349_v45, %s10144_s22  ;;  %v17352_v14 = vrot.slane %v17345_v5, 2  ;;  %v17354_v60 = vrot.slane %v17320_v57, 7  ;;  %v5682_v17 = vrot.slane %v5680_v7, 2  ;;  %v5688_v61 = vrot.slane %v5686_v63, 2 }
 0x2b4   : > { %v17353_v2 = vmov %v17351_v32  ;;  %v5701_v37 = vrot.slane %v17355_v0, 2  ;;  %v5685_v40 = vrot.slane %v5683_v55, 2  ;;  %v17357_v48 = vrot.slane %v17356_v41, 7  ;;  %9632 = vrot.lane.b32.xlu1 %v17313_v29, %s10142_s20 }
 0x2b5   : > { %v13429_v12 = vsel %vm10310_vm7, %v17352_v14, %v17351_v32  ;;  %v5673_v35 = vrot.slane %v17353_v2, 2  ;;  %v5679_v45 = vrot.slane %v17354_v60, 2  ;;  %v5705_v56 = vrot.slane %v5109_v46, 7  ;;  %v17364_v46 = vld [vmem:[#allocation11_spill] sm:$0xff] }
 0x2b6   : > { %v5698_v21 = vrot.slane %v17357_v48, 2  ;;  %v5708_v5 = vrot.slane %v13310_v13, 7  ;;  %v17359_v32 = vrot.slane %v17358_v47, 7  ;;  %v17361_v57 = vrot.slane %v17321_v28, 7 }
 0x2b7   : > { %v5711_v11 = vrot.slane %v5110_v20, 7  ;;  %v17363_v48 = vpack.i.bf16 %v13070_v18, %v12749_v49  ;;  %v13461_v47 = vsel %vm10310_vm7, %v5657_v53, %v5658_v24  ;;  %v13466_v13 = vsel %vm10310_vm7, %v5673_v35, %v17342_v22  ;;  %v17365_v49 = vld [vmem:[#allocation96_spill] sm:$0xff] }
 0x2b8   : > { %v13443_v15 = vsel %vm10310_vm7, %v5688_v61, %v17359_v32  ;;  %v13449_v14 = vsel %vm10310_vm7, %v5701_v37, %v17361_v57  ;;  %v17362_v2 = vmov %v17361_v57  ;;  %v5707_v61 = vrot.slane %v5705_v56, 2  ;;  %v17366_v18 = vld [vmem:[#allocation88_spill] sm:$0xff] }
 0x2b9   : > { %17360 = vst [vmem:[#allocation68_spill] sm:$0xff] %v13443_v15  ;;  %v5704_v60 = vrot.slane %v17362_v2, 2  ;;  %9647 = vrot.lane.b32.xlu0 %v17363_v48, %s10140_s18  ;;  %v5710_v28 = vrot.slane %v5708_v5, 2  ;;  %v5662_v29 = vsel %vm10310_vm7, %v5660_v10, %v17364_v46  ;;  %v13473_v20 = vsel %vm10310_vm7, %v5679_v45, %v5680_v7 }
 0x2ba   : > { %v17367_v37 = vrot.slane %v17366_v18, 9  ;;  %v5713_v53 = vrot.slane %v5711_v11, 2  ;;  %v13484_v22 = vsel %vm10310_vm7, %v5682_v17, %v5683_v55  ;;  %v13488_v35 = vsel %vm10310_vm7, %v5685_v40, %v5686_v63  ;;  %v17373_v55 = vld [vmem:[#allocation86_spill] sm:$0xff] }
 0x2bb   : > { %17368 = vst [vmem:[#allocation72_spill] sm:$0xff] %v13488_v35  ;;  %v17369_v10 = vrot.slane %v17356_v41, 7  ;;  %v17370_v7 = vrot.slane %v17365_v49, 2  ;;  %v13501_v32 = vsel %vm10310_vm7, %v5698_v21, %v17355_v0  ;;  %v13505_v17 = vsel %vm10310_vm7, %v5704_v60, %v5705_v56 }
 0x2bc   : > { %v13480_v24 = vsel %vm10310_vm7, %v17367_v37, %v17365_v49  ;;  %17372 = vst [vmem:[#allocation69_spill] sm:$0xff] %v13505_v17  ;;  %v17374_v63 = vrot.slane %v17373_v55, 7  ;;  %v8419_v40 = vrot.slane %v13331_v27, 9  ;;  %v8420_v57 = vrot.slane %v13293_v30, 9 }
 0x2bd   : > { %v13496_v45 = vsel %vm10310_vm7, %v17370_v7, %v17369_v10  ;;  %v17375_v2 = vpack.i.bf16 %v13038_v51, %v12845_v43  ;;  %v17376_v21 = vpack.i.bf16 %v13100_v34, %v12770_v25  ;;  %v13525_v0 = vsel %vm10310_vm7, %v5707_v61, %v5708_v5 }
 0x2be   : > { %17371 = vst [vmem:[#allocation87_spill] sm:$0xff] %v13496_v45  ;;  %v13511_v41 = vsel %vm10310_vm7, %v5713_v53, %v17374_v63  ;;  %17377 = vst [vmem:[#allocation18_spill] sm:$0xff] %v13525_v0  ;;  %v13529_v56 = vsel %vm10310_vm7, %v5710_v28, %v5711_v11  ;;  %v8421_v60 = vrot.slane %v13338_v26, 9  ;;  %v8422_v48 = vrot.slane %v13346_v31, 9 }
 0x2bf   : > { %9652 = vrot.lane.b32.xlu1 %v17375_v2, %s10140_s18  ;;  %9657 = vrot.lane.b32.xlu0 %v17376_v21, %s10141_s19  ;;  %17378 = vst [vmem:[#allocation64_spill] sm:$0xff] %v13529_v56  ;;  %v8423_v43 = vrot.slane %v13399_v38, 9  ;;  %v8424_v51 = vrot.slane %v13369_v59, 9  ;;  %v8425_v46 = vrot.slane %v13376_v52, 9  ;;  %v8426_v34 = vrot.slane %v13384_v50, 9 }
 0x2c0   : > { %v8427_v25 = vrot.slane %v13393_v44, 9  ;;  %v8428_v5 = vrot.slane %v13360_v58, 9  ;;  %v8429_v61 = vrot.slane %v13421_v6, 9  ;;  %v8430_v11 = vrot.slane %v13461_v47, 9 }
 0x2c1   : > { %v8431_v28 = vrot.slane %v5662_v29, 9  ;;  %v8433_v49 = vrot.slane %v13406_v1, 9  ;;  %v8434_v18 = vrot.slane %v13429_v12, 9  ;;  %v8435_v37 = vrot.slane %v13466_v13, 9 }
 0x2c2   : > { %v17379_v53 = vpack.i.bf16 %v13059_v4, %v12855_v33  ;;  %v8436_v10 = vrot.slane %v13412_v9, 9  ;;  %v8437_v7 = vrot.slane %v13473_v20, 9  ;;  %v8438_v55 = vrot.slane %v13484_v22, 9 }
 0x2c3   : > { %9667 = vrot.lane.b32.xlu0 %v13140_v8, %s10146_s16  ;;  %v8439_v63 = vrot.slane %v13488_v35, 9  ;;  %v8440_v2 = vrot.slane %v13443_v15, 9  ;;  %v8441_v21 = vrot.slane %v13480_v24, 9  ;;  %v8442_v16 = vrot.slane %v13496_v45, 9 }
 0x2c4   : > { %9662 = vrot.lane.b32.xlu1 %v17379_v53, %s10141_s19  ;;  %v8443_v4 = vrot.slane %v13501_v32, 9  ;;  %v8444_v33 = vrot.slane %v13449_v14, 9  ;;  %v8445_v53 = vrot.slane %v13505_v17, 9  ;;  %v8446_v39 = vrot.slane %v13525_v0, 9 }
 0x2c5   : > { %v8447_v42 = vrot.slane %v13529_v56, 9  ;;  %v17381_v19 = vrot.slane %v17380_v23, 9  ;;  %v6530_v15 = vadd.f32 %v8419_v40, %v13331_v27  ;;  %v6531_v35 = vadd.f32 %v8420_v57, %v13293_v30  ;;  %v13582_v40 = vpop.permute.xlu0 %9392 }
 0x2c6   : > { %v6532_v45 = vadd.f32 %v8421_v60, %v13338_v26  ;;  %v8448_v0 = vrot.slane %v13511_v41, 9  ;;  %v6533_v56 = vadd.f32 %v8422_v48, %v13346_v31  ;;  %v6534_v17 = vadd.f32 %v8423_v43, %v13399_v38  ;;  %v17382_v38 = vld [vmem:[#allocation17_spill] sm:$0xff] }
 0x2c7   : > { %v6529_v54 = vadd.f32 %v17381_v19, %v17380_v23  ;;  %9672 = vrot.lane.b32.xlu0 %v13150_v62, %s10147_s23  ;;  %v6535_v23 = vadd.f32 %v8424_v51, %v13369_v59  ;;  %v6536_v27 = vadd.f32 %v8425_v46, %v13376_v52  ;;  %v6537_v30 = vadd.f32 %v8426_v34, %v13384_v50  ;;  %v17385_v51 = vld [vmem:[#allocation69_spill] sm:$0xff] }
 0x2c8   : > { %9677 = vrot.lane.b32.xlu1 %v13140_v8, %s10143_s21  ;;  %v6538_v26 = vadd.f32 %v8427_v25, %v13393_v44  ;;  %v6539_v19 = vadd.f32 %v8428_v5, %v13360_v58  ;;  %v13580_v8 = vpop.permute.xlu1 %9397  ;;  %v6540_v57 = vadd.f32 %v8429_v61, %v13421_v6  ;;  %v6541_v31 = vadd.f32 %v8430_v11, %v13461_v47  ;;  %v17386_v25 = vld [vmem:[#allocation18_spill] sm:$0xff]  ;;  %v17387_v61 = vld [vmem:[#allocation76_spill] sm:$0xff] }
 0x2c9   : > { %v6542_v60 = vadd.f32 %v8431_v28, %v5662_v29  ;;  %v17383_v59 = vrot.slane %v17382_v38, 9  ;;  %v6544_v52 = vadd.f32 %v8433_v49, %v13406_v1  ;;  %v6545_v50 = vadd.f32 %v8434_v18, %v13429_v12  ;;  %v17384_v29 = vld [vmem:[#allocation87_spill] sm:$0xff]  ;;  %v13605_v34 = vpop.permute.xlu0 %9407  ;;  %v17388_v28 = vld [vmem:[#allocation72_spill] sm:$0xff] }
 0x2ca   : > { %v6546_v44 = vadd.f32 %v8435_v37, %v13466_v13  ;;  %v6547_v58 = vadd.f32 %v8436_v10, %v13412_v9  ;;  %v2209_v43 = vrot.slane %v13296_v36, 1  ;;  %v6548_v6 = vadd.f32 %v8437_v7, %v13473_v20  ;;  %v17389_v49 = vld [vmem:[#allocation68_spill] sm:$0xff] }
 0x2cb   : > { %v6543_v48 = vadd.f32 %v17383_v59, %v17382_v38  ;;  %9692 = vrot.lane.b32.xlu0 %v13169_v3, %s10145_s15  ;;  %v6549_v47 = vadd.f32 %v8438_v55, %v13484_v22  ;;  %v6552_v1 = vadd.f32 %v8441_v21, %v13480_v24  ;;  %v6553_v12 = vadd.f32 %v8442_v16, %v17384_v29  ;;  %v17390_v18 = vld [vmem:[#allocation64_spill] sm:$0xff]  ;;  %v17393_v55 = vld [vmem:[#allocation151_spill] sm:$0xff]  ;;  %v17396_v38 = vld [vmem:[#allocation162_spill] sm:$0xff] }
 0x2cc   : > { %9682 = vrot.lane.b32.xlu1 %v13150_v62, %s10144_s22  ;;  %v6554_v13 = vadd.f32 %v8443_v4, %v13501_v32  ;;  %v6555_v9 = vadd.f32 %v8444_v33, %v13449_v14  ;;  %v6556_v46 = vadd.f32 %v8445_v53, %v17385_v51  ;;  %v13607_v62 = vpop.permute.xlu1 %9402  ;;  %v6557_v5 = vadd.f32 %v8446_v39, %v17386_v25  ;;  %v17391_v37 = vld [vmem:[#allocation156_spill] sm:$0xff]  ;;  %v17394_v39 = vld [vmem:[#allocation25_spill] sm:$0xff]  ;;  %v17398_v51 = vld [vmem:[#allocation51_spill] sm:$0xff] }
 0x2cd   : > { %v6656_v20 = vadd.f32 %v6536_v27, %v17387_v61  ;;  %v6657_v11 = vadd.f32 %v6537_v30, %v6529_v54  ;;  %v6658_v22 = vadd.f32 %v6538_v26, %v6530_v15  ;;  %v6550_v24 = vadd.f32 %v8439_v63, %v17388_v28  ;;  %v17392_v7 = vld [vmem:[#allocation140_spill] sm:$0xff]  ;;  %v17397_v59 = vld [vmem:[#allocation45_spill] sm:$0xff]  ;;  %v17414_v28 = vld [vmem:[#allocation67_spill] sm:$0xff] }
 0x2ce   : > { %v6551_v16 = vadd.f32 %v8440_v2, %v17389_v49  ;;  %v6558_v32 = vadd.f32 %v8447_v42, %v17390_v18  ;;  %v6559_v14 = vadd.f32 %v8448_v0, %v13511_v41  ;;  %v17395_v21 = vpack.i.bf16 %v17393_v55, %v17394_v39  ;;  %v13622_v42 = vpop.permute.xlu0 %9412 }
 0x2cf   : > { %v6659_v54 = vadd.f32 %v6539_v19, %v6531_v35  ;;  %v6660_v15 = vadd.f32 %v6540_v57, %v6532_v45  ;;  %v6661_v4 = vadd.f32 %v6541_v31, %v6533_v56  ;;  %v6662_v63 = vadd.f32 %v6542_v60, %v6534_v17  ;;  %v17400_v45 = vld [vmem:[#allocation48_spill] sm:$0xff]  ;;  %v17402_v19 = vld [vmem:[#allocation155_spill] sm:$0xff]  ;;  %v17405_v60 = vld [vmem:[#allocation153_spill] sm:$0xff] }
 0x2d0   : > { %9687 = vrot.lane.b32.xlu1 %v17392_v7, %s10146_s16  ;;  %9697 = vrot.lane.b32.xlu0 %v17395_v21, %s10140_s18  ;;  %v6663_v33 = vadd.f32 %v6543_v48, %v6535_v23  ;;  %v6664_v2 = vadd.f32 %v6552_v1, %v6544_v52  ;;  %v6665_v53 = vadd.f32 %v6553_v12, %v6545_v50  ;;  %v13624_v41 = vpop.permute.xlu1 %9417  ;;  %v17399_v35 = vrot.slane %v17398_v51, 2  ;;  %v17403_v57 = vld [vmem:[#allocation47_spill] sm:$0xff] }
 0x2d1   : > { %v6666_v0 = vadd.f32 %v6554_v13, %v6546_v44  ;;  %v6667_v27 = vadd.f32 %v6555_v9, %v6547_v58  ;;  %v6668_v30 = vadd.f32 %v6556_v46, %v6548_v6  ;;  %v6669_v26 = vadd.f32 %v6557_v5, %v6549_v47  ;;  %v17406_v48 = vld [vmem:[#allocation27_spill] sm:$0xff]  ;;  %v17410_v47 = vld [vmem:[#allocation146_spill] sm:$0xff]  ;;  %v17412_v9 = vld [vmem:[#allocation157_spill] sm:$0xff] }
 0x2d2   : > { %v13628_v29 = vpack.i.bf16 %v17397_v59, %v17396_v38  ;;  %v17401_v56 = vrot.slane %v17400_v45, 2  ;;  %v17404_v31 = vpack.i.bf16 %v17402_v19, %v17403_v57  ;;  %v17407_v52 = vpack.i.bf16 %v17405_v60, %v17406_v48  ;;  %v17411_v1 = vld [vmem:[#allocation91_spill] sm:$0xff]  ;;  %v17413_v46 = vld [vmem:[#allocation65_spill] sm:$0xff]  ;;  %v9428_v61 = vpop.permute.xlu0 %9427 }
 0x2d3   : > { %v17408_v50 = vrot.slane %v17391_v37, 1  ;;  %v6670_v58 = vadd.f32 %v6558_v32, %v6550_v24  ;;  %v6671_v6 = vadd.f32 %v6559_v14, %v6551_v16  ;;  %v13655_v13 = vpack.i.bf16 %v17398_v51, %v17400_v45  ;;  %v17415_v24 = vld [vmem:[#allocation60_spill] sm:$0xff]  ;;  %v17417_v16 = vld [vmem:[#allocation37_spill] sm:$0xff]  ;;  %v17419_v57 = vld [vmem:[#allocation143_spill] sm:$0xff] }
 0x2d4   : > { %v13635_v17 = vsel %vm16737_vm8, %v17401_v56, %v17399_v35  ;;  %9702 = vrot.lane.b32.xlu1 %v17404_v31, %s10140_s18  ;;  %9707 = vrot.lane.b32.xlu0 %v17407_v52, %s10141_s19  ;;  %v13659_v25 = vpack.i.bf16 %v17413_v46, %v17412_v9  ;;  %v13661_v5 = vpop.permute.xlu1 %9422  ;;  %v17416_v49 = vrot.slane %v17415_v24, 2  ;;  %v17418_v18 = vrot.slane %v17417_v16, 2  ;;  %v17420_v31 = vld [vmem:[#allocation158_spill] sm:$0xff] }
 0x2d5   : > { %v13649_v44 = vsel %vm16736_vm1, %v17408_v50, %v2209_v43  ;;  %v13665_v43 = vpack.i.bf16 %v17414_v28, %v13635_v17  ;;  %v9394_v35 = vunpack.i.l.bf16 %v13582_v40  ;;  %v9404_v48 = vunpack.i.l.bf16 %v13607_v62 }
 0x2d6   : > { %17409 = vst [vmem:[#allocation41_spill] sm:$0xff] %v13649_v44  ;;  %v13672_v32 = vsel %vm16737_vm8, %v17418_v18, %v17416_v49  ;;  %v6720_v50 = vmul.f32 0.25, %v6656_v20  ;;  %v9438_v39 = vpop.permute.xlu0 %9437  ;;  %v13694_v55 = vmul.f32 0.25, %v6657_v11  ;;  %v13696_v56 = vmul.f32 0.25, %v6658_v22  ;;  %v17421_v20 = vld [vmem:[#allocation159_spill] sm:$0xff]  ;;  %v17423_v18 = vld [vmem:[#allocation44_spill] sm:$0xff] }
 0x2d7   : > { %v13698_v21 = vmul.f32 0.25, %v6659_v54  ;;  %v13700_v12 = vmul.f32 0.25, %v6660_v15  ;;  %v9429_v14 = vunpack.i.l.bf16 %v9428_v61  ;;  %v9440_v52 = vunpack.i.h.bf16 %v9438_v39 }
 0x2d8   : > { %9717 = vrot.lane.b32.xlu1 %v17419_v57, %s10147_s23  ;;  %9712 = vrot.lane.b32.xlu0 %v17420_v31, %s10146_s16  ;;  %v9433_v23 = vpop.permute.xlu1 %9432  ;;  %v9430_v57 = vunpack.i.h.bf16 %v9428_v61  ;;  %v17422_v49 = vpack.i.bf16 %v17421_v20, %v17413_v46  ;;  %v17424_v10 = vpack.i.bf16 %v17412_v9, %v17423_v18  ;;  %v13710_v11 = vmul.f32 0.25, %v6661_v4 }
 0x2d9   : > { %v13712_v22 = vmul.f32 0.25, %v6662_v63  ;;  %v13714_v54 = vmul.f32 0.25, %v6663_v33  ;;  %v13716_v15 = vmul.f32 0.25, %v6664_v2  ;;  %v13718_v61 = vmul.f32 0.25, %v6665_v53  ;;  %v17425_v63 = vld [vmem:[#allocation23_spill] sm:$0xff] }
 0x2da   : > { %v13720_v7 = vmul.f32 0.25, %v6666_v0  ;;  %v9439_v19 = vunpack.i.l.bf16 %v9438_v39  ;;  %v13728_v4 = vmul.f32 0.25, %v6667_v27  ;;  %v3054_v33 = vsel %vm1390_vm10, %v17425_v63, %v9430_v57  ;;  %v17426_v39 = vld [vmem:[#allocation39_spill] sm:$0xff] }
 0x2db   : > { %v13732_v2 = vmul.f32 0.25, %v6668_v30  ;;  %v13734_v53 = vmul.f32 0.25, %v6669_v26  ;;  %v6784_v0 = vpack.c.bf16 %v6720_v50, %v6720_v50  ;;  %v3053_v9 = vsel %vm1390_vm10, 0.0, %v9429_v14  ;;  %v17428_v27 = vld [vmem:[#allocation163_spill] sm:$0xff] }
 0x2dc   : > { %9732 = vrot.lane.b32.xlu1 %v17422_v49, %s10140_s18  ;;  %9722 = vrot.lane.b32.xlu0 %v17424_v10, %s10140_s18  ;;  %v13724_v60 = vpop.permute.xlu1 %9442  ;;  %v13726_v10 = vpop.permute.xlu0 %9457  ;;  %v9435_v18 = vunpack.i.h.bf16 %v9433_v23  ;;  %v3085_v46 = vsel %vm1423_vm11, %v3054_v33, %v9440_v52  ;;  %v17427_v49 = vpack.i.bf16 %v17396_v38, %v17426_v39  ;;  %v13744_v45 = vmul.f32 0.25, %v6670_v58  ;;  %v17431_v39 = vld [vmem:[#allocation148_spill] sm:$0xff] }
 0x2dd   : > { %v9434_v30 = vunpack.i.l.bf16 %v9433_v23  ;;  %v13746_v57 = vmul.f32 0.25, %v6671_v6  ;;  %v6785_v26 = vpack.c.bf16 %v13694_v55, %v13694_v55  ;;  %v6786_v14 = vpack.c.bf16 %v13696_v56, %v13696_v56 }
 0x2de   : > { %v3084_v52 = vsel %vm1423_vm11, %v3053_v9, %v9439_v19  ;;  %v6787_v38 = vpack.c.bf16 %v13698_v21, %v13698_v21  ;;  %v6788_v58 = vpack.c.bf16 %v13700_v12, %v13700_v12  ;;  %v6789_v23 = vpack.c.bf16 %v13710_v11, %v13710_v11  ;;  %v17430_v11 = vld [vmem:[#allocation164_spill] sm:$0xff] }
 0x2df   : > { %v3117_v6 = vsel %vm1456_vm12, %v3085_v46, %v9394_v35  ;;  %v6790_v55 = vpack.c.bf16 %v13712_v22, %v13712_v22  ;;  %v6791_v56 = vpack.c.bf16 %v13714_v54, %v13714_v54  ;;  %v6920_v19 = vunpack.c.l.b16 %v6784_v0  ;;  %v17433_v22 = vld [vmem:[#allocation160_spill] sm:$0xff]  ;;  %v17434_v46 = vld [vmem:[#allocation55_spill] sm:$0xff] }
 0x2e0   : > { %9737 = vrot.lane.b32.xlu1 %v17427_v49, %s10141_s19  ;;  %9727 = vrot.lane.b32.xlu0 %v17428_v27, %s10147_s23  ;;  %v9448_v50 = vpop.permute.xlu1 %9447  ;;  %v13753_v63 = vpop.permute.xlu0 %9467  ;;  %v17429_v49 = vld [vmem:[#allocation116_spill] sm:$0xff]  ;;  %v9444_v21 = vunpack.i.l.bf16 %v13724_v60  ;;  %v17432_v35 = vpack.i.bf16 %v17430_v11, %v17431_v39  ;;  %v17435_v51 = vpack.i.bf16 %v17433_v22, %v17434_v46  ;;  %vm6990_vm9 = vcmask 1043459  }
 0x2e1   : > { %v13768_v33 = vsel %vm1390_vm10, %v17429_v49, %v9435_v18  ;;  %v9450_v12 = vunpack.i.h.bf16 %v9448_v50  ;;  %v9449_v9 = vunpack.i.l.bf16 %v9448_v50  ;;  %v17436_v54 = vld [vmem:[#allocation84_spill] sm:$0xff]  ;;  %v3115_v18 = vsel %vm1456_vm12, %v3084_v52, %v9404_v48 }
 0x2e2   : > { %v3055_v0 = vsel %vm1390_vm10, %v17436_v54, %v9434_v30  ;;  %v17437_v49 = vunpack.i.h.bf16 %v13607_v62  ;;  %v6792_v50 = vpack.c.bf16 %v13716_v15, %v13716_v15  ;;  %v6793_v15 = vpack.c.bf16 %v13718_v61, %v13718_v61 }
 0x2e3   : > { %v6794_v54 = vpack.c.bf16 %v13720_v7, %v13720_v7  ;;  %v6922_v11 = vunpack.c.l.b16 %v6786_v14  ;;  %v6923_v36 = vunpack.c.l.b16 %v6787_v38  ;;  %v6796_v14 = vpack.c.bf16 %v13732_v2, %v13732_v2 }
 0x2e4   : > { %9752 = vrot.lane.b32.xlu1 %v17432_v35, %s10140_s18  ;;  %9742 = vrot.lane.b32.xlu0 %v17435_v51, %s10140_s18  ;;  %v3116_v37 = vsel %vm1456_vm12, %v3084_v52, %v17437_v49  ;;  %v17438_v51 = vunpack.i.l.bf16 %v13605_v34  ;;  %v9453_v30 = vpop.permute.xlu1 %9452  ;;  %v13795_v48 = vpop.permute.xlu0 %9477  ;;  %v3086_v49 = vsel %vm1423_vm11, %v3055_v0, %v9444_v21  ;;  %v3147_v35 = vsel %vm16738_vm13, %v3115_v18, %v9449_v9 }
 0x2e5   : > { %v9455_v62 = vunpack.i.h.bf16 %v9453_v30  ;;  %v9454_v52 = vunpack.i.l.bf16 %v9453_v30  ;;  %v3148_v39 = vsel %vm16738_vm13, %v3116_v37, %v9450_v12  ;;  %v17440_v9 = vunpack.i.l.bf16 %v13580_v8 }
 0x2e6   : > { %v13793_v22 = vsel %vm16738_vm13, %v3117_v6, %v17438_v51  ;;  %v17439_v6 = vld [vmem:[#allocation61_spill] sm:$0xff]  ;;  %v6921_v51 = vunpack.c.l.b16 %v6785_v26  ;;  %v17441_v12 = vunpack.i.h.bf16 %v13580_v8  ;;  %v6924_v26 = vunpack.c.l.b16 %v6788_v58 }
 0x2e7   : > { %v3179_v30 = vsel %vm1522_vm14, %v3147_v35, %v9454_v52  ;;  %v3180_v61 = vsel %vm1522_vm14, %v3148_v39, %v9455_v62  ;;  %v6925_v38 = vunpack.c.l.b16 %v6789_v23  ;;  %v6926_v39 = vunpack.c.l.b16 %v6790_v55 }
 0x2e8   : > { %9757 = vrot.lane.b32.xlu1 %v17439_v6, %s10142_s20  ;;  %9747 = vrot.lane.b32.xlu0 %v13169_v3, %s10142_s20  ;;  %v13810_v7 = vpop.permute.xlu1 %9462  ;;  %v13812_v21 = vpop.permute.xlu0 %9482  ;;  %v3211_v37 = vsel %vm1555_vm15, %v3179_v30, %v17440_v9  ;;  %v3212_v0 = vsel %vm1555_vm15, %v3180_v61, %v17441_v12  ;;  %v6795_v3 = vpack.c.bf16 %v13728_v4, %v13728_v4  ;;  %v6927_v18 = vunpack.c.l.b16 %v6791_v56 }
 0x2e9   : > { %v17442_v35 = vpack.i.bf16 %v17411_v1, %v17410_v47  ;;  %v17443_v8 = vunpack.i.l.bf16 %v13624_v41  ;;  %v17444_v4 = vunpack.i.h.bf16 %v13624_v41  ;;  %v6929_v2 = vunpack.c.l.b16 %v6793_v15 }
 0x2ea   : > { %v6984_v23 = vrot.slane %v6921_v51, 7  ;;  %v17445_v55 = vunpack.i.l.bf16 %v13661_v5  ;;  %v17446_v52 = vunpack.i.h.bf16 %v13661_v5  ;;  %v6987_v61 = vrot.slane %v6922_v11, 6 }
 0x2eb   : > { %v3243_v62 = vsel %vm1588_vm3, %v3211_v37, %v17443_v8  ;;  %v3244_v58 = vsel %vm1588_vm3, %v3212_v0, %v17444_v4  ;;  %v6989_v9 = vrot.slane %v6923_v36, 5  ;;  %v6930_v41 = vunpack.c.l.b16 %v6794_v54 }
 0x2ec   : > { %2271 = vrot.lane.b32.xlu1 %v13649_v44, %s10140_s18  ;;  %9762 = vrot.lane.b32.xlu0 %v17442_v35, %s10140_s18  ;;  %v3275_v56 = vsel %vm1621_vm6, %v3243_v62, %v17445_v55  ;;  %v3276_v30 = vsel %vm1621_vm6, %v3244_v58, %v17446_v52  ;;  %v13842_v12 = vpop.permute.xlu1 %9472  ;;  %v13844_v35 = vpop.permute.xlu0 %9497  ;;  %v6986_v0 = vsel %vm6985_vm2, %v6984_v23, %v6920_v19  ;;  %v6992_v15 = vrot.slane %v6924_v26, 4  ;;  %v17448_v62 = vld [vmem:[#allocation166_spill] sm:$0xff] }
 0x2ed   : > { %v3307_v37 = vpack.c.bf16 %v3276_v30, %v3275_v56  ;;  %v17447_v51 = vunpack.i.h.bf16 %v13582_v40  ;;  %v6797_v5 = vpack.c.bf16 %v13734_v53, %v13734_v53  ;;  %v6798_v11 = vpack.c.bf16 %v13744_v45, %v13744_v45 }
 0x2ee   : > { %v6928_v36 = vunpack.c.l.b16 %v6792_v50  ;;  %v6931_v54 = vunpack.c.l.b16 %v6795_v3  ;;  %v6932_v4 = vunpack.c.l.b16 %v6796_v14  ;;  %v6988_v19 = vsel %vm5610_vm0, %v6987_v61, %v6986_v0 }
 0x2ef   : > { %v3118_v8 = vsel %vm1456_vm12, %v3086_v49, %v17447_v51  ;;  %8649 = vmatprep.mubr.msk.bf16.mxu1 %vm16739_vm5, %v3307_v37  ;;  %v6994_v26 = vrot.slane %v6925_v38, 3  ;;  %v6799_v40 = vpack.c.bf16 %v13746_v57, %v13746_v57  ;;  %v6991_v53 = vsel %vm6990_vm9, %v6989_v9, %v6988_v19 }
 0x2f0   : > { %9772 = vrot.lane.b32.xlu1 %v17448_v62, %s10143_s21  ;;  %9767 = vrot.lane.b32.xlu0 %v17420_v31, %s10143_s21  ;;  %vm16746_vm1 = vcmask 1045509   ;;  %v6997_v45 = vrot.slane %v6926_v39, 2  ;;  %v13863_v50 = vpop.permute.xlu1 %9487  ;;  %v13865_v49 = vpop.permute.xlu0 %9507  ;;  %v6993_v3 = vsel %vm5612_vm4, %v6992_v15, %v6991_v53  ;;  %v6999_v14 = vrot.slane %v6927_v18, 1 }
 0x2f1   : > { %v7002_v58 = vrot.slane %v6929_v2, 7  ;;  %v7004_v23 = vrot.slane %v6930_v41, 6  ;;  %v17449_v38 = vunpack.i.h.bf16 %v13605_v34  ;;  %v6933_v55 = vunpack.c.l.b16 %v6797_v5 }
 0x2f2   : > { %v6934_v56 = vunpack.c.l.b16 %v6798_v11  ;;  %vm16745_vm8 = vcmask 1047559   ;;  %v6996_v57 = vsel %vm16746_vm1, %v6994_v26, %v6993_v3  ;;  %v7006_v52 = vrot.slane %v6931_v54, 5 }
 0x2f3   : > { %v3150_v31 = vsel %vm16738_vm13, %v3118_v8, %v17449_v38  ;;  %v7003_v39 = vsel %vm6985_vm2, %v7002_v58, %v6928_v36  ;;  %v7008_v30 = vrot.slane %v6932_v4, 4  ;;  %v9470_v18 = vunpack.i.h.bf16 %v13753_v63 }
 0x2f4   : > { %9782 = vrot.lane.b32.xlu1 %v13628_v29, %s10144_s22  ;;  %v9469_v2 = vunpack.i.l.bf16 %v13753_v63  ;;  %9777 = vrot.lane.b32.xlu0 %v17428_v27, %s10144_s22  ;;  %vm17450_vm13 = vcmask 1046534   ;;  %v7005_v61 = vsel %vm5610_vm0, %v7004_v23, %v7003_v39  ;;  %v17451_v9 = vunpack.i.h.bf16 %v13622_v42  ;;  %v13884_v41 = vpop.permute.xlu1 %9492  ;;  %v9518_v0 = vpop.permute.xlu0 %9517 }
 0x2f5   : > { %v6998_v34 = vsel %vm17450_vm13, %v6997_v45, %v6996_v57  ;;  %v6935_v15 = vunpack.c.l.b16 %v6799_v40  ;;  %v7007_v8 = vsel %vm6990_vm9, %v7006_v52, %v7005_v61  ;;  %v17452_v63 = vunpack.i.h.bf16 %v13724_v60 }
 0x2f6   : > { %v3182_v37 = vsel %vm1522_vm14, %v3150_v31, %v17451_v9  ;;  %v7001_v51 = vsel %vm16745_vm8, %v6999_v14, %v6998_v34  ;;  %v17453_v5 = vunpack.i.l.bf16 %v13622_v42  ;;  %v9499_v36 = vunpack.i.l.bf16 %v13844_v35  ;;  %v17454_v31 = vld [vmem:[#allocation14_spill] sm:$0xff] }
 0x2f7   : > { %v3087_v27 = vsel %vm1423_vm11, %v13768_v33, %v17452_v63  ;;  %v9520_v54 = vunpack.i.h.bf16 %v9518_v0  ;;  %v9519_v4 = vunpack.i.l.bf16 %v9518_v0  ;;  %v7009_v19 = vsel %vm5612_vm4, %v7008_v30, %v7007_v8 }
 0x2f8   : > { %v3181_v11 = vsel %vm1522_vm14, %v13793_v22, %v17453_v5  ;;  %9792 = vrot.lane.b32.xlu1 %v13655_v13, %s10145_s15  ;;  %v7010_v26 = vrot.slane %v6933_v55, 3  ;;  %v7012_v40 = vrot.slane %v6934_v56, 2  ;;  %v3214_v60 = vsel %vm1555_vm15, %v3182_v37, %v9470_v18  ;;  %9787 = vrot.lane.b32.xlu0 %v17439_v6, %s10145_s15  ;;  %v13908_v3 = vpop.permute.xlu1 %9502  ;;  %v9523_v14 = vpop.permute.xlu0 %9522 }
 0x2f9   : > { %v3213_v33 = vsel %vm1555_vm15, %v3181_v11, %v9469_v2  ;;  %v9509_v53 = vunpack.i.l.bf16 %v13865_v49  ;;  %v9474_v45 = vunpack.i.l.bf16 %v13842_v12  ;;  %v7014_v23 = vrot.slane %v6935_v15, 1  ;;  %v17455_v11 = vld [vmem:[#allocation89_spill] sm:$0xff] }
 0x2fa   : > { %v7011_v58 = vsel %vm16746_vm1, %v7010_v26, %v7009_v19  ;;  %v9500_v38 = vunpack.i.h.bf16 %v13844_v35  ;;  %v3057_v55 = vsel %vm1390_vm10, %v17454_v31, %v9499_v36  ;;  %v9525_v56 = vunpack.i.h.bf16 %v9523_v14  ;;  %v17457_v19 = vld [vmem:[#allocation92_spill] sm:$0xff]  ;;  %v17466_v31 = vld [vmem:[#allocation139_spill] sm:$0xff] }
 0x2fb   : > { %v9524_v57 = vunpack.i.l.bf16 %v9523_v14  ;;  %v9510_v39 = vunpack.i.h.bf16 %v13865_v49  ;;  %v3245_v6 = vsel %vm1588_vm3, %v3213_v33, %v9519_v4  ;;  %v3246_v52 = vsel %vm1588_vm3, %v3214_v60, %v9520_v54  ;;  %v17459_v60 = vld [vmem:[#allocation26_spill] sm:$0xff]  ;;  %v17462_v14 = vld [vmem:[#allocation28_spill] sm:$0xff] }
 0x2fc   : > { %9802 = vrot.lane.b32.xlu1 %v13659_v25, %s10146_s16  ;;  %v7013_v30 = vsel %vm17450_vm13, %v7012_v40, %v7011_v58  ;;  %v3088_v35 = vsel %vm1423_vm11, %v3057_v55, %v9509_v53  ;;  %v3278_v34 = vsel %vm1621_vm6, %v3246_v52, %v9525_v56  ;;  %9797 = vrot.lane.b32.xlu0 %v17448_v62, %s10146_s16  ;;  %v9475_v49 = vunpack.i.h.bf16 %v13842_v12  ;;  %v13928_v9 = vpop.permute.xlu1 %9512  ;;  %v13930_v37 = vpop.permute.xlu0 %9537  ;;  %v17463_v58 = vld [vmem:[#allocation90_spill] sm:$0xff] }
 0x2fd   : > { %v3277_v2 = vsel %vm1621_vm6, %v3245_v6, %v9524_v57  ;;  %v9504_v61 = vunpack.i.l.bf16 %v13908_v3  ;;  %v7015_v15 = vsel %vm16745_vm8, %v7014_v23, %v7013_v30  ;;  %v3119_v5 = vsel %vm1456_vm12, %v3087_v27, %v9474_v45  ;;  %v17456_v27 = vld [vmem:[#allocation30_spill] sm:$0xff]  ;;  %v17464_v23 = vld [vmem:[#allocation127_spill] sm:$0xff] }
 0x2fe   : > { %v3308_v0 = vpack.c.bf16 %v3278_v34, %v3277_v2  ;;  %v3058_v62 = vsel %vm1390_vm10, %v17455_v11, %v9500_v38  ;;  %v3120_v54 = vsel %vm1456_vm12, %v3088_v35, %v9475_v49  ;;  %v7100_v4 = vpack.c.b16 %v7015_v15, %v7001_v51  ;;  %v17465_v38 = vld [vmem:[#allocation13_spill] sm:$0xff]  ;;  %v17467_v6 = vld [vmem:[#allocation46_spill] sm:$0xff] }
 0x2ff   : > { %v13940_v36 = vsel %vm1423_vm11, %v3058_v62, %v9510_v39  ;;  %v5731_v40 = vsel %vm10310_vm7, %v17457_v19, %v17456_v27  ;;  %v17460_v33 = vrot.slane %v17459_v60, 7  ;;  %v17461_v53 = vrot.slane %v17456_v27, 2  ;;  %v17470_v2 = vld [vmem:[#allocation49_spill] sm:$0xff]  ;;  %v17474_v15 = vld [vmem:[#allocation114_spill] sm:$0xff]  ;;  %v17475_v62 = vld [vmem:[#allocation36_spill] sm:$0xff] }
 0x300   : > { %9812 = vrot.lane.b32.xlu1 %v13665_v43, %s10147_s23  ;;  %8650 = vmatmul.mubr.msk.bf16.vlgmr.msra.gmra.mxu1 %vm16739_vm5, %v3308_v0  ;;  %v5737_v51 = vsel %vm10310_vm7, %v17463_v58, %v17462_v14  ;;  %v3059_v55 = vsel %vm1390_vm10, %v17466_v31, %v9504_v61  ;;  %v9514_v56 = vunpack.i.l.bf16 %v13928_v9  ;;  %v9528_v57 = vpop.permute.xlu1 %9527  ;;  %v13969_v39 = vpop.permute.xlu0 %9547  ;;  %v17468_v52 = vrot.slane %v17467_v6, 7  ;;  %v17471_v34 = vld [vmem:[#allocation129_spill] sm:$0xff]  ;;  %v17473_v0 = vld [vmem:[#allocation112_spill] sm:$0xff]  ;;  %v17478_v60 = vld [vmem:[#allocation38_spill] sm:$0xff] }
 0x301   : > { %9807 = vrot.lane.b32.xlu0 %v13628_v29, %s10147_s23  ;;  %v5734_v45 = vsel %vm10310_vm7, %v17461_v53, %v17460_v33  ;;  %v5756_v29 = vsel %vm10310_vm7, %v17465_v38, %v17464_v23  ;;  %8683 = vmatprep.mubr.msk.bf16.mxu0 %vm1390_vm10, %v7100_v4  ;;  %v17469_v30 = vrot.slane %v17464_v23, 2  ;;  %v5762_v49 = vsel %vm10310_vm7, %v17471_v34, %v17470_v2  ;;  %v17472_v61 = vld [vmem:[#allocation161_spill] sm:$0xff]  ;;  %v17479_v33 = vld [vmem:[#allocation126_spill] sm:$0xff]  ;;  %v17481_v58 = vld [vmem:[#allocation132_spill] sm:$0xff] }
 0x302   : > { %8692 = vmatpush3.bf16.msra.mxu1 %v17472_v61  ;;  %v5781_v11 = vsel %vm10310_vm7, %v17474_v15, %v17473_v0  ;;  %v17476_v4 = vrot.slane %v17475_v62, 7  ;;  %v17477_v27 = vrot.slane %v17473_v0, 2  ;;  %v5787_v53 = vsel %vm10310_vm7, %v17479_v33, %v17478_v60  ;;  %v17480_v14 = vld [vmem:[#allocation133_spill] sm:$0xff]  ;;  %v17487_v15 = vld [vmem:[#allocation66_spill] sm:$0xff] }
 0x303   : > { %v5759_v35 = vsel %vm10310_vm7, %v17469_v30, %v17468_v52  ;;  %v5806_v23 = vsel %vm10310_vm7, %v17481_v58, %v17480_v14  ;;  %v9530_v38 = vunpack.i.h.bf16 %v9528_v57  ;;  %v9529_v31 = vunpack.i.l.bf16 %v9528_v57  ;;  %v17483_v52 = vld [vmem:[#allocation62_spill] sm:$0xff] }
 0x304   : > { %v5784_v19 = vsel %vm10310_vm7, %v17477_v27, %v17476_v4  ;;  %v17482_v6 = vpack.i.bf16 %v13672_v32, %v17414_v28  ;;  %v17484_v30 = vrot.slane %v17483_v52, 7  ;;  %v17485_v2 = vrot.slane %v17480_v14, 2  ;;  %v17488_v57 = vld [vmem:[#allocation22_spill] sm:$0xff]  ;;  %v14022_v33 = vpop.permute.xlu1 %9532  ;;  %v14024_v14 = vpop.permute.xlu0 %9557 }
 0x305   : > { %v8453_v61 = vrot.slane %v5731_v40, 9  ;;  %v17486_v0 = vpack.i.bf16 %v13635_v17, %v17397_v59  ;;  %v5812_v62 = vsel %vm10310_vm7, %v17488_v57, %v17487_v15  ;;  %v8454_v28 = vrot.slane %v5734_v45, 9 }
 0x306   : > { %9822 = vrot.lane.b32.xlu1 %v17482_v6, %s10141_s19  ;;  %v5809_v34 = vsel %vm10310_vm7, %v17485_v2, %v17484_v30  ;;  %v8455_v4 = vrot.slane %v5737_v51, 9  ;;  %v8461_v27 = vrot.slane %v5756_v29, 9  ;;  %v14020_v60 = vsel %vm1423_vm11, %v3059_v55, %v9514_v56 }
 0x307   : > { %9817 = vrot.lane.b32.xlu0 %v17486_v0, %s10141_s19  ;;  %v8462_v58 = vrot.slane %v5759_v35, 9  ;;  %v8463_v6 = vrot.slane %v5762_v49, 9  ;;  %v8469_v52 = vrot.slane %v5781_v11, 9  ;;  %v9534_v59 = vunpack.i.l.bf16 %v14022_v33 }
 0x308   : > { %v8470_v17 = vrot.slane %v5784_v19, 9  ;;  %v8471_v30 = vrot.slane %v5787_v53, 9  ;;  %v8477_v2 = vrot.slane %v5806_v23, 9  ;;  %vm17489_vm13 = vcmask 130048   ;;  %v14033_v47 = vpop.permute.xlu1 %9542  ;;  %v14035_v44 = vpop.permute.xlu0 %9562 }
 0x309   : > { %v3151_v0 = vsel %vm17489_vm13, %v3119_v5, %v9529_v31  ;;  %vm17490_vm5 = vmmov %vm17489_vm13  ;;  %v8478_v57 = vrot.slane %v5809_v34, 9  ;;  %v8479_v63 = vrot.slane %v5812_v62, 9  ;;  %v6564_v55 = vadd.f32 %v8453_v61, %v5731_v40  ;;  %v17493_v61 = vld [vmem:[#allocation98_spill] sm:$0xff] }
 0x30a   : > { %v3152_v15 = vsel %vm17490_vm5, %v3120_v54, %v9530_v38  ;;  %v6565_v56 = vadd.f32 %v8454_v28, %v5734_v45  ;;  %v6566_v42 = vadd.f32 %v8455_v4, %v5737_v51  ;;  %v6572_v22 = vadd.f32 %v8461_v27, %v5756_v29  ;;  %v17491_v45 = vld [vmem:[#allocation56_spill] sm:$0xff]  ;;  %v17492_v51 = vld [vmem:[#allocation130_spill] sm:$0xff]  ;;  %v17494_v28 = vld [vmem:[#allocation131_spill] sm:$0xff] }
 0x30b   : > { %v9535_v12 = vunpack.i.h.bf16 %v14022_v33  ;;  %v14031_v18 = vsel %vm1522_vm14, %v3151_v0, %v9534_v59  ;;  %v6573_v8 = vadd.f32 %v8462_v58, %v5759_v35  ;;  %v6574_v26 = vadd.f32 %v8463_v6, %v5762_v49  ;;  %v17495_v27 = vld [vmem:[#allocation97_spill] sm:$0xff]  ;;  %v17497_v59 = vld [vmem:[#allocation111_spill] sm:$0xff]  ;;  %9827 = vrot.lane.b32.xlu0 %v13655_v13, %s10142_s20 }
 0x30c   : > { %v6580_v5 = vadd.f32 %v8469_v52, %v5781_v11  ;;  %v6581_v31 = vadd.f32 %v8470_v17, %v5784_v19  ;;  %v6582_v54 = vadd.f32 %v8471_v30, %v5787_v53  ;;  %v6588_v38 = vadd.f32 %v8477_v2, %v5806_v23  ;;  %v17496_v33 = vld [vmem:[#allocation113_spill] sm:$0xff]  ;;  %v17498_v0 = vld [vmem:[#allocation115_spill] sm:$0xff]  ;;  %v17499_v19 = vld [vmem:[#allocation12_spill] sm:$0xff]  ;;  %v14049_v17 = vpop.permute.xlu1 %9552  ;;  %v14051_v30 = vpop.permute.xlu0 %9577 }
 0x30d   : > { %v6589_v1 = vadd.f32 %v8478_v57, %v5809_v34  ;;  %v6590_v40 = vadd.f32 %v8479_v63, %v5812_v62  ;;  %v6673_v29 = vadd.f32 %v17492_v51, %v17491_v45  ;;  %v6674_v4 = vadd.f32 %v17494_v28, %v17493_v61  ;;  %v17500_v53 = vld [vmem:[#allocation134_spill] sm:$0xff]  ;;  %v17501_v34 = vld [vmem:[#allocation128_spill] sm:$0xff] }
 0x30e   : > { %v6675_v35 = vadd.f32 %v17496_v33, %v17495_v27  ;;  %v6676_v49 = vadd.f32 %v6572_v22, %v6564_v55  ;;  %v6677_v58 = vadd.f32 %v6573_v8, %v6565_v56  ;;  %v6678_v6 = vadd.f32 %v6574_v26, %v6566_v42  ;;  %v17502_v63 = vld [vmem:[#allocation94_spill] sm:$0xff] }
 0x30f   : > { %v6681_v11 = vadd.f32 %v17498_v0, %v17497_v59  ;;  %v6682_v23 = vadd.f32 %v17500_v53, %v17499_v19  ;;  %v6683_v62 = vadd.f32 %v17502_v63, %v17501_v34  ;;  %v6684_v52 = vadd.f32 %v6588_v38, %v6580_v5  ;;  %v17503_v45 = vld [vmem:[#allocation54_spill] sm:$0xff]  ;;  %9837 = vrot.lane.b32.xlu0 %v13659_v25, %s10143_s21  ;;  %v17521_v25 = vld [vmem:[#allocation63_spill] sm:$0xff] }
 0x310   : > { %v6685_v2 = vadd.f32 %v6589_v1, %v6581_v31  ;;  %v6686_v57 = vadd.f32 %v6590_v40, %v6582_v54  ;;  %v6736_v22 = vmul.f32 0.25, %v17503_v45  ;;  %v6737_v8 = vmul.f32 0.25, %v6673_v29  ;;  %v17504_v61 = vld [vmem:[#allocation70_spill] sm:$0xff]  ;;  %v14055_v19 = vpop.permute.xlu1 %9567  ;;  %v14057_v1 = vpop.permute.xlu0 %9587 }
 0x311   : > { %v6738_v42 = vmul.f32 0.25, %v6674_v4  ;;  %v6739_v26 = vmul.f32 0.25, %v6675_v35  ;;  %v6740_v55 = vmul.f32 0.25, %v6676_v49  ;;  %v6741_v56 = vmul.f32 0.25, %v6677_v58 }
 0x312   : > { %v6742_v51 = vmul.f32 0.25, %v6678_v6  ;;  %v6744_v28 = vmul.f32 0.25, %v17504_v61  ;;  %v6745_v27 = vmul.f32 0.25, %v6681_v11  ;;  %v6746_v33 = vmul.f32 0.25, %v6682_v23 }
 0x313   : > { %v6747_v59 = vmul.f32 0.25, %v6683_v62  ;;  %v6748_v5 = vmul.f32 0.25, %v6684_v52  ;;  %v6749_v38 = vmul.f32 0.25, %v6685_v2  ;;  %v6750_v0 = vmul.f32 0.25, %v6686_v57  ;;  %9847 = vrot.lane.b32.xlu0 %v13665_v43, %s10144_s22 }
 0x314   : > { %v6800_v31 = vpack.c.bf16 %v6736_v22, %v6736_v22  ;;  %v6801_v54 = vpack.c.bf16 %v6737_v8, %v6737_v8  ;;  %v6802_v40 = vpack.c.bf16 %v6738_v42, %v6738_v42  ;;  %v6803_v29 = vpack.c.bf16 %v6739_v26, %v6739_v26  ;;  %v14060_v2 = vpop.permute.xlu1 %9572  ;;  %v14062_v57 = vpop.permute.xlu0 %9597 }
 0x315   : > { %v6804_v4 = vpack.c.bf16 %v6740_v55, %v6740_v55  ;;  %v6805_v35 = vpack.c.bf16 %v6741_v56, %v6741_v56  ;;  %v6806_v49 = vpack.c.bf16 %v6742_v51, %v6742_v51  ;;  %v6808_v58 = vpack.c.bf16 %v6744_v28, %v6744_v28  ;;  %17505 = vst [vmem:[#allocation9_spill] sm:$0xff] %v14060_v2  ;;  %v17506_v56 = vld [vmem:[#allocation15_spill] sm:$0xff] }
 0x316   : > { %v6809_v6 = vpack.c.bf16 %v6745_v27, %v6745_v27  ;;  %v6810_v53 = vpack.c.bf16 %v6746_v33, %v6746_v33  ;;  %v6811_v11 = vpack.c.bf16 %v6747_v59, %v6747_v59  ;;  %v6812_v23 = vpack.c.bf16 %v6748_v5, %v6748_v5 }
 0x317   : > { %v3184_v34 = vsel %vm1522_vm14, %v3152_v15, %v9535_v12  ;;  %v6813_v63 = vpack.c.bf16 %v6749_v38, %v6749_v38  ;;  %v6814_v62 = vpack.c.bf16 %v6750_v0, %v6750_v0  ;;  %v6937_v52 = vunpack.c.l.b16 %v6801_v54 }
 0x318   : > { %v6938_v45 = vunpack.c.l.b16 %v6802_v40  ;;  %v6939_v22 = vunpack.c.l.b16 %v6803_v29  ;;  %v6940_v8 = vunpack.c.l.b16 %v6804_v4  ;;  %v6941_v42 = vunpack.c.l.b16 %v6805_v35  ;;  %v14067_v54 = vpop.permute.xlu1 %9582  ;;  %v14069_v40 = vpop.permute.xlu0 %9602  ;;  %v17508_v29 = vld [vmem:[#allocation136_spill] sm:$0xff] }
 0x319   : > { %v6936_v26 = vunpack.c.l.b16 %v6800_v31  ;;  %v6942_v55 = vunpack.c.l.b16 %v6806_v49  ;;  %v17507_v51 = vpack.c.bf16 %v17506_v56, %v17506_v56  ;;  %v6945_v28 = vunpack.c.l.b16 %v6809_v6 }
 0x31a   : > { %v6944_v27 = vunpack.c.l.b16 %v6808_v58  ;;  %v6946_v12 = vunpack.c.l.b16 %v6810_v53  ;;  %v6947_v15 = vunpack.c.l.b16 %v6811_v11  ;;  %v6948_v33 = vunpack.c.l.b16 %v6812_v23 }
 0x31b   : > { %v6943_v61 = vunpack.c.l.b16 %v17507_v51  ;;  %v6949_v59 = vunpack.c.l.b16 %v6813_v63  ;;  %v6950_v5 = vunpack.c.l.b16 %v6814_v62  ;;  %v7016_v38 = vrot.slane %v6937_v52, 7 }
 0x31c   : > { %v7018_v0 = vrot.slane %v6938_v45, 6  ;;  %v17509_v31 = vpack.c.bf16 %v17508_v29, %v17508_v29  ;;  %v7020_v35 = vrot.slane %v6939_v22, 5  ;;  %v7022_v49 = vrot.slane %v6940_v8, 4  ;;  %v14080_v22 = vpop.permute.xlu0 %9617 }
 0x31d   : > { %v7024_v56 = vrot.slane %v6941_v42, 3  ;;  %v7017_v58 = vsel %vm6985_vm2, %v7016_v38, %v6936_v26  ;;  %v7026_v6 = vrot.slane %v6942_v55, 2  ;;  %v7030_v53 = vrot.slane %v6945_v28, 7 }
 0x31e   : > { %v6951_v4 = vunpack.c.l.b16 %v17509_v31  ;;  %v7032_v11 = vrot.slane %v6946_v12, 6  ;;  %v7019_v23 = vsel %vm5610_vm0, %v7018_v0, %v7017_v58  ;;  %v7028_v63 = vrot.slane %v6943_v61, 1  ;;  %v14078_v31 = vpop.permute.xlu1 %9592 }
 0x31f   : > { %v7034_v62 = vrot.slane %v6947_v15, 5  ;;  %v7036_v52 = vrot.slane %v6948_v33, 4  ;;  %v7021_v45 = vsel %vm6990_vm9, %v7020_v35, %v7019_v23  ;;  %v7031_v51 = vsel %vm6985_vm2, %v7030_v53, %v6944_v27 }
 0x320   : > { %v7038_v2 = vrot.slane %v6949_v59, 3  ;;  %v7040_v29 = vrot.slane %v6950_v5, 2  ;;  %v7023_v8 = vsel %vm5612_vm4, %v7022_v49, %v7021_v45  ;;  %v7033_v42 = vsel %vm5610_vm0, %v7032_v11, %v7031_v51 }
 0x321   : > { %v14086_v26 = vpack.i.bf16 %v17415_v24, %v17417_v16  ;;  %v17510_v55 = vunpack.i.l.bf16 %v13810_v7  ;;  %v7025_v28 = vsel %vm16746_vm1, %v7024_v56, %v7023_v8  ;;  %v7035_v27 = vsel %vm6990_vm9, %v7034_v62, %v7033_v42  ;;  %v14116_v56 = vpop.permute.xlu0 %9627  ;;  %v17522_v42 = vld [vmem:[#allocation154_spill] sm:$0xff] }
 0x322   : > { %v7042_v12 = vrot.slane %v6951_v4, 1  ;;  %v9489_v15 = vunpack.i.l.bf16 %v13863_v50  ;;  %v17511_v33 = vunpack.i.h.bf16 %v13810_v7  ;;  %vm17512_vm5 = vcmask 1046534   ;;  %v14114_v49 = vpop.permute.xlu1 %9607 }
 0x323   : > { %v3215_v61 = vsel %vm1555_vm15, %v14031_v18, %v17510_v55  ;;  %v7027_v5 = vsel %vm17512_vm5, %v7026_v6, %v7025_v28  ;;  %v7037_v38 = vsel %vm5612_vm4, %v7036_v52, %v7035_v27  ;;  %9832 = vrot.lane.b32.xlu1 %v14086_v26, %s10142_s20  ;;  %v17513_v18 = vunpack.i.l.bf16 %v13726_v10  ;;  %vm17515_vm13 = vmmov %vm17512_vm5  ;;  %v17525_v27 = vld [vmem:[#allocation156_spill] sm:$0xff]  ;;  %9857 = vrot.lane.b32.xlu0 %v14086_v26, %s10145_s15  ;;  %v17535_v26 = vld [vmem:[#allocation137_spill] sm:$0xff] }
 0x324   : > { %v3216_v59 = vsel %vm1555_vm15, %v3184_v34, %v17511_v33  ;;  %v17514_v4 = vunpack.i.h.bf16 %v13726_v10  ;;  %v7029_v34 = vsel %vm16745_vm8, %v7028_v63, %v7027_v5  ;;  %v7039_v35 = vsel %vm16746_vm1, %v7038_v2, %v7037_v38 }
 0x325   : > { %v3121_v0 = vsel %vm1456_vm12, %v13940_v36, %v17513_v18  ;;  %v9495_v13 = vunpack.i.h.bf16 %v13884_v41  ;;  %v7041_v58 = vsel %vm17515_vm13, %v7040_v29, %v7039_v35  ;;  %v14122_v36 = vpack.i.bf16 %v17434_v46, %v17421_v20 }
 0x326   : > { %v3122_v7 = vsel %vm1456_vm12, %v14020_v60, %v17514_v4  ;;  %v9494_v10 = vunpack.i.l.bf16 %v13884_v41  ;;  %v7043_v60 = vsel %vm16745_vm8, %v7042_v12, %v7041_v58  ;;  %v3247_v6 = vsel %vm1588_vm3, %v3215_v61, %v9489_v15  ;;  %v14145_v45 = vpop.permute.xlu1 %9612  ;;  %v17523_v61 = vld [vmem:[#allocation165_spill] sm:$0xff] }
 0x327   : > { %v17516_v2 = vunpack.i.h.bf16 %v13863_v50  ;;  %v9505_v11 = vunpack.i.h.bf16 %v13908_v3  ;;  %v17517_v23 = vunpack.i.l.bf16 %v13795_v48  ;;  %vm17518_vm5 = vcmask 130048   ;;  %9842 = vrot.lane.b32.xlu1 %v14122_v36, %s10143_s21  ;;  %9867 = vrot.lane.b32.xlu0 %v14122_v36, %s10146_s16 }
 0x328   : > { %v17519_v62 = vunpack.i.h.bf16 %v13795_v48  ;;  %vm17520_vm13 = vmmov %vm17518_vm5  ;;  %v7101_v46 = vpack.c.b16 %v7043_v60, %v7029_v34  ;;  %v9515_v50 = vunpack.i.h.bf16 %v13928_v9  ;;  %v9549_v41 = vunpack.i.l.bf16 %v13969_v39  ;;  %v14147_v48 = vpop.permute.xlu0 %9637  ;;  %v17532_v60 = vld [vmem:[#allocation142_spill] sm:$0xff] }
 0x329   : > { %v3248_v53 = vsel %vm1588_vm3, %v3216_v59, %v17516_v2  ;;  %v3153_v63 = vsel %vm17518_vm5, %v3121_v0, %v17517_v23  ;;  %v3279_v3 = vsel %vm1621_vm6, %v3247_v6, %v9494_v10  ;;  %v9484_v51 = vunpack.i.l.bf16 %v13812_v21  ;;  %v17529_v59 = vld [vmem:[#allocation138_spill] sm:$0xff]  ;;  %v17531_v10 = vld [vmem:[#allocation144_spill] sm:$0xff] }
 0x32a   : > { %v3154_v20 = vsel %vm17520_vm13, %v3122_v7, %v17519_v62  ;;  %v3280_v52 = vsel %vm1621_vm6, %v3248_v53, %v9495_v13  ;;  %v9550_v29 = vunpack.i.h.bf16 %v13969_v39  ;;  %8684 = vmatmul.mubr.msk.bf16.vlgmr.msra.gmra.mxu0 %vm1390_vm10, %v7101_v46  ;;  %v14154_v9 = vpack.i.bf16 %v17521_v25, %v13672_v32  ;;  %v14181_v34 = vpop.permute.xlu1 %9622 }
 0x32b   : > { %v3309_v8 = vpack.c.bf16 %v3280_v52, %v3279_v3  ;;  %v2676_v55 = vrot.slane %v17522_v42, 2  ;;  %v17524_v28 = vrot.slane %v17523_v61, 2  ;;  %v17526_v12 = vrot.slane %v17525_v27, 2 }
 0x32c   : > { %vm17527_vm5 = vcmask 1045504   ;;  %v17528_v33 = vunpack.i.h.bf16 %v13812_v21  ;;  %v3060_v5 = vsel %vm1390_vm10, %v17529_v59, %v9505_v11  ;;  %v3185_v38 = vsel %vm1522_vm14, %v3153_v63, %v9484_v51  ;;  %9852 = vrot.lane.b32.xlu1 %v14154_v9, %s10144_s22  ;;  %v14183_v35 = vpop.permute.xlu0 %9642  ;;  %9877 = vrot.lane.b32.xlu0 %v14154_v9, %s10147_s23 }
 0x32d   : > { %v14162_v15 = vsel %vm17527_vm5, %v17526_v12, %v17524_v28  ;;  %vm17530_vm13 = vcmask 293888   ;;  %v9600_v32 = vunpack.i.h.bf16 %v14062_v57  ;;  %v9599_v18 = vunpack.i.l.bf16 %v14062_v57 }
 0x32e   : > { %v3186_v39 = vsel %vm1522_vm14, %v3154_v20, %v17528_v33  ;;  %8653 = vmatprep.mubr.msk.bf16.mxu1 %vm17530_vm13, %v3309_v8  ;;  %v3091_v0 = vsel %vm1423_vm11, %v3060_v5, %v9515_v50  ;;  %v9540_v21 = vunpack.i.h.bf16 %v13930_v37  ;;  %v9539_v4 = vunpack.i.l.bf16 %v13930_v37  ;;  %v17534_v8 = vld [vmem:[#allocation148_spill] sm:$0xff] }
 0x32f   : > { %v3217_v7 = vsel %vm1555_vm15, %v3185_v38, %v9549_v41  ;;  %v3218_v13 = vsel %vm1555_vm15, %v3186_v39, %v9550_v29  ;;  %v9560_v58 = vunpack.i.h.bf16 %v14024_v14  ;;  %v9559_v57 = vunpack.i.l.bf16 %v14024_v14  ;;  %v14207_v41 = vpop.permute.xlu1 %9632  ;;  %v17533_v29 = vld [vmem:[#allocation160_spill] sm:$0xff]  ;;  %v17550_v14 = vld [vmem:[#allocation91_spill] sm:$0xff] }
 0x330   : > { %v14190_v6 = vpack.i.bf16 %v17532_v60, %v17531_v10  ;;  %v9579_v2 = vunpack.i.l.bf16 %v14051_v30  ;;  %v9605_v53 = vunpack.i.h.bf16 %v14069_v40  ;;  %v9604_v43 = vunpack.i.l.bf16 %v14069_v40  ;;  %v14209_v3 = vpop.permute.xlu0 %9647 }
 0x331   : > { %v9589_v11 = vunpack.i.l.bf16 %v14057_v1  ;;  %v3249_v23 = vsel %vm1588_vm3, %v3217_v7, %v9599_v18  ;;  %v3250_v63 = vsel %vm1588_vm3, %v3218_v13, %v9600_v32  ;;  %v9584_v62 = vunpack.i.l.bf16 %v14067_v54  ;;  %v17538_v32 = vld [vmem:[#allocation6_spill] sm:$0xff] }
 0x332   : > { %9862 = vrot.lane.b32.xlu1 %v14190_v6, %s10145_s15  ;;  %v9545_v20 = vunpack.i.h.bf16 %v14033_v47  ;;  %v3281_v46 = vsel %vm1621_vm6, %v3249_v23, %v9604_v43  ;;  %v3282_v40 = vsel %vm1621_vm6, %v3250_v63, %v9605_v53  ;;  %v9594_v50 = vunpack.i.l.bf16 %v14078_v31  ;;  %v17539_v23 = vld [vmem:[#allocation42_spill] sm:$0xff] }
 0x333   : > { %v9554_v52 = vunpack.i.l.bf16 %v14049_v17  ;;  %v9580_v51 = vunpack.i.h.bf16 %v14051_v30  ;;  %v14215_v61 = vpack.i.bf16 %v17534_v8, %v17533_v29  ;;  %v3310_v28 = vpack.c.bf16 %v3282_v40, %v3281_v46  ;;  %v14239_v53 = vpop.permute.xlu1 %9652  ;;  %v17540_v46 = vld [vmem:[#allocation152_spill] sm:$0xff]  ;;  %v17542_v29 = vld [vmem:[#allocation9_spill] sm:$0xff] }
 0x334   : > { %v3061_v12 = vsel %vm1390_vm10, %v17535_v26, %v9579_v2  ;;  %v9590_v33 = vunpack.i.h.bf16 %v14057_v1  ;;  %v17536_v39 = vrot.slane %v17532_v60, 2  ;;  %v17537_v59 = vrot.slane %v17531_v10, 2  ;;  %v14241_v43 = vpop.permute.xlu0 %9657 }
 0x335   : > { %v9544_v38 = vunpack.i.l.bf16 %v14033_v47  ;;  %v3092_v30 = vsel %vm1423_vm11, %v3061_v12, %v9589_v11  ;;  %v3063_v18 = vsel %vm1390_vm10, %v17538_v32, %v9584_v62  ;;  %8654 = vmatmul.mubr.msk.bf16.gmra.mxu1 %vm17530_vm13, %v3310_v28  ;;  %v9610_v1 = vunpack.i.h.bf16 %v14114_v49  ;;  %v17543_v28 = vld [vmem:[#allocation141_spill] sm:$0xff]  ;;  %v17545_v12 = vld [vmem:[#allocation71_spill] sm:$0xff] }
 0x336   : > { %v2368_v5 = vsel %vm17527_vm5, %v17537_v59, %v17536_v39  ;;  %9872 = vrot.lane.b32.xlu1 %v14215_v61, %s10146_s16  ;;  %v9565_v7 = vunpack.i.h.bf16 %v14035_v44  ;;  %v9555_v13 = vunpack.i.h.bf16 %v14049_v17  ;;  %v3094_v47 = vsel %vm1423_vm11, %v3063_v18, %v9594_v50 }
 0x337   : > { %v9609_v2 = vunpack.i.l.bf16 %v14114_v49  ;;  %v3123_v11 = vsel %vm1456_vm12, %v3091_v0, %v9554_v52  ;;  %v3062_v63 = vsel %vm1390_vm10, %v17539_v23, %v9580_v51  ;;  %v9570_v62 = vunpack.i.h.bf16 %v14055_v19 }
 0x338   : > { %v14248_v17 = vpack.i.bf16 %v17540_v46, %v2368_v5  ;;  %v3093_v36 = vsel %vm1423_vm11, %v3062_v63, %v9590_v33  ;;  %v3124_v40 = vsel %vm1456_vm12, %v3092_v30, %v9555_v13  ;;  %v9615_v49 = vunpack.i.h.bf16 %v14145_v45  ;;  %v14271_v30 = vpop.permute.xlu0 %9667 }
 0x339   : > { %v9569_v50 = vunpack.i.l.bf16 %v14055_v19  ;;  %v3126_v0 = vsel %vm1456_vm12, %v3094_v47, %v9540_v21  ;;  %vm17541_vm5 = vcmask 130048   ;;  %v9614_v51 = vunpack.i.l.bf16 %v14145_v45  ;;  %v14269_v21 = vpop.permute.xlu1 %9662 }
 0x33a   : > { %9882 = vrot.lane.b32.xlu1 %v14248_v17, %s10147_s23  ;;  %v3156_v52 = vsel %vm17541_vm5, %v3124_v40, %v9610_v1  ;;  %v9574_v8 = vunpack.i.l.bf16 %v17542_v29  ;;  %v17544_v26 = vrot.slane %v17543_v28, 2  ;;  %v17546_v33 = vrot.slane %v17545_v12, 2  ;;  %vm17548_vm8 = vmmov %vm17541_vm5 }
 0x33b   : > { %vm17547_vm13 = vcmask 1045504   ;;  %v3155_v39 = vsel %vm17548_vm8, %v3123_v11, %v9609_v2  ;;  %v3188_v59 = vsel %vm1522_vm14, %v3156_v52, %v9615_v49  ;;  %v3125_v45 = vsel %vm1456_vm12, %v3093_v36, %v9539_v4  ;;  %vm17549_vm8 = vmmov %vm17541_vm5  ;;  %v17551_v36 = vld [vmem:[#allocation41_spill] sm:$0xff] }
 0x33c   : > { %v2373_v19 = vsel %vm17547_vm13, %v17546_v33, %v17544_v26  ;;  %v3187_v32 = vsel %vm1522_vm14, %v3155_v39, %v9614_v51  ;;  %v3220_v18 = vsel %vm1555_vm15, %v3188_v59, %v9545_v20  ;;  %v9585_v1 = vunpack.i.h.bf16 %v14067_v54  ;;  %v17554_v39 = vld [vmem:[#allocation164_spill] sm:$0xff]  ;;  %v17555_v59 = vld [vmem:[#allocation146_spill] sm:$0xff] }
 0x33d   : > { %v9891_v9 = vpack.i.bf16 %v2373_v19, %v17540_v46  ;;  %v9886_v13 = vpack.i.bf16 %v2368_v5, %v17521_v25  ;;  %v3158_v47 = vsel %vm17549_vm8, %v3126_v0, %v9560_v58  ;;  %v3219_v2 = vsel %vm1555_vm15, %v3187_v32, %v9544_v38  ;;  %v14297_v38 = vpop.permute.xlu1 %9677 }
 0x33e   : > { %v9575_v37 = vunpack.i.h.bf16 %v17542_v29  ;;  %v9595_v4 = vunpack.i.h.bf16 %v14078_v31  ;;  %v9630_v11 = vunpack.i.h.bf16 %v14116_v56  ;;  %v3251_v20 = vsel %vm1588_vm3, %v3219_v2, %v9569_v50  ;;  %v9673_v31 = vpop.permute.xlu0 %9672 }
 0x33f   : > { %9892 = vrot.lane.b32.xlu1 %v9891_v9, %s10141_s19  ;;  %9887 = vrot.lane.b32.xlu0 %v9886_v13, %s10141_s19  ;;  %v9629_v54 = vunpack.i.l.bf16 %v14116_v56  ;;  %v3157_v25 = vsel %vm17541_vm5, %v3125_v45, %v9559_v57  ;;  %v3252_v58 = vsel %vm1588_vm3, %v3220_v18, %v9570_v62  ;;  %v3283_v5 = vsel %vm1621_vm6, %v3251_v20, %v9574_v8  ;;  %v17552_v62 = vld [vmem:[#allocation117_spill] sm:$0xff] }
 0x340   : > { %v9564_v23 = vunpack.i.l.bf16 %v14035_v44  ;;  %v3190_v63 = vsel %vm1522_vm14, %v3158_v47, %v9565_v7  ;;  %v14303_v46 = vpack.i.bf16 %v17543_v28, %v17545_v12  ;;  %v3284_v56 = vsel %vm1621_vm6, %v3252_v58, %v9575_v37  ;;  %v17556_v47 = vld [vmem:[#allocation147_spill] sm:$0xff] }
 0x341   : > { %v14308_v57 = vpack.i.bf16 %v17551_v36, %v17550_v14  ;;  %v3064_v40 = vsel %vm1390_vm10, %v17552_v62, %v9585_v1  ;;  %v3311_v49 = vpack.c.bf16 %v3284_v56, %v3283_v5  ;;  %v9620_v44 = vunpack.i.h.bf16 %v14080_v22  ;;  %v9683_v26 = vpop.permute.xlu1 %9682  ;;  %v17558_v14 = vld [vmem:[#allocation43_spill] sm:$0xff] }
 0x342   : > { %v3095_v50 = vsel %vm1423_vm11, %v3064_v40, %v9595_v4  ;;  %v9619_v7 = vunpack.i.l.bf16 %v14080_v22  ;;  %v3189_v0 = vsel %vm1522_vm14, %v3157_v25, %v9564_v23  ;;  %v3222_v51 = vsel %vm1555_vm15, %v3190_v63, %v9630_v11  ;;  %v14325_v33 = vpop.permute.xlu0 %9692  ;;  %v17557_v63 = vld [vmem:[#allocation7_spill] sm:$0xff] }
 0x343   : > { %9902 = vrot.lane.b32.xlu1 %v14303_v46, %s10142_s20  ;;  %v3221_v52 = vsel %vm1555_vm15, %v3189_v0, %v9629_v54  ;;  %9897 = vrot.lane.b32.xlu0 %v14190_v6, %s10142_s20  ;;  %v9640_v29 = vunpack.i.h.bf16 %v14147_v48  ;;  %v9639_v8 = vunpack.i.l.bf16 %v14147_v48  ;;  %vm17553_vm13 = vcmask 293888  }
 0x344   : > { %8657 = vmatprep.mubr.msk.bf16.mxu1 %vm17553_vm13, %v3311_v49  ;;  %v14329_v45 = vpack.i.bf16 %v17555_v59, %v17554_v39  ;;  %v9625_v9 = vunpack.i.h.bf16 %v14181_v34  ;;  %v9670_v32 = vunpack.i.h.bf16 %v14271_v30  ;;  %v9624_v18 = vunpack.i.l.bf16 %v14181_v34  ;;  %v17560_v39 = vld [vmem:[#allocation145_spill] sm:$0xff]  ;;  %vm17563_vm8 = vmmov %vm17553_vm13 }
 0x345   : > { %v9645_v6 = vunpack.i.h.bf16 %v14183_v35  ;;  %v9649_v1 = vunpack.i.l.bf16 %v14209_v3  ;;  %v9669_v13 = vunpack.i.l.bf16 %v14271_v30  ;;  %v14340_v2 = vpack.i.bf16 %v17556_v47, %v2373_v19  ;;  %v14348_v30 = vpop.permute.xlu1 %9687 }
 0x346   : > { %v9650_v37 = vunpack.i.h.bf16 %v14209_v3  ;;  %v9659_v4 = vunpack.i.l.bf16 %v14241_v43  ;;  %v9635_v11 = vunpack.i.h.bf16 %v14207_v41  ;;  %v9660_v20 = vunpack.i.h.bf16 %v14241_v43  ;;  %v14350_v58 = vpop.permute.xlu0 %9697 }
 0x347   : > { %9912 = vrot.lane.b32.xlu1 %v14329_v45, %s10143_s21  ;;  %9907 = vrot.lane.b32.xlu0 %v14215_v61, %s10143_s21  ;;  %v9675_v54 = vunpack.i.h.bf16 %v9673_v31  ;;  %v9674_v25 = vunpack.i.l.bf16 %v9673_v31  ;;  %v9634_v19 = vunpack.i.l.bf16 %v14207_v41  ;;  %v9654_v5 = vunpack.i.l.bf16 %v14239_v53 }
 0x348   : > { %v3253_v3 = vsel %vm1588_vm3, %v3221_v52, %v9669_v13  ;;  %v3254_v23 = vsel %vm1588_vm3, %v3222_v51, %v9670_v32  ;;  %v3065_v61 = vsel %vm1390_vm10, %v17557_v63, %v9649_v1  ;;  %v9664_v56 = vunpack.i.l.bf16 %v14269_v21  ;;  %v17559_v51 = vld [vmem:[#allocation149_spill] sm:$0xff]  ;;  %v17561_v13 = vld [vmem:[#allocation150_spill] sm:$0xff] }
 0x349   : > { %v3285_v43 = vsel %vm1621_vm6, %v3253_v3, %v9674_v25  ;;  %v3286_v31 = vsel %vm1621_vm6, %v3254_v23, %v9675_v54  ;;  %v3066_v41 = vsel %vm1390_vm10, %v17558_v14, %v9650_v37  ;;  %v3096_v36 = vsel %vm1423_vm11, %v3065_v61, %v9659_v4  ;;  %v14375_v32 = vpop.permute.xlu1 %9702  ;;  %v17562_v4 = vld [vmem:[#allocation24_spill] sm:$0xff] }
 0x34a   : > { %v9680_v62 = vunpack.i.h.bf16 %v14297_v38  ;;  %v3312_v40 = vpack.c.bf16 %v3286_v31, %v3285_v43  ;;  %v3097_v49 = vsel %vm1423_vm11, %v3066_v41, %v9660_v20  ;;  %v9679_v0 = vunpack.i.l.bf16 %v14297_v38  ;;  %v14377_v1 = vpop.permute.xlu0 %9707 }
 0x34b   : > { %9922 = vrot.lane.b32.xlu1 %v14340_v2, %s10144_s22  ;;  %9917 = vrot.lane.b32.xlu0 %v14248_v17, %s10144_s22  ;;  %v9685_v52 = vunpack.i.h.bf16 %v9683_v26  ;;  %v14373_v59 = vpack.i.bf16 %v17560_v39, %v17559_v51  ;;  %v14381_v37 = vpack.i.bf16 %v17525_v27, %v17561_v13  ;;  %v3067_v17 = vsel %vm1390_vm10, %v17562_v4, %v9654_v5 }
 0x34c   : > { %v9684_v54 = vunpack.i.l.bf16 %v9683_v26  ;;  %8658 = vmatmul.mubr.msk.bf16.gmra.mxu1 %vm17563_vm8, %v3312_v40  ;;  %v3127_v38 = vsel %vm1456_vm12, %v3095_v50, %v9634_v19  ;;  %v3098_v20 = vsel %vm1423_vm11, %v3067_v17, %v9664_v56  ;;  %v3128_v25 = vsel %vm1456_vm12, %v3096_v36, %v9635_v11 }
 0x34d   : > { %v3129_v3 = vsel %vm1456_vm12, %v3097_v49, %v9619_v7  ;;  %v17564_v23 = vrot.slane %v17525_v27, 2  ;;  %v17565_v63 = vrot.slane %v17561_v13, 2  ;;  %vm17566_vm5 = vcmask 1045504   ;;  %v9718_v41 = vpop.permute.xlu1 %9717 }
 0x34e   : > { %vm17567_vm13 = vcmask 130048   ;;  %v17568_v50 = vrot.slane %v17560_v39, 1  ;;  %v17569_v19 = vrot.slane %v17559_v51, 1  ;;  %vm17570_vm8 = vcmask 1046528   ;;  %v9713_v36 = vpop.permute.xlu0 %9712 }
 0x34f   : > { %9932 = vrot.lane.b32.xlu1 %v14381_v37, %s10145_s15  ;;  %v14397_v5 = vsel %vm17566_vm5, %v17565_v63, %v17564_v23  ;;  %v3160_v26 = vsel %vm17567_vm13, %v3128_v25, %v9680_v62  ;;  %9927 = vrot.lane.b32.xlu0 %v14303_v46, %s10145_s15  ;;  %vm17571_vm1 = vmmov %vm17567_vm13  ;;  %v9690_v56 = vunpack.i.h.bf16 %v14348_v30  ;;  %v17572_v43 = vrot.slane %v17522_v42, 1 }
 0x350   : > { %v2574_v11 = vsel %vm17570_vm8, %v17569_v19, %v17568_v50  ;;  %v3159_v7 = vsel %vm17571_vm1, %v3127_v38, %v9679_v0  ;;  %v3192_v61 = vsel %vm1522_vm14, %v3160_v26, %v9685_v52  ;;  %v17573_v31 = vmov %v17568_v50  ;;  %vm17574_vm5 = vmmov %vm17570_vm8  ;;  %v10056_v50 = vld [vmem:[%s10249_s17 + $0x108] sm:$0xff] }
 0x351   : > { %v2576_v14 = vsel %vm17574_vm5, %v17573_v31, %v17572_v43  ;;  %v3130_v62 = vsel %vm1456_vm12, %v3098_v20, %v9620_v44  ;;  %v3191_v46 = vsel %vm1522_vm14, %v3159_v7, %v9684_v54  ;;  %v9689_v40 = vunpack.i.l.bf16 %v14348_v30  ;;  %v14451_v23 = vpop.permute.xlu1 %9732 }
 0x352   : > { %v14420_v49 = vpack.i.bf16 %v2576_v14, %v2574_v11  ;;  %v14424_v0 = vpack.i.bf16 %v14162_v15, %v14397_v5  ;;  %v9695_v52 = vunpack.i.h.bf16 %v14325_v33  ;;  %v17575_v4 = vrot.slane %v17560_v39, 2  ;;  %v14453_v42 = vpop.permute.xlu0 %9722 }
 0x353   : > { %v17576_v17 = vrot.slane %v17559_v51, 2  ;;  %vm17577_vm1 = vcmask 1045504   ;;  %9942 = vrot.lane.b32.xlu1 %v14308_v57, %s10146_s16  ;;  %v9694_v44 = vunpack.i.l.bf16 %v14325_v33  ;;  %v3224_v30 = vsel %vm1555_vm15, %v3192_v61, %v9625_v9  ;;  %9937 = vrot.lane.b32.xlu0 %v14329_v45, %s10146_s16 }
 0x354   : > { %v17578_v54 = vmov %v17575_v4  ;;  %vm17579_vm13 = vmmov %vm17577_vm1  ;;  %v9720_v20 = vunpack.i.h.bf16 %v9718_v41  ;;  %v3223_v51 = vsel %vm1555_vm15, %v3191_v46, %v9624_v18  ;;  %v3256_v33 = vsel %vm1588_vm3, %v3224_v30, %v9690_v56 }
 0x355   : > { %v2675_v22 = vsel %vm17577_vm1, %v17576_v17, %v17575_v4  ;;  %v2677_v38 = vsel %vm17579_vm13, %v17578_v54, %v2676_v55  ;;  %v9719_v9 = vunpack.i.l.bf16 %v9718_v41  ;;  %vm17580_vm8 = vcmask 130048   ;;  %v17584_v41 = vld [vmem:[#allocation8_spill] sm:$0xff] }
 0x356   : > { %v14449_v25 = vpack.i.bf16 %v2677_v38, %v2675_v22  ;;  %v3162_v55 = vsel %vm17580_vm8, %v3130_v62, %v9640_v29  ;;  %v3255_v39 = vsel %vm1588_vm3, %v3223_v51, %v9689_v40  ;;  %v3288_v45 = vsel %vm1621_vm6, %v3256_v33, %v9720_v20  ;;  %vm17581_vm5 = vmmov %vm17580_vm8  ;;  %v9728_v61 = vpop.permute.xlu0 %9727  ;;  %v17587_v22 = vld [vmem:[#allocation19_spill] sm:$0xff]  ;;  %v10058_v33 = vld [vmem:[%s10249_s17 + $0xf0] sm:$0xff] }
 0x357   : > { %v3161_v34 = vsel %vm17581_vm5, %v3129_v3, %v9639_v8  ;;  %v9705_v18 = vunpack.i.h.bf16 %v14375_v32  ;;  %v3287_v63 = vsel %vm1621_vm6, %v3255_v39, %v9719_v9  ;;  %v9715_v26 = vunpack.i.h.bf16 %v9713_v36  ;;  %9952 = vrot.lane.b32.xlu1 %v14424_v0, %s10147_s23  ;;  %9947 = vrot.lane.b32.xlu0 %v14340_v2, %s10147_s23  ;;  %v14476_v3 = vpop.permute.xlu1 %9737  ;;  %v14511_v38 = vld [vmem:[%s10249_s17 + $0xe0] sm:$0xff]  ;;  %v14522_v39 = vld.sshfl [vmem:[%s10249_s17 + $0xe8] sm:$0x3 pattern:$0x76325410]  ;;  %vm17600_vm8 = vmmov %vm17581_vm5 }
 0x358   : > { %v5364_v19 = vcombine.high %v10056_v50, %v10056_v50  ;;  %v9644_v11 = vunpack.i.l.bf16 %v14183_v35  ;;  %v3313_v29 = vpack.c.bf16 %v3288_v45, %v3287_v63  ;;  %v9714_v7 = vunpack.i.l.bf16 %v9713_v36 }
 0x359   : > { %v9956_v48 = vpack.i.bf16 %v14397_v5, %v17556_v47  ;;  %v3194_v8 = vsel %vm1522_vm14, %v3162_v55, %v9645_v6  ;;  %vm17582_vm1 = vcmask 293888   ;;  %v9740_v31 = vunpack.i.h.bf16 %v14476_v3  ;;  %v17583_v47 = vld [vmem:[#allocation34_spill] sm:$0xff] }
 0x35a   : > { %v3193_v56 = vsel %vm1522_vm14, %v3161_v34, %v9644_v11  ;;  %v3226_v43 = vsel %vm1555_vm15, %v3194_v8, %v9695_v52  ;;  %8661 = vmatprep.mubr.msk.bf16.mxu1 %vm17582_vm1, %v3313_v29  ;;  %v9730_v14 = vunpack.i.h.bf16 %v9728_v61  ;;  %v3072_v35 = vsel %vm1390_vm10, %v17583_v47, %v9705_v18  ;;  %v17585_v52 = vld [vmem:[#allocation20_spill] sm:$0xff]  ;;  %v14508_v54 = vpop.permute.xlu0 %9742  ;;  %vm17590_vm13 = vmmov %vm17582_vm1 }
 0x35b   : > { %v3225_v2 = vsel %vm1555_vm15, %v3193_v56, %v9694_v44  ;;  %v3258_v6 = vsel %vm1588_vm3, %v3226_v43, %v9715_v26  ;;  %v9729_v5 = vunpack.i.l.bf16 %v9728_v61  ;;  %v14487_v36 = vrot.slane %v10056_v50, %v17584_v41  ;;  %2441 = vrot.lane.b32.xlu1 %v14162_v15, %s10141_s19  ;;  %9957 = vrot.lane.b32.xlu0 %v9956_v48, %s10141_s19  ;;  %v14506_v30 = vpop.permute.xlu1 %9752  ;;  %v14548_v48 = vld [vmem:[%s10249_s17 + $0x110] sm:$0xff]  ;;  %v14631_v11 = vld [vmem:[%s10249_s17 + $0x128] sm:$0xff]  ;;  %vm17601_vm1 = vmmov %vm17581_vm5 }
 0x35c   : > { %v3257_v62 = vsel %vm1588_vm3, %v3225_v2, %v9714_v7  ;;  %v14493_v46 = vsel %vm1423_vm11, %v3072_v35, %v9740_v31  ;;  %v3290_v40 = vsel %vm1621_vm6, %v3258_v6, %v9730_v14  ;;  %v17586_v4 = vcombine.high %v17585_v52, %v17585_v52  ;;  %17588 = vst [vmem:[#allocation77_spill] sm:$0xff] %v14506_v30  ;;  %v14563_v31 = vld.sshfl [vmem:[%s10249_s17 + $0x118] sm:$0x3 pattern:$0x76325410] }
 0x35d   : > { %v5297_v44 = vcombine.high %v17587_v22, %v17587_v22  ;;  %v3289_v15 = vsel %vm1621_vm6, %v3257_v62, %v9729_v5  ;;  %17589 = vst [vmem:[#allocation52_spill] sm:$0xff] %v14508_v54  ;;  %v14515_v20 = vrot.slane %v14511_v38, %v17584_v41  ;;  %v5323_v9 = vcombine.high %v10058_v33, %v10058_v33  ;;  %v14575_v6 = vld [vmem:[%s10249_s17 + $0xf8] sm:$0xff]  ;;  %v14644_v7 = vld.sshfl [vmem:[%s10249_s17 + $0x130] sm:$0x3 pattern:$0x76325410] }
 0x35e   : > { %v14500_v17 = vrot.slane %v17586_v4, %v17584_v41  ;;  %v3314_v51 = vpack.c.bf16 %v3290_v40, %v3289_v15  ;;  %v14519_v55 = vrot.slane %v10058_v33, %v17584_v41  ;;  %v14525_v45 = vrot.slane %v5364_v19, %v17584_v41  ;;  %v14540_v50 = vpop.permute.xlu0 %9747  ;;  %v14589_v4 = vld.sshfl [vmem:[%s10249_s17 + $0x100] sm:$0x3 pattern:$0x76325410] }
 0x35f   : > { %v5379_v34 = vcombine.high %v14487_v36, %v14487_v36  ;;  %9967 = vrot.lane.b32.xlu1 %v14373_v59, %s10142_s20  ;;  %v14534_v63 = vrot.slane %v5297_v44, 7  ;;  %9962 = vrot.lane.b32.xlu0 %v14381_v37, %s10142_s20  ;;  %v14538_v26 = vpop.permute.xlu1 %9757  ;;  %v14552_v8 = vrot.slane %v14548_v48, %v17584_v41  ;;  %v14555_v37 = vrot.slane %v5323_v9, %v17584_v41  ;;  %v10064_v44 = vld [vmem:[%s10249_s17 + $0x120] sm:$0xff] }
 0x360   : > { %8662 = vmatmul.mubr.msk.bf16.gmra.mxu1 %vm17590_vm13, %v3314_v51  ;;  %v5298_v18 = vcombine.high %v14500_v17, %v14500_v17  ;;  %v5338_v61 = vcombine.high %v14519_v55, %v14519_v55  ;;  %v5380_v43 = vcombine.high %v14525_v45, %v14525_v45  ;;  %v14579_v5 = vrot.slane %v14575_v6, %v17584_v41  ;;  %vm17602_vm13 = vmmov %vm17601_vm1 }
 0x361   : > { %v14565_v14 = vrot.slane %v5379_v34, 7  ;;  %v5405_v15 = vcombine.high %v10064_v44, %v10064_v44  ;;  %v14593_v51 = vrot.slane %v10064_v44, %v17584_v41  ;;  %v5339_v9 = vcombine.high %v14555_v37, %v14555_v37 }
 0x362   : > { %v14570_v47 = vrot.slane %v5298_v18, 7  ;;  %v14585_v40 = vpop.permute.xlu0 %9762  ;;  %v14598_v34 = vrot.slane %v5338_v61, 7  ;;  %v14602_v56 = vrot.slane %v5380_v43, 7  ;;  %v9655_v33 = vunpack.i.h.bf16 %v14239_v53 }
 0x363   : > { %9977 = vrot.lane.b32.xlu1 %v14420_v49, %s10143_s21  ;;  %9972 = vrot.lane.b32.xlu0 %v14308_v57, %s10143_s21  ;;  %v14583_v62 = vpop.permute.xlu1 %2271  ;;  %17592 = vst [vmem:[#allocation53_spill] sm:$0xff] %v14585_v40  ;;  %v14618_v57 = vrot.slane %v5405_v15, %v17584_v41  ;;  %v5420_v18 = vcombine.high %v14593_v51, %v14593_v51  ;;  %v14626_v61 = vrot.slane %v5339_v9, 7  ;;  %v9700_v29 = vunpack.i.h.bf16 %v14350_v58  ;;  %v17596_v40 = vld [vmem:[#allocation29_spill] sm:$0xff] }
 0x364   : > { %17591 = vst [vmem:[#allocation21_spill] sm:$0xff] %v14583_v62  ;;  %v14637_v52 = vrot.slane %v14631_v11, %v17584_v41  ;;  %v9699_v53 = vunpack.i.l.bf16 %v14350_v58  ;;  %v9704_v35 = vunpack.i.l.bf16 %v14375_v32  ;;  %v17593_v9 = vmov 0.0   ;;  %v17594_v32 = vld [vmem:[#allocation32_spill] sm:$0xff]  ;;  %v17595_v62 = vld [vmem:[#allocation31_spill] sm:$0xff] }
 0x365   : > { %v9710_v44 = vunpack.i.h.bf16 %v14377_v1  ;;  %v9709_v19 = vunpack.i.l.bf16 %v14377_v1  ;;  %v14653_v28 = vrot.slane %v5420_v18, 7  ;;  %v9739_v13 = vunpack.i.l.bf16 %v14476_v3  ;;  %v17597_v18 = vld [vmem:[#allocation35_spill] sm:$0xff] }
 0x366   : > { %v14623_v2 = vpop.permute.xlu0 %9767  ;;  %v3070_v1 = vsel %vm1390_vm10, %v17595_v62, %v9700_v29  ;;  %v9760_v12 = vunpack.i.h.bf16 %v14538_v26  ;;  %v3069_v58 = vsel %vm1390_vm10, %v17596_v40, %v9699_v53  ;;  %v3071_v24 = vsel %vm1390_vm10, %v17597_v18, %v9704_v35 }
 0x367   : > { %9987 = vrot.lane.b32.xlu1 %v14449_v25, %s10144_s22  ;;  %9982 = vrot.lane.b32.xlu0 %v14424_v0, %s10144_s22  ;;  %v14614_v43 = vpop.permute.xlu1 %9772  ;;  %v9665_v0 = vunpack.i.h.bf16 %v14269_v21  ;;  %v9750_v3 = vunpack.i.h.bf16 %v14540_v50  ;;  %v3101_v29 = vsel %vm1423_vm11, %v3070_v1, %v9710_v44  ;;  %v3102_v53 = vsel %vm1423_vm11, %v3071_v24, %v9739_v13 }
 0x368   : > { %v3134_v44 = vsel %vm1456_vm12, %v3102_v53, %v9760_v12  ;;  %v9769_v1 = vunpack.i.l.bf16 %v14623_v2 }
 0x36a   : > { %v9778_v27 = vpop.permute.xlu0 %9777 }
 0x36b   : > { %2834 = vrot.lane.b32.xlu1 %v17593_v9, %s10145_s15  ;;  %9992 = vrot.lane.b32.xlu0 %v14373_v59, %s10145_s15  ;;  %v9783_v15 = vpop.permute.xlu1 %9782  ;;  %v3068_v9 = vsel %vm1390_vm10, %v17594_v32, %v9655_v33  ;;  %v9759_v59 = vunpack.i.l.bf16 %v14538_v26  ;;  %v17598_v33 = vld [vmem:[#allocation135_spill] sm:$0xff]  ;;  %v3100_v32 = vsel %vm1423_vm11, %v3069_v58, %v9709_v19  ;;  %v9770_v58 = vunpack.i.h.bf16 %v14623_v2 }
 0x36c   : > { %v3099_v21 = vsel %vm1423_vm11, %v3068_v9, %v9665_v0  ;;  %v9749_v0 = vunpack.i.l.bf16 %v14540_v50  ;;  %v9775_v9 = vunpack.i.h.bf16 %v14614_v43  ;;  %v9774_v50 = vunpack.i.l.bf16 %v14614_v43 }
 0x36d   : > { %v3133_v19 = vsel %vm1456_vm12, %v3101_v29, %v9759_v59  ;;  %v3132_v24 = vsel %vm1456_vm12, %v3100_v32, %v9750_v3  ;;  %v9785_v13 = vunpack.i.h.bf16 %v9783_v15  ;;  %v9784_v35 = vunpack.i.l.bf16 %v9783_v15 }
 0x36e   : > { %v9788_v18 = vpop.permute.xlu0 %9787  ;;  %v9780_v43 = vunpack.i.h.bf16 %v9778_v27  ;;  %v9779_v59 = vunpack.i.l.bf16 %v9778_v27  ;;  %v3165_v26 = vsel %vm17600_vm8, %v3133_v19, %v9774_v50  ;;  %v3166_v2 = vsel %vm17581_vm5, %v3134_v44, %v9775_v9 }
 0x36f   : > { %2927 = vrot.lane.b32.xlu1 %v17598_v33, %s10146_s16  ;;  %9997 = vrot.lane.b32.xlu0 %v14420_v49, %s10146_s16  ;;  %v9793_v40 = vpop.permute.xlu1 %9792  ;;  %v17599_v49 = vld [vmem:[#allocation75_spill] sm:$0xff]  ;;  %v3131_v33 = vsel %vm1456_vm12, %v3099_v21, %v9749_v0  ;;  %v9790_v62 = vunpack.i.h.bf16 %v9788_v18  ;;  %v3164_v3 = vsel %vm17602_vm13, %v3132_v24, %v9770_v58  ;;  %v3198_v27 = vsel %vm1522_vm14, %v3166_v2, %v9785_v13  ;;  %vm17641_vm13 = vmmov %vm17601_vm1  ;;  %s16281_s16 = scalar_lea.hbm %s16323_s7, %s8559_s14 }
 0x370   : > { %v9795_v29 = vunpack.i.h.bf16 %v9793_v40  ;;  %v9794_v12 = vunpack.i.l.bf16 %v9793_v40  ;;  %v3163_v21 = vsel %vm17601_vm1, %v3131_v33, %v9769_v1  ;;  %v3196_v50 = vsel %vm1522_vm14, %v3164_v3, %v9780_v43 }
 0x371   : > { %v3195_v60 = vsel %vm1522_vm14, %v3163_v21, %v9779_v59  ;;  %v3228_v58 = vsel %vm1555_vm15, %v3196_v50, %v9790_v62  ;;  %v5896_v21 = vrot.slane %v14618_v57, 7  ;;  %vm17611_vm8 = vcmask 293888  }
 0x372   : > { %v9798_v10 = vpop.permute.xlu0 %9797  ;;  %vm17613_vm5 = vmmov %vm17611_vm8 }
 0x373   : > { %3020 = vrot.lane.b32.xlu1 %v17599_v49, %s10147_s23  ;;  %10002 = vrot.lane.b32.xlu0 %v14449_v25, %s10147_s23  ;;  %v9803_v53 = vpop.permute.xlu1 %9802  ;;  %v9789_v49 = vunpack.i.l.bf16 %v9788_v18  ;;  %v3197_v25 = vsel %vm1522_vm14, %v3165_v26, %v9784_v35  ;;  %v9800_v32 = vunpack.i.h.bf16 %v9798_v10  ;;  %v9799_v40 = vunpack.i.l.bf16 %v9798_v10 }
 0x374   : > { %v9805_v15 = vunpack.i.h.bf16 %v9803_v53  ;;  %v9804_v0 = vunpack.i.l.bf16 %v9803_v53  ;;  %v3229_v9 = vsel %vm1555_vm15, %v3197_v25, %v9794_v12  ;;  %v3230_v18 = vsel %vm1555_vm15, %v3198_v27, %v9795_v29 }
 0x375   : > { %v3227_v44 = vsel %vm1555_vm15, %v3195_v60, %v9789_v49  ;;  %v3260_v59 = vsel %vm1588_vm3, %v3228_v58, %v9800_v32  ;;  %v5902_v60 = vrot.slane %v14637_v52, 7  ;;  %v5895_v27 = vrot.slane %v14653_v28, 2 }
 0x376   : > { %v9808_v26 = vpop.permute.xlu0 %9807  ;;  %v3261_v35 = vsel %vm1588_vm3, %v3229_v9, %v9804_v0  ;;  %v3262_v10 = vsel %vm1588_vm3, %v3230_v18, %v9805_v15  ;;  %v3259_v43 = vsel %vm1588_vm3, %v3227_v44, %v9799_v40  ;;  %v17604_v32 = vcombine.high %v14618_v57, %v14618_v57 }
 0x377   : > { %v9813_v19 = vpop.permute.xlu1 %9812  ;;  %v9810_v24 = vunpack.i.h.bf16 %v9808_v26  ;;  %v9809_v13 = vunpack.i.l.bf16 %v9808_v26  ;;  %v17605_v18 = vunpack.i.l.bf16 %v14451_v23  ;;  %v17607_v58 = vunpack.i.h.bf16 %v14453_v42 }
 0x378   : > { %v9815_v1 = vunpack.i.h.bf16 %v9813_v19  ;;  %v9814_v33 = vunpack.i.l.bf16 %v9813_v19  ;;  %v14721_v40 = vrot.slane %v17604_v32, 7  ;;  %v17606_v19 = vld [vmem:[#allocation51_spill] sm:$0xff]  ;;  %v17609_v26 = vunpack.i.l.bf16 %v14453_v42 }
 0x379   : > { %v3291_v53 = vsel %vm1621_vm6, %v3259_v43, %v9809_v13  ;;  %v3292_v2 = vsel %vm1621_vm6, %v3260_v59, %v9810_v24  ;;  %v3075_v44 = vsel %vm1390_vm10, %v17606_v19, %v17605_v18  ;;  %v17612_v24 = vcombine.high %v14511_v38, %v14511_v38 }
 0x37a   : > { %v3293_v29 = vsel %vm1621_vm6, %v3261_v35, %v9814_v33  ;;  %v3294_v12 = vsel %vm1621_vm6, %v3262_v10, %v9815_v1  ;;  %v3315_v15 = vpack.c.bf16 %v3292_v2, %v3291_v53  ;;  %v9818_v25 = vpop.permute.xlu0 %9817  ;;  %v17608_v1 = vld [vmem:[#allocation48_spill] sm:$0xff]  ;;  %v17610_v35 = vld [vmem:[#allocation57_spill] sm:$0xff]  ;;  %v5314_v42 = vcombine.high %v14515_v20, %v14515_v20 }
 0x37b   : > { %v3316_v62 = vpack.c.bf16 %v3294_v12, %v3293_v29  ;;  %v14712_v49 = vpop.permute.xlu1 %9822  ;;  %v9820_v50 = vunpack.i.h.bf16 %v9818_v25  ;;  %v9819_v9 = vunpack.i.l.bf16 %v9818_v25  ;;  %v3074_v33 = vsel %vm1390_vm10, %v17608_v1, %v17607_v58 }
 0x37c   : > { %17603 = vst [vmem:[#allocation78_spill] sm:$0xff] %v14712_v49  ;;  %v9824_v0 = vunpack.i.l.bf16 %v14712_v49  ;;  %v3073_v10 = vsel %vm1390_vm10, %v17610_v35, %v17609_v26  ;;  %8665 = vmatprep.mubr.msk.bf16.mxu1 %vm17611_vm8, %v3315_v15  ;;  %v5313_v13 = vrot.slane %v17612_v24, %v17584_v41  ;;  %v17614_v29 = vcombine.high %v14575_v6, %v14575_v6  ;;  %vm17642_vm8 = vmmov %vm17601_vm1 }
 0x37d   : > { %v14744_v59 = vsel %vm1423_vm11, %v3073_v10, %v9819_v9  ;;  %8666 = vmatmul.mubr.msk.bf16.gmra.mxu1 %vm17613_vm5, %v3316_v62  ;;  %v14754_v53 = vsel %vm1423_vm11, %v3074_v33, %v9820_v50  ;;  %v17615_v2 = vcombine.high %v14548_v48, %v14548_v48  ;;  %v17616_v62 = vcombine.high %v14631_v11, %v14631_v11  ;;  %vm17643_vm5 = vmmov %vm17601_vm1 }
 0x37e   : > { %v14741_v43 = vsel %vm1423_vm11, %v3075_v44, %v9824_v0  ;;  %v5354_v12 = vrot.slane %v17614_v29, %v17584_v41  ;;  %v5315_v38 = vcombine.high %v5313_v13, %v5313_v13  ;;  %v5355_v6 = vcombine.high %v14579_v5, %v14579_v5 }
 0x37f   : > { %v14760_v15 = vrot.slane %v17615_v2, %v17584_v41  ;;  %v14766_v0 = vrot.slane %v17616_v62, %v17584_v41  ;;  %v5396_v32 = vcombine.high %v14552_v8, %v14552_v8  ;;  %v5437_v50 = vcombine.high %v14637_v52, %v14637_v52 }
 0x380   : > { %v5356_v25 = vcombine.high %v5354_v12, %v5354_v12  ;;  %v17617_v48 = vrot.slane %v17587_v22, 9  ;;  %v17619_v11 = vrot.slane %v14500_v17, 7  ;;  %v17620_v19 = vrot.slane %v14534_v63, 2 }
 0x381   : > { %v5826_v33 = vrot.slane %v14570_v47, 2  ;;  %v17622_v26 = vrot.slane %v14515_v20, 7  ;;  %v5830_v35 = vrot.slane %v5314_v42, 7  ;;  %v5833_v10 = vrot.slane %v5313_v13, 7 }
 0x382   : > { %v14779_v18 = vsel %vm10310_vm7, %v17617_v48, %v14534_v63  ;;  %v14787_v44 = vsel %vm10310_vm7, %v17620_v19, %v17619_v11  ;;  %v17621_v58 = vmov %v17619_v11  ;;  %v5836_v24 = vrot.slane %v5315_v38, 7 }
 0x383   : > { %v5823_v1 = vrot.slane %v17621_v58, 2  ;;  %v5829_v22 = vrot.slane %v17622_v26, 2  ;;  %v5397_v29 = vcombine.high %v14760_v15, %v14760_v15  ;;  %v5438_v63 = vcombine.high %v14766_v0, %v14766_v0 }
 0x384   : > { %v17623_v17 = vmov %v17622_v26  ;;  %v5832_v42 = vrot.slane %v5830_v35, 2  ;;  %v5835_v13 = vrot.slane %v5833_v10, 2  ;;  %v5838_v38 = vrot.slane %v5836_v24, 2 }
 0x385   : > { %v14801_v2 = vsel %vm10310_vm7, %v5823_v1, %v14570_v47  ;;  %v14807_v62 = vsel %vm10310_vm7, %v5826_v33, %v17623_v17  ;;  %v17624_v48 = vrot.slane %v14519_v55, 9  ;;  %v17625_v19 = vrot.slane %v14555_v37, 7 }
 0x386   : > { %v5851_v58 = vrot.slane %v14626_v61, 2  ;;  %v17626_v20 = vrot.slane %v14579_v5, 7  ;;  %v5855_v33 = vrot.slane %v5355_v6, 7  ;;  %v14823_v26 = vsel %vm10310_vm7, %v5829_v22, %v5830_v35 }
 0x387   : > { %v14814_v11 = vsel %vm10310_vm7, %v17624_v48, %v14598_v34  ;;  %v5848_v47 = vrot.slane %v17625_v19, 2  ;;  %v17627_v17 = vrot.slane %v14522_v39, 7  ;;  %v17628_v48 = vmov %v17625_v19 }
 0x388   : > { %v5854_v1 = vrot.slane %v17626_v20, 2  ;;  %v17629_v19 = vrot.slane %v14598_v34, 2  ;;  %v5858_v20 = vrot.slane %v5354_v12, 7  ;;  %v14841_v6 = vsel %vm10310_vm7, %v5832_v42, %v5833_v10 }
 0x389   : > { %v14829_v55 = vsel %vm10310_vm7, %v5838_v38, %v17627_v17  ;;  %v14845_v39 = vsel %vm10310_vm7, %v5835_v13, %v5836_v24  ;;  %v17630_v22 = vrot.slane %v14579_v5, 7  ;;  %v5857_v34 = vrot.slane %v5855_v33, 2 }
 0x38a   : > { %v14837_v3 = vsel %vm10310_vm7, %v17629_v19, %v17628_v48  ;;  %v14856_v35 = vsel %vm10310_vm7, %v5848_v47, %v14626_v61  ;;  %v14860_v12 = vsel %vm10310_vm7, %v5854_v1, %v5855_v33  ;;  %v5860_v10 = vrot.slane %v5858_v20, 2 }
 0x38b   : > { %v14851_v37 = vsel %vm10310_vm7, %v5851_v58, %v17630_v22  ;;  %v5861_v42 = vrot.slane %v5356_v25, 7  ;;  %v17631_v24 = vrot.slane %v14487_v36, 9  ;;  %v17632_v13 = vrot.slane %v14525_v45, 7 }
 0x38c   : > { %v17633_v38 = vrot.slane %v14565_v14, 2  ;;  %v5876_v25 = vrot.slane %v14602_v56, 2  ;;  %v17635_v36 = vrot.slane %v14552_v8, 7  ;;  %v5880_v17 = vrot.slane %v5396_v32, 7 }
 0x38d   : > { %v14867_v5 = vsel %vm10310_vm7, %v17631_v24, %v14565_v14  ;;  %v17634_v47 = vmov %v17632_v13  ;;  %v5863_v1 = vrot.slane %v5861_v42, 2  ;;  %v5883_v48 = vrot.slane %v14760_v15, 7 }
 0x38e   : > { %v14875_v61 = vsel %vm10310_vm7, %v17633_v38, %v17632_v13  ;;  %v5873_v58 = vrot.slane %v17634_v47, 2  ;;  %v5879_v33 = vrot.slane %v17635_v36, 2  ;;  %v14885_v19 = vsel %vm10310_vm7, %v5857_v34, %v5858_v20 }
 0x38f   : > { %v14889_v14 = vsel %vm10310_vm7, %v5860_v10, %v5861_v42  ;;  %v17636_v45 = vmov %v17635_v36  ;;  %v5886_v24 = vrot.slane %v5397_v29, 7  ;;  %v17637_v13 = vrot.slane %v14589_v4, 7 }
 0x390   : > { %v14895_v22 = vsel %vm10310_vm7, %v5876_v25, %v17636_v45  ;;  %v14906_v32 = vsel %vm10310_vm7, %v5873_v58, %v14602_v56  ;;  %v5882_v20 = vrot.slane %v5880_v17, 2  ;;  %v5885_v34 = vrot.slane %v5883_v48, 2 }
 0x391   : > { %v14901_v15 = vsel %vm10310_vm7, %v5863_v1, %v17637_v13  ;;  %v5888_v10 = vrot.slane %v5886_v24, 2  ;;  %v17638_v8 = vrot.slane %v14593_v51, 9  ;;  %v5898_v4 = vrot.slane %v5896_v21, 2 }
 0x392   : > { %v5901_v42 = vrot.slane %v14721_v40, 2  ;;  %v14920_v38 = vsel %vm10310_vm7, %v5879_v33, %v5880_v17  ;;  %v14928_v56 = vsel %vm10310_vm7, %v5895_v27, %v5896_v21  ;;  %v5904_v51 = vrot.slane %v5902_v60, 2 }
 0x393   : > { %v14913_v29 = vsel %vm10310_vm7, %v17638_v8, %v14653_v28  ;;  %v5905_v47 = vrot.slane %v5437_v50, 7  ;;  %v14934_v58 = vsel %vm10310_vm7, %v5882_v20, %v5883_v48  ;;  %v17639_v25 = vrot.slane %v14563_v31, 7 }
 0x394   : > { %v14946_v28 = vsel %vm10310_vm7, %v5901_v42, %v5902_v60  ;;  %v5908_v57 = vrot.slane %v14766_v0, 7  ;;  %v14951_v21 = vsel %vm10310_vm7, %v5885_v34, %v5886_v24  ;;  %v14956_v31 = vsel %vm10310_vm7, %v5898_v4, %v14721_v40 }
 0x395   : > { %v14940_v1 = vsel %vm10310_vm7, %v5888_v10, %v17639_v25  ;;  %v5907_v27 = vrot.slane %v5905_v47, 2  ;;  %v5911_v50 = vrot.slane %v5438_v63, 7  ;;  %v14960_v52 = vsel %vm10310_vm7, %v5904_v51, %v5905_v47 }
 0x396   : > { %v5910_v36 = vrot.slane %v5908_v57, 2  ;;  %v8481_v60 = vrot.slane %v14779_v18, 9  ;;  %v8482_v0 = vrot.slane %v14787_v44, 9  ;;  %v8483_v48 = vrot.slane %v14801_v2, 9 }
 0x397   : > { %v14966_v33 = vsel %vm10310_vm7, %v5907_v27, %v5908_v57  ;;  %v5913_v17 = vrot.slane %v5911_v50, 2  ;;  %v8484_v40 = vrot.slane %v14807_v62, 9  ;;  %v8485_v45 = vrot.slane %v14823_v26, 9 }
 0x398   : > { %v14972_v63 = vsel %vm10310_vm7, %v5910_v36, %v5911_v50  ;;  %v8486_v24 = vrot.slane %v14841_v6, 9  ;;  %v8487_v13 = vrot.slane %v14845_v39, 9  ;;  %v17640_v20 = vrot.slane %v14644_v7, 7  ;;  %v9833_v36 = vpop.permute.xlu1 %9832 }
 0x399   : > { %v8488_v10 = vrot.slane %v14829_v55, 9  ;;  %v8489_v8 = vrot.slane %v14814_v11, 9  ;;  %v8490_v4 = vrot.slane %v14837_v3, 9  ;;  %v8491_v42 = vrot.slane %v14856_v35, 9 }
 0x39a   : > { %v14981_v34 = vsel %vm10310_vm7, %v5913_v17, %v17640_v20  ;;  %v8492_v51 = vrot.slane %v14851_v37, 9  ;;  %v9828_v17 = vpop.permute.xlu0 %9827  ;;  %v9835_v9 = vunpack.i.h.bf16 %v9833_v36  ;;  %v9834_v25 = vunpack.i.l.bf16 %v9833_v36 }
 0x39b   : > { %v9830_v49 = vunpack.i.h.bf16 %v9828_v17  ;;  %v9829_v7 = vunpack.i.l.bf16 %v9828_v17  ;;  %v8509_v54 = vrot.slane %v14960_v52, 9  ;;  %v8510_v41 = vrot.slane %v14966_v33, 9 }
 0x39c   : > { %v3137_v20 = vsel %vm1456_vm12, %v14754_v53, %v9834_v25  ;;  %v3138_v16 = vsel %vm1456_vm12, %v14741_v43, %v9835_v9  ;;  %v9843_v57 = vpop.permute.xlu1 %9842  ;;  %v15017_v47 = vadd.f32 %v8481_v60, %v14779_v18  ;;  %v15033_v18 = vadd.f32 %v8485_v45, %v14823_v26 }
 0x39d   : > { %v3135_v17 = vsel %vm1456_vm12, %v14493_v46, %v9829_v7  ;;  %v3136_v27 = vsel %vm1456_vm12, %v14744_v59, %v9830_v49  ;;  %v9845_v53 = vunpack.i.h.bf16 %v9843_v57  ;;  %v9844_v25 = vunpack.i.l.bf16 %v9843_v57 }
 0x39e   : > { %v9838_v50 = vpop.permute.xlu0 %9837  ;;  %v15020_v46 = vadd.f32 %v8482_v0, %v14787_v44  ;;  %v15025_v7 = vadd.f32 %v8483_v48, %v14801_v2  ;;  %v15028_v57 = vadd.f32 %v8484_v40, %v14807_v62  ;;  %v15036_v44 = vadd.f32 %v8486_v24, %v14841_v6 }
 0x39f   : > { %v9840_v30 = vunpack.i.h.bf16 %v9838_v50  ;;  %v9839_v43 = vunpack.i.l.bf16 %v9838_v50  ;;  %v3169_v49 = vsel %vm17601_vm1, %v3137_v20, %v9844_v25  ;;  %v3170_v59 = vsel %vm17641_vm13, %v3138_v16, %v9845_v53 }
 0x3a0   : > { %v9853_v9 = vpop.permute.xlu1 %9852  ;;  %v15039_v2 = vadd.f32 %v8487_v13, %v14845_v39  ;;  %v15042_v62 = vadd.f32 %v8488_v10, %v14829_v55  ;;  %v6602_v45 = vadd.f32 %v8491_v42, %v14856_v35  ;;  %v6603_v24 = vadd.f32 %v8492_v51, %v14851_v37 }
 0x3a1   : > { %v3167_v50 = vsel %vm17642_vm8, %v3135_v17, %v9839_v43  ;;  %v3168_v36 = vsel %vm17643_vm5, %v3136_v27, %v9840_v30  ;;  %v9855_v60 = vunpack.i.h.bf16 %v9853_v9  ;;  %v9854_v0 = vunpack.i.l.bf16 %v9853_v9  ;;  %vm17677_vm8 = vmmov %vm17643_vm5 }
 0x3a2   : > { %v9848_v16 = vpop.permute.xlu0 %9847  ;;  %v6600_v30 = vadd.f32 %v8489_v8, %v14814_v11  ;;  %v6601_v27 = vadd.f32 %v8490_v4, %v14837_v3  ;;  %v17644_v10 = vrot.slane %v14860_v12, 9  ;;  %v17645_v3 = vrot.slane %v14885_v19, 9 }
 0x3a3   : > { %v9850_v48 = vunpack.i.h.bf16 %v9848_v16  ;;  %v9849_v40 = vunpack.i.l.bf16 %v9848_v16  ;;  %v3201_v26 = vsel %vm1522_vm14, %v3169_v49, %v9854_v0  ;;  %v3202_v6 = vsel %vm1522_vm14, %v3170_v59, %v9855_v60 }
 0x3a4   : > { %v9863_v55 = vpop.permute.xlu1 %9862  ;;  %v6604_v20 = vadd.f32 %v17644_v10, %v14860_v12  ;;  %v6605_v11 = vadd.f32 %v17645_v3, %v14885_v19  ;;  %v17646_v35 = vrot.slane %v14889_v14, 9  ;;  %v17647_v42 = vrot.slane %v14901_v15, 9 }
 0x3a5   : > { %v3199_v39 = vsel %vm1522_vm14, %v3167_v50, %v9849_v40  ;;  %v3200_v13 = vsel %vm1522_vm14, %v3168_v36, %v9850_v48  ;;  %v9865_v8 = vunpack.i.h.bf16 %v9863_v55  ;;  %v9864_v4 = vunpack.i.l.bf16 %v9863_v55 }
 0x3a6   : > { %v9858_v17 = vpop.permute.xlu0 %9857  ;;  %v6606_v37 = vadd.f32 %v17646_v35, %v14889_v14  ;;  %v6607_v51 = vadd.f32 %v17647_v42, %v14901_v15  ;;  %v17648_v12 = vrot.slane %v14867_v5, 9  ;;  %v17649_v19 = vrot.slane %v14875_v61, 9 }
 0x3a7   : > { %v9860_v36 = vunpack.i.h.bf16 %v9858_v17  ;;  %v9859_v53 = vunpack.i.l.bf16 %v9858_v17  ;;  %v3233_v9 = vsel %vm1555_vm15, %v3201_v26, %v9864_v4  ;;  %v3234_v49 = vsel %vm1555_vm15, %v3202_v6, %v9865_v8 }
 0x3a8   : > { %v6608_v25 = vadd.f32 %v17648_v12, %v14867_v5  ;;  %v6609_v43 = vadd.f32 %v17649_v19, %v14875_v61  ;;  %v17650_v14 = vrot.slane %v14906_v32, 9  ;;  %v17651_v15 = vrot.slane %v14895_v22, 9  ;;  %v9873_v0 = vpop.permute.xlu1 %9872 }
 0x3a9   : > { %v3231_v60 = vsel %vm1555_vm15, %v3199_v39, %v9859_v53  ;;  %v3232_v5 = vsel %vm1555_vm15, %v3200_v13, %v9860_v36  ;;  %v17652_v61 = vrot.slane %v14920_v38, 9  ;;  %v17653_v48 = vrot.slane %v14934_v58, 9 }
 0x3aa   : > { %v6610_v59 = vadd.f32 %v17650_v14, %v14906_v32  ;;  %v6611_v50 = vadd.f32 %v17651_v15, %v14895_v22  ;;  %v9875_v26 = vunpack.i.h.bf16 %v9873_v0  ;;  %v9874_v6 = vunpack.i.l.bf16 %v9873_v0  ;;  %v9868_v32 = vpop.permute.xlu0 %9867 }
 0x3ab   : > { %v6612_v16 = vadd.f32 %v17652_v61, %v14920_v38  ;;  %v6613_v40 = vadd.f32 %v17653_v48, %v14934_v58  ;;  %v17654_v55 = vrot.slane %v14951_v21, 9  ;;  %v17655_v39 = vrot.slane %v14940_v1, 9 }
 0x3ac   : > { %v9870_v10 = vunpack.i.h.bf16 %v9868_v32  ;;  %v9869_v3 = vunpack.i.l.bf16 %v9868_v32  ;;  %v17656_v38 = vrot.slane %v14913_v29, 9  ;;  %v17657_v58 = vrot.slane %v14928_v56, 9  ;;  %v9883_v12 = vpop.permute.xlu1 %9882 }
 0x3ad   : > { %v6614_v22 = vadd.f32 %v17654_v55, %v14951_v21  ;;  %v6615_v13 = vadd.f32 %v17655_v39, %v14940_v1  ;;  %v3265_v17 = vsel %vm1588_vm3, %v3233_v9, %v9874_v6  ;;  %v3266_v35 = vsel %vm1588_vm3, %v3234_v49, %v9875_v26  ;;  %v17665_v55 = vld [vmem:[#allocation99_spill] sm:$0xff] }
 0x3ae   : > { %v6616_v8 = vadd.f32 %v17656_v38, %v14913_v29  ;;  %v6617_v4 = vadd.f32 %v17657_v58, %v14928_v56  ;;  %v17658_v21 = vrot.slane %v14956_v31, 9  ;;  %v17659_v1 = vrot.slane %v14946_v28, 9  ;;  %v17668_v58 = vld [vmem:[#allocation78_spill] sm:$0xff] }
 0x3af   : > { %v3263_v53 = vsel %vm1588_vm3, %v3231_v60, %v9869_v3  ;;  %v3264_v29 = vsel %vm1588_vm3, %v3232_v5, %v9870_v10  ;;  %v6620_v56 = vadd.f32 %v8509_v54, %v14960_v52  ;;  %v6621_v19 = vadd.f32 %v8510_v41, %v14966_v33  ;;  %v17666_v3 = vld [vmem:[#allocation77_spill] sm:$0xff] }
 0x3b0   : > { %v6618_v42 = vadd.f32 %v17658_v21, %v14956_v31  ;;  %v6619_v36 = vadd.f32 %v17659_v1, %v14946_v28  ;;  %v9885_v9 = vunpack.i.h.bf16 %v9883_v12  ;;  %v9884_v49 = vunpack.i.l.bf16 %v9883_v12  ;;  %v9878_v31 = vpop.permute.xlu0 %9877  ;;  %v17672_v12 = vld [vmem:[#allocation101_spill] sm:$0xff] }
 0x3b1   : > { %v15115_v14 = vadd.f32 %v6600_v30, %v15017_v47  ;;  %v15118_v28 = vadd.f32 %v6601_v27, %v15020_v46  ;;  %v9880_v15 = vunpack.i.h.bf16 %v9878_v31  ;;  %v9879_v60 = vunpack.i.l.bf16 %v9878_v31 }
 0x3b2   : > { %v15121_v5 = vadd.f32 %v6602_v45, %v15025_v7  ;;  %v15124_v54 = vadd.f32 %v6603_v24, %v15028_v57  ;;  %v3297_v52 = vsel %vm1621_vm6, %v3265_v17, %v9884_v49  ;;  %v3298_v41 = vsel %vm1621_vm6, %v3266_v35, %v9885_v9  ;;  %v15136_v7 = vpop.permute.xlu1 %9892  ;;  %v17669_v17 = vld [vmem:[#allocation80_spill] sm:$0xff]  ;;  %v17673_v49 = vld [vmem:[#allocation37_spill] sm:$0xff] }
 0x3b3   : > { %v15129_v33 = vadd.f32 %v6604_v20, %v15033_v18  ;;  %v15132_v47 = vadd.f32 %v6605_v11, %v15036_v44  ;;  %v3318_v46 = vpack.c.bf16 %v3298_v41, %v3297_v52  ;;  %v3295_v30 = vsel %vm1621_vm6, %v3263_v53, %v9879_v60  ;;  %v17671_v53 = vld [vmem:[#allocation82_spill] sm:$0xff] }
 0x3b4   : > { %v3296_v27 = vsel %vm1621_vm6, %v3264_v29, %v9880_v15  ;;  %v15139_v57 = vadd.f32 %v6606_v37, %v15039_v2  ;;  %v9888_v24 = vpop.permute.xlu0 %9887  ;;  %v17660_v0 = vrot.slane %v14972_v63, 9  ;;  %v17661_v44 = vrot.slane %v14981_v34, 9  ;;  %v17674_v15 = vld [vmem:[#allocation142_spill] sm:$0xff] }
 0x3b5   : > { %v3317_v45 = vpack.c.bf16 %v3296_v27, %v3295_v30  ;;  %v15148_v11 = vadd.f32 %v6607_v51, %v15042_v62  ;;  %v15150_v61 = vadd.f32 %v6616_v8, %v6608_v25  ;;  %v15152_v48 = vadd.f32 %v6617_v4, %v6609_v43  ;;  %v17664_v25 = vld [vmem:[#allocation79_spill] sm:$0xff]  ;;  %v17676_v27 = vld [vmem:[#allocation60_spill] sm:$0xff] }
 0x3b6   : > { %v6622_v18 = vadd.f32 %v17660_v0, %v14972_v63  ;;  %v6623_v20 = vadd.f32 %v17661_v44, %v14981_v34  ;;  %vm17662_vm1 = vcmask 293888   ;;  %v15155_v2 = vadd.f32 %v6618_v42, %v6610_v59  ;;  %v9903_v63 = vpop.permute.xlu1 %9902 }
 0x3b7   : > { %8669 = vmatprep.mubr.msk.bf16.mxu1 %vm17662_vm1, %v3317_v45  ;;  %v15157_v37 = vadd.f32 %v6619_v36, %v6611_v50  ;;  %vm17663_vm13 = vmmov %vm17662_vm1  ;;  %v15160_v26 = vadd.f32 %v6620_v56, %v6612_v16  ;;  %v15162_v6 = vadd.f32 %v6621_v19, %v6613_v40  ;;  %v5921_v43 = vrot.slane %v17664_v25, 7  ;;  %v17667_v16 = vld [vmem:[#allocation52_spill] sm:$0xff] }
 0x3b8   : > { %8670 = vmatmul.mubr.msk.bf16.gmra.mxu1 %vm17663_vm13, %v3318_v46  ;;  %v9898_v34 = vpop.permute.xlu0 %9897  ;;  %v15164_v62 = vadd.f32 %v6622_v18, %v6614_v22  ;;  %v15166_v51 = vadd.f32 %v6623_v20, %v6615_v13  ;;  %v5920_v59 = vrot.slane %v17665_v55, 2  ;;  %v9735_v10 = vunpack.i.h.bf16 %v14451_v23  ;;  %v17675_v46 = vld [vmem:[#allocation144_spill] sm:$0xff]  ;;  %vm17678_vm1 = vmmov %vm17643_vm5 }
 0x3b9   : > { %v5923_v50 = vrot.slane %v5921_v43, 2  ;;  %v9754_v38 = vunpack.i.l.bf16 %v17666_v3  ;;  %v9745_v8 = vunpack.i.h.bf16 %v17667_v16  ;;  %v9744_v40 = vunpack.i.l.bf16 %v17667_v16  ;;  %vm17679_vm13 = vmmov %vm17678_vm1 }
 0x3ba   : > { %v9913_v32 = vpop.permute.xlu1 %9912  ;;  %v9825_v22 = vunpack.i.h.bf16 %v17668_v58  ;;  %v9894_v13 = vunpack.i.l.bf16 %v15136_v7  ;;  %v5478_v35 = vcombine.high %v17669_v17, %v17669_v17  ;;  %v15180_v42 = vsel %vm10310_vm7, %v5920_v59, %v5921_v43 }
 0x3bb   : > { %v9890_v1 = vunpack.i.h.bf16 %v9888_v24  ;;  %v9889_v23 = vunpack.i.l.bf16 %v9888_v24  ;;  %v15185_v29 = vsel %vm10310_vm7, %v5923_v50, %v17671_v53  ;;  %v5519_v56 = vcombine.high %v17672_v12, %v17672_v12 }
 0x3bc   : > { %v9908_v39 = vpop.permute.xlu0 %9907  ;;  %v9905_v19 = vunpack.i.h.bf16 %v9903_v63  ;;  %v9904_v9 = vunpack.i.l.bf16 %v9903_v63  ;;  %v3076_v31 = vsel %vm1390_vm10, %v17673_v49, %v9735_v10  ;;  %v3079_v60 = vsel %vm1390_vm10, %v17674_v15, %v9754_v38 }
 0x3bd   : > { %v9900_v52 = vunpack.i.h.bf16 %v9898_v34  ;;  %v9899_v41 = vunpack.i.l.bf16 %v9898_v34  ;;  %v3078_v30 = vsel %vm1390_vm10, %v17675_v46, %v9745_v8  ;;  %v3077_v45 = vsel %vm1390_vm10, %v17676_v27, %v9744_v40 }
 0x3be   : > { %v9923_v4 = vpop.permute.xlu1 %9922  ;;  %v3107_v24 = vsel %vm1423_vm11, %v3076_v31, %v9825_v22  ;;  %v3110_v0 = vsel %vm1423_vm11, %v3079_v60, %v9894_v13  ;;  %v3108_v44 = vsel %vm1423_vm11, %v3077_v45, %v9889_v23  ;;  %v3109_v20 = vsel %vm1423_vm11, %v3078_v30, %v9890_v1 }
 0x3bf   : > { %v9915_v63 = vunpack.i.h.bf16 %v9913_v32  ;;  %v9914_v25 = vunpack.i.l.bf16 %v9913_v32  ;;  %v3141_v34 = vsel %vm1456_vm12, %v3109_v20, %v9904_v9  ;;  %v3142_v55 = vsel %vm1456_vm12, %v3110_v0, %v9905_v19 }
 0x3c0   : > { %v9918_v36 = vpop.permute.xlu0 %9917  ;;  %v9910_v59 = vunpack.i.h.bf16 %v9908_v39  ;;  %v9909_v50 = vunpack.i.l.bf16 %v9908_v39  ;;  %v3139_v10 = vsel %vm1456_vm12, %v3107_v24, %v9899_v41  ;;  %v3140_v38 = vsel %vm1456_vm12, %v3108_v44, %v9900_v52 }
 0x3c1   : > { %v9925_v16 = vunpack.i.h.bf16 %v9923_v4  ;;  %v9924_v8 = vunpack.i.l.bf16 %v9923_v4  ;;  %v9920_v40 = vunpack.i.h.bf16 %v9918_v36  ;;  %v9919_v58 = vunpack.i.l.bf16 %v9918_v36 }
 0x3c2   : > { %v9933_v18 = vpop.permute.xlu1 %9932  ;;  %v3173_v32 = vsel %vm17677_vm8, %v3141_v34, %v9914_v25  ;;  %v3174_v23 = vsel %vm17643_vm5, %v3142_v55, %v9915_v63  ;;  %v3171_v39 = vsel %vm17678_vm1, %v3139_v10, %v9909_v50  ;;  %v3172_v49 = vsel %vm17679_vm13, %v3140_v38, %v9910_v59  ;;  %v17680_v38 = vld [vmem:[#allocation100_spill] sm:$0xff]  ;;  %vm17701_vm13 = vmmov %vm17678_vm1 }
 0x3c3   : > { %v9935_v22 = vunpack.i.h.bf16 %v9933_v18  ;;  %v9934_v13 = vunpack.i.l.bf16 %v9933_v18  ;;  %v3205_v4 = vsel %vm1522_vm14, %v3173_v32, %v9924_v8  ;;  %v3206_v36 = vsel %vm1522_vm14, %v3174_v23, %v9925_v16 }
 0x3c4   : > { %v9928_v43 = vpop.permute.xlu0 %9927  ;;  %v3203_v41 = vsel %vm1522_vm14, %v3171_v39, %v9919_v58  ;;  %v3204_v46 = vsel %vm1522_vm14, %v3172_v49, %v9920_v40  ;;  %v5946_v16 = vrot.slane %v17680_v38, 7  ;;  %v8515_v49 = vrot.slane %v15185_v29, 9 }
 0x3c5   : > { %v9930_v53 = vunpack.i.h.bf16 %v9928_v43  ;;  %v9929_v9 = vunpack.i.l.bf16 %v9928_v43  ;;  %v3237_v30 = vsel %vm1555_vm15, %v3205_v4, %v9934_v13  ;;  %v3238_v27 = vsel %vm1555_vm15, %v3206_v36, %v9935_v22  ;;  %v17685_v36 = vld [vmem:[#allocation103_spill] sm:$0xff] }
 0x3c6   : > { %v9943_v1 = vpop.permute.xlu1 %9942  ;;  %v15231_v13 = vrot.slane %v5478_v35, 7  ;;  %vm17684_vm8 = vcmask 293888   ;;  %v5948_v4 = vrot.slane %v5946_v16, 2  ;;  %v15244_v35 = vrot.slane %v5519_v56, 7 }
 0x3c7   : > { %v9945_v31 = vunpack.i.h.bf16 %v9943_v1  ;;  %v9944_v15 = vunpack.i.l.bf16 %v9943_v1  ;;  %v3235_v24 = vsel %vm1555_vm15, %v3203_v41, %v9929_v9  ;;  %v3236_v0 = vsel %vm1555_vm15, %v3204_v46, %v9930_v53  ;;  %v17681_v1 = vld [vmem:[#allocation81_spill] sm:$0xff]  ;;  %vm17686_vm5 = vmmov %vm17684_vm8 }
 0x3c8   : > { %v9938_v19 = vpop.permute.xlu0 %9937  ;;  %v5933_v32 = vrot.slane %v17681_v1, 7  ;;  %v8514_v9 = vrot.slane %v15180_v42, 9  ;;  %v17687_v41 = vrot.slane %v17669_v17, 7  ;;  %v17688_v17 = vld [vmem:[#allocation53_spill] sm:$0xff]  ;;  %v17724_v1 = vrot.slane %v15244_v35, 2 }
 0x3c9   : > { %v9940_v60 = vunpack.i.h.bf16 %v9938_v19  ;;  %v9939_v52 = vunpack.i.l.bf16 %v9938_v19  ;;  %v3269_v63 = vsel %vm1588_vm3, %v3237_v30, %v9944_v15  ;;  %v3270_v25 = vsel %vm1588_vm3, %v3238_v27, %v9945_v31  ;;  %v17682_v19 = vld [vmem:[#allocation104_spill] sm:$0xff]  ;;  %v17683_v31 = vld [vmem:[#allocation85_spill] sm:$0xff] }
 0x3ca   : > { %v9953_v45 = vpop.permute.xlu1 %9952  ;;  %v5945_v39 = vrot.slane %v17682_v19, 2  ;;  %v8516_v15 = vrot.slane %v17683_v31, 9  ;;  %v15252_v46 = vrot.slane %v17687_v41, 2  ;;  %v15257_v27 = vrot.slane %v5933_v32, 2  ;;  %v17700_v41 = vld [vmem:[#allocation141_spill] sm:$0xff] }
 0x3cb   : > { %v9955_v18 = vunpack.i.h.bf16 %v9953_v45  ;;  %v9954_v44 = vunpack.i.l.bf16 %v9953_v45  ;;  %v3267_v55 = vsel %vm1588_vm3, %v3235_v24, %v9939_v52  ;;  %v3268_v59 = vsel %vm1588_vm3, %v3236_v0, %v9940_v60 }
 0x3cc   : > { %v9948_v20 = vpop.permute.xlu0 %9947  ;;  %v16761_v60 = vrot.slane %v17685_v36, 7  ;;  %v9755_v45 = vunpack.i.h.bf16 %v17666_v3  ;;  %v15263_v24 = vadd.f32 %v8514_v9, %v15180_v42  ;;  %v15267_v0 = vsel %vm10310_vm7, %v5945_v39, %v5946_v16  ;;  %v17689_v3 = vld [vmem:[#allocation93_spill] sm:$0xff]  ;;  %v17696_v9 = vld [vmem:[#allocation71_spill] sm:$0xff] }
 0x3cd   : > { %v9950_v43 = vunpack.i.h.bf16 %v9948_v20  ;;  %v9949_v34 = vunpack.i.l.bf16 %v9948_v20  ;;  %v3301_v50 = vsel %vm1621_vm6, %v3269_v63, %v9954_v44  ;;  %v3302_v10 = vsel %vm1621_vm6, %v3270_v25, %v9955_v18  ;;  %v17697_v39 = vld [vmem:[#allocation21_spill] sm:$0xff] }
 0x3ce   : > { %v3320_v8 = vpack.c.bf16 %v3302_v10, %v3301_v50  ;;  %v15226_v22 = vpop.permute.xlu1 %2441  ;;  %v9765_v18 = vunpack.i.h.bf16 %v17688_v17  ;;  %v9764_v44 = vunpack.i.l.bf16 %v17688_v17  ;;  %v15272_v20 = vadd.f32 %v8515_v49, %v15185_v29  ;;  %v17698_v49 = vld [vmem:[#allocation156_spill] sm:$0xff] }
 0x3cf   : > { %v3299_v40 = vsel %vm1621_vm6, %v3267_v55, %v9949_v34  ;;  %v3300_v58 = vsel %vm1621_vm6, %v3268_v59, %v9950_v43  ;;  %v15275_v63 = vadd.f32 %v8516_v15, %v17683_v31  ;;  %v17690_v25 = vrot.slane %v17689_v3, 7  ;;  %v17691_v34 = vld [vmem:[#allocation105_spill] sm:$0xff]  ;;  %v17699_v15 = vld [vmem:[#allocation150_spill] sm:$0xff] }
 0x3d0   : > { %v3319_v23 = vpack.c.bf16 %v3300_v58, %v3299_v40  ;;  %v15234_v53 = vpop.permute.xlu0 %9957  ;;  %v9895_v42 = vunpack.i.h.bf16 %v15136_v7  ;;  %v15285_v55 = vsel %vm10310_vm7, %v5948_v4, %v17691_v34  ;;  %v17692_v59 = vrot.slane %v17672_v12, 7  ;;  %v17695_v58 = vld [vmem:[#allocation120_spill] sm:$0xff] }
 0x3d1   : > { %v15279_v43 = vrot.slane %v17690_v25, 2  ;;  %v15294_v10 = vrot.slane %v16761_v60, 2  ;;  %v8522_v16 = vrot.slane %v15267_v0, 9  ;;  %v3080_v12 = vsel %vm1390_vm10, %v17696_v9, %v9755_v45 }
 0x3d2   : > { %8673 = vmatprep.mubr.msk.bf16.mxu1 %vm17684_vm8, %v3319_v23  ;;  %v15248_v52 = vpop.permute.xlu1 %9967  ;;  %v15289_v50 = vrot.slane %v17692_v59, 2  ;;  %v15302_v23 = vmul.f32 0.25, %v17695_v58  ;;  %v3083_v31 = vsel %vm1390_vm10, %v17698_v49, %v17697_v39  ;;  %v3082_v4 = vsel %vm1390_vm10, %v17699_v15, %v9765_v18  ;;  %vm17702_vm8 = vmmov %vm17678_vm1 }
 0x3d3   : > { %8674 = vmatmul.mubr.msk.bf16.gmra.mxu1 %vm17686_vm5, %v3320_v8  ;;  %v17693_v8 = vld [vmem:[#allocation118_spill] sm:$0xff]  ;;  %v3081_v17 = vsel %vm1390_vm10, %v17700_v41, %v9764_v44  ;;  %v15316_v3 = vmul.f32 0.25, %v15115_v14  ;;  %v3111_v25 = vsel %vm1423_vm11, %v3080_v12, %v9895_v42  ;;  %v15320_v34 = vmul.f32 0.25, %v15118_v28  ;;  %vm17703_vm5 = vmmov %vm17678_vm1 }
 0x3d4   : > { %v15260_v56 = vpop.permute.xlu0 %9962  ;;  %v17694_v7 = vrot.slane %v17693_v8, 7  ;;  %v15323_v45 = vmul.f32 0.25, %v15121_v5  ;;  %v15326_v59 = vmul.f32 0.25, %v15124_v54  ;;  %v15329_v18 = vmul.f32 0.25, %v15129_v33 }
 0x3d5   : > { %v15332_v44 = vmul.f32 0.25, %v15132_v47  ;;  %v15335_v14 = vmul.f32 0.25, %v15139_v57  ;;  %v15338_v42 = vmul.f32 0.25, %v15148_v11  ;;  %v9960_v28 = vunpack.i.h.bf16 %v15234_v53 }
 0x3d6   : > { %v9978_v38 = vpop.permute.xlu1 %9977  ;;  %v15299_v40 = vrot.slane %v17694_v7, 2  ;;  %v15342_v7 = vmul.f32 0.25, %v15150_v61  ;;  %v15345_v54 = vmul.f32 0.25, %v15152_v48  ;;  %v15348_v33 = vmul.f32 0.25, %v15155_v2 }
 0x3d7   : > { %v9970_v47 = vunpack.i.h.bf16 %v15248_v52  ;;  %v9969_v57 = vunpack.i.l.bf16 %v15248_v52  ;;  %v15353_v58 = vmul.f32 0.25, %v15157_v37  ;;  %v6816_v11 = vpack.c.bf16 %v15316_v3, %v15316_v3 }
 0x3d8   : > { %v15306_v19 = vpop.permute.xlu0 %9972  ;;  %v9980_v9 = vunpack.i.h.bf16 %v9978_v38  ;;  %v9979_v12 = vunpack.i.l.bf16 %v9978_v38  ;;  %v6817_v61 = vpack.c.bf16 %v15320_v34, %v15320_v34  ;;  %v6818_v48 = vpack.c.bf16 %v15323_v45, %v15323_v45 }
 0x3d9   : > { %v6819_v52 = vpack.c.bf16 %v15326_v59, %v15326_v59  ;;  %v6820_v37 = vpack.c.bf16 %v15329_v18, %v15329_v18  ;;  %v3114_v15 = vsel %vm1423_vm11, %v3083_v31, %v15226_v22  ;;  %v9959_v38 = vunpack.i.l.bf16 %v15234_v53 }
 0x3da   : > { %v9988_v8 = vpop.permute.xlu1 %9987  ;;  %v3113_v41 = vsel %vm1423_vm11, %v3082_v4, %v9960_v28  ;;  %v9964_v34 = vunpack.i.l.bf16 %v15260_v56  ;;  %v3146_v45 = vsel %vm1456_vm12, %v3114_v15, %v9970_v47  ;;  %v9965_v60 = vunpack.i.h.bf16 %v15260_v56 }
 0x3db   : > { %v9990_v2 = vunpack.i.h.bf16 %v9988_v8  ;;  %v9989_v39 = vunpack.i.l.bf16 %v9988_v8  ;;  %v3145_v8 = vsel %vm1456_vm12, %v3113_v41, %v9969_v57  ;;  %v9974_v59 = vunpack.i.l.bf16 %v15306_v19 }
 0x3dc   : > { %v9983_v5 = vpop.permute.xlu0 %9982  ;;  %v3177_v18 = vsel %vm17678_vm1, %v3145_v8, %v9979_v12  ;;  %v3178_v30 = vsel %vm17701_vm13, %v3146_v45, %v9980_v9  ;;  %v6821_v22 = vpack.c.bf16 %v15332_v44, %v15332_v44  ;;  %v6825_v53 = vpack.c.bf16 %v15345_v54, %v15345_v54 }
 0x3dd   : > { %v9975_v31 = vunpack.i.h.bf16 %v15306_v19  ;;  %v9984_v4 = vunpack.i.l.bf16 %v9983_v5  ;;  %v3209_v28 = vsel %vm1522_vm14, %v3177_v18, %v9989_v39  ;;  %v3210_v47 = vsel %vm1522_vm14, %v3178_v30, %v9990_v2 }
 0x3de   : > { %v2835_v49 = vpop.permute.xlu1 %2834  ;;  %v3112_v57 = vsel %vm1423_vm11, %v3081_v17, %v9959_v38  ;;  %v3143_v12 = vsel %vm1456_vm12, %v3111_v25, %v9964_v34  ;;  %v9985_v15 = vunpack.i.h.bf16 %v9983_v5  ;;  %v6826_v19 = vpack.c.bf16 %v15348_v33, %v15348_v33 }
 0x3df   : > { %v3144_v44 = vsel %vm1456_vm12, %v3112_v57, %v9965_v60  ;;  %v3175_v45 = vsel %vm17702_vm8, %v3143_v12, %v9974_v59  ;;  %v3241_v39 = vsel %vm1555_vm15, %v3209_v28, %v2835_v49  ;;  %v3242_v30 = vsel %vm1555_vm15, %v3210_v47, %v2835_v49 }
 0x3e0   : > { %v9993_v29 = vpop.permute.xlu0 %9992  ;;  %v3176_v17 = vsel %vm17703_vm5, %v3144_v44, %v9975_v31  ;;  %v3207_v25 = vsel %vm1522_vm14, %v3175_v45, %v9984_v4  ;;  %v6953_v12 = vunpack.c.l.b16 %v6817_v61  ;;  %v6955_v44 = vunpack.c.l.b16 %v6819_v52 }
 0x3e1   : > { %v9994_v9 = vunpack.i.l.bf16 %v9993_v29  ;;  %v9995_v54 = vunpack.i.h.bf16 %v9993_v29  ;;  %v3208_v29 = vsel %vm1522_vm14, %v3176_v17, %v9985_v15  ;;  %v6961_v61 = vunpack.c.l.b16 %v6825_v53 }
 0x3e2   : > { %v2928_v56 = vpop.permute.xlu1 %2927  ;;  %vm17704_vm12 = vcmask 293888   ;;  %v6823_v52 = vpack.c.bf16 %v15338_v42, %v15338_v42  ;;  %v7044_v17 = vrot.slane %v6953_v12, 7  ;;  %vm17713_vm1 = vcmask 1046534  }
 0x3e3   : > { %v3273_v5 = vsel %vm1588_vm3, %v3241_v39, %v2928_v56  ;;  %v3274_v60 = vsel %vm1588_vm3, %v3242_v30, %v2928_v56  ;;  %v3239_v34 = vsel %vm1555_vm15, %v3207_v25, %v9994_v9  ;;  %v3240_v18 = vsel %vm1555_vm15, %v3208_v29, %v9995_v54  ;;  %vm17705_vm14 = vmmov %vm17704_vm12 }
 0x3e4   : > { %v9998_v41 = vpop.permute.xlu0 %9997  ;;  %v6824_v56 = vpack.c.bf16 %v15342_v7, %v15342_v7  ;;  %v6764_v54 = vmul.f32 0.25, %v15160_v26  ;;  %v6765_v39 = vmul.f32 0.25, %v15162_v6  ;;  %v6822_v30 = vpack.c.bf16 %v15335_v14, %v15335_v14  ;;  %vm17718_vm5 = vmmov %vm17713_vm1 }
 0x3e5   : > { %v10000_v2 = vunpack.i.h.bf16 %v9998_v41  ;;  %v9999_v8 = vunpack.i.l.bf16 %v9998_v41  ;;  %v6954_v41 = vunpack.c.l.b16 %v6818_v48  ;;  %v6956_v7 = vunpack.c.l.b16 %v6820_v37 }
 0x3e6   : > { %v3021_v38 = vpop.permute.xlu1 %3020  ;;  %v6766_v48 = vmul.f32 0.25, %v15164_v62  ;;  %v6827_v26 = vpack.c.bf16 %v15353_v58, %v15353_v58  ;;  %v6957_v6 = vunpack.c.l.b16 %v6821_v22  ;;  %v6960_v14 = vunpack.c.l.b16 %v6824_v56 }
 0x3e7   : > { %v3305_v33 = vsel %vm1621_vm6, %v3273_v5, %v3021_v38  ;;  %v3306_v59 = vsel %vm1621_vm6, %v3274_v60, %v3021_v38  ;;  %v3271_v4 = vsel %vm1588_vm3, %v3239_v34, %v9999_v8  ;;  %v3272_v57 = vsel %vm1588_vm3, %v3240_v18, %v10000_v2  ;;  %v17706_v38 = vld [vmem:[#allocation121_spill] sm:$0xff]  ;;  %v17707_v18 = vld [vmem:[#allocation122_spill] sm:$0xff] }
 0x3e8   : > { %v10003_v49 = vpop.permute.xlu0 %10002  ;;  %v3322_v28 = vpack.c.bf16 %v3306_v59, %v3305_v33  ;;  %v6952_v2 = vunpack.c.l.b16 %v6816_v11  ;;  %v6962_v8 = vunpack.c.l.b16 %v6826_v19  ;;  %v7046_v3 = vrot.slane %v6954_v41, 6 }
 0x3e9   : > { %v10005_v31 = vunpack.i.h.bf16 %v10003_v49  ;;  %v10004_v47 = vunpack.i.l.bf16 %v10003_v49  ;;  %v7048_v11 = vrot.slane %v6955_v44, 5  ;;  %v6767_v37 = vmul.f32 0.25, %v15166_v51  ;;  %v17709_v44 = vld [vmem:[#allocation125_spill] sm:$0xff] }
 0x3ea   : > { %v6828_v53 = vpack.c.bf16 %v6764_v54, %v6764_v54  ;;  %v6829_v19 = vpack.c.bf16 %v6765_v39, %v6765_v39  ;;  %v6958_v25 = vunpack.c.l.b16 %v6822_v30  ;;  %v7045_v62 = vsel %vm6985_vm2, %v7044_v17, %v6952_v2  ;;  %v17710_v54 = vld [vmem:[#allocation119_spill] sm:$0xff] }
 0x3eb   : > { %v3303_v15 = vsel %vm1621_vm6, %v3271_v4, %v10004_v47  ;;  %v3304_v9 = vsel %vm1621_vm6, %v3272_v57, %v10005_v31  ;;  %v7050_v5 = vrot.slane %v6956_v7, 4  ;;  %v7058_v60 = vrot.slane %v6961_v61, 7  ;;  %v17708_v31 = vld [vmem:[#allocation123_spill] sm:$0xff] }
 0x3ec   : > { %v3321_v45 = vpack.c.bf16 %v3304_v9, %v3303_v15  ;;  %v7060_v42 = vrot.slane %v6962_v8, 6  ;;  %v6778_v29 = vmul.f32 0.25, %v17706_v38  ;;  %v6830_v58 = vpack.c.bf16 %v6766_v48, %v6766_v48 }
 0x3ed   : > { %v6959_v22 = vunpack.c.l.b16 %v6823_v52  ;;  %v7047_v34 = vsel %vm5610_vm0, %v7046_v3, %v7045_v62  ;;  %v6963_v33 = vunpack.c.l.b16 %v6827_v26  ;;  %v7052_v49 = vrot.slane %v6957_v6, 3 }
 0x3ee   : > { %8677 = vmatprep.mubr.msk.bf16.mxu1 %vm17704_vm12, %v3321_v45  ;;  %v7049_v59 = vsel %vm6990_vm9, %v7048_v11, %v7047_v34  ;;  %v7059_v51 = vsel %vm6985_vm2, %v7058_v60, %v6960_v14  ;;  %v6780_v47 = vmul.f32 0.25, %v17708_v31  ;;  %v6831_v4 = vpack.c.bf16 %v6767_v37, %v6767_v37  ;;  %v17712_v14 = vld [vmem:[#allocation107_spill] sm:$0xff]  ;;  %v17716_v34 = vld [vmem:[#allocation10_spill] sm:$0xff]  ;;  %v17719_v31 = vld [vmem:[#allocation124_spill] sm:$0xff] }
 0x3ef   : > { %8678 = vmatmul.mubr.msk.bf16.gmra.mxu1 %vm17705_vm14, %v3322_v28  ;;  %v6779_v28 = vmul.f32 0.25, %v17707_v18  ;;  %v6964_v57 = vunpack.c.l.b16 %v6828_v53  ;;  %v6965_v56 = vunpack.c.l.b16 %v6829_v19  ;;  %v7051_v12 = vsel %vm5612_vm4, %v7050_v5, %v7049_v59  ;;  %v17714_v53 = vld [vmem:[#allocation109_spill] sm:$0xff]  ;;  %vm17730_vm14 = vmmov %vm17713_vm1 }
 0x3f0   : > { %v7054_v15 = vrot.slane %v6958_v25, 2  ;;  %v7061_v9 = vsel %vm5610_vm0, %v7060_v42, %v7059_v51  ;;  %v8523_v41 = vrot.slane %v15285_v55, 9  ;;  %v6012_v45 = vsel %vm10310_vm7, %v15299_v40, %v17709_v44 }
 0x3f1   : > { %v6776_v39 = vmul.f32 0.25, %v17710_v54  ;;  %v7056_v30 = vrot.slane %v6959_v22, 1  ;;  %v6841_v2 = vpack.c.bf16 %v15302_v23, %v15302_v23  ;;  %v6966_v7 = vunpack.c.l.b16 %v6830_v58 }
 0x3f2   : > { %vm17711_vm3 = vcmask 1045509   ;;  %v7062_v8 = vrot.slane %v6963_v33, 5  ;;  %v6842_v48 = vpack.c.bf16 %v6778_v29, %v6778_v29  ;;  %v6843_v52 = vpack.c.bf16 %v6779_v28, %v6779_v28 }
 0x3f3   : > { %v7053_v61 = vsel %vm17711_vm3, %v7052_v49, %v7051_v12  ;;  %v6967_v26 = vunpack.c.l.b16 %v6831_v4  ;;  %v7064_v6 = vrot.slane %v6964_v57, 4  ;;  %v8524_v17 = vrot.slane %v17712_v14, 9  ;;  %vm17717_vm8 = vmmov %vm17711_vm3 }
 0x3f4   : > { %v6844_v3 = vpack.c.bf16 %v6780_v47, %v6780_v47  ;;  %v7055_v11 = vsel %vm17713_vm1, %v7054_v15, %v7053_v61  ;;  %v7066_v40 = vrot.slane %v6965_v56, 3  ;;  %v6633_v37 = vadd.f32 %v8522_v16, %v15267_v0 }
 0x3f5   : > { %v15445_v23 = vmul.f32 0.25, %v17714_v53  ;;  %v8543_v19 = vrot.slane %v6012_v45, 9  ;;  %vm17715_vm13 = vcmask 1047559   ;;  %v6840_v62 = vpack.c.bf16 %v6776_v39, %v6776_v39  ;;  %v17722_v39 = vld [vmem:[#allocation83_spill] sm:$0xff] }
 0x3f6   : > { %v7057_v25 = vsel %vm17715_vm13, %v7056_v30, %v7055_v11  ;;  %v15448_v5 = vunpack.c.l.b16 %v6841_v2  ;;  %v7063_v60 = vsel %vm6990_vm9, %v7062_v8, %v7061_v9  ;;  %v7068_v42 = vrot.slane %v6966_v7, 2  ;;  %vm17720_vm12 = vmmov %vm17715_vm13 }
 0x3f7   : > { %v15451_v38 = vunpack.c.l.b16 %v6842_v48  ;;  %v15453_v29 = vunpack.c.l.b16 %v6843_v52  ;;  %v7065_v58 = vsel %vm5612_vm4, %v7064_v6, %v7063_v60  ;;  %v7070_v22 = vrot.slane %v6967_v26, 1 }
 0x3f8   : > { %v6634_v0 = vadd.f32 %v8523_v41, %v15285_v55  ;;  %v15457_v16 = vunpack.c.l.b16 %v6844_v3  ;;  %v6783_v33 = vmul.f32 0.25, %v17716_v34  ;;  %v7067_v59 = vsel %vm17717_vm8, %v7066_v40, %v7065_v58 }
 0x3f9   : > { %v6635_v49 = vadd.f32 %v8524_v17, %v17712_v14  ;;  %v6839_v51 = vpack.c.bf16 %v15445_v23, %v15445_v23  ;;  %v6654_v18 = vadd.f32 %v8543_v19, %v6012_v45  ;;  %v7069_v28 = vsel %vm17718_vm5, %v7068_v42, %v7067_v59 }
 0x3fa   : > { %v15466_v47 = vmul.f32 0.25, %v17719_v31  ;;  %v15468_v4 = vunpack.c.l.b16 %v6840_v62  ;;  %v7086_v55 = vrot.slane %v15448_v5, 7  ;;  %v7071_v57 = vsel %vm17720_vm12, %v7070_v22, %v7069_v28 }
 0x3fb   : > { %v7088_v56 = vrot.slane %v15451_v38, 6  ;;  %v7090_v12 = vrot.slane %v15453_v29, 5  ;;  %v7102_v15 = vpack.c.b16 %v7071_v57, %v7057_v25  ;;  %v5931_v9 = vsel %vm10310_vm7, %v15252_v46, %v15231_v13  ;;  %v17727_v25 = vld [vmem:[#allocation108_spill] sm:$0xff]  ;;  %v15536_v38 = vld [vmem:[%s16320_s4] ss:$0 sm:$0xff] }
 0x3fc   : > { %v7092_v41 = vrot.slane %v15457_v16, 4  ;;  %v6847_v44 = vpack.c.bf16 %v6783_v33, %v6783_v33  ;;  %v17721_v45 = vrot.slane %v15231_v13, 2  ;;  %v5937_v30 = vsel %vm10310_vm7, %v15257_v27, %v17722_v39  ;;  %v17726_v27 = vld [vmem:[#allocation95_spill] sm:$0xff] }
 0x3fd   : > { %8687 = vmatprep.mubr.msk.bf16.mxu1 %vm1390_vm10, %v7102_v15  ;;  %v5956_v46 = vsel %vm10310_vm7, %v15289_v50, %v15244_v35  ;;  %v17723_v2 = vrot.slane %v17685_v36, 7  ;;  %v5987_v61 = vsel %vm10310_vm7, %v15279_v43, %v17726_v27  ;;  %v8517_v8 = vrot.slane %v5931_v9, 9 }
 0x3fe   : > { %v5934_v54 = vsel %vm10310_vm7, %v17721_v45, %v5933_v32  ;;  %v17725_v32 = vld [vmem:[#allocation106_spill] sm:$0xff]  ;;  %v8519_v50 = vrot.slane %v5937_v30, 9  ;;  %v8525_v52 = vrot.slane %v5956_v46, 9  ;;  %v8535_v35 = vrot.slane %v5987_v61, 9 }
 0x3ff   : > { %v5959_v13 = vsel %vm10310_vm7, %v17724_v1, %v17723_v2  ;;  %v5962_v7 = vsel %vm10310_vm7, %v15294_v10, %v17725_v32  ;;  %v8518_v48 = vrot.slane %v5934_v54, 9  ;;  %v6705_v6 = vadd.f32 %v6633_v37, %v15263_v24  ;;  %v8651_v24 = vpop.f32.mrf.mxu1 }
 0x400   : > { %v8526_v36 = vrot.slane %v5959_v13, 9  ;;  %v8527_v26 = vrot.slane %v5962_v7, 9  ;;  %v6628_v14 = vadd.f32 %v8517_v8, %v5931_v9  ;;  %v6630_v3 = vadd.f32 %v8519_v50, %v5937_v30 }
 0x401   : > { %v6629_v17 = vadd.f32 %v8518_v48, %v5934_v54  ;;  %v6636_v11 = vadd.f32 %v8525_v52, %v5956_v46  ;;  %v6646_v53 = vadd.f32 %v8535_v35, %v5987_v61  ;;  %v6706_v19 = vadd.f32 %v6634_v0, %v15272_v20  ;;  %v3435_v30 = vpop.f32.mrf.mxu1 }
 0x402   : > { %v6637_v40 = vadd.f32 %v8526_v36, %v5959_v13  ;;  %v6638_v10 = vadd.f32 %v8527_v26, %v5962_v7  ;;  %v6707_v21 = vadd.f32 %v6635_v49, %v15275_v63  ;;  %v6768_v62 = vmul.f32 0.25, %v17727_v25 }
 0x403   : > { %v6708_v43 = vadd.f32 %v6636_v11, %v6628_v14  ;;  %v6769_v60 = vmul.f32 0.25, %v6705_v6  ;;  %v6718_v22 = vadd.f32 %v6654_v18, %v6646_v53  ;;  %v6770_v34 = vmul.f32 0.25, %v6706_v19  ;;  %v8652_v26 = vpop.f32.mrf.mxu1 }
 0x404   : > { %v6709_v42 = vadd.f32 %v6637_v40, %v6629_v17  ;;  %v6710_v58 = vadd.f32 %v6638_v10, %v6630_v3  ;;  %v6771_v37 = vmul.f32 0.25, %v6707_v21  ;;  %v6832_v59 = vpack.c.bf16 %v6768_v62, %v6768_v62 }
 0x405   : > { %v6772_v33 = vmul.f32 0.25, %v6708_v43  ;;  %v6833_v28 = vpack.c.bf16 %v6769_v60, %v6769_v60  ;;  %v6782_v15 = vmul.f32 0.25, %v6718_v22  ;;  %v6834_v9 = vpack.c.bf16 %v6770_v34, %v6770_v34  ;;  %v17734_v60 = vld [vmem:[#allocation8_spill] sm:$0xff] }
 0x406   : > { %v6773_v31 = vmul.f32 0.25, %v6709_v42  ;;  %v6774_v57 = vmul.f32 0.25, %v6710_v58  ;;  %v6983_v20 = vunpack.c.l.b16 %v6847_v44  ;;  %v6835_v0 = vpack.c.bf16 %v6771_v37, %v6771_v37 }
 0x407   : > { %v6836_v63 = vpack.c.bf16 %v6772_v33, %v6772_v33  ;;  %v6845_v49 = vpack.c.bf16 %v15466_v47, %v15466_v47  ;;  %v6846_v39 = vpack.c.bf16 %v6782_v15, %v6782_v15  ;;  %v6969_v18 = vunpack.c.l.b16 %v6833_v28  ;;  %v8685_v15 = vpop.f32.mrf.mxu0 }
 0x408   : > { %v6837_v45 = vpack.c.bf16 %v6773_v31, %v6773_v31  ;;  %v6838_v54 = vpack.c.bf16 %v6774_v57, %v6774_v57  ;;  %v6968_v46 = vunpack.c.l.b16 %v6832_v59  ;;  %v6970_v2 = vunpack.c.l.b16 %v6834_v9 }
 0x409   : > { %v6971_v1 = vunpack.c.l.b16 %v6835_v0  ;;  %v6972_v13 = vunpack.c.l.b16 %v6836_v63  ;;  %v6981_v27 = vunpack.c.l.b16 %v6845_v49  ;;  %v6982_v61 = vunpack.c.l.b16 %v6846_v39 }
 0x40a   : > { %v6973_v32 = vunpack.c.l.b16 %v6837_v45  ;;  %v6974_v7 = vunpack.c.l.b16 %v6838_v54  ;;  %v6975_v44 = vunpack.c.l.b16 %v6839_v51  ;;  %v7072_v8 = vrot.slane %v6969_v18, 7  ;;  %v15561_v18 = vld [vmem:[%s16322_s6] ss:$0 sm:$0xff] }
 0x40b   : > { %v7074_v48 = vrot.slane %v6970_v2, 6  ;;  %v7076_v47 = vrot.slane %v6971_v1, 5  ;;  %v7078_v50 = vrot.slane %v6972_v13, 4  ;;  %v7087_v36 = vsel %vm6985_vm2, %v7086_v55, %v15468_v4 }
 0x40c   : > { %v7080_v52 = vrot.slane %v6973_v32, 3  ;;  %v7073_v35 = vsel %vm6985_vm2, %v7072_v8, %v6968_v46  ;;  %v7089_v6 = vsel %vm5610_vm0, %v7088_v56, %v7087_v36  ;;  %v7094_v14 = vrot.slane %v6981_v27, 3 }
 0x40d   : > { %v7096_v23 = vrot.slane %v6982_v61, 2  ;;  %v7075_v51 = vsel %vm5610_vm0, %v7074_v48, %v7073_v35  ;;  %v7082_v17 = vrot.slane %v6974_v7, 2  ;;  %v7091_v3 = vsel %vm6990_vm9, %v7090_v12, %v7089_v6  ;;  %vm17728_vm0 = vmmov %vm17711_vm3  ;;  %v3438_v12 = vpop.f32.mrf.mxu1 }
 0x40e   : > { %v7098_v11 = vrot.slane %v6983_v20, 1  ;;  %v7077_v5 = vsel %vm6990_vm9, %v7076_v47, %v7075_v51  ;;  %v7084_v4 = vrot.slane %v6975_v44, 1  ;;  %v7093_v55 = vsel %vm5612_vm4, %v7092_v41, %v7091_v3  ;;  %vm17729_vm7 = vmmov %vm17728_vm0 }
 0x40f   : > { %v7079_v56 = vsel %vm5612_vm4, %v7078_v50, %v7077_v5  ;;  %v7095_v40 = vsel %vm17728_vm0, %v7094_v14, %v7093_v55  ;;  %v3436_v29 = vadd.f32 %v15536_v38, %v3435_v30  ;;  %vm17731_vm3 = vmmov %vm17713_vm1  ;;  %v3444_v19 = vadd.f32 %v8651_v24, %v15536_v38  ;;  %v7153_v30 = vpop.f32.mrf.mxu0 }
 0x410   : > { %v7081_v10 = vsel %vm17729_vm7, %v7080_v52, %v7079_v56  ;;  %v7097_v53 = vsel %vm17730_vm14, %v7096_v23, %v7095_v40  ;;  %vm17732_vm1 = vmmov %vm17720_vm12  ;;  %v3439_v43 = vadd.f32 %v15536_v38, %v3438_v12  ;;  %v3447_v58 = vadd.f32 %v8652_v26, %v15536_v38 }
 0x411   : > { %v7083_v16 = vsel %vm17731_vm3, %v7082_v17, %v7081_v10  ;;  %v7099_v41 = vsel %vm17732_vm1, %v7098_v11, %v7097_v53  ;;  %vm17733_vm13 = vmmov %vm17732_vm1  ;;  %v3594_v62 = vcombine.high %v3436_v29, %v3436_v29  ;;  %v3601_v42 = vrot.slane %v3436_v29, %v17734_v60  ;;  %v8655_v29 = vpop.f32.mrf.mxu1 }
 0x412   : > { %v7085_v21 = vsel %vm17733_vm13, %v7084_v4, %v7083_v16  ;;  %v3628_v22 = vcombine.high %v3444_v19, %v3444_v19  ;;  %v3635_v34 = vrot.slane %v3444_v19, %v17734_v60  ;;  %v3611_v37 = vcombine.high %v3439_v43, %v3439_v43  ;;  %vm17737_vm4 = vmmov %vm17728_vm0 }
 0x413   : > { %v7103_v25 = vpack.c.b16 %v7099_v41, %v7085_v21  ;;  %v3608_v33 = vrot.slane %v3594_v62, %v17734_v60  ;;  %v3618_v24 = vrot.slane %v3439_v43, %v17734_v60  ;;  %v3609_v59 = vcombine.high %v3601_v42, %v3601_v42  ;;  %vm17739_vm8 = vmmov %vm17728_vm0 }
 0x414   : > { %v3645_v28 = vcombine.high %v3447_v58, %v3447_v58  ;;  %v3642_v31 = vrot.slane %v3628_v22, %v17734_v60  ;;  %v3652_v57 = vrot.slane %v3447_v58, %v17734_v60  ;;  %v3643_v9 = vcombine.high %v3635_v34, %v3635_v34  ;;  %vm17742_vm5 = vmmov %vm17728_vm0 }
 0x415   : > { %8688 = vmatmul.mubr.msk.bf16.vlgmr.msra.gmra.mxu1 %vm1390_vm10, %v7103_v25  ;;  %v3625_v20 = vrot.slane %v3611_v37, %v17734_v60  ;;  %v3610_v0 = vcombine.high %v3608_v33, %v3608_v33  ;;  %v3626_v63 = vcombine.high %v3618_v24, %v3618_v24  ;;  %v8274_v49 = vrot.slane %v3609_v59, 9  ;;  %vm17738_vm10 = vmmov %vm17728_vm0 }
 0x416   : > { %v3659_v45 = vrot.slane %v3645_v28, %v17734_v60  ;;  %v3644_v54 = vcombine.high %v3642_v31, %v3642_v31  ;;  %v3660_v39 = vcombine.high %v3652_v57, %v3652_v57  ;;  %v8282_v46 = vrot.slane %v3643_v9, 9  ;;  %vm17743_vm12 = vmmov %vm17728_vm0 }
 0x417   : > { %v3627_v2 = vcombine.high %v3625_v20, %v3625_v20  ;;  %v8276_v1 = vrot.slane %v3610_v0, 9  ;;  %v8278_v13 = vrot.slane %v3626_v63, 9  ;;  %v8281_v32 = vrot.slane %v3635_v34, 9  ;;  %vm17750_vm7 = vmmov %vm17728_vm0 }
 0x418   : > { %v4651_v7 = vadd.f32 %v8274_v49, %v3609_v59  ;;  %v3661_v27 = vcombine.high %v3659_v45, %v3659_v45  ;;  %v7154_v61 = vadd.f32 %v15561_v18, %v7153_v30  ;;  %v8284_v44 = vrot.slane %v3644_v54, 9  ;;  %v3451_v59 = vpop.f32.mrf.mxu1  ;;  %vm17751_vm14 = vmmov %vm17728_vm0 }
 0x419   : > { %v8286_v8 = vrot.slane %v3660_v39, 9  ;;  %v4659_v48 = vadd.f32 %v8282_v46, %v3643_v9  ;;  %v8273_v47 = vrot.slane %v3601_v42, 9  ;;  %v8280_v50 = vrot.slane %v3627_v2, 9  ;;  %vm17753_vm3 = vmmov %vm17732_vm1 }
 0x41a   : > { %v8283_v52 = vrot.slane %v3642_v31, 9  ;;  %v4653_v36 = vadd.f32 %v8276_v1, %v3610_v0  ;;  %v4655_v26 = vadd.f32 %v8278_v13, %v3626_v63  ;;  %v7192_v35 = vcombine.high %v7154_v61, %v7154_v61  ;;  %vm17754_vm13 = vmmov %vm17732_vm1 }
 0x41b   : > { %v4658_v6 = vadd.f32 %v8281_v32, %v3635_v34  ;;  %v4779_v14 = vadd.f32 %v4659_v48, %v4651_v7  ;;  %v8288_v23 = vrot.slane %v3661_v27, 9  ;;  %v7199_v51 = vrot.slane %v7154_v61, %v17734_v60 }
 0x41c   : > { %v4661_v17 = vadd.f32 %v8284_v44, %v3644_v54  ;;  %v8275_v3 = vrot.slane %v3608_v33, 9  ;;  %v4663_v11 = vadd.f32 %v8286_v8, %v3660_v39  ;;  %v8277_v5 = vrot.slane %v3618_v24, 9 }
 0x41d   : > { %v4650_v4 = vadd.f32 %v8273_v47, %v3601_v42  ;;  %v8285_v55 = vrot.slane %v3652_v57, 9  ;;  %v8279_v56 = vrot.slane %v3625_v20, 9  ;;  %v4657_v40 = vadd.f32 %v8280_v50, %v3627_v2 }
 0x41e   : > { %v4781_v12 = vadd.f32 %v4661_v17, %v4653_v36  ;;  %v8287_v10 = vrot.slane %v3659_v45, 9  ;;  %v4783_v53 = vadd.f32 %v4663_v11, %v4655_v26  ;;  %v7206_v16 = vrot.slane %v7192_v35, %v17734_v60 }
 0x41f   : > { %v4665_v41 = vadd.f32 %v8288_v23, %v3661_v27  ;;  %v4843_v19 = vmul.f32 0.25, %v4779_v14  ;;  %v7207_v21 = vcombine.high %v7199_v51, %v7199_v51  ;;  %v7328_v43 = vrot.slane %v7199_v51, 1 }
 0x420   : > { %v4660_v25 = vadd.f32 %v8283_v52, %v3642_v31  ;;  %v4652_v62 = vadd.f32 %v8275_v3, %v3608_v33  ;;  %v4654_v58 = vadd.f32 %v8277_v5, %v3618_v24  ;;  %v4778_v22 = vadd.f32 %v4658_v6, %v4650_v4 }
 0x421   : > { %v4662_v34 = vadd.f32 %v8285_v55, %v3652_v57  ;;  %v4656_v37 = vadd.f32 %v8279_v56, %v3625_v20  ;;  %v4785_v42 = vadd.f32 %v4665_v41, %v4657_v40  ;;  %v4847_v28 = vmul.f32 0.25, %v4783_v53  ;;  %v8656_v57 = vpop.f32.mrf.mxu1 }
 0x422   : > { %v7162_v9 = vadd.f32 %v8685_v15, %v15561_v18  ;;  %v7208_v0 = vcombine.high %v7206_v16, %v7206_v16  ;;  %v7330_v63 = vrot.slane %v7206_v16, 1  ;;  %v4664_v49 = vadd.f32 %v8287_v10, %v3659_v45 }
 0x423   : > { %v4845_v54 = vmul.f32 0.25, %v4781_v12  ;;  %v7329_v39 = vrot.slane %v7207_v21, 1  ;;  %v7425_v30 = vadd.f32 %v7328_v43, %v4843_v19  ;;  %v4782_v46 = vadd.f32 %v4662_v34, %v4654_v58  ;;  %v3454_v50 = vpop.f32.mrf.mxu1 }
 0x424   : > { %v7226_v2 = vcombine.high %v7162_v9, %v7162_v9  ;;  %v4780_v1 = vadd.f32 %v4660_v25, %v4652_v62  ;;  %v4784_v31 = vadd.f32 %v4664_v49, %v4656_v37  ;;  %v4842_v33 = vmul.f32 0.25, %v4778_v22  ;;  %v8686_v22 = vpop.f32.mrf.mxu0 }
 0x425   : > { %v3460_v24 = vadd.f32 %v8655_v29, %v15536_v38  ;;  %v4849_v20 = vmul.f32 0.25, %v4785_v42  ;;  %v15569_v13 = vrot.slane %v7162_v9, %v17734_v60  ;;  %v7331_v32 = vrot.slane %v7208_v0, 1  ;;  %v8659_v49 = vpop.f32.mrf.mxu1 }
 0x426   : > { %v7429_v15 = vadd.f32 %v7330_v63, %v4847_v28  ;;  %v7427_v7 = vadd.f32 %v7329_v39, %v4845_v54  ;;  %v15571_v27 = vrot.slane %v7425_v30, 7  ;;  %v3452_v45 = vadd.f32 %v15536_v38, %v3451_v59 }
 0x427   : > { %v4846_v61 = vmul.f32 0.25, %v4782_v46  ;;  %v15575_v44 = vrot.slane %v7226_v2, %v17734_v60  ;;  %v4844_v8 = vmul.f32 0.25, %v4780_v1  ;;  %v7424_v48 = vadd.f32 %v7199_v51, %v4842_v33 }
 0x428   : > { %v3696_v47 = vcombine.high %v3460_v24, %v3460_v24  ;;  %v4848_v52 = vmul.f32 0.25, %v4784_v31  ;;  %v15579_v36 = vcombine.high %v15569_v13, %v15569_v13  ;;  %v7431_v26 = vadd.f32 %v7331_v32, %v4849_v20 }
 0x429   : > { %v15581_v35 = vrot.slane %v7429_v15, 7  ;;  %v7555_v6 = vsel %vm6985_vm2, %v15571_v27, %v7424_v48  ;;  %v15585_v14 = vrot.slane %v7427_v7, 7  ;;  %v3703_v23 = vrot.slane %v3460_v24, %v17734_v60  ;;  %v7156_v24 = vpop.f32.mrf.mxu0  ;;  %v3467_v48 = vpop.f32.mrf.mxu1 }
 0x42a   : > { %v3662_v17 = vcombine.high %v3452_v45, %v3452_v45  ;;  %v15590_v51 = vcombine.high %v15575_v44, %v15575_v44  ;;  %v7428_v11 = vadd.f32 %v7206_v16, %v4846_v61  ;;  %v3455_v5 = vadd.f32 %v15536_v38, %v3454_v50 }
 0x42b   : > { %17735 = vst [vmem:[#allocation58_spill] sm:$0xff] %v15581_v35  ;;  %v7426_v4 = vadd.f32 %v7207_v21, %v4844_v8  ;;  %v3710_v55 = vrot.slane %v3696_v47, %v17734_v60  ;;  %v3669_v56 = vrot.slane %v3452_v45, %v17734_v60  ;;  %v3463_v40 = vadd.f32 %v8656_v57, %v15536_v38 }
 0x42c   : > { %v7556_v10 = vsel %vm6990_vm9, %v15571_v27, %v7555_v6  ;;  %v7569_v53 = vsel %vm6985_vm2, %v15581_v35, %v7428_v11  ;;  %v15605_v41 = vrot.slane %v7431_v26, 7  ;;  %v3711_v19 = vcombine.high %v3703_v23, %v3703_v23 }
 0x42d   : > { %v7562_v16 = vsel %vm6985_vm2, %v15585_v14, %v7426_v4  ;;  %v3676_v21 = vrot.slane %v3662_v17, %v17734_v60  ;;  %v7430_v25 = vadd.f32 %v7208_v0, %v4848_v52  ;;  %v3679_v62 = vcombine.high %v3455_v5, %v3455_v5 }
 0x42e   : > { %17736 = vst [vmem:[#allocation59_spill] sm:$0xff] %v15605_v41  ;;  %v3686_v58 = vrot.slane %v3455_v5, %v17734_v60  ;;  %v7570_v34 = vsel %vm6990_vm9, %v15581_v35, %v7569_v53  ;;  %v3712_v37 = vcombine.high %v3710_v55, %v3710_v55  ;;  %v3677_v42 = vcombine.high %v3669_v56, %v3669_v56 }
 0x42f   : > { %v3713_v59 = vcombine.high %v3463_v40, %v3463_v40  ;;  %v15614_v28 = vsel %vm17737_vm4, %v15571_v27, %v7556_v10  ;;  %v7563_v9 = vsel %vm6990_vm9, %v15585_v14, %v7562_v16  ;;  %v8297_v63 = vrot.slane %v3703_v23, 9  ;;  %vm17755_vm4 = vmmov %vm17732_vm1 }
 0x430   : > { %v3720_v0 = vrot.slane %v3463_v40, %v17734_v60  ;;  %v7576_v54 = vsel %vm6985_vm2, %v15605_v41, %v7430_v25  ;;  %v8298_v39 = vrot.slane %v3711_v19, 9  ;;  %v3678_v30 = vcombine.high %v3676_v21, %v3676_v21 }
 0x431   : > { %v8289_v46 = vrot.slane %v3669_v56, 9  ;;  %v15623_v2 = vsel %vm17738_vm10, %v15581_v35, %v7570_v34  ;;  %v8299_v1 = vrot.slane %v3710_v55, 9  ;;  %v3693_v31 = vrot.slane %v3679_v62, %v17734_v60  ;;  %v8660_v34 = vpop.f32.mrf.mxu1  ;;  %vm17760_vm10 = vmmov %vm17728_vm0 }
 0x432   : > { %v3694_v33 = vcombine.high %v3686_v58, %v3686_v58  ;;  %v15628_v57 = vsel %vm17739_vm8, %v15585_v14, %v7563_v9  ;;  %v8300_v20 = vrot.slane %v3712_v37, 9  ;;  %v8290_v32 = vrot.slane %v3677_v42, 9  ;;  %vm17761_vm8 = vmmov %vm17728_vm0 }
 0x433   : > { %v3727_v15 = vrot.slane %v3713_v59, %v17734_v60  ;;  %v15633_v7 = vsel %vm6990_vm9, %v15605_v41, %v7576_v54  ;;  %v4674_v45 = vadd.f32 %v8297_v63, %v3703_v23  ;;  %v8291_v61 = vrot.slane %v3676_v21, 9 }
 0x434   : > { %17740 = vst [vmem:[#allocation73_spill] sm:$0xff] %v15633_v7  ;;  %v3728_v8 = vcombine.high %v3720_v0, %v3720_v0  ;;  %v4675_v47 = vadd.f32 %v8298_v39, %v3711_v19  ;;  %v8292_v50 = vrot.slane %v3678_v30, 9  ;;  %v4666_v52 = vadd.f32 %v8289_v46, %v3669_v56 }
 0x435   : > { %v7157_v26 = vadd.f32 %v15561_v18, %v7156_v24  ;;  %v4676_v6 = vadd.f32 %v8299_v1, %v3710_v55  ;;  %v3695_v17 = vcombine.high %v3693_v31, %v3693_v31  ;;  %v8294_v11 = vrot.slane %v3694_v33, 9  ;;  %v3470_v24 = vpop.f32.mrf.mxu1 }
 0x436   : > { %v7165_v5 = vadd.f32 %v8686_v22, %v15561_v18  ;;  %v4677_v4 = vadd.f32 %v8300_v20, %v3712_v37  ;;  %v4667_v40 = vadd.f32 %v8290_v32, %v3677_v42  ;;  %v3729_v10 = vcombine.high %v3727_v15, %v3727_v15 }
 0x437   : > { %v8293_v53 = vrot.slane %v3686_v58, 9  ;;  %v4668_v16 = vadd.f32 %v8291_v61, %v3676_v21  ;;  %v8302_v25 = vrot.slane %v3728_v8, 9  ;;  %v8295_v23 = vrot.slane %v3693_v31, 9 }
 0x438   : > { %v7243_v62 = vcombine.high %v7165_v5, %v7165_v5  ;;  %v4669_v59 = vadd.f32 %v8292_v50, %v3678_v30  ;;  %v4786_v19 = vadd.f32 %v4674_v45, %v4666_v52  ;;  %v8301_v9 = vrot.slane %v3720_v0, 9  ;;  %v8663_v52 = vpop.f32.mrf.mxu1 }
 0x439   : > { %v15638_v56 = vrot.slane %v7157_v26, %v17734_v60  ;;  %v8303_v55 = vrot.slane %v3727_v15, 9  ;;  %v8296_v63 = vrot.slane %v3695_v17, 9  ;;  %v4671_v54 = vadd.f32 %v8294_v11, %v3694_v33 }
 0x43a   : > { %v7209_v39 = vcombine.high %v7157_v26, %v7157_v26  ;;  %v4787_v18 = vadd.f32 %v4675_v47, %v4667_v40  ;;  %v8304_v22 = vrot.slane %v3729_v10, 9  ;;  %v4670_v37 = vadd.f32 %v8293_v53, %v3686_v58 }
 0x43b   : > { %v15641_v42 = vrot.slane %v7165_v5, %v17734_v60  ;;  %v4679_v21 = vadd.f32 %v8302_v25, %v3728_v8  ;;  %v4672_v46 = vadd.f32 %v8295_v23, %v3693_v31  ;;  %v15644_v1 = vrot.slane %v7243_v62, %v17734_v60  ;;  %v3483_v23 = vpop.f32.mrf.mxu1 }
 0x43c   : > { %v3476_v30 = vadd.f32 %v8659_v49, %v15536_v38  ;;  %v4788_v20 = vadd.f32 %v4676_v6, %v4668_v16  ;;  %v4789_v32 = vadd.f32 %v4677_v4, %v4669_v59  ;;  %v4678_v45 = vadd.f32 %v8301_v9, %v3720_v0 }
 0x43d   : > { %v7224_v33 = vcombine.high %v15638_v56, %v15638_v56  ;;  %v4680_v61 = vadd.f32 %v8303_v55, %v3727_v15  ;;  %v4673_v47 = vadd.f32 %v8296_v63, %v3695_v17  ;;  %v4791_v58 = vadd.f32 %v4679_v21, %v4671_v54 }
 0x43e   : > { %v7223_v50 = vrot.slane %v7209_v39, %v17734_v60  ;;  %v4681_v8 = vadd.f32 %v8304_v22, %v3729_v10  ;;  %v4790_v31 = vadd.f32 %v4678_v45, %v4670_v37  ;;  %v15652_v26 = vcombine.high %v15641_v42, %v15641_v42 }
 0x43f   : > { %v4850_v49 = vmul.f32 0.25, %v4786_v19  ;;  %v4792_v11 = vadd.f32 %v4680_v61, %v4672_v46  ;;  %v15656_v0 = vcombine.high %v15644_v1, %v15644_v1  ;;  %v4851_v6 = vmul.f32 0.25, %v4787_v18 }
 0x440   : > { %v3764_v5 = vcombine.high %v3476_v30, %v3476_v30  ;;  %v4853_v15 = vmul.f32 0.25, %v4789_v32  ;;  %v7332_v17 = vrot.slane %v15638_v56, 1  ;;  %v7333_v4 = vrot.slane %v7224_v33, 1 }
 0x441   : > { %v3468_v40 = vadd.f32 %v15536_v38, %v3467_v48  ;;  %v4793_v10 = vadd.f32 %v4681_v8, %v4673_v47  ;;  %v4855_v53 = vmul.f32 0.25, %v4791_v58  ;;  %v7225_v16 = vcombine.high %v7223_v50, %v7223_v50 }
 0x442   : > { %v7334_v25 = vrot.slane %v7223_v50, 1  ;;  %v4854_v62 = vmul.f32 0.25, %v4790_v31  ;;  %v3771_v9 = vrot.slane %v3476_v30, %v17734_v60  ;;  %v4856_v55 = vmul.f32 0.25, %v4792_v11 }
 0x443   : > { %v3778_v54 = vrot.slane %v3764_v5, %v17734_v60  ;;  %v3479_v39 = vadd.f32 %v8660_v34, %v15536_v38  ;;  %v7433_v48 = vadd.f32 %v7332_v17, %v4851_v6  ;;  %v7435_v18 = vadd.f32 %v7333_v4, %v4853_v15 }
 0x444   : > { %v3730_v22 = vcombine.high %v3468_v40, %v3468_v40  ;;  %v15667_v37 = vadd.f32 %v15536_v38, %v3483_v23  ;;  %v4857_v21 = vmul.f32 0.25, %v4793_v10  ;;  %v7335_v32 = vrot.slane %v7225_v16, 1 }
 0x445   : > { %v7437_v45 = vadd.f32 %v7334_v25, %v4855_v53  ;;  %v4852_v61 = vmul.f32 0.25, %v4788_v20  ;;  %v3779_v30 = vcombine.high %v3771_v9, %v3771_v9  ;;  %v3471_v47 = vadd.f32 %v15536_v38, %v3470_v24 }
 0x446   : > { %v15672_v58 = vadd.f32 %v8663_v52, %v15536_v38  ;;  %v3780_v8 = vcombine.high %v3778_v54, %v3778_v54  ;;  %v3737_v34 = vrot.slane %v3468_v40, %v17734_v60  ;;  %v3781_v31 = vcombine.high %v3479_v39, %v3479_v39 }
 0x447   : > { %v15676_v11 = vrot.slane %v3479_v39, %v17734_v60  ;;  %v15678_v6 = vrot.slane %v7433_v48, 7  ;;  %v15680_v5 = vrot.slane %v7435_v18, 7  ;;  %v3744_v15 = vrot.slane %v3730_v22, %v17734_v60 }
 0x448   : > { %v15685_v20 = vrot.slane %v15667_v37, %v17734_v60  ;;  %v7432_v24 = vadd.f32 %v15638_v56, %v4850_v49  ;;  %v7439_v52 = vadd.f32 %v7335_v32, %v4857_v21  ;;  %v15688_v17 = vrot.slane %v7437_v45, 7 }
 0x449   : > { %v8313_v4 = vrot.slane %v3771_v9, 9  ;;  %v7434_v40 = vadd.f32 %v7224_v33, %v4852_v61  ;;  %v8314_v10 = vrot.slane %v3779_v30, 9  ;;  %v8315_v53 = vrot.slane %v3778_v54, 9 }
 0x44a   : > { %v15692_v25 = vrot.slane %v15672_v58, %v17734_v60  ;;  %v7436_v23 = vadd.f32 %v7223_v50, %v4854_v62  ;;  %v7438_v39 = vadd.f32 %v7225_v16, %v4856_v55  ;;  %v8316_v48 = vrot.slane %v3780_v8, 9 }
 0x44b   : > { %v3745_v18 = vcombine.high %v3737_v34, %v3737_v34  ;;  %v7583_v22 = vsel %vm6985_vm2, %v15678_v6, %v7432_v24  ;;  %v7590_v56 = vsel %vm6985_vm2, %v15680_v5, %v7434_v40  ;;  %v3746_v49 = vcombine.high %v3744_v15, %v3744_v15 }
 0x44c   : > { %v3813_v33 = vcombine.high %v15685_v20, %v15685_v20  ;;  %v7597_v21 = vsel %vm6985_vm2, %v15688_v17, %v7436_v23  ;;  %v15702_v32 = vrot.slane %v7439_v52, 7  ;;  %v8305_v45 = vrot.slane %v3737_v34, 9 }
 0x44d   : > { %v3747_v50 = vcombine.high %v3471_v47, %v3471_v47  ;;  %v4690_v16 = vadd.f32 %v8313_v4, %v3771_v9  ;;  %v4691_v62 = vadd.f32 %v8314_v10, %v3779_v30  ;;  %v4692_v55 = vadd.f32 %v8315_v53, %v3778_v54 }
 0x44e   : > { %17741 = vst [vmem:[#allocation33_spill] sm:$0xff] %v15702_v32  ;;  %v3847_v61 = vcombine.high %v15692_v25, %v15692_v25  ;;  %v7584_v24 = vsel %vm6990_vm9, %v15678_v6, %v7583_v22  ;;  %v7591_v40 = vsel %vm6990_vm9, %v15680_v5, %v7590_v56  ;;  %v8306_v46 = vrot.slane %v3745_v18, 9 }
 0x44f   : > { %v3754_v19 = vrot.slane %v3471_v47, %v17734_v60  ;;  %v7598_v52 = vsel %vm6990_vm9, %v15688_v17, %v7597_v21  ;;  %v8307_v23 = vrot.slane %v3744_v15, 9  ;;  %v8308_v63 = vrot.slane %v3746_v49, 9 }
 0x450   : > { %v8322_v9 = vrot.slane %v3813_v33, 9  ;;  %v7604_v54 = vsel %vm6985_vm2, %v15702_v32, %v7438_v39  ;;  %v4693_v30 = vadd.f32 %v8316_v48, %v3780_v8  ;;  %v4682_v4 = vadd.f32 %v8305_v45, %v3737_v34  ;;  %v8664_v48 = vpop.f32.mrf.mxu1 }
 0x451   : > { %v3761_v10 = vrot.slane %v3747_v50, %v17734_v60  ;;  %v15718_v53 = vsel %vm17742_vm5, %v15678_v6, %v7584_v24  ;;  %v3795_v22 = vrot.slane %v3781_v31, %v17734_v60  ;;  %v3796_v47 = vcombine.high %v15676_v11, %v15676_v11  ;;  %vm17762_vm5 = vmmov %vm17732_vm1 }
 0x452   : > { %v8330_v56 = vrot.slane %v3847_v61, 9  ;;  %v15725_v21 = vsel %vm17743_vm12, %v15680_v5, %v7591_v40  ;;  %v15729_v8 = vsel %vm17728_vm0, %v15688_v17, %v7598_v52  ;;  %v4683_v34 = vadd.f32 %v8306_v46, %v3745_v18  ;;  %vm17763_vm12 = vmmov %vm17732_vm1 }
 0x453   : > { %v3762_v39 = vcombine.high %v3754_v19, %v3754_v19  ;;  %v15733_v45 = vsel %vm6990_vm9, %v15702_v32, %v7604_v54  ;;  %v4684_v31 = vadd.f32 %v8307_v23, %v3744_v15  ;;  %v4685_v50 = vadd.f32 %v8308_v63, %v3746_v49  ;;  %v3486_v63 = vpop.f32.mrf.mxu1  ;;  %vm17764_vm0 = vmmov %vm17732_vm1 }
 0x454   : > { %17744 = vst [vmem:[#allocation102_spill] sm:$0xff] %v15733_v45  ;;  %v4699_v24 = vadd.f32 %v8322_v9, %v3813_v33  ;;  %v4794_v43 = vadd.f32 %v4690_v16, %v4682_v4  ;;  %v8317_v12 = vrot.slane %v15676_v11, 9  ;;  %v3763_v29 = vcombine.high %v3761_v10, %v3761_v10 }
 0x455   : > { %v3798_v40 = vcombine.high %v15667_v37, %v15667_v37  ;;  %v3797_v59 = vcombine.high %v3795_v22, %v3795_v22  ;;  %v8318_v52 = vrot.slane %v3796_v47, 9  ;;  %v4707_v3 = vadd.f32 %v8330_v56, %v3847_v61 }
 0x456   : > { %v8321_v46 = vrot.slane %v15685_v20, 9  ;;  %v4795_v18 = vadd.f32 %v4691_v62, %v4683_v34  ;;  %v8319_v41 = vrot.slane %v3795_v22, 9  ;;  %v8310_v7 = vrot.slane %v3762_v39, 9 }
 0x457   : > { %v3832_v15 = vcombine.high %v15672_v58, %v15672_v58  ;;  %v4796_v49 = vadd.f32 %v4692_v55, %v4684_v31  ;;  %v4797_v33 = vadd.f32 %v4693_v30, %v4685_v50  ;;  %v8329_v16 = vrot.slane %v15692_v25, 9 }
 0x458   : > { %v4803_v23 = vadd.f32 %v4707_v3, %v4699_v24  ;;  %v4858_v9 = vmul.f32 0.25, %v4794_v43  ;;  %v4694_v37 = vadd.f32 %v8317_v12, %v15676_v11  ;;  %v8312_v54 = vrot.slane %v3763_v29, 9 }
 0x459   : > { %v3812_v61 = vrot.slane %v3798_v40, %v17734_v60  ;;  %v8320_v4 = vrot.slane %v3797_v59, 9  ;;  %v8309_v56 = vrot.slane %v3754_v19, 9  ;;  %v4698_v62 = vadd.f32 %v8321_v46, %v15685_v20 }
 0x45a   : > { %v3487_v34 = vadd.f32 %v15536_v38, %v3486_v63  ;;  %v4859_v32 = vmul.f32 0.25, %v4795_v18  ;;  %v4695_v58 = vadd.f32 %v8318_v52, %v3796_v47  ;;  %v4687_v45 = vadd.f32 %v8310_v7, %v3762_v39 }
 0x45b   : > { %v3846_v55 = vrot.slane %v3832_v15, %v17734_v60  ;;  %v8311_v30 = vrot.slane %v3761_v10, 9  ;;  %v4706_v3 = vadd.f32 %v8329_v16, %v15692_v25  ;;  %v4867_v43 = vmul.f32 0.25, %v4803_v23 }
 0x45c   : > { %v3495_v12 = vadd.f32 %v8664_v48, %v15536_v38  ;;  %v4861_v11 = vmul.f32 0.25, %v4797_v33  ;;  %v4696_v31 = vadd.f32 %v8319_v41, %v3795_v22  ;;  %v4689_v50 = vadd.f32 %v8312_v54, %v3763_v29 }
 0x45d   : > { %v3814_v24 = vcombine.high %v3812_v61, %v3812_v61  ;;  %v4860_v40 = vmul.f32 0.25, %v4796_v49  ;;  %v4686_v35 = vadd.f32 %v8309_v56, %v3754_v19  ;;  %v4802_v20 = vadd.f32 %v4706_v3, %v4698_v62 }
 0x45e   : > { %v3815_v46 = vcombine.high %v3487_v34, %v3487_v34  ;;  %v17745_v18 = vrot.slane %v15569_v13, 1  ;;  %v4697_v7 = vadd.f32 %v8320_v4, %v3797_v59  ;;  %v4799_v39 = vadd.f32 %v4695_v58, %v4687_v45 }
 0x45f   : > { %v3848_v52 = vcombine.high %v3846_v55, %v3846_v55  ;;  %v7440_v15 = vadd.f32 %v15569_v13, %v4858_v9  ;;  %v4688_v25 = vadd.f32 %v8311_v30, %v3761_v10  ;;  %v17746_v63 = vrot.slane %v15641_v42, 1 }
 0x460   : > { %v7441_v47 = vadd.f32 %v17745_v18, %v4859_v32  ;;  %v3849_v33 = vcombine.high %v3495_v12, %v3495_v12  ;;  %v17747_v29 = vrot.slane %v15579_v36, 1  ;;  %v4801_v22 = vadd.f32 %v4697_v7, %v4689_v50 }
 0x461   : > { %v7449_v48 = vadd.f32 %v17746_v63, %v4867_v43  ;;  %v8324_v19 = vrot.slane %v3814_v24, 9  ;;  %v15757_v49 = vrot.slane %v3487_v34, %v17734_v60  ;;  %v7442_v32 = vadd.f32 %v15579_v36, %v4860_v40 }
 0x462   : > { %v7443_v41 = vadd.f32 %v17747_v29, %v4861_v11  ;;  %v4798_v59 = vadd.f32 %v4694_v37, %v4686_v35  ;;  %v4866_v45 = vmul.f32 0.25, %v4802_v20  ;;  %v15761_v16 = vrot.slane %v3815_v46, %v17734_v60  ;;  %v8667_v20 = vpop.f32.mrf.mxu1 }
 0x463   : > { %v15763_v13 = vrot.slane %v7441_v47, 7  ;;  %v4863_v10 = vmul.f32 0.25, %v4799_v39  ;;  %v8332_v23 = vrot.slane %v3848_v52, 9  ;;  %v3856_v9 = vrot.slane %v3495_v12, %v17734_v60 }
 0x464   : > { %v4800_v54 = vadd.f32 %v4696_v31, %v4688_v25  ;;  %v8323_v4 = vrot.slane %v3812_v61, 9  ;;  %v7638_v56 = vrot.slane %v7449_v48, 7  ;;  %v3863_v62 = vrot.slane %v3849_v33, %v17734_v60 }
 0x465   : > { %v15767_v34 = vrot.slane %v7443_v41, 7  ;;  %v4865_v58 = vmul.f32 0.25, %v4801_v22  ;;  %v4701_v36 = vadd.f32 %v8324_v19, %v3814_v24  ;;  %v3830_v35 = vcombine.high %v15757_v49, %v15757_v49  ;;  %v3499_v22 = vpop.f32.mrf.mxu1 }
 0x466   : > { %v4862_v37 = vmul.f32 0.25, %v4798_v59  ;;  %v8331_v30 = vrot.slane %v3846_v55, 9  ;;  %v7448_v3 = vadd.f32 %v15641_v42, %v4866_v45  ;;  %v3831_v43 = vcombine.high %v15761_v16, %v15761_v16 }
 0x467   : > { %v7611_v12 = vsel %vm6985_vm2, %v15763_v13, %v7440_v15  ;;  %v17748_v11 = vrot.slane %v15575_v44, 1  ;;  %v4709_v50 = vadd.f32 %v8332_v23, %v3848_v52  ;;  %v3864_v40 = vcombine.high %v3856_v9, %v3856_v9 }
 0x468   : > { %v4864_v24 = vmul.f32 0.25, %v4800_v54  ;;  %v4700_v46 = vadd.f32 %v8323_v4, %v3812_v61  ;;  %v7639_v18 = vsel %vm6985_vm2, %v7638_v56, %v7448_v3  ;;  %v3865_v47 = vcombine.high %v3863_v62, %v3863_v62 }
 0x469   : > { %v7445_v31 = vadd.f32 %v17748_v11, %v4863_v10  ;;  %v15781_v42 = vsel %vm6985_vm2, %v15767_v34, %v7442_v32  ;;  %v17749_v7 = vrot.slane %v15590_v51, 1  ;;  %v4805_v25 = vadd.f32 %v4709_v50, %v4701_v36  ;;  %v8668_v11 = vpop.f32.mrf.mxu1 }
 0x46a   : > { %v8326_v15 = vrot.slane %v3830_v35, 9  ;;  %v7612_v63 = vsel %vm6990_vm9, %v15763_v13, %v7611_v12  ;;  %v7444_v52 = vadd.f32 %v15575_v44, %v4862_v37  ;;  %v4708_v48 = vadd.f32 %v8331_v30, %v3846_v55 }
 0x46b   : > { %v7447_v39 = vadd.f32 %v17749_v7, %v4865_v58  ;;  %v8328_v33 = vrot.slane %v3831_v43, 9  ;;  %v15788_v61 = vrot.slane %v7445_v31, 7  ;;  %v7640_v29 = vsel %vm6990_vm9, %v7638_v56, %v7639_v18 }
 0x46c   : > { %v8334_v41 = vrot.slane %v3864_v40, 9  ;;  %v7446_v19 = vadd.f32 %v15590_v51, %v4864_v24  ;;  %v4804_v32 = vadd.f32 %v4708_v48, %v4700_v46  ;;  %v8336_v59 = vrot.slane %v3865_v47, 9  ;;  %v3502_v48 = vpop.f32.mrf.mxu1 }
 0x46d   : > { %v3508_v45 = vadd.f32 %v8667_v20, %v15536_v38  ;;  %v15793_v10 = vrot.slane %v7447_v39, 7  ;;  %v4869_v23 = vmul.f32 0.25, %v4805_v25  ;;  %v8333_v54 = vrot.slane %v3856_v9, 9 }
 0x46e   : > { %v4703_v4 = vadd.f32 %v8326_v15, %v3830_v35  ;;  %v8335_v44 = vrot.slane %v3863_v62, 9  ;;  %v4705_v55 = vadd.f32 %v8328_v33, %v3831_v43  ;;  %v7641_v58 = vsel %vm17750_vm7, %v7638_v56, %v7640_v29  ;;  %vm17765_vm7 = vmmov %vm17764_vm0 }
 0x46f   : > { %v10149_v36 = vmov 1934713408   ;;  %v7625_v30 = vsel %vm6985_vm2, %v15788_v61, %v7444_v52  ;;  %v4711_v3 = vadd.f32 %v8334_v41, %v3864_v40  ;;  %v8325_v51 = vrot.slane %v15757_v49, 9 }
 0x470   : > { %v7810_v37 = vunpack.c.l.s4 %v10149_v36  ;;  %v3500_v12 = vadd.f32 %v15536_v38, %v3499_v22  ;;  %v4868_v31 = vmul.f32 0.25, %v4804_v32  ;;  %v4713_v50 = vadd.f32 %v8336_v59, %v3865_v47 }
 0x471   : > { %v8327_v20 = vrot.slane %v15761_v16, 9  ;;  %v7613_v35 = vsel %vm17751_vm14, %v15763_v13, %v7612_v63  ;;  %v7632_v43 = vsel %vm6985_vm2, %v15793_v10, %v7446_v19  ;;  %v17752_v24 = vrot.slane %v15652_v26, 1  ;;  %vm17766_vm14 = vmmov %vm17764_vm0 }
 0x472   : > { %v4807_v18 = vadd.f32 %v4711_v3, %v4703_v4  ;;  %v7642_v40 = vsel %vm17753_vm3, %v7638_v56, %v7641_v58  ;;  %v4710_v7 = vadd.f32 %v8333_v54, %v3856_v9  ;;  %v4712_v39 = vadd.f32 %v8335_v44, %v3863_v62  ;;  %vm17768_vm3 = vmmov %vm17764_vm0 }
 0x473   : > { %v7451_v46 = vadd.f32 %v17752_v24, %v4869_v23  ;;  %v4809_v25 = vadd.f32 %v4713_v50, %v4705_v55  ;;  %v7811_v15 = vunpack.c.0.s8 %v7810_v37  ;;  %v4702_v47 = vadd.f32 %v8325_v51, %v15757_v49 }
 0x474   : > { %v3900_v52 = vcombine.high %v3508_v45, %v3508_v45  ;;  %v7586_v63 = vsel %vm17732_vm1, %v15678_v6, %v15718_v53  ;;  %v7614_v33 = vsel %vm17754_vm13, %v15763_v13, %v7613_v35  ;;  %v7450_v29 = vadd.f32 %v15652_v26, %v4868_v31  ;;  %v17756_v13 = vld [vmem:[#allocation5_spill] sm:$0xff]  ;;  %vm17769_vm1 = vmmov %vm17761_vm8 }
 0x475   : > { %v4704_v41 = vadd.f32 %v8327_v20, %v15761_v16  ;;  %v3907_v9 = vrot.slane %v3508_v45, %v17734_v60  ;;  %v7817_v56 = vcombine.low %v7614_v33, %v7642_v40  ;;  %v15817_v62 = vrot.slane %v7451_v46, 7  ;;  %vm17770_vm13 = vmmov %vm17769_vm1 }
 0x476   : > { %v4871_v22 = vmul.f32 0.25, %v4807_v18  ;;  %v3866_v49 = vcombine.high %v3500_v12, %v3500_v12  ;;  %v7558_v19 = vsel %vm17755_vm4, %v15571_v27, %v15614_v28  ;;  %v4873_v32 = vmul.f32 0.25, %v4809_v25  ;;  %vm17774_vm4 = vmmov %vm17764_vm0 }
 0x477   : > { %v3503_v6 = vadd.f32 %v15536_v38, %v3502_v48  ;;  %v7808_v53 = vcombine.low %v7558_v19, %v7586_v63  ;;  %v15824_v59 = vsub.s32 %v7811_v15, %v17756_v13  ;;  %v4806_v26 = vadd.f32 %v4710_v7, %v4702_v47 }
 0x478   : > { %v3914_v16 = vrot.slane %v3900_v52, %v17734_v60  ;;  %v3873_v45 = vrot.slane %v3500_v12, %v17734_v60  ;;  %v3511_v23 = vadd.f32 %v8668_v11, %v15536_v38  ;;  %v15832_v54 = vsel %vm6990_vm9, %v15767_v34, %v15781_v42 }
 0x479   : > { %17757 = vst [vmem:[#allocation110_spill] sm:$0xff] %v15824_v59  ;;  %v4808_v27 = vadd.f32 %v4712_v39, %v4704_v41  ;;  %v3915_v28 = vcombine.high %v3907_v9, %v3907_v9  ;;  %v15835_v4 = vrot.slane %v7817_v56, %v15824_v59  ;;  %v15839_v44 = vsel %vm6990_vm9, %v15788_v61, %v7625_v30 }
 0x47a   : > { %v15843_v55 = vsel %vm6990_vm9, %v15793_v10, %v7632_v43  ;;  %v7646_v38 = vsel %vm6985_vm2, %v15817_v62, %v7450_v29  ;;  %v3880_v58 = vrot.slane %v3866_v49, %v17734_v60  ;;  %v17758_v42 = vrot.slane %v15644_v1, 1 }
 0x47b   : > { %v17759_v37 = vrot.slane %v15656_v0, 1  ;;  %v3883_v51 = vcombine.high %v3503_v6, %v3503_v6  ;;  %v15853_v12 = vrot.slane %v7808_v53, %v15824_v59  ;;  %v4870_v30 = vmul.f32 0.25, %v4806_v26 }
 0x47c   : > { %v7453_v36 = vadd.f32 %v17758_v42, %v4871_v22  ;;  %v3916_v11 = vcombine.high %v3914_v16, %v3914_v16  ;;  %v3881_v31 = vcombine.high %v3873_v45, %v3873_v45  ;;  %v3917_v50 = vcombine.high %v3511_v23, %v3511_v23 }
 0x47d   : > { %v7455_v3 = vadd.f32 %v17759_v37, %v4873_v32  ;;  %v4872_v20 = vmul.f32 0.25, %v4808_v27  ;;  %v8345_v35 = vrot.slane %v3907_v9, 9  ;;  %v8346_v43 = vrot.slane %v3915_v28, 9 }
 0x47e   : > { %v7647_v46 = vsel %vm6990_vm9, %v15817_v62, %v7646_v38  ;;  %v3882_v18 = vcombine.high %v3880_v58, %v3880_v58  ;;  %v3924_v40 = vrot.slane %v3511_v23, %v17734_v60  ;;  %v3890_v7 = vrot.slane %v3503_v6, %v17734_v60  ;;  %v8671_v23 = vpop.f32.mrf.mxu1 }
 0x47f   : > { %v15861_v39 = vrot.slane %v7453_v36, 7  ;;  %v15863_v25 = vrot.slane %v7455_v3, 7  ;;  %v8337_v15 = vrot.slane %v3873_v45, 9  ;;  %v3897_v47 = vrot.slane %v3883_v51, %v17734_v60 }
 0x480   : > { %v7452_v52 = vadd.f32 %v15644_v1, %v4870_v30  ;;  %v8338_v48 = vrot.slane %v3881_v31, 9  ;;  %v8339_v63 = vrot.slane %v3880_v58, 9  ;;  %v3931_v33 = vrot.slane %v3917_v50, %v17734_v60 }
 0x481   : > { %v7454_v29 = vadd.f32 %v15656_v0, %v4872_v20  ;;  %v8347_v41 = vrot.slane %v3914_v16, 9  ;;  %v8348_v56 = vrot.slane %v3916_v11, 9  ;;  %v4722_v22 = vadd.f32 %v8345_v35, %v3907_v9 }
 0x482   : > { %v4723_v49 = vadd.f32 %v8346_v43, %v3915_v28  ;;  %v8340_v19 = vrot.slane %v3882_v18, 9  ;;  %v3932_v32 = vcombine.high %v3924_v40, %v3924_v40  ;;  %v3898_v6 = vcombine.high %v3890_v7, %v3890_v7 }
 0x483   : > { %v7653_v53 = vsel %vm6985_vm2, %v15861_v39, %v7452_v52  ;;  %v7660_v13 = vsel %vm6985_vm2, %v15863_v25, %v7454_v29  ;;  %v4714_v1 = vadd.f32 %v8337_v15, %v3873_v45  ;;  %v3899_v26 = vcombine.high %v3897_v47, %v3897_v47 }
 0x484   : > { %v4715_v27 = vadd.f32 %v8338_v48, %v3881_v31  ;;  %v4716_v38 = vadd.f32 %v8339_v63, %v3880_v58  ;;  %v3933_v42 = vcombine.high %v3931_v33, %v3931_v33  ;;  %v8349_v0 = vrot.slane %v3924_v40, 9  ;;  %v3515_v58 = vpop.f32.mrf.mxu1 }
 0x485   : > { %v4724_v36 = vadd.f32 %v8347_v41, %v3914_v16  ;;  %v4725_v37 = vadd.f32 %v8348_v56, %v3916_v11  ;;  %v8341_v9 = vrot.slane %v3890_v7, 9  ;;  %v8343_v28 = vrot.slane %v3897_v47, 9 }
 0x486   : > { %v7654_v3 = vsel %vm6990_vm9, %v15861_v39, %v7653_v53  ;;  %v4717_v51 = vadd.f32 %v8340_v19, %v3882_v18  ;;  %v8350_v30 = vrot.slane %v3932_v32, 9  ;;  %v8342_v50 = vrot.slane %v3898_v6, 9  ;;  %v15882_v18 = vld [vmem:[%s16320_s4] ss:$0 sm:$0xff] }
 0x487   : > { %v15877_v20 = vsel %vm6990_vm9, %v15863_v25, %v7660_v13  ;;  %v4810_v45 = vadd.f32 %v4722_v22, %v4714_v1  ;;  %v8351_v35 = vrot.slane %v3931_v33, 9  ;;  %v8344_v31 = vrot.slane %v3899_v26, 9  ;;  %v8672_v13 = vpop.f32.mrf.mxu1 }
 0x488   : > { %v4811_v43 = vadd.f32 %v4723_v49, %v4715_v27  ;;  %v4812_v15 = vadd.f32 %v4724_v36, %v4716_v38  ;;  %v8352_v16 = vrot.slane %v3933_v42, 9  ;;  %v4726_v11 = vadd.f32 %v8349_v0, %v3924_v40 }
 0x489   : > { %v4718_v52 = vadd.f32 %v8341_v9, %v3890_v7  ;;  %v4720_v48 = vadd.f32 %v8343_v28, %v3897_v47  ;;  %v3524_v63 = vadd.f32 %v15882_v18, %v8671_v23  ;;  %v7648_v29 = vsel %vm17760_vm10, %v15817_v62, %v7647_v46  ;;  %v17767_v28 = vld [vmem:[#allocation58_spill] sm:$0xff]  ;;  %vm17775_vm10 = vmmov %vm17764_vm0 }
 0x48a   : > { %v4813_v41 = vadd.f32 %v4725_v37, %v4717_v51  ;;  %v4727_v56 = vadd.f32 %v8350_v30, %v3932_v32  ;;  %v4719_v22 = vadd.f32 %v8342_v50, %v3898_v6  ;;  %v3516_v49 = vadd.f32 %v15882_v18, %v3515_v58 }
 0x48b   : > { %v4728_v19 = vadd.f32 %v8351_v35, %v3931_v33  ;;  %v4721_v53 = vadd.f32 %v8344_v31, %v3899_v26  ;;  %v15888_v40 = vmul.f32 0.25, %v4810_v45  ;;  %v7620_v7 = vsel %vm17761_vm8, %v15767_v34, %v15832_v54  ;;  %vm17782_vm8 = vmmov %vm17769_vm1 }
 0x48c   : > { %v4729_v47 = vadd.f32 %v8352_v16, %v3933_v42  ;;  %v15893_v1 = vmul.f32 0.25, %v4811_v43  ;;  %v15895_v23 = vmul.f32 0.25, %v4812_v15  ;;  %v7649_v46 = vsel %vm17762_vm5, %v15817_v62, %v7648_v29  ;;  %vm17785_vm5 = vmmov %vm17769_vm1 }
 0x48d   : > { %v4814_v32 = vadd.f32 %v4726_v11, %v4718_v52  ;;  %v4816_v6 = vadd.f32 %v4728_v19, %v4720_v48  ;;  %v3968_v27 = vcombine.high %v3524_v63, %v3524_v63  ;;  %v7593_v33 = vsel %vm17763_vm12, %v15680_v5, %v15725_v21  ;;  %v3518_v5 = vpop.f32.mrf.mxu1  ;;  %vm17788_vm12 = vmmov %vm17764_vm0 }
 0x48e   : > { %v4815_v26 = vadd.f32 %v4727_v56, %v4719_v22  ;;  %v3934_v38 = vcombine.high %v3516_v49, %v3516_v49  ;;  %v7621_v54 = vsel %vm17764_vm0, %v15767_v34, %v7620_v7  ;;  %v7600_v42 = vsel %vm17765_vm7, %v15688_v17, %v15729_v8  ;;  %vm17791_vm7 = vmmov %vm17769_vm1 }
 0x48f   : > { %v4817_v0 = vadd.f32 %v4729_v47, %v4721_v53  ;;  %v3941_v36 = vrot.slane %v3516_v49, %v17734_v60  ;;  %v7565_v62 = vsel %vm17766_vm14, %v15585_v14, %v15628_v57  ;;  %v7853_v37 = vcombine.low %v7621_v54, %v7649_v46  ;;  %vm17792_vm14 = vmmov %vm17769_vm1 }
 0x490   : > { %v3527_v9 = vadd.f32 %v15882_v18, %v8672_v13  ;;  %v7844_v21 = vcombine.low %v7565_v62, %v7593_v33  ;;  %v7572_v34 = vsel %vm17768_vm3, %v17767_v28, %v15623_v2  ;;  %v7627_v17 = vsel %vm17769_vm1, %v15788_v61, %v15839_v44  ;;  %vm17795_vm3 = vmmov %vm17764_vm0 }
 0x491   : > { %v3975_v8 = vrot.slane %v3524_v63, %v17734_v60  ;;  %v3982_v51 = vrot.slane %v3968_v27, %v17734_v60  ;;  %v7655_v14 = vsel %vm17770_vm13, %v15861_v39, %v7654_v3  ;;  %v7880_v57 = vcombine.low %v7572_v34, %v7600_v42  ;;  %vm17797_vm1 = vmmov %vm17764_vm0 }
 0x492   : > { %v15922_v30 = vmul.f32 0.25, %v4814_v32  ;;  %v15924_v50 = vmul.f32 0.25, %v4816_v6  ;;  %v3948_v45 = vrot.slane %v3934_v38, %v17734_v60  ;;  %v15927_v35 = vmul.f32 0.25, %v4813_v41  ;;  %vm17805_vm13 = vmmov %vm17785_vm5 }
 0x493   : > { %v15929_v2 = vmul.f32 0.25, %v4815_v26  ;;  %v3949_v31 = vcombine.high %v3941_v36, %v3941_v36  ;;  %v3519_v44 = vadd.f32 %v15882_v18, %v3518_v5  ;;  %v15933_v58 = vrot.slane %v7853_v37, %v15824_v59  ;;  %v8675_v22 = vpop.f32.mrf.mxu1 }
 0x494   : > { %17771 = vst [vmem:[#allocation40_spill] sm:$0xff] %v15924_v50  ;;  %v15935_v43 = vmul.f32 0.25, %v4817_v0  ;;  %v3985_v3 = vcombine.high %v3527_v9, %v3527_v9  ;;  %v15939_v15 = vsel %vm17774_vm4, %v15788_v61, %v7627_v17  ;;  %v15943_v16 = vsel %vm17775_vm10, %v15861_v39, %v7655_v14  ;;  %vm17806_vm4 = vmmov %vm17785_vm5 }
 0x495   : > { %17772 = vst [vmem:[#allocation74_spill] sm:$0xff] %v15933_v58  ;;  %v3983_v11 = vcombine.high %v3975_v8, %v3975_v8  ;;  %v3984_v52 = vcombine.high %v3982_v51, %v3982_v51  ;;  %v15946_v48 = vrot.slane %v7844_v21, %v15824_v59  ;;  %v15949_v63 = vrot.slane %v7880_v57, %v15824_v59  ;;  %v3531_v42 = vpop.f32.mrf.mxu1  ;;  %vm17807_vm10 = vmmov %vm17806_vm4 }
 0x496   : > { %17773 = vst [vmem:[#allocation11_spill] sm:$0xff] %v15935_v43  ;;  %v3950_v29 = vcombine.high %v3948_v45, %v3948_v45  ;;  %v8353_v41 = vrot.slane %v3941_v36, 9  ;;  %v3992_v56 = vrot.slane %v3527_v9, %v17734_v60  ;;  %v8550_v61 = vcombine.high %v15853_v12, %v15835_v4 }
 0x497   : > { %17776 = vst [vmem:[#allocation96_spill] sm:$0xff] %v15946_v48  ;;  %17777 = vst [vmem:[#allocation88_spill] sm:$0xff] %v15949_v63  ;;  %v8354_v49 = vrot.slane %v3949_v31, 9  ;;  %v3951_v19 = vcombine.high %v3519_v44, %v3519_v44  ;;  %v8002_v39 = vcombine.low %v15946_v48, %v15933_v58  ;;  %v8361_v7 = vrot.slane %v3975_v8, 9 }
 0x498   : > { %v8355_v47 = vrot.slane %v3948_v45, 9  ;;  %v3999_v13 = vrot.slane %v3985_v3, %v17734_v60  ;;  %v3958_v46 = vrot.slane %v3519_v44, %v17734_v60  ;;  %v8362_v32 = vrot.slane %v3983_v11, 9 }
 0x499   : > { %v8363_v6 = vrot.slane %v3982_v51, 9  ;;  %v8364_v27 = vrot.slane %v3984_v52, 9  ;;  %v7889_v33 = vcombine.low %v15939_v15, %v15943_v16  ;;  %v8356_v26 = vrot.slane %v3950_v29, 9 }
 0x49a   : > { %v4730_v38 = vadd.f32 %v8353_v41, %v3941_v36  ;;  %v4000_v54 = vcombine.high %v3992_v56, %v3992_v56  ;;  %v15963_v0 = vrot.slane %v8550_v61, %v17734_v60  ;;  %v4731_v62 = vadd.f32 %v8354_v49, %v3949_v31  ;;  %v8676_v61 = vpop.f32.mrf.mxu1 }
 0x49b   : > { %v8365_v37 = vrot.slane %v3992_v56, 9  ;;  %v3965_v9 = vrot.slane %v3951_v19, %v17734_v60  ;;  %v15967_v5 = vrot.slane %v8002_v39, %v17734_v60  ;;  %v4738_v21 = vadd.f32 %v8361_v7, %v3975_v8  ;;  %v17781_v7 = vld [vmem:[#allocation33_spill] sm:$0xff] }
 0x49c   : > { %17778 = vst [vmem:[#allocation86_spill] sm:$0xff] %v15963_v0  ;;  %v4732_v28 = vadd.f32 %v8355_v47, %v3948_v45  ;;  %v4001_v34 = vcombine.high %v3999_v13, %v3999_v13  ;;  %v3966_v17 = vcombine.high %v3958_v46, %v3958_v46  ;;  %v4739_v14 = vadd.f32 %v8362_v32, %v3983_v11  ;;  %v17780_v45 = vld [vmem:[#allocation102_spill] sm:$0xff]  ;;  %v17783_v47 = vld [vmem:[#allocation73_spill] sm:$0xff]  ;;  %v17784_v32 = vld [vmem:[#allocation59_spill] sm:$0xff] }
 0x49d   : > { %17779 = vst [vmem:[#allocation50_spill] sm:$0xff] %v15967_v5  ;;  %v4740_v57 = vadd.f32 %v8363_v6, %v3982_v51  ;;  %v4741_v44 = vadd.f32 %v8364_v27, %v3984_v52  ;;  %v8357_v36 = vrot.slane %v3958_v46, 9  ;;  %v4733_v3 = vadd.f32 %v8356_v26, %v3950_v29 }
 0x49e   : > { %v4818_v15 = vadd.f32 %v4738_v21, %v4730_v38  ;;  %v8366_v16 = vrot.slane %v4000_v54, 9  ;;  %v8367_v41 = vrot.slane %v3999_v13, 9  ;;  %v4819_v31 = vadd.f32 %v4739_v14, %v4731_v62  ;;  %v3534_v38 = vpop.f32.mrf.mxu1 }
 0x49f   : > { %v4742_v49 = vadd.f32 %v8365_v37, %v3992_v56  ;;  %v3967_v53 = vcombine.high %v3965_v9, %v3965_v9  ;;  %v3540_v19 = vadd.f32 %v15882_v18, %v8675_v22  ;;  %v4820_v39 = vadd.f32 %v4740_v57, %v4732_v28 }
 0x4a0   : > { %v8368_v24 = vrot.slane %v4001_v34, 9  ;;  %v8358_v8 = vrot.slane %v3966_v17, 9  ;;  %v7606_v11 = vsel %vm17782_vm8, %v17781_v7, %v17780_v45  ;;  %v8359_v51 = vrot.slane %v3965_v9, 9  ;;  %vm17810_vm8 = vmmov %vm17806_vm4 }
 0x4a1   : > { %v4734_v52 = vadd.f32 %v8357_v36, %v3958_v46  ;;  %v3532_v29 = vadd.f32 %v15882_v18, %v3531_v42  ;;  %v7578_v6 = vsel %vm17785_vm5, %v17784_v32, %v17783_v47  ;;  %v4821_v27 = vadd.f32 %v4741_v44, %v4733_v3  ;;  %vm17811_vm5 = vmmov %vm17764_vm0 }
 0x4a2   : > { %v4743_v56 = vadd.f32 %v8366_v16, %v4000_v54  ;;  %v4744_v26 = vadd.f32 %v8367_v41, %v3999_v13  ;;  %v15977_v22 = vmul.f32 0.25, %v4818_v15  ;;  %v8360_v62 = vrot.slane %v3967_v53, 9 }
 0x4a3   : > { %v4036_v37 = vcombine.high %v3540_v19, %v3540_v19  ;;  %v15979_v21 = vmul.f32 0.25, %v4819_v31  ;;  %v7607_v28 = vsel %vm17788_vm12, %v17781_v7, %v7606_v11  ;;  %v4745_v46 = vadd.f32 %v8368_v24, %v4001_v34  ;;  %vm17812_vm12 = vmmov %vm17806_vm4 }
 0x4a4   : > { %17786 = vst [vmem:[#allocation17_spill] sm:$0xff] %v15977_v22  ;;  %v4735_v14 = vadd.f32 %v8358_v8, %v3966_v17  ;;  %v15984_v57 = vrot.slane %v7889_v33, %v15824_v59  ;;  %v7579_v54 = vsel %vm17764_vm0, %v17784_v32, %v7578_v6  ;;  %v4736_v13 = vadd.f32 %v8359_v51, %v3965_v9  ;;  %vm17813_vm0 = vmmov %vm17806_vm4 }
 0x4a5   : > { %17787 = vst [vmem:[#allocation87_spill] sm:$0xff] %v15979_v21  ;;  %v4822_v44 = vadd.f32 %v4742_v49, %v4734_v52  ;;  %v4043_v36 = vrot.slane %v3540_v19, %v17734_v60  ;;  %v4002_v3 = vcombine.high %v3532_v29, %v3532_v29  ;;  %v4009_v15 = vrot.slane %v3532_v29, %v17734_v60 }
 0x4a6   : > { %17789 = vst [vmem:[#allocation69_spill] sm:$0xff] %v15984_v57  ;;  %v15990_v16 = vmul.f32 0.25, %v4820_v39  ;;  %v7634_v24 = vsel %vm17791_vm7, %v15793_v10, %v15843_v55  ;;  %v7916_v34 = vcombine.low %v7579_v54, %v7607_v28  ;;  %v4737_v17 = vadd.f32 %v8360_v62, %v3967_v53  ;;  %vm17814_vm7 = vmmov %vm17797_vm1 }
 0x4a7   : > { %v4050_v33 = vrot.slane %v4036_v37, %v17734_v60  ;;  %v3543_v41 = vadd.f32 %v15882_v18, %v8676_v61  ;;  %v7662_v9 = vsel %vm17792_vm14, %v15863_v25, %v15877_v20  ;;  %v4823_v31 = vadd.f32 %v4743_v56, %v4735_v14  ;;  %vm17815_vm14 = vmmov %vm17797_vm1 }
 0x4a8   : > { %17790 = vst [vmem:[#allocation18_spill] sm:$0xff] %v15990_v16  ;;  %v3535_v49 = vadd.f32 %v15882_v18, %v3534_v38  ;;  %v16001_v39 = vmul.f32 0.25, %v4821_v27  ;;  %v4824_v55 = vadd.f32 %v4744_v26, %v4736_v13  ;;  %v16005_v45 = vmul.f32 0.25, %v4822_v44 }
 0x4a9   : > { %v4051_v53 = vcombine.high %v4043_v36, %v4043_v36  ;;  %v4016_v7 = vrot.slane %v4002_v3, %v17734_v60  ;;  %v4017_v61 = vcombine.high %v4009_v15, %v4009_v15  ;;  %v16010_v11 = vsel %vm17795_vm3, %v15793_v10, %v7634_v24  ;;  %vm17816_vm3 = vmmov %vm17813_vm0 }
 0x4aa   : > { %17793 = vst [vmem:[#allocation76_spill] sm:$0xff] %v16001_v39  ;;  %17794 = vst [vmem:[#allocation72_spill] sm:$0xff] %v16005_v45  ;;  %v16014_v20 = vsel %vm17797_vm1, %v15863_v25, %v7662_v9  ;;  %v16017_v51 = vrot.slane %v7916_v34, %v15824_v59  ;;  %v4825_v52 = vadd.f32 %v4745_v46, %v4737_v17  ;;  %v8377_v27 = vrot.slane %v4043_v36, 9 }
 0x4ab   : > { %17796 = vst [vmem:[#allocation68_spill] sm:$0xff] %v16010_v11  ;;  %17798 = vst [vmem:[#allocation64_spill] sm:$0xff] %v16014_v20  ;;  %v4052_v29 = vcombine.high %v4050_v33, %v4050_v33  ;;  %v4053_v47 = vcombine.high %v3543_v41, %v3543_v41  ;;  %v17800_v32 = vcombine.low %v15853_v12, %v15835_v4  ;;  %v8369_v56 = vrot.slane %v4009_v15, 9 }
 0x4ac   : > { %17799 = vst [vmem:[#allocation140_spill] sm:$0xff] %v16017_v51  ;;  %v4060_v10 = vrot.slane %v3543_v41, %v17734_v60  ;;  %v4019_v26 = vcombine.high %v3535_v49, %v3535_v49  ;;  %v16026_v25 = vmul.f32 0.25, %v4823_v31  ;;  %v16028_v62 = vmul.f32 0.25, %v4824_v55  ;;  %vm17817_vm1 = vmmov %vm17813_vm0 }
 0x4ad   : > { %v16023_v6 = vrot.slane %v17800_v32, %v17734_v60  ;;  %v8378_v37 = vrot.slane %v4051_v53, 9  ;;  %v4018_v28 = vcombine.high %v4016_v7, %v4016_v7  ;;  %v8379_v46 = vrot.slane %v4050_v33, 9 }
 0x4ae   : > { %17802 = vst [vmem:[#allocation25_spill] sm:$0xff] %v16026_v25  ;;  %17803 = vst [vmem:[#allocation162_spill] sm:$0xff] %v16028_v62  ;;  %v8370_v14 = vrot.slane %v4017_v61, 9  ;;  %v4026_v54 = vrot.slane %v3535_v49, %v17734_v60  ;;  %v16033_v12 = vmul.f32 0.25, %v4825_v52  ;;  %v8380_v13 = vrot.slane %v4052_v29, 9 }
 0x4af   : > { %v8679_v42 = vpop.f32.mrf.mxu1  ;;  %17801 = vst [vmem:[#allocation151_spill] sm:$0xff] %v16023_v6  ;;  %v8371_v44 = vrot.slane %v4016_v7, 9  ;;  %v4067_v3 = vrot.slane %v4053_v47, %v17734_v60  ;;  %v4754_v24 = vadd.f32 %v8377_v27, %v4043_v36  ;;  %v4746_v34 = vadd.f32 %v8369_v56, %v4009_v15 }
 0x4b0   : > { %17804 = vst [vmem:[#allocation45_spill] sm:$0xff] %v16033_v12  ;;  %v4068_v17 = vcombine.high %v4060_v10, %v4060_v10  ;;  %v4033_v41 = vrot.slane %v4019_v26, %v17734_v60  ;;  %v4755_v31 = vadd.f32 %v8378_v37, %v4051_v53  ;;  %v8372_v55 = vrot.slane %v4018_v28, 9 }
 0x4b1   : > { %v3547_v19 = vpop.f32.mrf.mxu1  ;;  %v8381_v32 = vrot.slane %v4060_v10, 9  ;;  %v4756_v8 = vadd.f32 %v8379_v46, %v4050_v33  ;;  %v4747_v6 = vadd.f32 %v8370_v14, %v4017_v61  ;;  %v4034_v4 = vcombine.high %v4026_v54, %v4026_v54 }
 0x4b2   : > { %v3548_v49 = vadd.f32 %v15882_v18, %v3547_v19  ;;  %v3556_v52 = vadd.f32 %v15882_v18, %v8679_v42  ;;  %v4757_v51 = vadd.f32 %v8380_v13, %v4052_v29  ;;  %v4748_v63 = vadd.f32 %v8371_v44, %v4016_v7 }
 0x4b3   : > { %v8680_v38 = vpop.f32.mrf.mxu1  ;;  %v4069_v57 = vcombine.high %v4067_v3, %v4067_v3  ;;  %v4826_v15 = vadd.f32 %v4754_v24, %v4746_v34  ;;  %v8382_v47 = vrot.slane %v4068_v17, 9  ;;  %v8383_v27 = vrot.slane %v4067_v3, 9 }
 0x4b4   : > { %v4035_v56 = vcombine.high %v4033_v41, %v4033_v41  ;;  %v4749_v26 = vadd.f32 %v8372_v55, %v4018_v28  ;;  %v4758_v53 = vadd.f32 %v8381_v32, %v4060_v10  ;;  %v4070_v37 = vcombine.high %v3548_v49, %v3548_v49 }
 0x4b5   : > { %v3550_v9 = vpop.f32.mrf.mxu1  ;;  %v3559_v58 = vadd.f32 %v15882_v18, %v8680_v38  ;;  %v4827_v19 = vadd.f32 %v4755_v31, %v4747_v6  ;;  %v8373_v33 = vrot.slane %v4026_v54, 9  ;;  %v8374_v61 = vrot.slane %v4034_v4, 9 }
 0x4b6   : > { %v3551_v36 = vadd.f32 %v15882_v18, %v3550_v9  ;;  %v4104_v46 = vcombine.high %v3556_v52, %v3556_v52  ;;  %v4828_v14 = vadd.f32 %v4756_v8, %v4748_v63  ;;  %v8384_v42 = vrot.slane %v4069_v57, 9 }
 0x4b7   : > { %v8375_v29 = vrot.slane %v4033_v41, 9  ;;  %v4759_v13 = vadd.f32 %v8382_v47, %v4068_v17  ;;  %v4760_v44 = vadd.f32 %v8383_v27, %v4067_v3  ;;  %v8376_v9 = vrot.slane %v4035_v56, 9 }
 0x4b8   : > { %v4087_v7 = vcombine.high %v3551_v36, %v3551_v36  ;;  %v4077_v24 = vrot.slane %v3548_v49, %v17734_v60  ;;  %v4084_v34 = vrot.slane %v4070_v37, %v17734_v60  ;;  %v4121_v28 = vcombine.high %v3559_v58, %v3559_v58 }
 0x4b9   : > { %v4094_v10 = vrot.slane %v3551_v36, %v17734_v60  ;;  %v16044_v55 = vmul.f32 0.25, %v4826_v15  ;;  %v4750_v18 = vadd.f32 %v8373_v33, %v4026_v54  ;;  %v4751_v6 = vadd.f32 %v8374_v61, %v4034_v4 }
 0x4ba   : > { %v4111_v38 = vrot.slane %v3556_v52, %v17734_v60  ;;  %v4118_v63 = vrot.slane %v4104_v46, %v17734_v60  ;;  %v4829_v8 = vadd.f32 %v4757_v51, %v4749_v26  ;;  %v4752_v31 = vadd.f32 %v8375_v29, %v4033_v41 }
 0x4bb   : > { %v4128_v3 = vrot.slane %v3559_v58, %v17734_v60  ;;  %v4101_v17 = vrot.slane %v4087_v7, %v17734_v60  ;;  %v4761_v32 = vadd.f32 %v8384_v42, %v4069_v57  ;;  %v4753_v49 = vadd.f32 %v8376_v9, %v4035_v56 }
 0x4bc   : > { %v4085_v47 = vcombine.high %v4077_v24, %v4077_v24  ;;  %v16050_v27 = vmul.f32 0.25, %v4827_v19  ;;  %v4086_v36 = vcombine.high %v4084_v34, %v4084_v34  ;;  %v4135_v15 = vrot.slane %v4121_v28, %v17734_v60 }
 0x4bd   : > { %v4102_v54 = vcombine.high %v4094_v10, %v4094_v10  ;;  %v16053_v4 = vmul.f32 0.25, %v4828_v14  ;;  %v4830_v52 = vadd.f32 %v4758_v53, %v4750_v18  ;;  %v4831_v37 = vadd.f32 %v4759_v13, %v4751_v6 }
 0x4be   : > { %v4119_v33 = vcombine.high %v4111_v38, %v4111_v38  ;;  %v4120_v51 = vcombine.high %v4118_v63, %v4118_v63  ;;  %v4832_v41 = vadd.f32 %v4760_v44, %v4752_v31  ;;  %v8385_v26 = vrot.slane %v4077_v24, 9 }
 0x4bf   : > { %v4136_v58 = vcombine.high %v4128_v3, %v4128_v3  ;;  %v4103_v61 = vcombine.high %v4101_v17, %v4101_v17  ;;  %v4833_v46 = vadd.f32 %v4761_v32, %v4753_v49  ;;  %v8393_v57 = vrot.slane %v4111_v38, 9 }
 0x4c0   : > { %v8386_v56 = vrot.slane %v4085_v47, 9  ;;  %v8387_v42 = vrot.slane %v4084_v34, 9  ;;  %v8388_v19 = vrot.slane %v4086_v36, 9  ;;  %v4137_v29 = vcombine.high %v4135_v15, %v4135_v15 }
 0x4c1   : > { %v8389_v7 = vrot.slane %v4094_v10, 9  ;;  %v8390_v9 = vrot.slane %v4102_v54, 9  ;;  %v8394_v28 = vrot.slane %v4119_v33, 9  ;;  %v8395_v48 = vrot.slane %v4118_v63, 9 }
 0x4c2   : > { %v8396_v14 = vrot.slane %v4120_v51, 9  ;;  %v8391_v5 = vrot.slane %v4101_v17, 9  ;;  %v4762_v53 = vadd.f32 %v8385_v26, %v4077_v24  ;;  %v8397_v13 = vrot.slane %v4128_v3, 9 }
 0x4c3   : > { %v8398_v18 = vrot.slane %v4136_v58, 9  ;;  %v8392_v6 = vrot.slane %v4103_v61, 9  ;;  %v4770_v44 = vadd.f32 %v8393_v57, %v4111_v38  ;;  %v4763_v31 = vadd.f32 %v8386_v56, %v4085_v47 }
 0x4c4   : > { %v4764_v0 = vadd.f32 %v8387_v42, %v4084_v34  ;;  %v8399_v20 = vrot.slane %v4135_v15, 9  ;;  %v4765_v32 = vadd.f32 %v8388_v19, %v4086_v36  ;;  %v8400_v49 = vrot.slane %v4137_v29, 9 }
 0x4c5   : > { %v4766_v11 = vadd.f32 %v8389_v7, %v4094_v10  ;;  %v4767_v59 = vadd.f32 %v8390_v9, %v4102_v54  ;;  %v4771_v62 = vadd.f32 %v8394_v28, %v4119_v33  ;;  %v4772_v12 = vadd.f32 %v8395_v48, %v4118_v63  ;;  %v16058_v48 = vld [vmem:[%s16322_s6] ss:$0 sm:$0xff] }
 0x4c6   : > { %v4773_v25 = vadd.f32 %v8396_v14, %v4120_v51  ;;  %v4768_v45 = vadd.f32 %v8391_v5, %v4101_v17  ;;  %v4834_v39 = vadd.f32 %v4770_v44, %v4762_v53  ;;  %v4774_v16 = vadd.f32 %v8397_v13, %v4128_v3 }
 0x4c7   : > { %v4775_v21 = vadd.f32 %v8398_v18, %v4136_v58  ;;  %v4769_v22 = vadd.f32 %v8392_v6, %v4103_v61  ;;  %v4835_v24 = vadd.f32 %v4771_v62, %v4763_v31  ;;  %v4836_v26 = vadd.f32 %v4772_v12, %v4764_v0 }
 0x4c8   : > { %v4776_v50 = vadd.f32 %v8399_v20, %v4135_v15  ;;  %v4893_v43 = vmul.f32 0.25, %v4829_v8  ;;  %v4837_v38 = vadd.f32 %v4773_v25, %v4765_v32  ;;  %v4777_v47 = vadd.f32 %v8400_v49, %v4137_v29 }
 0x4c9   : > { %v4838_v34 = vadd.f32 %v4774_v16, %v4766_v11  ;;  %v4839_v57 = vadd.f32 %v4775_v21, %v4767_v59  ;;  %v4894_v56 = vmul.f32 0.25, %v4830_v52  ;;  %v4895_v10 = vmul.f32 0.25, %v4831_v37 }
 0x4ca   : > { %v4840_v54 = vadd.f32 %v4776_v50, %v4768_v45  ;;  %v4896_v63 = vmul.f32 0.25, %v4832_v41  ;;  %v4897_v62 = vmul.f32 0.25, %v4833_v46  ;;  %v4841_v0 = vadd.f32 %v4777_v47, %v4769_v22 }
 0x4cb   : > { %v16061_v12 = vmul.f32 0.25, %v4834_v39  ;;  %v16065_v16 = vmul.f32 0.25, %v4835_v24  ;;  %v16067_v50 = vmul.f32 0.25, %v4838_v34  ;;  %v16069_v45 = vmul.f32 0.25, %v4839_v57 }
 0x4cc   : > { %v16071_v11 = vmul.f32 0.25, %v4836_v26  ;;  %v16073_v8 = vmul.f32 0.25, %v4837_v38  ;;  %v16075_v3 = vmul.f32 0.25, %v4840_v54  ;;  %v16078_v52 = vmul.f32 0.25, %v4841_v0 }
 0x4d5   : > { %v8689_v36 = vpop.f32.mrf.mxu1 }
 0x4d6   : > { %v7178_v5 = vadd.f32 %v16058_v48, %v8689_v36 }
 0x4d7   : > { %v7169_v20 = vpop.f32.mrf.mxu1 }
 0x4d8   : > { %v7294_v25 = vcombine.high %v7178_v5, %v7178_v5  ;;  %v7301_v59 = vrot.slane %v7178_v5, %v17734_v60  ;;  %v7170_v21 = vadd.f32 %v16058_v48, %v7169_v20 }
 0x4d9   : > { %v8690_v15 = vpop.f32.mrf.mxu1 }
 0x4da   : > { %v7308_v22 = vrot.slane %v7294_v25, %v17734_v60  ;;  %v7309_v39 = vcombine.high %v7301_v59, %v7301_v59  ;;  %v7352_v17 = vrot.slane %v7301_v59, 1  ;;  %v7472_v37 = vadd.f32 %v7301_v59, %v16044_v55  ;;  %v17808_v59 = vld [vmem:[#allocation11_spill] sm:$0xff] }
 0x4db   : > { %v7260_v33 = vcombine.high %v7170_v21, %v7170_v21  ;;  %v7267_v51 = vrot.slane %v7170_v21, %v17734_v60  ;;  %v7181_v7 = vadd.f32 %v16058_v48, %v8690_v15 }
 0x4dc   : > { %v7310_v41 = vcombine.high %v7308_v22, %v7308_v22  ;;  %v7353_v58 = vrot.slane %v7309_v39, 1  ;;  %v7354_v61 = vrot.slane %v7308_v22, 1  ;;  %v7473_v46 = vadd.f32 %v7352_v17, %v16050_v27  ;;  %v17809_v17 = vld [vmem:[#allocation40_spill] sm:$0xff] }
 0x4dd   : > { %v7474_v42 = vadd.f32 %v7309_v39, %v16053_v4  ;;  %v7274_v19 = vrot.slane %v7260_v33, %v17734_v60  ;;  %v7275_v29 = vcombine.high %v7267_v51, %v7267_v51  ;;  %v7476_v14 = vadd.f32 %v7308_v22, %v4894_v56 }
 0x4de   : > { %v7355_v9 = vrot.slane %v7310_v41, 1  ;;  %v7475_v28 = vadd.f32 %v7353_v58, %v4893_v43  ;;  %v7477_v53 = vadd.f32 %v7354_v61, %v4895_v10  ;;  %v7478_v55 = vadd.f32 %v7310_v41, %v4896_v63 }
 0x4df   : > { %v7722_v13 = vrot.slane %v7473_v46, 7  ;;  %v7276_v18 = vcombine.high %v7274_v19, %v7274_v19  ;;  %v7344_v6 = vrot.slane %v7267_v51, 1  ;;  %v7345_v27 = vrot.slane %v7275_v29, 1 }
 0x4e0   : > { %v7479_v44 = vadd.f32 %v7355_v9, %v4897_v62  ;;  %v16086_v31 = vrot.slane %v7475_v28, 7  ;;  %v16088_v32 = vrot.slane %v7477_v53, 7  ;;  %v7346_v49 = vrot.slane %v7274_v19, 1  ;;  %v7172_v62 = vpop.f32.mrf.mxu1 }
 0x4e1   : > { %v7723_v4 = vsel %vm6985_vm2, %v7722_v13, %v7472_v37  ;;  %v7347_v24 = vrot.slane %v7276_v18, 1  ;;  %v7457_v26 = vadd.f32 %v7344_v6, %v15893_v1  ;;  %v7456_v1 = vadd.f32 %v7267_v51, %v15888_v40 }
 0x4e2   : > { %v7724_v43 = vsel %vm6990_vm9, %v7722_v13, %v7723_v4  ;;  %v7730_v38 = vsel %vm6985_vm2, %v16086_v31, %v7474_v42  ;;  %v7737_v47 = vsel %vm6985_vm2, %v16088_v32, %v7476_v14  ;;  %v16097_v34 = vrot.slane %v7479_v44, 7 }
 0x4e3   : > { %v7725_v57 = vsel %vm17805_vm13, %v7722_v13, %v7724_v43  ;;  %v7731_v36 = vsel %vm6990_vm9, %v16086_v31, %v7730_v38  ;;  %v7738_v56 = vsel %vm6990_vm9, %v16088_v32, %v7737_v47  ;;  %v7458_v5 = vadd.f32 %v7275_v29, %v15895_v23  ;;  %vm17818_vm13 = vmmov %vm17813_vm0 }
 0x4e4   : > { %v16107_v10 = vsel %vm17806_vm4, %v16086_v31, %v7731_v36  ;;  %v7744_v54 = vsel %vm6985_vm2, %v16097_v34, %v7478_v55  ;;  %v7459_v63 = vadd.f32 %v7345_v27, %v15927_v35  ;;  %v16115_v0 = vsel %vm17807_vm10, %v16088_v32, %v7738_v56  ;;  %vm17824_vm4 = vmmov %vm17811_vm5 }
 0x4e5   : > { %v16119_v20 = vsel %vm6990_vm9, %v16097_v34, %v7744_v54  ;;  %v7460_v40 = vadd.f32 %v7274_v19, %v15922_v30  ;;  %v7461_v25 = vadd.f32 %v7346_v49, %v15929_v2  ;;  %v7463_v21 = vadd.f32 %v7347_v24, %v17808_v59  ;;  %vm17828_vm10 = vmmov %vm17824_vm4 }
 0x4e6   : > { %v7666_v22 = vrot.slane %v7457_v26, 7  ;;  %v7673_v39 = vrot.slane %v7459_v63, 7  ;;  %v7311_v23 = vcombine.high %v7181_v7, %v7181_v7  ;;  %v7462_v35 = vadd.f32 %v7276_v18, %v17809_v17 }
 0x4e7   : > { %v16125_v15 = vrot.slane %v7461_v25, 7  ;;  %v7318_v37 = vrot.slane %v7181_v7, %v17734_v60  ;;  %v7173_v33 = vadd.f32 %v16058_v48, %v7172_v62  ;;  %v16131_v30 = vrot.slane %v7463_v21, 7 }
 0x4e8   : > { %v7667_v51 = vsel %vm6985_vm2, %v7666_v22, %v7456_v1  ;;  %v7674_v41 = vsel %vm6985_vm2, %v7673_v39, %v7458_v5  ;;  %v7325_v2 = vrot.slane %v7311_v23, %v17734_v60  ;;  %v16144_v7 = vsel %vm17811_vm5, %v7722_v13, %v7725_v57  ;;  %v17819_v23 = vld [vmem:[#allocation17_spill] sm:$0xff]  ;;  %vm17830_vm5 = vmmov %vm17824_vm4 }
 0x4e9   : > { %v7668_v58 = vsel %vm6990_vm9, %v7666_v22, %v7667_v51  ;;  %v7675_v61 = vsel %vm6990_vm9, %v7673_v39, %v7674_v41  ;;  %v7681_v46 = vsel %vm6985_vm2, %v16125_v15, %v7460_v40  ;;  %v7326_v42 = vcombine.high %v7318_v37, %v7318_v37  ;;  %v17820_v51 = vld [vmem:[#allocation87_spill] sm:$0xff] }
 0x4ea   : > { %v7669_v19 = vsel %vm17810_vm8, %v7666_v22, %v7668_v58  ;;  %v7682_v48 = vsel %vm6990_vm9, %v16125_v15, %v7681_v46  ;;  %v7688_v29 = vsel %vm6985_vm2, %v16131_v30, %v7462_v35  ;;  %v7676_v9 = vsel %vm17812_vm12, %v7673_v39, %v7675_v61  ;;  %v17822_v61 = vld [vmem:[#allocation76_spill] sm:$0xff]  ;;  %vm17829_vm8 = vmmov %vm17824_vm4 }
 0x4eb   : > { %v7683_v28 = vsel %vm17813_vm0, %v16125_v15, %v7682_v48  ;;  %v7327_v14 = vcombine.high %v7325_v2, %v7325_v2  ;;  %v7356_v53 = vrot.slane %v7318_v37, 1  ;;  %v16151_v55 = vsel %vm6990_vm9, %v16131_v30, %v7688_v29  ;;  %v17825_v29 = vld [vmem:[#allocation25_spill] sm:$0xff]  ;;  %vm17832_vm12 = vmmov %vm17813_vm0 }
 0x4ec   : > { %v7357_v18 = vrot.slane %v7326_v42, 1  ;;  %v7358_v6 = vrot.slane %v7325_v2, 1  ;;  %v7480_v44 = vadd.f32 %v7318_v37, %v16061_v12  ;;  %v7482_v13 = vadd.f32 %v7326_v42, %v16071_v11  ;;  %v17823_v42 = vld [vmem:[#allocation72_spill] sm:$0xff] }
 0x4ed   : > { %v7359_v27 = vrot.slane %v7327_v14, 1  ;;  %v7481_v4 = vadd.f32 %v7356_v53, %v16065_v16  ;;  %v7484_v49 = vadd.f32 %v7325_v2, %v16067_v50  ;;  %v7277_v43 = vcombine.high %v7173_v33, %v7173_v33  ;;  %v17821_v2 = vld [vmem:[#allocation18_spill] sm:$0xff] }
 0x4ee   : > { %v7483_v24 = vadd.f32 %v7357_v18, %v16073_v8  ;;  %v7485_v26 = vadd.f32 %v7358_v6, %v16069_v45  ;;  %v7284_v38 = vrot.slane %v7173_v33, %v17734_v60  ;;  %v7486_v47 = vadd.f32 %v7327_v14, %v16075_v3  ;;  %v17826_v14 = vld [vmem:[#allocation45_spill] sm:$0xff] }
 0x4ef   : > { %v7487_v57 = vadd.f32 %v7359_v27, %v16078_v52  ;;  %v7750_v36 = vrot.slane %v7481_v4, 7  ;;  %v7670_v12 = vsel %vm17814_vm7, %v7666_v22, %v7669_v19  ;;  %v7291_v11 = vrot.slane %v7277_v43, %v17734_v60  ;;  %vm17833_vm7 = vmmov %vm17824_vm4 }
 0x4f0   : > { %v7757_v56 = vrot.slane %v7483_v24, 7  ;;  %v7764_v16 = vrot.slane %v7485_v26, 7  ;;  %v7292_v1 = vcombine.high %v7284_v38, %v7284_v38  ;;  %v7348_v45 = vrot.slane %v7284_v38, 1 }
 0x4f1   : > { %v7751_v50 = vsel %vm6985_vm2, %v7750_v36, %v7480_v44  ;;  %v16165_v8 = vrot.slane %v7487_v57, 7  ;;  %v7677_v54 = vsel %vm17815_vm14, %v7673_v39, %v7676_v9  ;;  %v7293_v63 = vcombine.high %v7291_v11, %v7291_v11  ;;  %v17827_v44 = vld [vmem:[#allocation162_spill] sm:$0xff]  ;;  %vm17834_vm14 = vmmov %vm17824_vm4 }
 0x4f2   : > { %v7752_v5 = vsel %vm6990_vm9, %v7750_v36, %v7751_v50  ;;  %v7758_v3 = vsel %vm6985_vm2, %v7757_v56, %v7482_v13  ;;  %v7765_v52 = vsel %vm6985_vm2, %v7764_v16, %v7484_v49  ;;  %v7349_v39 = vrot.slane %v7292_v1, 1  ;;  %v17831_v57 = vld [vmem:[#allocation110_spill] sm:$0xff] }
 0x4f3   : > { %v7753_v62 = vsel %vm17816_vm3, %v7750_v36, %v7752_v5  ;;  %v7759_v40 = vsel %vm6990_vm9, %v7757_v56, %v7758_v3  ;;  %v7766_v25 = vsel %vm6990_vm9, %v7764_v16, %v7765_v52  ;;  %v7772_v59 = vsel %vm6985_vm2, %v16165_v8, %v7486_v47  ;;  %vm17835_vm3 = vmmov %vm17813_vm0 }
 0x4f4   : > { %v7760_v21 = vsel %vm17817_vm1, %v7757_v56, %v7759_v40  ;;  %v7767_v22 = vsel %vm17818_vm13, %v7764_v16, %v7766_v25  ;;  %v7464_v17 = vadd.f32 %v7284_v38, %v17819_v23  ;;  %v7773_v35 = vsel %vm6990_vm9, %v16165_v8, %v7772_v59  ;;  %vm17836_vm1 = vmmov %vm17824_vm4 }
 0x4f5   : > { %v7350_v37 = vrot.slane %v7291_v11, 1  ;;  %v7351_v33 = vrot.slane %v7293_v63, 1  ;;  %v7465_v41 = vadd.f32 %v7348_v45, %v17820_v51  ;;  %v7466_v58 = vadd.f32 %v7292_v1, %v17821_v2  ;;  %vm17838_vm13 = vmmov %vm17836_vm1 }
 0x4f6   : > { %v7467_v46 = vadd.f32 %v7349_v39, %v17822_v61  ;;  %v7468_v19 = vadd.f32 %v7291_v11, %v17823_v42  ;;  %v7754_v48 = vsel %vm17824_vm4, %v7750_v36, %v7753_v62  ;;  %v7470_v27 = vadd.f32 %v7293_v63, %v17827_v44  ;;  %vm17839_vm4 = vmmov %vm17813_vm0  ;;  %v17847_v42 = vld [vmem:[#allocation68_spill] sm:$0xff]  ;;  %v17851_v44 = vld [vmem:[#allocation50_spill] sm:$0xff] }
 0x4f7   : > { %v7469_v9 = vadd.f32 %v7350_v37, %v17825_v29  ;;  %v7471_v53 = vadd.f32 %v7351_v33, %v17826_v14  ;;  %v7694_v18 = vrot.slane %v7465_v41, 7  ;;  %v7835_v6 = vcombine.low %v16144_v7, %v7754_v48 }
 0x4f8   : > { %v7701_v4 = vrot.slane %v7467_v46, 7  ;;  %v7733_v13 = vsel %vm17828_vm10, %v16086_v31, %v16107_v10  ;;  %v7761_v49 = vsel %vm17829_vm8, %v7757_v56, %v7760_v21  ;;  %v7684_v38 = vsel %vm17830_vm5, %v16125_v15, %v7683_v28  ;;  %vm17841_vm10 = vmmov %vm17813_vm0 }
 0x4f9   : > { %v7695_v24 = vsel %vm6985_vm2, %v7694_v18, %v7464_v17  ;;  %v7708_v26 = vrot.slane %v7469_v9, 7  ;;  %v7715_v43 = vrot.slane %v7471_v53, 7  ;;  %v7842_v36 = vrot.slane %v7835_v6, %v17831_v57  ;;  %vm17842_vm8 = vmmov %vm17813_vm0 }
 0x4fa   : > { %v7696_v47 = vsel %vm6990_vm9, %v7694_v18, %v7695_v24  ;;  %v7702_v7 = vsel %vm6985_vm2, %v7701_v4, %v7466_v58  ;;  %v7871_v11 = vcombine.low %v7733_v13, %v7761_v49  ;;  %v7740_v28 = vsel %vm17834_vm14, %v16088_v32, %v16115_v0  ;;  %vm17843_vm5 = vmmov %vm17836_vm1  ;;  %v17852_v49 = vld [vmem:[#allocation96_spill] sm:$0xff]  ;;  %v17853_v24 = vld [vmem:[#allocation74_spill] sm:$0xff] }
 0x4fb   : > { %v7697_v1 = vsel %vm17832_vm12, %v7694_v18, %v7696_v47  ;;  %v7703_v31 = vsel %vm6990_vm9, %v7701_v4, %v7702_v7  ;;  %v7709_v10 = vsel %vm6985_vm2, %v7708_v26, %v7468_v19  ;;  %v7716_v56 = vsel %vm6985_vm2, %v7715_v43, %v7470_v27  ;;  %vm17837_vm2 = vmmov %vm17836_vm1  ;;  %v17848_v19 = vld [vmem:[#allocation64_spill] sm:$0xff] }
 0x4fc   : > { %v7704_v50 = vsel %vm17813_vm0, %v7701_v4, %v7703_v31  ;;  %v7710_v45 = vsel %vm6990_vm9, %v7708_v26, %v7709_v10  ;;  %v7698_v15 = vsel %vm17833_vm7, %v7694_v18, %v7697_v1  ;;  %v7717_v3 = vsel %vm6990_vm9, %v7715_v43, %v7716_v56  ;;  %vm17840_vm9 = vmmov %vm17813_vm0  ;;  %v17856_v47 = vld [vmem:[#allocation88_spill] sm:$0xff]  ;;  %v17859_v10 = vld [vmem:[#allocation151_spill] sm:$0xff] }
 0x4fd   : > { %v7711_v5 = vsel %vm17835_vm3, %v7708_v26, %v7710_v45  ;;  %v7826_v52 = vcombine.low %v7670_v12, %v7698_v15  ;;  %v7705_v63 = vsel %vm17836_vm1, %v7701_v4, %v7704_v50  ;;  %v7878_v40 = vrot.slane %v7871_v11, %v17831_v57  ;;  %vm17844_vm12 = vmmov %vm17836_vm1 }
 0x4fe   : > { %v7862_v62 = vcombine.low %v7677_v54, %v7705_v63  ;;  %v7712_v25 = vsel %vm17837_vm2, %v7708_v26, %v7711_v5  ;;  %v7768_v59 = vsel %vm17838_vm13, %v7764_v16, %v7767_v22  ;;  %v7690_v32 = vsel %vm17839_vm4, %v16131_v30, %v16151_v55  ;;  %vm17845_vm0 = vmmov %vm17836_vm1 }
 0x4ff   : > { %v7833_v21 = vrot.slane %v7826_v52, %v17831_v57  ;;  %v7898_v39 = vcombine.low %v7684_v38, %v7712_v25  ;;  %v7907_v23 = vcombine.low %v7740_v28, %v7768_v59  ;;  %v7718_v12 = vsel %vm17840_vm9, %v7715_v43, %v7717_v3  ;;  %vm17846_vm7 = vmmov %vm17845_vm0  ;;  %v17855_v38 = vld [vmem:[#allocation69_spill] sm:$0xff] }
 0x500   : > { %v7869_v0 = vrot.slane %v7862_v62, %v17831_v57  ;;  %v7746_v54 = vsel %vm17841_vm10, %v16097_v34, %v16119_v20  ;;  %v7774_v17 = vsel %vm17842_vm8, %v16165_v8, %v7773_v35  ;;  %v7719_v33 = vsel %vm17843_vm5, %v7715_v43, %v7718_v12 }
 0x501   : > { %v8551_v16 = vcombine.high %v7833_v21, %v7842_v36  ;;  %v7905_v22 = vrot.slane %v7898_v39, %v17831_v57  ;;  %v7914_v37 = vrot.slane %v7907_v23, %v17831_v57  ;;  %v7691_v41 = vsel %vm17844_vm12, %v16131_v30, %v7690_v32  ;;  %v17850_v30 = vld [vmem:[#allocation86_spill] sm:$0xff] }
 0x502   : > { %v8003_v51 = vcombine.low %v7869_v0, %v7878_v40  ;;  %v8553_v55 = vcombine.high %v7869_v0, %v7878_v40  ;;  %v7775_v2 = vsel %vm17845_vm0, %v16165_v8, %v7774_v17  ;;  %v7747_v35 = vsel %vm17846_vm7, %v16097_v34, %v7746_v54 }
 0x503   : > { %v7993_v20 = vrot.slane %v8551_v16, %v17734_v60  ;;  %v8051_v58 = vcombine.low %v7905_v22, %v7914_v37  ;;  %v7934_v61 = vcombine.low %v7691_v41, %v7719_v33  ;;  %v17849_v48 = vcombine.low %v17847_v42, %v17848_v19 }
 0x504   : > { %v8017_v46 = vrot.slane %v8003_v51, %v17734_v60  ;;  %v7943_v9 = vcombine.low %v7747_v35, %v7775_v2  ;;  %v7957_v14 = vcombine.low %v7833_v21, %v7842_v36  ;;  %v8041_v8 = vrot.slane %v8553_v55, %v17734_v60 }
 0x505   : > { %v7932_v29 = vrot.slane %v17849_v48, %v17831_v57  ;;  %v7994_v53 = vcombine.low %v17850_v30, %v7993_v20  ;;  %v8555_v18 = vcombine.high %v7905_v22, %v7914_v37  ;;  %v7941_v6 = vrot.slane %v7934_v61, %v17831_v57 }
 0x506   : > { %v8018_v27 = vcombine.low %v17851_v44, %v8017_v46  ;;  %v8065_v34 = vrot.slane %v8051_v58, %v17734_v60  ;;  %v7950_v4 = vrot.slane %v7943_v9, %v17831_v57  ;;  %v7971_v13 = vrot.slane %v7957_v14, %v17734_v60  ;;  %v17858_v57 = vld [vmem:[#allocation140_spill] sm:$0xff] }
 0x507   : > { %7995 = vrot.lane.b32.xlu0 %v7994_v53, %s10141_s19  ;;  %v17854_v26 = vcombine.high %v17852_v49, %v17853_v24  ;;  %v8554_v7 = vcombine.high %v17856_v47, %v17855_v38  ;;  %v17857_v36 = vcombine.low %v17856_v47, %v17855_v38  ;;  %v8098_v1 = vcombine.low %v17858_v57, %v7932_v29  ;;  %s10150_s19 = smov 40  }
 0x508   : > { %8019 = vrot.lane.b32.xlu1 %v8018_v27, %s10143_s21  ;;  %v8099_v31 = vcombine.low %v7941_v6, %v7950_v4  ;;  %v7972_v56 = vcombine.low %v17859_v10, %v7971_v13  ;;  %v8089_v45 = vrot.slane %v8555_v18, %v17734_v60  ;;  %v8557_v15 = vcombine.high %v7941_v6, %v7950_v4  ;;  %s10151_s21 = smov 48  }
 0x509   : > { %v8034_v43 = vrot.slane %v17854_v26, %v17734_v60  ;;  %v8058_v11 = vrot.slane %v17857_v36, %v17734_v60  ;;  %v8082_v3 = vrot.slane %v8554_v7, %v17734_v60  ;;  %v8556_v52 = vcombine.high %v17858_v57, %v7932_v29 }
 0x50a   : > { %v8113_v5 = vrot.slane %v8099_v31, %v17734_v60  ;;  %v8106_v63 = vrot.slane %v8098_v1, %v17734_v60  ;;  %v8137_v40 = vrot.slane %v8557_v15, %v17734_v60  ;;  %vm17860_vm14 = vcmask 130048  }
 0x50b   : > { %v8042_v50 = vcombine.low %v8034_v43, %v8041_v8  ;;  %v8066_v28 = vcombine.low %v8058_v11, %v8065_v34  ;;  %v8090_v62 = vcombine.low %v8082_v3, %v8089_v45  ;;  %v8130_v59 = vrot.slane %v8556_v52, %v17734_v60 }
 0x50c   : > { %v8114_v25 = vcombine.low %v8106_v63, %v8113_v5  ;;  %vm8146_vm3 = vcmask 326656   ;;  %vm8148_vm1 = vcmask 392192   ;;  %vm8152_vm2 = vcmask 523264  }
 0x50d   : > { %8043 = vrot.lane.b32.xlu0 %v8042_v50, %s10145_s15  ;;  %8067 = vrot.lane.b32.xlu1 %v8066_v28, %s10147_s23  ;;  %v8138_v21 = vcombine.low %v8130_v59, %v8137_v40  ;;  %s10152_s15 = smov 56   ;;  %s8231_s23 = sshll.u32 %s269_s13, 3 }
 0x50e   : > { %s271_s17 = scalar_lea.vmem [#allocation2], %s8231_s23 }
 0x50f   : > { %s8168_s18 = sshll.u32 %s271_s17, 4  ;;  %s8169_s18 = int_to_ptr.vmem [resolvable:$true] %s8168_s18 }
 0x510   : > { %s10077_s8 = scalar_lea.vmem %s8169_s18, 128  ;;  %p10084_p0 = scmp.lt.s32.totalorder %s8169_s18, %s10082_s9 }
 0x511   : > { %8091 = vrot.lane.b32.xlu0 %v8090_v62, %s10150_s19  ;;  %8115 = vrot.lane.b32.xlu1 %v8114_v25, %s10151_s21  ;;  %p10078_p11 = scmp.ne.s32.totalorder %s8169_s18, %s10077_s8  ;;  %s10083_s19 = scalar_lea.vmem %s10082_s9, 256 }
 0x512   : > { %p10085_p1 = scmp.lt.s32.totalorder %s10083_s19, %s10077_s8 }
 0x513   : > { %p10079_p12 = pnand %p10078_p11, %p10232_p5 }
 0x514   : > { %p10086_p2 = por %p10085_p1, %p10084_p0 }
 0x515   : > { %8139 = vrot.lane.b32.xlu0 %v8138_v21, %s10152_s15  ;;  %p10080_p13 = pneg %p10079_p12 }
 0x517   : > { %p10087_p3 = pnand %p10086_p2, %p10080_p13 }
 0x579   : > { %v7996_v39 = vpop.permute.xlu0 %7995 }
 0x57a   : > { %v8142_v23 = vsel %vm1423_vm11, %v7972_v56, %v7996_v39  ;;  %v8020_v32 = vpop.permute.xlu1 %8019  ;;  %vm8150_vm11 = vcmask 457728  }
 0x57b   : > { %v8143_v0 = vsel %vm17860_vm14, %v8142_v23, %v8020_v32 }
 0x57f   : > { %v8044_v12 = vpop.permute.xlu0 %8043  ;;  %v8068_v17 = vpop.permute.xlu1 %8067 }
 0x580   : > { %v8144_v54 = vsel %vm1555_vm15, %v8143_v0, %v8044_v12 }
 0x581   : > { %v8145_v60 = vsel %vm1621_vm6, %v8144_v54, %v8068_v17 }
 0x583   : > { %v8092_v16 = vpop.permute.xlu0 %8091  ;;  %v8116_v37 = vpop.permute.xlu1 %8115 }
 0x584   : > { %v8147_v22 = vsel %vm8146_vm3, %v8145_v60, %v8092_v16 }
 0x585   : > { %v8149_v33 = vsel %vm8148_vm1, %v8147_v22, %v8116_v37 }
 0x587   : > { %v8140_v51 = vpop.permute.xlu0 %8139 }
 0x588   : > { %v8151_v55 = vsel %vm8150_vm11, %v8149_v33, %v8140_v51 }
 0x589   : > { %8153 = vst.msk [vmem:[%s271_s17] sm:$0xff] %vm8152_vm2, %v8151_v55 }
 0x58a   : > { %10090 = shalt.err (!%p10087_p3)
}
 0x58b   : > { %s10091_s21 = scalar_lea.hbm %s16281_s16, 128  ;;  %s10095_s23 = scalar_lea.hbm %s16323_s7, 256 }
 0x58c   : > { %p10092_p4 = scmp.ne.s32.totalorder %s16281_s16, %s10091_s21  ;;  %p10096_p9 = scmp.lt.s32.totalorder %s16281_s16, %s16323_s7 }
 0x58d   : > { %p10097_p10 = scmp.lt.s32.totalorder %s10095_s23, %s10091_s21 }
 0x58e   : > { %p10093_p7 = pnand %p10092_p4, %p10232_p5 }
 0x58f   : > { %p10098_p11 = por %p10097_p10, %p10096_p9 }
 0x590   : > { %p10094_p8 = pneg %p10093_p7 }
 0x592   : > { %p10099_p12 = pnand %p10098_p11, %p10094_p8 }
 0x594   : > { %10102 = shalt.err (!%p10099_p12)
}
 0x595   : > { %8698 = dma.vmem_to_hbm [thread:$0]  (%p10232_p5), %s8169_s18, 128, %s16281_s16, %s8155_s29  }
 0x596 PF: > { %p8704_p13 = scmp.ge.s32.totalorder %s10137_s27, 2  ;;  %s8180_s20 = sand.u32 1, %s10125_s24  }
 0x597   : > { %s8181_s22 = scalar_lea.sflag [#allocation3], %s8180_s20 }
 0x598   : > { %p8701_p0 = pnand %p8704_p13, %p10236_p6 }
 0x59a   : > { %p8702_p1 = pneg %p8701_p0 }
 0x59c   : > { %10120 = dma.done.wait (%p8702_p1), %s8181_s22, 128  }
 0x59d   : > { %10122 = vsyncadd (%p8702_p1), %s8181_s22, 4294967168  ;;  %p17_p2 = scmp.ge.s32.totalorder %s10219_s30, 4   ;;  %s17861_s24 = smov %s10129_s25 }
 0x59e   : > { %s17862_s25 = smov %s10133_s26  ;;  %s17863_s26 = smov %s10230_s10 }
 0x59f   : > { %s17864_s27 = smov %s10219_s30  ;;  %19 = sbr.rel (!%p17_p2) target bundleno = 3 (0x3), region = 83 }
 0x5a4   :  { %8186 = vsyncpa [#allocation3], 1 }
 0x5a5   :  { %8188 = vsyncpa [#allocation3 + $0x1], 1 }

</bundles_post_ra>
